<compile_context>
chip_gen: v5e
topology: v5e:2x2
jax: 0.10.0
libtpu: 0.0.40
codegen_flags: <defaults>
</compile_context>

<pallas_src>
import jax
import jax.numpy as jnp
from jax.experimental import pallas as pl
from jax.experimental.pallas import tpu as pltpu

# ---------------------------- problem sizes ----------------------------
B = 2              # batch
IN_CHANS = 1       # module default in_chans=1
H = W = 16         # spatial
HW = H * W
CONV_OUT = 8       # synthetic backbone stem width
NUM_CLASSES = 3    # module default
EPS = 1e-5         # BatchNorm1d eps

N1, N2, N3 = 1024, 512, 128          # classifier hidden widths
TAPS = IN_CHANS * 9                  # im2col depth
TAPS_P = TAPS + 1                    # + ones column (carries the conv bias)
INV_HW = 1.0 / float(HW)

# packed per-feature vector (1, VLEN) f32 layout; every offset is a multiple of 128 (lane-aligned)
B0_OFF = 0                           # bias of (backbone fc folded into) LazyLinear(1024)
S1_OFF = N1                          # BN1d(1024) scale
T1_OFF = 2 * N1                      # BN1d(1024) shift
S2_OFF = 3 * N1                      # BN1d(512) scale
C2_OFF = 3 * N1 + N2                 # Linear(1024,512) bias pushed through BN2: b2*s2 + t2
B3_OFF = 3 * N1 + 2 * N2             # Linear(512,128) bias
S3_OFF = B3_OFF + N3                 # BN1d(128) scale
T3_OFF = B3_OFF + 2 * N3             # BN1d(128) shift
B4_OFF = B3_OFF + 3 * N3             # Linear(128,num_classes) bias
VLEN = B4_OFF + NUM_CLASSES

BIG_DT = jnp.bfloat16                # W2/W3 storage + MXU dtype (see TODO above)

VMEM = pltpu.MemorySpace.VMEM
SMEM = pltpu.MemorySpace.SMEM


# ----------------------------- fused kernel -----------------------------

def fused_forward_kernel(patches_ref, cwT_ref, alphas_ref, w0_ref, vec_ref, w4_ref,
                         w2_hbm_ref, w3_hbm_ref,          # big weights: HBM, manual DMA
                         out_ref,
                         w2_vmem, w3_vmem, dma_sem):
    """patches -> conv+ReLU -> GAP -> (folded) classifier MLP -> logits, VMEM resident."""
    # Queue the big-weight copies first (W2 before W3: 8x larger, needed first) so they overlap
    # the conv / GAP / layer-1 prologue.
    cp_w2 = pltpu.make_async_copy(w2_hbm_ref, w2_vmem, dma_sem.at[0])
    cp_w3 = pltpu.make_async_copy(w3_hbm_ref, w3_vmem, dma_sem.at[1])
    cp_w2.start()
    cp_w3.start()

    # Hoist all SMEM scalar reads above the DMA waits (.wait() breaks sst->sld forwarding).
    a1 = alphas_ref[0]
    a2 = alphas_ref[1]
    a3 = alphas_ref[2]

    def prelu(x, a):
        return jnp.where(x >= 0.0, x, a * x)

    def vec(off, n):
        return vec_ref[:, off:off + n]                     # (1, n) f32, lane-aligned slice

    # ---- conv3x3 (pad=1) + bias + ReLU: one small MXU dot over the im2col patches ----
    fmap = jnp.dot(patches_ref[...], cwT_ref[...],
                   preferred_element_type=jnp.float32)     # (B*HW, CONV_OUT) f32
    fmap = jnp.maximum(fmap, 0.0)

    # ---- global average pool: per batch an aligned sublane-slice sum ----
    pooled = jnp.concatenate(
        [jnp.sum(fmap[b * HW:(b + 1) * HW, :], axis=0, keepdims=True) for b in range(B)],
        axis=0) * INV_HW                                   # (B, CONV_OUT) f32

    # ---- layer 1: backbone fc + LazyLinear(1024) folded -> one dot, then PReLU + BN1 ----
    h = jnp.dot(pooled.astype(jnp.bfloat16), w0_ref[...],
                preferred_element_type=jnp.float32) + vec(B0_OFF, N1)
    h = prelu(h, a1)
    h = h * vec(S1_OFF, N1) + vec(T1_OFF, N1)

    # ---- layer 2: Linear(1024,512); BN2 applied as a post-matmul f32 affine ----
    cp_w2.wait()
    h = jnp.dot(h.astype(jnp.bfloat16), w2_vmem[...], preferred_element_type=jnp.float32)
    h = h * vec(S2_OFF, N2) + vec(C2_OFF, N2)
    h = prelu(h, a2)

    # ---- layer 3: Linear(512,128) + PReLU + BN3 ----
    cp_w3.wait()
    h = jnp.dot(h.astype(jnp.bfloat16), w3_vmem[...],
                preferred_element_type=jnp.float32) + vec(B3_OFF, N3)
    h = prelu(h, a3)
    h = h * vec(S3_OFF, N3) + vec(T3_OFF, N3)

    # ---- layer 4: Linear(128, num_classes) ----
    out_ref[...] = (jnp.dot(h.astype(jnp.bfloat16), w4_ref[...],
                            preferred_element_type=jnp.float32) + vec(B4_OFF, NUM_CLASSES))


# ------------------------------- wrapper --------------------------------

def make_patches(img):
    """Pad + im2col in the XLA wrapper (no in-kernel slice relayouts).
    Returns (B*H*W, IN_CHANS*9 + 1) bf16; the trailing ones column carries the conv bias."""
    xpad = jnp.pad(img, ((0, 0), (0, 0), (1, 1), (1, 1)))
    taps = [xpad[:, :, kh:kh + H, kw:kw + W] for kh in range(3) for kw in range(3)]
    p = jnp.stack(taps, axis=-1)                                   # (B, C, H, W, 9)
    p = p.transpose(0, 2, 3, 1, 4).reshape(B * HW, TAPS)           # (B*HW, C*9)
    ones = jnp.ones((B * HW, 1), p.dtype)
    return jnp.concatenate([p, ones], axis=1).astype(jnp.bfloat16)


def build_forward(big_space):
    """big_space: memory space for the two large weights (HBM preferred; pl.ANY fallback)."""
    @jax.jit
    def fwd(img, kp):
        patches = make_patches(img)
        return pl.pallas_call(
            fused_forward_kernel,
            out_shape=jax.ShapeDtypeStruct((B, NUM_CLASSES), jnp.float32),
            in_specs=[
                pl.BlockSpec(memory_space=VMEM),        # patches (B*HW, TAPS_P) bf16
                pl.BlockSpec(memory_space=VMEM),        # cwT     (TAPS_P, CONV_OUT) bf16
                pl.BlockSpec(memory_space=SMEM),        # PReLU alphas (3,) f32
                pl.BlockSpec(memory_space=VMEM),        # W0 (CONV_OUT, N1) bf16
                pl.BlockSpec(memory_space=VMEM),        # packed per-feature vectors (1, VLEN) f32
                pl.BlockSpec(memory_space=VMEM),        # W4 (N3, NUM_CLASSES) bf16
                pl.BlockSpec(memory_space=big_space),   # W2 (N1, N2) bf16 -> manual DMA
                pl.BlockSpec(memory_space=big_space),   # W3 (N2, N3) bf16 -> manual DMA
            ],
            out_specs=pl.BlockSpec(memory_space=VMEM),
            scratch_shapes=[
                pltpu.VMEM((N1, N2), BIG_DT),
                pltpu.VMEM((N2, N3), BIG_DT),
                pltpu.SemaphoreType.DMA((2,)),
            ],
        )(patches, kp["cwT"], kp["alphas"], kp["w0"], kp["vec"], kp["w4"],
          kp["w2"], kp["w3"])
    return fwd


# ---------------------- deterministic parameters ------------------------

def _bn_scale_shift(key, n):
    """Eval-mode BatchNorm1d as an affine y = x*scale + shift."""
    k1, k2, k3, k4 = jax.random.split(key, 4)
    gamma = 1.0 + 0.1 * jax.random.normal(k1, (1, n), jnp.float32)
    beta = 0.1 * jax.random.normal(k2, (1, n), jnp.float32)
    running_mean = 0.1 * jax.random.normal(k3, (1, n), jnp.float32)
    running_var = jax.random.uniform(k4, (1, n), jnp.float32, 0.5, 1.5)
    scale = gamma / jnp.sqrt(running_var + EPS)
    shift = beta - running_mean * scale
    return scale, shift


def make_raw_params(key):
    ks = jax.random.split(key, 10)

    def lin(k, fan_in, fan_out):
        kw, kb = jax.random.split(k)
        w = jax.random.normal(kw, (fan_in, fan_out), jnp.float32) / jnp.sqrt(fan_in)
        b = 0.01 * jax.random.normal(kb, (1, fan_out), jnp.float32)
        return w, b

    conv_w = jax.random.normal(ks[0], (CONV_OUT, IN_CHANS, 3, 3),
                               jnp.float32) / jnp.sqrt(IN_CHANS * 9.0)
    conv_b = 0.01 * jax.random.normal(ks[1], (CONV_OUT,), jnp.float32)

    wb, bb = lin(ks[2], CONV_OUT, NUM_CLASSES)     # synthetic backbone fc
    w1, b1 = lin(ks[3], NUM_CLASSES, N1)           # LazyLinear(1024)
    w2, b2 = lin(ks[4], N1, N2)
    w3, b3 = lin(ks[5], N2, N3)
    w4, b4 = lin(ks[6], N3, NUM_CLASSES)

    s1, t1 = _bn_scale_shift(ks[7], N1)
    s2, t2 = _bn_scale_shift(ks[8], N2)
    s3, t3 = _bn_scale_shift(ks[9], N3)

    a = jnp.asarray(0.25, jnp.float32)             # PyTorch PReLU default
    return dict(conv_w=conv_w, conv_b=conv_b, wb=wb, bb=bb, w1=w1, b1=b1,
                w2=w2, b2=b2, w3=w3, b3=b3, w4=w4, b4=b4,
                s1=s1, t1=t1, s2=s2, t2=t2, s3=s3, t3=t3, a1=a, a2=a, a3=a)


def pack_params(p):
    """Exact f32 folds (backbone fc -> layer 1, Linear-2 bias through BN2) + kernel-side packing.
    BN scales/shifts stay as small f32 vectors applied around the matmuls; they are NOT baked
    into the narrow-dtype big weights."""
    hp = jax.lax.Precision.HIGHEST
    w0 = jnp.dot(p["wb"], p["w1"], precision=hp)                       # (CONV_OUT, N1)
    b0 = jnp.dot(p["bb"], p["w1"], precision=hp) + p["b1"]             # (1, N1)
    c2 = p["b2"] * p["s2"] + p["t2"]                                   # (1, N2)

    cwT = jnp.concatenate(
        [p["conv_w"].transpose(1, 2, 3, 0).reshape(TAPS, CONV_OUT),
         p["conv_b"][None, :]], axis=0)                                # (TAPS_P, CONV_OUT)

    vec = jnp.concatenate([b0, p["s1"], p["t1"], p["s2"], c2,
                           p["b3"], p["s3"], p["t3"], p["b4"]],
                          axis=1).astype(jnp.float32)
    alphas = jnp.stack([p["a1"], p["a2"], p["a3"]]).astype(jnp.float32)
    assert vec.shape == (1, VLEN)

    return dict(cwT=cwT.astype(jnp.bfloat16), alphas=alphas,
                w0=w0.astype(jnp.bfloat16), vec=vec,
                w2=p["w2"].astype(BIG_DT), w3=p["w3"].astype(BIG_DT),
                w4=p["w4"].astype(jnp.bfloat16),
                # f32 copies used only by the host-side references
                w0_f32=w0, b0=b0, c2=c2)


# ----------------------------- pure-JAX refs -----------------------------

def reference_unfolded(img, p):
    """Original module math in f32 (eval mode): backbone conv->ReLU->GAP->fc, then the classifier."""
    hp = jax.lax.Precision.HIGHEST
    fmap = jax.lax.conv_general_dilated(
        img, jnp.transpose(p["conv_w"], (2, 3, 1, 0)), (1, 1), "SAME",
        dimension_numbers=("NCHW", "HWIO", "NCHW"), precision=hp)
    fmap = jnp.maximum(fmap + p["conv_b"][None, :, None, None], 0.0)
    pooled = fmap.mean(axis=(2, 3))
    prelu = lambda x, a: jnp.where(x >= 0.0, x, a * x)

    reps = jnp.dot(pooled, p["wb"], precision=hp) + p["bb"]            # backbone fc
    h = prelu(jnp.dot(reps, p["w1"], precision=hp) + p["b1"], p["a1"]) # LazyLinear + PReLU
    h = h * p["s1"] + p["t1"]                                          # BN1d(1024)
    h = jnp.dot(h, p["w2"], precision=hp) + p["b2"]                    # Linear(1024,512)
    h = prelu(h * p["s2"] + p["t2"], p["a2"])                          # BN1d(512) + PReLU
    h = prelu(jnp.dot(h, p["w3"], precision=hp) + p["b3"], p["a3"])    # Linear(512,128) + PReLU
    h = h * p["s3"] + p["t3"]                                          # BN1d(128)
    return jnp.dot(h, p["w4"], precision=hp) + p["b4"]                 # Linear(128,3)


def reference_folded_f32(img, p, kp):
    """Same math but with the kernel's folds (W0 = Wb@W1, b2 pushed through BN2), all f32."""
    hp = jax.lax.Precision.HIGHEST
    fmap = jax.lax.conv_general_dilated(
        img, jnp.transpose(p["conv_w"], (2, 3, 1, 0)), (1, 1), "SAME",
        dimension_numbers=("NCHW", "HWIO", "NCHW"), precision=hp)
    fmap = jnp.maximum(fmap + p["conv_b"][None, :, None, None], 0.0)
    pooled = fmap.mean(axis=(2, 3))
    prelu = lambda x, a: jnp.where(x >= 0.0, x, a * x)

    h = prelu(jnp.dot(pooled, kp["w0_f32"], precision=hp) + kp["b0"], p["a1"])
    h = h * p["s1"] + p["t1"]
    h = jnp.dot(h, p["w2"], precision=hp) * p["s2"] + kp["c2"]
    h = prelu(h, p["a2"])
    h = prelu(jnp.dot(h, p["w3"], precision=hp) + p["b3"], p["a3"])
    h = h * p["s3"] + p["t3"]
    return jnp.dot(h, p["w4"], precision=hp) + p["b4"]


def reference_kernel_mirror(img, kp):
    """XLA mirror of the fused kernel: identical bf16 rounding points, f32 accumulation."""
    hp = jax.lax.Precision.HIGHEST
    f32 = jnp.float32
    prelu = lambda x, a: jnp.where(x >= 0.0, x, a * x)

    def seg(off, n):
        return kp["vec"][:, off:off + n]

    def bdot(x, w):   # bf16 operands (exactly as the MXU sees them), f32 products / accumulate
        return jnp.dot(x.astype(jnp.bfloat16).astype(f32), w.astype(f32), precision=hp)

    patches = make_patches(img).astype(f32)
    fmap = jnp.maximum(jnp.dot(patches, kp["cwT"].astype(f32), precision=hp), 0.0)
    pooled = jnp.concatenate(
        [jnp.sum(fmap[b * HW:(b + 1) * HW, :], axis=0, keepdims=True) for b in range(B)],
        axis=0) * INV_HW

    a1, a2, a3 = kp["alphas"]
    h = prelu(bdot(pooled, kp["w0"]) + seg(B0_OFF, N1), a1)
    h = h * seg(S1_OFF, N1) + seg(T1_OFF, N1)
    h = bdot(h, kp["w2"]) * seg(S2_OFF, N2) + seg(C2_OFF, N2)
    h = prelu(h, a2)
    h = prelu(bdot(h, kp["w3"]) + seg(B3_OFF, N3), a3)
    h = h * seg(S3_OFF, N3) + seg(T3_OFF, N3)
    return bdot(h, kp["w4"]) + seg(B4_OFF, NUM_CLASSES)


# --------------------------------- main ----------------------------------

if __name__ == "__main__":
    key = jax.random.PRNGKey(0)
    k_img, k_par = jax.random.split(key)
    img = jax.random.normal(k_img, (B, IN_CHANS, H, W), jnp.float32)
    raw = make_raw_params(k_par)
    kp = pack_params(raw)

    # Pin the big weights to HBM (avoids a redundant compiler-inserted VMEM copy on top of the
    # manual DMA); fall back to pl.ANY if this JAX version rejects HBM operand specs.
    big_spaces = []
    if hasattr(pltpu, "MemorySpace") and hasattr(pltpu.MemorySpace, "HBM"):
        big_spaces.append(pltpu.MemorySpace.HBM)
    big_spaces.append(pl.ANY)

    out, last_err = None, None
    for space in big_spaces:
        try:
            fwd = build_forward(space)
            out = jax.block_until_ready(fwd(img, kp))
            break
        except Exception as e:          # noqa: BLE001 - fall back to the next memory space
            last_err = e
    if out is None:
        raise last_err

    assert out.shape == (B, NUM_CLASSES), out.shape

    # 1) fused Pallas kernel vs. an XLA mirror with identical bf16 rounding points.
    ref_mirror = jax.block_until_ready(reference_kernel_mirror(img, kp))
    assert jnp.allclose(out, ref_mirror, atol=2e-3, rtol=2e-3), (out, ref_mirror)

    # 2) the constant folding (backbone fc into layer 1, Linear-2 bias through BN2) is exact:
    #    folded f32 math matches the original unfolded module math.
    ref_folded = reference_folded_f32(img, raw, kp)
    ref_unfolded = reference_unfolded(img, raw)
    assert jnp.allclose(ref_folded, ref_unfolded, atol=1e-3, rtol=1e-3), (ref_folded, ref_unfolded)

    print("KERNEL_OK")
</pallas_src>

<mosaic_0001>
module attributes {stable_mosaic.version = 11 : i64} {
  func.func @fused_forward_kernel(%arg0: memref<512x10xbf16, #tpu.memory_space<vmem>>, %arg1: memref<10x8xbf16, #tpu.memory_space<vmem>>, %arg2: memref<3xf32, #tpu.memory_space<smem>>, %arg3: memref<8x1024xbf16, #tpu.memory_space<vmem>>, %arg4: memref<1x4483xf32, #tpu.memory_space<vmem>>, %arg5: memref<128x3xbf16, #tpu.memory_space<vmem>>, %arg6: memref<1024x512xbf16, #tpu.memory_space<hbm>>, %arg7: memref<512x128xbf16, #tpu.memory_space<hbm>>, %arg8: memref<2x3xf32, #tpu.memory_space<vmem>>, %arg9: memref<1024x512xbf16, #tpu.memory_space<vmem>>, %arg10: memref<512x128xbf16, #tpu.memory_space<vmem>>, %arg11: memref<2x!tpu.dma_semaphore, #tpu.memory_space<semaphore_mem>>) attributes {dimension_semantics = [], scalar_prefetch = 0 : i64, scratch_operands = 3 : i64, tpu.core_type = #tpu.core_type<tc>} {
    %c0_i32 = arith.constant 0 : i32
    %0 = tpu.memref_slice %arg11[%c0_i32] : memref<2x!tpu.dma_semaphore, #tpu.memory_space<semaphore_mem>> -> memref<1x!tpu.dma_semaphore, #tpu.memory_space<semaphore_mem>>
    %1 = tpu.memref_squeeze %0 : memref<1x!tpu.dma_semaphore, #tpu.memory_space<semaphore_mem>> -> memref<!tpu.dma_semaphore, #tpu.memory_space<semaphore_mem>>
    tpu.enqueue_dma source(%arg6 : memref<1024x512xbf16, #tpu.memory_space<hbm>>) target(%arg9 : memref<1024x512xbf16, #tpu.memory_space<vmem>>) target_semaphore(%1 : memref<!tpu.dma_semaphore, #tpu.memory_space<semaphore_mem>>)
    %c1_i32 = arith.constant 1 : i32
    %2 = tpu.memref_slice %arg11[%c1_i32] : memref<2x!tpu.dma_semaphore, #tpu.memory_space<semaphore_mem>> -> memref<1x!tpu.dma_semaphore, #tpu.memory_space<semaphore_mem>>
    %3 = tpu.memref_squeeze %2 : memref<1x!tpu.dma_semaphore, #tpu.memory_space<semaphore_mem>> -> memref<!tpu.dma_semaphore, #tpu.memory_space<semaphore_mem>>
    tpu.enqueue_dma source(%arg7 : memref<512x128xbf16, #tpu.memory_space<hbm>>) target(%arg10 : memref<512x128xbf16, #tpu.memory_space<vmem>>) target_semaphore(%3 : memref<!tpu.dma_semaphore, #tpu.memory_space<semaphore_mem>>)
    %c0 = arith.constant 0 : index
    %4 = memref.load %arg2[%c0] : memref<3xf32, #tpu.memory_space<smem>>
    %c1 = arith.constant 1 : index
    %5 = memref.load %arg2[%c1] : memref<3xf32, #tpu.memory_space<smem>>
    %c2 = arith.constant 2 : index
    %6 = memref.load %arg2[%c2] : memref<3xf32, #tpu.memory_space<smem>>
    %c0_0 = arith.constant 0 : index
    %c0_1 = arith.constant 0 : index
    %7 = vector.load %arg0[%c0_0, %c0_1] : memref<512x10xbf16, #tpu.memory_space<vmem>>, vector<512x10xbf16>
    %c0_2 = arith.constant 0 : index
    %c0_3 = arith.constant 0 : index
    %8 = vector.load %arg1[%c0_2, %c0_3] : memref<10x8xbf16, #tpu.memory_space<vmem>>, vector<10x8xbf16>
    %cst = arith.constant dense<0.000000e+00> : vector<512x8xf32>
    %9 = tpu.matmul %7, %8, %cst {dimension_numbers = #tpu.dot_dimension_numbers<[1], [0], [0], [1], [0, 0, 1, 1], [], []>} : vector<512x10xbf16>, vector<10x8xbf16>, vector<512x8xf32> -> vector<512x8xf32>
    %cst_4 = arith.constant 0.000000e+00 : f32
    %10 = vector.broadcast %cst_4 : f32 to vector<512x8xf32>
    %11 = arith.maximumf %9, %10 : vector<512x8xf32>
    %12 = vector.extract_strided_slice %11 {offsets = [0, 0], sizes = [256, 8], strides = [1, 1]} : vector<512x8xf32> to vector<256x8xf32>
    %cst_5 = arith.constant dense<0.000000e+00> : vector<8xf32>
    %13 = vector.multi_reduction <add>, %12, %cst_5 [0] : vector<256x8xf32> to vector<8xf32>
    %14 = vector.shape_cast %13 : vector<8xf32> to vector<1x8xf32>
    %15 = vector.extract_strided_slice %11 {offsets = [256, 0], sizes = [256, 8], strides = [1, 1]} : vector<512x8xf32> to vector<256x8xf32>
    %cst_6 = arith.constant dense<0.000000e+00> : vector<8xf32>
    %16 = vector.multi_reduction <add>, %15, %cst_6 [0] : vector<256x8xf32> to vector<8xf32>
    %17 = vector.shape_cast %16 : vector<8xf32> to vector<1x8xf32>
    %18 = tpu.concatenate %14, %17 in 0 : vector<1x8xf32>, vector<1x8xf32> -> vector<2x8xf32>
    %cst_7 = arith.constant 3.906250e-03 : f32
    %19 = vector.broadcast %cst_7 : f32 to vector<2x8xf32>
    %20 = arith.mulf %18, %19 : vector<2x8xf32>
    %21 = arith.truncf %20 : vector<2x8xf32> to vector<2x8xbf16>
    %c0_8 = arith.constant 0 : index
    %c0_9 = arith.constant 0 : index
    %22 = vector.load %arg3[%c0_8, %c0_9] : memref<8x1024xbf16, #tpu.memory_space<vmem>>, vector<8x1024xbf16>
    %cst_10 = arith.constant dense<0.000000e+00> : vector<2x1024xf32>
    %23 = tpu.matmul %21, %22, %cst_10 {dimension_numbers = #tpu.dot_dimension_numbers<[1], [0], [0], [1], [0, 0, 1, 1], [], []>} : vector<2x8xbf16>, vector<8x1024xbf16>, vector<2x1024xf32> -> vector<2x1024xf32>
    %c0_11 = arith.constant 0 : index
    %c0_12 = arith.constant 0 : index
    %24 = vector.load %arg4[%c0_11, %c0_12] : memref<1x4483xf32, #tpu.memory_space<vmem>>, vector<1x1024xf32>
    %25 = vector.broadcast %24 : vector<1x1024xf32> to vector<2x1024xf32>
    %26 = arith.addf %23, %25 : vector<2x1024xf32>
    %cst_13 = arith.constant 0.000000e+00 : f32
    %27 = vector.broadcast %cst_13 : f32 to vector<2x1024xf32>
    %28 = arith.cmpf oge, %26, %27 : vector<2x1024xf32>
    %29 = vector.broadcast %4 : f32 to vector<2x1024xf32>
    %30 = arith.mulf %29, %26 : vector<2x1024xf32>
    %31 = arith.select %28, %26, %30 : vector<2x1024xi1>, vector<2x1024xf32>
    %c0_14 = arith.constant 0 : index
    %c1024 = arith.constant 1024 : index
    %32 = vector.load %arg4[%c0_14, %c1024] : memref<1x4483xf32, #tpu.memory_space<vmem>>, vector<1x1024xf32>
    %33 = vector.broadcast %32 : vector<1x1024xf32> to vector<2x1024xf32>
    %34 = arith.mulf %31, %33 : vector<2x1024xf32>
    %c0_15 = arith.constant 0 : index
    %c2048 = arith.constant 2048 : index
    %35 = vector.load %arg4[%c0_15, %c2048] : memref<1x4483xf32, #tpu.memory_space<vmem>>, vector<1x1024xf32>
    %36 = vector.broadcast %35 : vector<1x1024xf32> to vector<2x1024xf32>
    %37 = arith.addf %34, %36 : vector<2x1024xf32>
    %c0_i32_16 = arith.constant 0 : i32
    %38 = tpu.memref_slice %arg11[%c0_i32_16] : memref<2x!tpu.dma_semaphore, #tpu.memory_space<semaphore_mem>> -> memref<1x!tpu.dma_semaphore, #tpu.memory_space<semaphore_mem>>
    %39 = tpu.memref_squeeze %38 : memref<1x!tpu.dma_semaphore, #tpu.memory_space<semaphore_mem>> -> memref<!tpu.dma_semaphore, #tpu.memory_space<semaphore_mem>>
    tpu.wait_dma2 semaphore(%39 : memref<!tpu.dma_semaphore, #tpu.memory_space<semaphore_mem>>) src(%arg6 : memref<1024x512xbf16, #tpu.memory_space<hbm>>) dst(%arg9 : memref<1024x512xbf16, #tpu.memory_space<vmem>>)
    %40 = arith.truncf %37 : vector<2x1024xf32> to vector<2x1024xbf16>
    %c0_17 = arith.constant 0 : index
    %c0_18 = arith.constant 0 : index
    %41 = vector.load %arg9[%c0_17, %c0_18] : memref<1024x512xbf16, #tpu.memory_space<vmem>>, vector<1024x512xbf16>
    %cst_19 = arith.constant dense<0.000000e+00> : vector<2x512xf32>
    %42 = tpu.matmul %40, %41, %cst_19 {dimension_numbers = #tpu.dot_dimension_numbers<[1], [0], [0], [1], [0, 0, 1, 1], [], []>} : vector<2x1024xbf16>, vector<1024x512xbf16>, vector<2x512xf32> -> vector<2x512xf32>
    %c0_20 = arith.constant 0 : index
    %c3072 = arith.constant 3072 : index
    %43 = vector.load %arg4[%c0_20, %c3072] : memref<1x4483xf32, #tpu.memory_space<vmem>>, vector<1x512xf32>
    %44 = vector.broadcast %43 : vector<1x512xf32> to vector<2x512xf32>
    %45 = arith.mulf %42, %44 : vector<2x512xf32>
    %c0_21 = arith.constant 0 : index
    %c3584 = arith.constant 3584 : index
    %46 = vector.load %arg4[%c0_21, %c3584] : memref<1x4483xf32, #tpu.memory_space<vmem>>, vector<1x512xf32>
    %47 = vector.broadcast %46 : vector<1x512xf32> to vector<2x512xf32>
    %48 = arith.addf %45, %47 : vector<2x512xf32>
    %cst_22 = arith.constant 0.000000e+00 : f32
    %49 = vector.broadcast %cst_22 : f32 to vector<2x512xf32>
    %50 = arith.cmpf oge, %48, %49 : vector<2x512xf32>
    %51 = vector.broadcast %5 : f32 to vector<2x512xf32>
    %52 = arith.mulf %51, %48 : vector<2x512xf32>
    %53 = arith.select %50, %48, %52 : vector<2x512xi1>, vector<2x512xf32>
    %c1_i32_23 = arith.constant 1 : i32
    %54 = tpu.memref_slice %arg11[%c1_i32_23] : memref<2x!tpu.dma_semaphore, #tpu.memory_space<semaphore_mem>> -> memref<1x!tpu.dma_semaphore, #tpu.memory_space<semaphore_mem>>
    %55 = tpu.memref_squeeze %54 : memref<1x!tpu.dma_semaphore, #tpu.memory_space<semaphore_mem>> -> memref<!tpu.dma_semaphore, #tpu.memory_space<semaphore_mem>>
    tpu.wait_dma2 semaphore(%55 : memref<!tpu.dma_semaphore, #tpu.memory_space<semaphore_mem>>) src(%arg7 : memref<512x128xbf16, #tpu.memory_space<hbm>>) dst(%arg10 : memref<512x128xbf16, #tpu.memory_space<vmem>>)
    %56 = arith.truncf %53 : vector<2x512xf32> to vector<2x512xbf16>
    %c0_24 = arith.constant 0 : index
    %c0_25 = arith.constant 0 : index
    %57 = vector.load %arg10[%c0_24, %c0_25] : memref<512x128xbf16, #tpu.memory_space<vmem>>, vector<512x128xbf16>
    %cst_26 = arith.constant dense<0.000000e+00> : vector<2x128xf32>
    %58 = tpu.matmul %56, %57, %cst_26 {dimension_numbers = #tpu.dot_dimension_numbers<[1], [0], [0], [1], [0, 0, 1, 1], [], []>} : vector<2x512xbf16>, vector<512x128xbf16>, vector<2x128xf32> -> vector<2x128xf32>
    %c0_27 = arith.constant 0 : index
    %c4096 = arith.constant 4096 : index
    %59 = vector.load %arg4[%c0_27, %c4096] : memref<1x4483xf32, #tpu.memory_space<vmem>>, vector<1x128xf32>
    %60 = vector.broadcast %59 : vector<1x128xf32> to vector<2x128xf32>
    %61 = arith.addf %58, %60 : vector<2x128xf32>
    %cst_28 = arith.constant 0.000000e+00 : f32
    %62 = vector.broadcast %cst_28 : f32 to vector<2x128xf32>
    %63 = arith.cmpf oge, %61, %62 : vector<2x128xf32>
    %64 = vector.broadcast %6 : f32 to vector<2x128xf32>
    %65 = arith.mulf %64, %61 : vector<2x128xf32>
    %66 = arith.select %63, %61, %65 : vector<2x128xi1>, vector<2x128xf32>
    %c0_29 = arith.constant 0 : index
    %c4224 = arith.constant 4224 : index
    %67 = vector.load %arg4[%c0_29, %c4224] : memref<1x4483xf32, #tpu.memory_space<vmem>>, vector<1x128xf32>
    %68 = vector.broadcast %67 : vector<1x128xf32> to vector<2x128xf32>
    %69 = arith.mulf %66, %68 : vector<2x128xf32>
    %c0_30 = arith.constant 0 : index
    %c4352 = arith.constant 4352 : index
    %70 = vector.load %arg4[%c0_30, %c4352] : memref<1x4483xf32, #tpu.memory_space<vmem>>, vector<1x128xf32>
    %71 = vector.broadcast %70 : vector<1x128xf32> to vector<2x128xf32>
    %72 = arith.addf %69, %71 : vector<2x128xf32>
    %73 = arith.truncf %72 : vector<2x128xf32> to vector<2x128xbf16>
    %c0_31 = arith.constant 0 : index
    %c0_32 = arith.constant 0 : index
    %74 = vector.load %arg5[%c0_31, %c0_32] : memref<128x3xbf16, #tpu.memory_space<vmem>>, vector<128x3xbf16>
    %cst_33 = arith.constant dense<0.000000e+00> : vector<2x3xf32>
    %75 = tpu.matmul %73, %74, %cst_33 {dimension_numbers = #tpu.dot_dimension_numbers<[1], [0], [0], [1], [0, 0, 1, 1], [], []>} : vector<2x128xbf16>, vector<128x3xbf16>, vector<2x3xf32> -> vector<2x3xf32>
    %c0_34 = arith.constant 0 : index
    %c4480 = arith.constant 4480 : index
    %76 = vector.load %arg4[%c0_34, %c4480] : memref<1x4483xf32, #tpu.memory_space<vmem>>, vector<1x3xf32>
    %77 = vector.broadcast %76 : vector<1x3xf32> to vector<2x3xf32>
    %78 = arith.addf %75, %77 : vector<2x3xf32>
    %c0_35 = arith.constant 0 : index
    %c0_36 = arith.constant 0 : index
    %79 = vector.load %arg8[%c0_35, %c0_36] : memref<2x3xf32, #tpu.memory_space<vmem>>, vector<2x3xf32>
    tpu.vector_store %arg8[%c0_35, %c0_36], %78 {strides = array<i32>} : memref<2x3xf32, #tpu.memory_space<vmem>>, vector<2x3xf32>,
    return
  }
}

module attributes {stable_mosaic.version = 11 : i64} {
  func.func @fused_forward_kernel(%arg0: memref<512x10xbf16, #tpu.memory_space<vmem>>, %arg1: memref<10x8xbf16, #tpu.memory_space<vmem>>, %arg2: memref<3xf32, #tpu.memory_space<smem>>, %arg3: memref<8x1024xbf16, #tpu.memory_space<vmem>>, %arg4: memref<1x4483xf32, #tpu.memory_space<vmem>>, %arg5: memref<128x3xbf16, #tpu.memory_space<vmem>>, %arg6: memref<1024x512xbf16, #tpu.memory_space<any>>, %arg7: memref<512x128xbf16, #tpu.memory_space<any>>, %arg8: memref<2x3xf32, #tpu.memory_space<vmem>>, %arg9: memref<1024x512xbf16, #tpu.memory_space<vmem>>, %arg10: memref<512x128xbf16, #tpu.memory_space<vmem>>, %arg11: memref<2x!tpu.dma_semaphore, #tpu.memory_space<semaphore_mem>>) attributes {dimension_semantics = [], scalar_prefetch = 0 : i64, scratch_operands = 3 : i64, tpu.core_type = #tpu.core_type<tc>} {
    %c0_i32 = arith.constant 0 : i32
    %0 = tpu.memref_slice %arg11[%c0_i32] : memref<2x!tpu.dma_semaphore, #tpu.memory_space<semaphore_mem>> -> memref<1x!tpu.dma_semaphore, #tpu.memory_space<semaphore_mem>>
    %1 = tpu.memref_squeeze %0 : memref<1x!tpu.dma_semaphore, #tpu.memory_space<semaphore_mem>> -> memref<!tpu.dma_semaphore, #tpu.memory_space<semaphore_mem>>
    tpu.enqueue_dma source(%arg6 : memref<1024x512xbf16, #tpu.memory_space<any>>) target(%arg9 : memref<1024x512xbf16, #tpu.memory_space<vmem>>) target_semaphore(%1 : memref<!tpu.dma_semaphore, #tpu.memory_space<semaphore_mem>>)
    %c1_i32 = arith.constant 1 : i32
    %2 = tpu.memref_slice %arg11[%c1_i32] : memref<2x!tpu.dma_semaphore, #tpu.memory_space<semaphore_mem>> -> memref<1x!tpu.dma_semaphore, #tpu.memory_space<semaphore_mem>>
    %3 = tpu.memref_squeeze %2 : memref<1x!tpu.dma_semaphore, #tpu.memory_space<semaphore_mem>> -> memref<!tpu.dma_semaphore, #tpu.memory_space<semaphore_mem>>
    tpu.enqueue_dma source(%arg7 : memref<512x128xbf16, #tpu.memory_space<any>>) target(%arg10 : memref<512x128xbf16, #tpu.memory_space<vmem>>) target_semaphore(%3 : memref<!tpu.dma_semaphore, #tpu.memory_space<semaphore_mem>>)
    %c0 = arith.constant 0 : index
    %4 = memref.load %arg2[%c0] : memref<3xf32, #tpu.memory_space<smem>>
    %c1 = arith.constant 1 : index
    %5 = memref.load %arg2[%c1] : memref<3xf32, #tpu.memory_space<smem>>
    %c2 = arith.constant 2 : index
    %6 = memref.load %arg2[%c2] : memref<3xf32, #tpu.memory_space<smem>>
    %c0_0 = arith.constant 0 : index
    %c0_1 = arith.constant 0 : index
    %7 = vector.load %arg0[%c0_0, %c0_1] : memref<512x10xbf16, #tpu.memory_space<vmem>>, vector<512x10xbf16>
    %c0_2 = arith.constant 0 : index
    %c0_3 = arith.constant 0 : index
    %8 = vector.load %arg1[%c0_2, %c0_3] : memref<10x8xbf16, #tpu.memory_space<vmem>>, vector<10x8xbf16>
    %cst = arith.constant dense<0.000000e+00> : vector<512x8xf32>
    %9 = tpu.matmul %7, %8, %cst {dimension_numbers = #tpu.dot_dimension_numbers<[1], [0], [0], [1], [0, 0, 1, 1], [], []>} : vector<512x10xbf16>, vector<10x8xbf16>, vector<512x8xf32> -> vector<512x8xf32>
    %cst_4 = arith.constant 0.000000e+00 : f32
    %10 = vector.broadcast %cst_4 : f32 to vector<512x8xf32>
    %11 = arith.maximumf %9, %10 : vector<512x8xf32>
    %12 = vector.extract_strided_slice %11 {offsets = [0, 0], sizes = [256, 8], strides = [1, 1]} : vector<512x8xf32> to vector<256x8xf32>
    %cst_5 = arith.constant dense<0.000000e+00> : vector<8xf32>
    %13 = vector.multi_reduction <add>, %12, %cst_5 [0] : vector<256x8xf32> to vector<8xf32>
    %14 = vector.shape_cast %13 : vector<8xf32> to vector<1x8xf32>
    %15 = vector.extract_strided_slice %11 {offsets = [256, 0], sizes = [256, 8], strides = [1, 1]} : vector<512x8xf32> to vector<256x8xf32>
    %cst_6 = arith.constant dense<0.000000e+00> : vector<8xf32>
    %16 = vector.multi_reduction <add>, %15, %cst_6 [0] : vector<256x8xf32> to vector<8xf32>
    %17 = vector.shape_cast %16 : vector<8xf32> to vector<1x8xf32>
    %18 = tpu.concatenate %14, %17 in 0 : vector<1x8xf32>, vector<1x8xf32> -> vector<2x8xf32>
    %cst_7 = arith.constant 3.906250e-03 : f32
    %19 = vector.broadcast %cst_7 : f32 to vector<2x8xf32>
    %20 = arith.mulf %18, %19 : vector<2x8xf32>
    %21 = arith.truncf %20 : vector<2x8xf32> to vector<2x8xbf16>
    %c0_8 = arith.constant 0 : index
    %c0_9 = arith.constant 0 : index
    %22 = vector.load %arg3[%c0_8, %c0_9] : memref<8x1024xbf16, #tpu.memory_space<vmem>>, vector<8x1024xbf16>
    %cst_10 = arith.constant dense<0.000000e+00> : vector<2x1024xf32>
    %23 = tpu.matmul %21, %22, %cst_10 {dimension_numbers = #tpu.dot_dimension_numbers<[1], [0], [0], [1], [0, 0, 1, 1], [], []>} : vector<2x8xbf16>, vector<8x1024xbf16>, vector<2x1024xf32> -> vector<2x1024xf32>
    %c0_11 = arith.constant 0 : index
    %c0_12 = arith.constant 0 : index
    %24 = vector.load %arg4[%c0_11, %c0_12] : memref<1x4483xf32, #tpu.memory_space<vmem>>, vector<1x1024xf32>
    %25 = vector.broadcast %24 : vector<1x1024xf32> to vector<2x1024xf32>
    %26 = arith.addf %23, %25 : vector<2x1024xf32>
    %cst_13 = arith.constant 0.000000e+00 : f32
    %27 = vector.broadcast %cst_13 : f32 to vector<2x1024xf32>
    %28 = arith.cmpf oge, %26, %27 : vector<2x1024xf32>
    %29 = vector.broadcast %4 : f32 to vector<2x1024xf32>
    %30 = arith.mulf %29, %26 : vector<2x1024xf32>
    %31 = arith.select %28, %26, %30 : vector<2x1024xi1>, vector<2x1024xf32>
    %c0_14 = arith.constant 0 : index
    %c1024 = arith.constant 1024 : index
    %32 = vector.load %arg4[%c0_14, %c1024] : memref<1x4483xf32, #tpu.memory_space<vmem>>, vector<1x1024xf32>
    %33 = vector.broadcast %32 : vector<1x1024xf32> to vector<2x1024xf32>
    %34 = arith.mulf %31, %33 : vector<2x1024xf32>
    %c0_15 = arith.constant 0 : index
    %c2048 = arith.constant 2048 : index
    %35 = vector.load %arg4[%c0_15, %c2048] : memref<1x4483xf32, #tpu.memory_space<vmem>>, vector<1x1024xf32>
    %36 = vector.broadcast %35 : vector<1x1024xf32> to vector<2x1024xf32>
    %37 = arith.addf %34, %36 : vector<2x1024xf32>
    %c0_i32_16 = arith.constant 0 : i32
    %38 = tpu.memref_slice %arg11[%c0_i32_16] : memref<2x!tpu.dma_semaphore, #tpu.memory_space<semaphore_mem>> -> memref<1x!tpu.dma_semaphore, #tpu.memory_space<semaphore_mem>>
    %39 = tpu.memref_squeeze %38 : memref<1x!tpu.dma_semaphore, #tpu.memory_space<semaphore_mem>> -> memref<!tpu.dma_semaphore, #tpu.memory_space<semaphore_mem>>
    tpu.wait_dma2 semaphore(%39 : memref<!tpu.dma_semaphore, #tpu.memory_space<semaphore_mem>>) src(%arg6 : memref<1024x512xbf16, #tpu.memory_space<any>>) dst(%arg9 : memref<1024x512xbf16, #tpu.memory_space<vmem>>)
    %40 = arith.truncf %37 : vector<2x1024xf32> to vector<2x1024xbf16>
    %c0_17 = arith.constant 0 : index
    %c0_18 = arith.constant 0 : index
    %41 = vector.load %arg9[%c0_17, %c0_18] : memref<1024x512xbf16, #tpu.memory_space<vmem>>, vector<1024x512xbf16>
    %cst_19 = arith.constant dense<0.000000e+00> : vector<2x512xf32>
    %42 = tpu.matmul %40, %41, %cst_19 {dimension_numbers = #tpu.dot_dimension_numbers<[1], [0], [0], [1], [0, 0, 1, 1], [], []>} : vector<2x1024xbf16>, vector<1024x512xbf16>, vector<2x512xf32> -> vector<2x512xf32>
    %c0_20 = arith.constant 0 : index
    %c3072 = arith.constant 3072 : index
    %43 = vector.load %arg4[%c0_20, %c3072] : memref<1x4483xf32, #tpu.memory_space<vmem>>, vector<1x512xf32>
    %44 = vector.broadcast %43 : vector<1x512xf32> to vector<2x512xf32>
    %45 = arith.mulf %42, %44 : vector<2x512xf32>
    %c0_21 = arith.constant 0 : index
    %c3584 = arith.constant 3584 : index
    %46 = vector.load %arg4[%c0_21, %c3584] : memref<1x4483xf32, #tpu.memory_space<vmem>>, vector<1x512xf32>
    %47 = vector.broadcast %46 : vector<1x512xf32> to vector<2x512xf32>
    %48 = arith.addf %45, %47 : vector<2x512xf32>
    %cst_22 = arith.constant 0.000000e+00 : f32
    %49 = vector.broadcast %cst_22 : f32 to vector<2x512xf32>
    %50 = arith.cmpf oge, %48, %49 : vector<2x512xf32>
    %51 = vector.broadcast %5 : f32 to vector<2x512xf32>
    %52 = arith.mulf %51, %48 : vector<2x512xf32>
    %53 = arith.select %50, %48, %52 : vector<2x512xi1>, vector<2x512xf32>
    %c1_i32_23 = arith.constant 1 : i32
    %54 = tpu.memref_slice %arg11[%c1_i32_23] : memref<2x!tpu.dma_semaphore, #tpu.memory_space<semaphore_mem>> -> memref<1x!tpu.dma_semaphore, #tpu.memory_space<semaphore_mem>>
    %55 = tpu.memref_squeeze %54 : memref<1x!tpu.dma_semaphore, #tpu.memory_space<semaphore_mem>> -> memref<!tpu.dma_semaphore, #tpu.memory_space<semaphore_mem>>
    tpu.wait_dma2 semaphore(%55 : memref<!tpu.dma_semaphore, #tpu.memory_space<semaphore_mem>>) src(%arg7 : memref<512x128xbf16, #tpu.memory_space<any>>) dst(%arg10 : memref<512x128xbf16, #tpu.memory_space<vmem>>)
    %56 = arith.truncf %53 : vector<2x512xf32> to vector<2x512xbf16>
    %c0_24 = arith.constant 0 : index
    %c0_25 = arith.constant 0 : index
    %57 = vector.load %arg10[%c0_24, %c0_25] : memref<512x128xbf16, #tpu.memory_space<vmem>>, vector<512x128xbf16>
    %cst_26 = arith.constant dense<0.000000e+00> : vector<2x128xf32>
    %58 = tpu.matmul %56, %57, %cst_26 {dimension_numbers = #tpu.dot_dimension_numbers<[1], [0], [0], [1], [0, 0, 1, 1], [], []>} : vector<2x512xbf16>, vector<512x128xbf16>, vector<2x128xf32> -> vector<2x128xf32>
    %c0_27 = arith.constant 0 : index
    %c4096 = arith.constant 4096 : index
    %59 = vector.load %arg4[%c0_27, %c4096] : memref<1x4483xf32, #tpu.memory_space<vmem>>, vector<1x128xf32>
    %60 = vector.broadcast %59 : vector<1x128xf32> to vector<2x128xf32>
    %61 = arith.addf %58, %60 : vector<2x128xf32>
    %cst_28 = arith.constant 0.000000e+00 : f32
    %62 = vector.broadcast %cst_28 : f32 to vector<2x128xf32>
    %63 = arith.cmpf oge, %61, %62 : vector<2x128xf32>
    %64 = vector.broadcast %6 : f32 to vector<2x128xf32>
    %65 = arith.mulf %64, %61 : vector<2x128xf32>
    %66 = arith.select %63, %61, %65 : vector<2x128xi1>, vector<2x128xf32>
    %c0_29 = arith.constant 0 : index
    %c4224 = arith.constant 4224 : index
    %67 = vector.load %arg4[%c0_29, %c4224] : memref<1x4483xf32, #tpu.memory_space<vmem>>, vector<1x128xf32>
    %68 = vector.broadcast %67 : vector<1x128xf32> to vector<2x128xf32>
    %69 = arith.mulf %66, %68 : vector<2x128xf32>
    %c0_30 = arith.constant 0 : index
    %c4352 = arith.constant 4352 : index
    %70 = vector.load %arg4[%c0_30, %c4352] : memref<1x4483xf32, #tpu.memory_space<vmem>>, vector<1x128xf32>
    %71 = vector.broadcast %70 : vector<1x128xf32> to vector<2x128xf32>
    %72 = arith.addf %69, %71 : vector<2x128xf32>
    %73 = arith.truncf %72 : vector<2x128xf32> to vector<2x128xbf16>
    %c0_31 = arith.constant 0 : index
    %c0_32 = arith.constant 0 : index
    %74 = vector.load %arg5[%c0_31, %c0_32] : memref<128x3xbf16, #tpu.memory_space<vmem>>, vector<128x3xbf16>
    %cst_33 = arith.constant dense<0.000000e+00> : vector<2x3xf32>
    %75 = tpu.matmul %73, %74, %cst_33 {dimension_numbers = #tpu.dot_dimension_numbers<[1], [0], [0], [1], [0, 0, 1, 1], [], []>} : vector<2x128xbf16>, vector<128x3xbf16>, vector<2x3xf32> -> vector<2x3xf32>
    %c0_34 = arith.constant 0 : index
    %c4480 = arith.constant 4480 : index
    %76 = vector.load %arg4[%c0_34, %c4480] : memref<1x4483xf32, #tpu.memory_space<vmem>>, vector<1x3xf32>
    %77 = vector.broadcast %76 : vector<1x3xf32> to vector<2x3xf32>
    %78 = arith.addf %75, %77 : vector<2x3xf32>
    %c0_35 = arith.constant 0 : index
    %c0_36 = arith.constant 0 : index
    %79 = vector.load %arg8[%c0_35, %c0_36] : memref<2x3xf32, #tpu.memory_space<vmem>>, vector<2x3xf32>
    tpu.vector_store %arg8[%c0_35, %c0_36], %78 {strides = array<i32>} : memref<2x3xf32, #tpu.memory_space<vmem>>, vector<2x3xf32>,
    return
  }
}

</mosaic_0001>

<bundles_post_ra>
// kernel: fwd.1
= control target key start
LH: loop header
LB: loop body
LE: loop exit
PB: predicated region body
PF: predicated region fallthrough
CT: control target
= control target key end

     0   :  { %13 = vsyncpa [#allocation7], 0  ;;  %s5931_s0 = inlined_call_operand.vmem [shape: bf16[512,10], index: 0, kind: input, shape index: {}]   ;;  %s5932_s1 = inlined_call_operand.vmem [shape: bf16[10,8], index: 1, kind: input, shape index: {}]   ;;  %s5933_s2 = inlined_call_operand.vmem [shape: f32[3], index: 2, kind: input, shape index: {}]   ;;  %s5934_s3 = inlined_call_operand.vmem [shape: bf16[8,1024], index: 3, kind: input, shape index: {}]   ;;  %s5935_s4 = inlined_call_operand.vmem [shape: f32[1,4483], index: 4, kind: input, shape index: {}]   ;;  %s5936_s5 = inlined_call_operand.vmem [shape: bf16[128,3], index: 5, kind: input, shape index: {}]   ;;  %s5937_s6 = inlined_call_operand.hbm [shape: bf16[1024,512], index: 6, kind: input, shape index: {}]   ;;  %s5938_s7 = inlined_call_operand.vmem [shape: bf16[512,128], index: 7, kind: input, shape index: {}]   ;;  %s5939_s8 = inlined_call_operand.hbm [shape: f32[2,3], index: 8, kind: output, shape index: {}]  }
   0x1   :  { %14 = vsyncpa [#allocation6], 0  ;;  %s24_s29 = sshll.u32 %s5933_s2, 4  ;;  %s5319_s30 = smov [#allocation5]   ;;  %s25_s29 = int_to_ptr.vmem [resolvable:$true] %s24_s29 }
   0x2   :  { %27 = dma.vmem_to_smem %s25_s29, 16, %s5319_s30, [#allocation7]  }
   0x3   :  { %5311 = dma.done.wait [#allocation7], 16  }
   0x4   :  { %5312 = vsyncadd [#allocation7], 4294967280 }
   0x5   :  { %38 = sfence }
   0x6   :  { %s47_s11 = sshll.u32 %s5937_s6, 4  ;;  %v64_v0 = vld [vmem:[%s5938_s7] sm:$0xff]  ;;  %v66_v1 = vld [vmem:[%s5938_s7 + $0x8] sm:$0xff]  ;;  %v68_v2 = vld [vmem:[%s5938_s7 + $0x10] sm:$0xff]  ;;  %s5320_s17 = smov [#allocation2]   ;;  %s48_s11 = int_to_ptr.hbm [resolvable:$true] %s47_s11 }
   0x7   :  { %s49_s18 = sshll.u32 %s5320_s17, 4  ;;  %65 = vst [vmem:[#allocation3 + $0xb0] sm:$0xff] %v64_v0  ;;  %v70_v3 = vld [vmem:[%s5938_s7 + $0x18] sm:$0xff]  ;;  %v72_v4 = vld [vmem:[%s5938_s7 + $0x20] sm:$0xff]  ;;  %v74_v5 = vld [vmem:[%s5938_s7 + $0x28] sm:$0xff]  ;;  %s50_s18 = int_to_ptr.vmem [resolvable:$true] %s49_s18 }
   0x8   :  { %67 = vst [vmem:[#allocation3] sm:$0xff] %v66_v1  ;;  %52 = dma.hbm_to_vmem [thread:$0]  %s48_s11, 32768, %s50_s18, [#allocation4]  ;;  %v76_v6 = vld [vmem:[%s5938_s7 + $0x30] sm:$0xff]  ;;  %v78_v7 = vld [vmem:[%s5938_s7 + $0x38] sm:$0xff]  ;;  %v80_v8 = vld [vmem:[%s5938_s7 + $0x40] sm:$0xff] }
   0x9   :  { %69 = vst [vmem:[#allocation3 + $0xd8] sm:$0xff] %v68_v2  ;;  %v82_v9 = vld [vmem:[%s5938_s7 + $0x48] sm:$0xff]  ;;  %v84_v10 = vld [vmem:[%s5938_s7 + $0x50] sm:$0xff]  ;;  %v86_v11 = vld [vmem:[%s5938_s7 + $0x58] sm:$0xff] }
   0xa   :  { %71 = vst [vmem:[#allocation3 + $0x18] sm:$0xff] %v70_v3  ;;  %v88_v12 = vld [vmem:[%s5938_s7 + $0x60] sm:$0xff]  ;;  %v90_v13 = vld [vmem:[%s5938_s7 + $0x68] sm:$0xff]  ;;  %v92_v14 = vld [vmem:[%s5938_s7 + $0x70] sm:$0xff] }
   0xb   :  { %73 = vst [vmem:[#allocation3 + $0x50] sm:$0xff] %v72_v4  ;;  %v94_v15 = vld [vmem:[%s5938_s7 + $0x78] sm:$0xff]  ;;  %v96_v16 = vld [vmem:[%s5938_s7 + $0x80] sm:$0xff]  ;;  %v98_v17 = vld [vmem:[%s5938_s7 + $0x88] sm:$0xff] }
   0xc   :  { %75 = vst [vmem:[#allocation3 + $0x68] sm:$0xff] %v74_v5  ;;  %v100_v18 = vld [vmem:[%s5938_s7 + $0x90] sm:$0xff]  ;;  %v102_v19 = vld [vmem:[%s5938_s7 + $0x98] sm:$0xff]  ;;  %v104_v20 = vld [vmem:[%s5938_s7 + $0xa0] sm:$0xff] }
   0xd   :  { %77 = vst [vmem:[#allocation3 + $0x30] sm:$0xff] %v76_v6  ;;  %v106_v21 = vld [vmem:[%s5938_s7 + $0xa8] sm:$0xff]  ;;  %v108_v22 = vld [vmem:[%s5938_s7 + $0xb0] sm:$0xff]  ;;  %v110_v23 = vld [vmem:[%s5938_s7 + $0xb8] sm:$0xff] }
   0xe   :  { %79 = vst [vmem:[#allocation3 + $0x48] sm:$0xff] %v78_v7  ;;  %v112_v24 = vld [vmem:[%s5938_s7 + $0xc0] sm:$0xff]  ;;  %v114_v25 = vld [vmem:[%s5938_s7 + $0xc8] sm:$0xff]  ;;  %v116_v26 = vld [vmem:[%s5938_s7 + $0xd0] sm:$0xff] }
   0xf   :  { %81 = vst [vmem:[#allocation3 + $0x80] sm:$0xff] %v80_v8  ;;  %v118_v27 = vld [vmem:[%s5938_s7 + $0xd8] sm:$0xff]  ;;  %v120_v28 = vld [vmem:[%s5938_s7 + $0xe0] sm:$0xff]  ;;  %v122_v29 = vld [vmem:[%s5938_s7 + $0xe8] sm:$0xff] }
  0x10   :  { %83 = vst [vmem:[#allocation3 + $0x88] sm:$0xff] %v82_v9  ;;  %v124_v30 = vld [vmem:[%s5938_s7 + $0xf0] sm:$0xff]  ;;  %v126_v31 = vld [vmem:[%s5938_s7 + $0xf8] sm:$0xff] }
  0x11   :  { %85 = vst [vmem:[#allocation3 + $0xe8] sm:$0xff] %v84_v10 }
  0x12   :  { %87 = vst [vmem:[#allocation3 + $0xb8] sm:$0xff] %v86_v11 }
  0x13   :  { %89 = vst [vmem:[#allocation3 + $0x60] sm:$0xff] %v88_v12 }
  0x14   :  { %91 = vst [vmem:[#allocation3 + $0xf0] sm:$0xff] %v90_v13 }
  0x15   :  { %93 = vst [vmem:[#allocation3 + $0x8] sm:$0xff] %v92_v14 }
  0x16   :  { %95 = vst [vmem:[#allocation3 + $0x78] sm:$0xff] %v94_v15 }
  0x17   :  { %97 = vst [vmem:[#allocation3 + $0x38] sm:$0xff] %v96_v16 }
  0x18   :  { %99 = vst [vmem:[#allocation3 + $0x58] sm:$0xff] %v98_v17 }
  0x19   :  { %101 = vst [vmem:[#allocation3 + $0x40] sm:$0xff] %v100_v18 }
  0x1a   :  { %103 = vst [vmem:[#allocation3 + $0xc8] sm:$0xff] %v102_v19 }
  0x1b   :  { %105 = vst [vmem:[#allocation3 + $0xe0] sm:$0xff] %v104_v20 }
  0x1c   :  { %107 = vst [vmem:[#allocation3 + $0x90] sm:$0xff] %v106_v21 }
  0x1d   :  { %109 = vst [vmem:[#allocation3 + $0x70] sm:$0xff] %v108_v22 }
  0x1e   :  { %111 = vst [vmem:[#allocation3 + $0xc0] sm:$0xff] %v110_v23 }
  0x1f   :  { %113 = vst [vmem:[#allocation3 + $0xa8] sm:$0xff] %v112_v24 }
  0x20   :  { %115 = vst [vmem:[#allocation3 + $0xd0] sm:$0xff] %v114_v25 }
  0x21   :  { %117 = vst [vmem:[#allocation3 + $0x10] sm:$0xff] %v116_v26 }
  0x22   :  { %119 = vst [vmem:[#allocation3 + $0x28] sm:$0xff] %v118_v27 }
  0x23   :  { %121 = vst [vmem:[#allocation3 + $0xa0] sm:$0xff] %v120_v28 }
  0x24   :  { %123 = vst [vmem:[#allocation3 + $0xf8] sm:$0xff] %v122_v29 }
  0x25   :  { %125 = vst [vmem:[#allocation3 + $0x20] sm:$0xff] %v124_v30 }
  0x26   :  { %127 = vst [vmem:[#allocation3 + $0x98] sm:$0xff] %v126_v31 }
  0x27   :  { %133 = vsyncadd [#allocation4 + $0x1], 4096  ;;  %s5469_s28 = sld [smem:[#allocation5 + $0x1]]  ;;  %v3685_v32 = vld [vmem:[%s5932_s1] sm:$0xf]  ;;  %vm465_vm0 = vcmask 1044480  }
  0x28   :  { %s5474_s9 = sld [smem:[#allocation5 + $0x2]]  ;;  %v4945_v33 = vld [vmem:[%s5932_s1] sm:$0x10]  ;;  %vm368_vm1 = vcmask 80896   ;;  %v4914_v37 = vld [vmem:[%s5931_s0 + $0x8] sm:$0xff]  ;;  %v4915_v38 = vld [vmem:[%s5931_s0 + $0x10] sm:$0xff] }
  0x29   :  { %v3686_v34 = vor.u32 %v4945_v33, %v3685_v32  ;;  %v4913_v36 = vld [vmem:[%s5931_s0] sm:$0xff]  ;;  %v4916_v39 = vld [vmem:[%s5931_s0 + $0x18] sm:$0xff]  ;;  %v4918_v41 = vld [vmem:[%s5931_s0 + $0x28] sm:$0xff]  ;;  %vm702_vm2 = vcmask 64512   ;;  %vm890_vm3 = vcmask 1043456   ;;  %vm841_vm4 = vcmask 1040384  }
  0x2a   :  { %v4917_v40 = vld [vmem:[%s5931_s0 + $0x20] sm:$0xff]  ;;  %v4919_v42 = vld [vmem:[%s5931_s0 + $0x30] sm:$0xff]  ;;  %v4920_v43 = vld [vmem:[%s5931_s0 + $0x38] sm:$0xff] }
  0x2b   :  { %v467_v35 = vsel %vm465_vm0, %v3686_v34, 0  ;;  %v4921_v44 = vld [vmem:[%s5931_s0 + $0x40] sm:$0xff]  ;;  %v4922_v52 = vld [vmem:[%s5931_s0 + $0x48] sm:$0xff]  ;;  %v4923_v61 = vld [vmem:[%s5931_s0 + $0x50] sm:$0xff] }
  0x2c   :  { %476 = vmatpush.bf16.msra.mxu0 %v467_v35  ;;  %5243 = vmatpush.bf16.msra.mxu2 %v467_v35  ;;  %v4924_v6 = vld [vmem:[%s5931_s0 + $0x58] sm:$0xff]  ;;  %v4925_v15 = vld [vmem:[%s5931_s0 + $0x60] sm:$0xff]  ;;  %v4926_v24 = vld [vmem:[%s5931_s0 + $0x68] sm:$0xff] }
  0x2d   :  { %5242 = vmatpush.bf16.msra.mxu1 %v467_v35  ;;  %v4927_v33 = vld [vmem:[%s5931_s0 + $0x70] sm:$0xff] }
  0x2f   :  { %3687 = vmatmul.msk.bf16.vlgmr.msra.gmra.mxu0 %vm368_vm1, %v4913_v36 }
  0x3f   :  { %3688 = vmatmul.msk.bf16.gmra.mxu0 %vm368_vm1, %v4914_v37 }
  0x4f   :  { %3689 = vmatmul.msk.bf16.gmra.mxu0 %vm368_vm1, %v4915_v38 }
  0x5f   :  { %3690 = vmatmul.msk.bf16.gmra.mxu0 %vm368_vm1, %v4916_v39 }
  0x6f   :  { %3691 = vmatmul.msk.bf16.gmra.mxu0 %vm368_vm1, %v4917_v40 }
  0x7f   :  { %3692 = vmatmul.msk.bf16.gmra.mxu0 %vm368_vm1, %v4918_v41 }
  0x8f   :  { %3693 = vmatmul.msk.bf16.gmra.mxu0 %vm368_vm1, %v4919_v42  ;;  %v4928_v42 = vld [vmem:[%s5931_s0 + $0x78] sm:$0xff] }
  0x9f   :  { %3694 = vmatmul.msk.bf16.gmra.mxu0 %vm368_vm1, %v4920_v43 }
  0xac   :  { %v478_v45 = vpop.f32.mrf.mxu0 }
  0xad   :  { %v638_v46 = vmax.f32 %v478_v45, 0.0 }
  0xaf   :  { %3695 = vmatmul.msk.bf16.gmra.mxu0 %vm368_vm1, %v4921_v44  ;;  %v703_v49 = vsel %vm702_vm2, %v638_v46, 0.0 }
  0xb4   :  { %v480_v47 = vpop.f32.mrf.mxu0 }
  0xb5   :  { %v639_v48 = vmax.f32 %v480_v47, 0.0 }
  0xb7   :  { %v704_v50 = vsel %vm702_vm2, %v639_v48, 0.0 }
  0xb8   :  { %v705_v51 = vadd.f32 %v704_v50, %v703_v49 }
  0xbc   :  { %v483_v53 = vpop.f32.mrf.mxu0 }
  0xbd   :  { %v640_v54 = vmax.f32 %v483_v53, 0.0 }
  0xbf   :  { %v706_v55 = vsel %vm702_vm2, %v640_v54, 0.0  ;;  %3696 = vmatmul.msk.bf16.gmra.mxu0 %vm368_vm1, %v4922_v52 }
  0xc0   :  { %v707_v56 = vadd.f32 %v706_v55, %v705_v51  ;;  %v4929_v51 = vld [vmem:[%s5931_s0 + $0x80] sm:$0xff] }
  0xc4   :  { %v485_v57 = vpop.f32.mrf.mxu0 }
  0xc5   :  { %v641_v58 = vmax.f32 %v485_v57, 0.0 }
  0xc7   :  { %v708_v59 = vsel %vm702_vm2, %v641_v58, 0.0 }
  0xc8   :  { %v709_v60 = vadd.f32 %v708_v59, %v707_v56 }
  0xcc   :  { %v488_v62 = vpop.f32.mrf.mxu0 }
  0xcd   :  { %v642_v63 = vmax.f32 %v488_v62, 0.0 }
  0xcf   :  { %v710_v0 = vsel %vm702_vm2, %v642_v63, 0.0  ;;  %3697 = vmatmul.msk.bf16.gmra.mxu0 %vm368_vm1, %v4923_v61 }
  0xd0   :  { %v711_v1 = vadd.f32 %v710_v0, %v709_v60  ;;  %v4930_v60 = vld [vmem:[%s5931_s0 + $0x88] sm:$0xff] }
  0xd4   :  { %v490_v2 = vpop.f32.mrf.mxu0 }
  0xd5   :  { %v643_v3 = vmax.f32 %v490_v2, 0.0 }
  0xd7   :  { %v712_v4 = vsel %vm702_vm2, %v643_v3, 0.0 }
  0xd8   :  { %v713_v5 = vadd.f32 %v712_v4, %v711_v1 }
  0xdc   :  { %v493_v7 = vpop.f32.mrf.mxu0 }
  0xdd   :  { %v644_v8 = vmax.f32 %v493_v7, 0.0 }
  0xdf   :  { %v714_v9 = vsel %vm702_vm2, %v644_v8, 0.0  ;;  %3698 = vmatmul.msk.bf16.gmra.mxu0 %vm368_vm1, %v4924_v6 }
  0xe0   :  { %v715_v10 = vadd.f32 %v714_v9, %v713_v5  ;;  %v4931_v5 = vld [vmem:[%s5931_s0 + $0x90] sm:$0xff] }
  0xe4   :  { %v495_v11 = vpop.f32.mrf.mxu0 }
  0xe5   :  { %v645_v12 = vmax.f32 %v495_v11, 0.0 }
  0xe7   :  { %v716_v13 = vsel %vm702_vm2, %v645_v12, 0.0 }
  0xe8   :  { %v717_v14 = vadd.f32 %v716_v13, %v715_v10 }
  0xec   :  { %v498_v16 = vpop.f32.mrf.mxu0 }
  0xed   :  { %v646_v17 = vmax.f32 %v498_v16, 0.0 }
  0xef   :  { %v718_v18 = vsel %vm702_vm2, %v646_v17, 0.0  ;;  %3699 = vmatmul.msk.bf16.gmra.mxu0 %vm368_vm1, %v4925_v15 }
  0xf0   :  { %v719_v19 = vadd.f32 %v718_v18, %v717_v14  ;;  %v4932_v14 = vld [vmem:[%s5931_s0 + $0x98] sm:$0xff] }
  0xf4   :  { %v500_v20 = vpop.f32.mrf.mxu0 }
  0xf5   :  { %v647_v21 = vmax.f32 %v500_v20, 0.0 }
  0xf7   :  { %v720_v22 = vsel %vm702_vm2, %v647_v21, 0.0 }
  0xf8   :  { %v721_v23 = vadd.f32 %v720_v22, %v719_v19 }
  0xfc   :  { %v503_v25 = vpop.f32.mrf.mxu0 }
  0xfd   :  { %v648_v26 = vmax.f32 %v503_v25, 0.0 }
  0xff   :  { %v722_v27 = vsel %vm702_vm2, %v648_v26, 0.0  ;;  %3700 = vmatmul.msk.bf16.gmra.mxu0 %vm368_vm1, %v4926_v24 }
 0x100   :  { %v723_v28 = vadd.f32 %v722_v27, %v721_v23  ;;  %v4933_v23 = vld [vmem:[%s5931_s0 + $0xa0] sm:$0xff] }
 0x104   :  { %v505_v29 = vpop.f32.mrf.mxu0 }
 0x105   :  { %v649_v30 = vmax.f32 %v505_v29, 0.0 }
 0x107   :  { %v724_v31 = vsel %vm702_vm2, %v649_v30, 0.0 }
 0x108   :  { %v725_v32 = vadd.f32 %v724_v31, %v723_v28 }
 0x10c   :  { %v508_v34 = vpop.f32.mrf.mxu0 }
 0x10d   :  { %v650_v35 = vmax.f32 %v508_v34, 0.0 }
 0x10f   :  { %v726_v36 = vsel %vm702_vm2, %v650_v35, 0.0  ;;  %3701 = vmatmul.msk.bf16.gmra.mxu0 %vm368_vm1, %v4927_v33 }
 0x110   :  { %v727_v37 = vadd.f32 %v726_v36, %v725_v32  ;;  %v4934_v32 = vld [vmem:[%s5931_s0 + $0xa8] sm:$0xff] }
 0x114   :  { %v510_v38 = vpop.f32.mrf.mxu0 }
 0x115   :  { %v651_v39 = vmax.f32 %v510_v38, 0.0 }
 0x117   :  { %v728_v40 = vsel %vm702_vm2, %v651_v39, 0.0 }
 0x118   :  { %v729_v41 = vadd.f32 %v728_v40, %v727_v37 }
 0x11c   :  { %v513_v43 = vpop.f32.mrf.mxu0 }
 0x11d   :  { %v652_v44 = vmax.f32 %v513_v43, 0.0 }
 0x11f   :  { %v730_v45 = vsel %vm702_vm2, %v652_v44, 0.0  ;;  %3702 = vmatmul.msk.bf16.gmra.mxu0 %vm368_vm1, %v4928_v42 }
 0x120   :  { %v731_v46 = vadd.f32 %v730_v45, %v729_v41  ;;  %v4935_v41 = vld [vmem:[%s5931_s0 + $0xb0] sm:$0xff] }
 0x124   :  { %v515_v47 = vpop.f32.mrf.mxu0 }
 0x125   :  { %v653_v48 = vmax.f32 %v515_v47, 0.0 }
 0x127   :  { %v732_v49 = vsel %vm702_vm2, %v653_v48, 0.0 }
 0x128   :  { %v733_v50 = vadd.f32 %v732_v49, %v731_v46 }
 0x12c   :  { %v518_v52 = vpop.f32.mrf.mxu0 }
 0x12d   :  { %v654_v53 = vmax.f32 %v518_v52, 0.0 }
 0x12f   :  { %v734_v54 = vsel %vm702_vm2, %v654_v53, 0.0  ;;  %3703 = vmatmul.msk.bf16.gmra.mxu0 %vm368_vm1, %v4929_v51 }
 0x130   :  { %v735_v55 = vadd.f32 %v734_v54, %v733_v50  ;;  %v4936_v50 = vld [vmem:[%s5931_s0 + $0xb8] sm:$0xff] }
 0x134   :  { %v520_v56 = vpop.f32.mrf.mxu0 }
 0x135   :  { %v655_v57 = vmax.f32 %v520_v56, 0.0 }
 0x137   :  { %v736_v58 = vsel %vm702_vm2, %v655_v57, 0.0 }
 0x138   :  { %v737_v59 = vadd.f32 %v736_v58, %v735_v55 }
 0x13c   :  { %v523_v61 = vpop.f32.mrf.mxu0 }
 0x13d   :  { %v656_v62 = vmax.f32 %v523_v61, 0.0 }
 0x13f   :  { %v738_v63 = vsel %vm702_vm2, %v656_v62, 0.0  ;;  %3704 = vmatmul.msk.bf16.gmra.mxu0 %vm368_vm1, %v4930_v60 }
 0x140   :  { %v739_v0 = vadd.f32 %v738_v63, %v737_v59  ;;  %v4937_v59 = vld [vmem:[%s5931_s0 + $0xc0] sm:$0xff] }
 0x144   :  { %v525_v1 = vpop.f32.mrf.mxu0 }
 0x145   :  { %v657_v2 = vmax.f32 %v525_v1, 0.0 }
 0x147   :  { %v740_v3 = vsel %vm702_vm2, %v657_v2, 0.0 }
 0x148   :  { %v741_v4 = vadd.f32 %v740_v3, %v739_v0  ;;  %v4938_v3 = vld [vmem:[%s5931_s0 + $0xc8] sm:$0xff] }
 0x14c   :  { %v528_v6 = vpop.f32.mrf.mxu0 }
 0x14d   :  { %v658_v7 = vmax.f32 %v528_v6, 0.0 }
 0x14f   :  { %v742_v8 = vsel %vm702_vm2, %v658_v7, 0.0  ;;  %3705 = vmatmul.msk.bf16.gmra.mxu0 %vm368_vm1, %v4931_v5 }
 0x150   :  { %v743_v9 = vadd.f32 %v742_v8, %v741_v4  ;;  %v4943_v4 = vld [vmem:[%s5931_s0 + $0xf0] sm:$0xff] }
 0x151   :  { %3717 = vmatmul.msk.bf16.vlgmr.msra.gmra.mxu2 %vm368_vm1, %v4943_v4 }
 0x154   :  { %v530_v10 = vpop.f32.mrf.mxu0 }
 0x155   :  { %v659_v11 = vmax.f32 %v530_v10, 0.0 }
 0x157   :  { %v744_v12 = vsel %vm702_vm2, %v659_v11, 0.0 }
 0x158   :  { %v745_v13 = vadd.f32 %v744_v12, %v743_v9 }
 0x15c   :  { %v533_v15 = vpop.f32.mrf.mxu0 }
 0x15d   :  { %v660_v16 = vmax.f32 %v533_v15, 0.0  ;;  %v4944_v15 = vld [vmem:[%s5931_s0 + $0xf8] sm:$0xff] }
 0x15f   :  { %v746_v17 = vsel %vm702_vm2, %v660_v16, 0.0  ;;  %3706 = vmatmul.msk.bf16.gmra.mxu0 %vm368_vm1, %v4932_v14  ;;  %v4939_v14 = vld [vmem:[%s5931_s0 + $0xd0] sm:$0xff] }
 0x160   :  { %v747_v18 = vadd.f32 %v746_v17, %v745_v13  ;;  %v4942_v13 = vld [vmem:[%s5931_s0 + $0xe8] sm:$0xff] }
 0x161   :  { %3716 = vmatmul.msk.bf16.vlgmr.msra.gmra.mxu1 %vm368_vm1, %v4942_v13  ;;  %3718 = vmatmul.msk.bf16.gmra.mxu2 %vm368_vm1, %v4944_v15 }
 0x164   :  { %v535_v19 = vpop.f32.mrf.mxu0 }
 0x165   :  { %v661_v20 = vmax.f32 %v535_v19, 0.0 }
 0x167   :  { %v748_v21 = vsel %vm702_vm2, %v661_v20, 0.0 }
 0x168   :  { %v749_v22 = vadd.f32 %v748_v21, %v747_v18 }
 0x16c   :  { %v538_v24 = vpop.f32.mrf.mxu0 }
 0x16d   :  { %v662_v25 = vmax.f32 %v538_v24, 0.0  ;;  %v4940_v24 = vld [vmem:[%s5931_s0 + $0xd8] sm:$0xff] }
 0x16f   :  { %v750_v26 = vsel %vm702_vm2, %v662_v25, 0.0  ;;  %3707 = vmatmul.msk.bf16.gmra.mxu0 %vm368_vm1, %v4933_v23 }
 0x170   :  { %v751_v27 = vadd.f32 %v750_v26, %v749_v22 }
 0x174   :  { %v540_v28 = vpop.f32.mrf.mxu0 }
 0x175   :  { %v663_v29 = vmax.f32 %v540_v28, 0.0 }
 0x177   :  { %v752_v30 = vsel %vm702_vm2, %v663_v29, 0.0 }
 0x178   :  { %v753_v31 = vadd.f32 %v752_v30, %v751_v27 }
 0x17c   :  { %v543_v33 = vpop.f32.mrf.mxu0 }
 0x17d   :  { %v664_v34 = vmax.f32 %v543_v33, 0.0  ;;  %v4941_v33 = vld [vmem:[%s5931_s0 + $0xe0] sm:$0xff] }
 0x17f   :  { %v754_v35 = vsel %vm702_vm2, %v664_v34, 0.0  ;;  %3708 = vmatmul.msk.bf16.gmra.mxu0 %vm368_vm1, %v4934_v32 }
 0x180   :  { %v755_v36 = vadd.f32 %v754_v35, %v753_v31 }
 0x184   :  { %v545_v37 = vpop.f32.mrf.mxu0 }
 0x185   :  { %v665_v38 = vmax.f32 %v545_v37, 0.0 }
 0x187   :  { %v756_v39 = vsel %vm702_vm2, %v665_v38, 0.0 }
 0x188   :  { %v757_v40 = vadd.f32 %v756_v39, %v755_v36 }
 0x18c   :  { %v548_v42 = vpop.f32.mrf.mxu0 }
 0x18d   :  { %v666_v43 = vmax.f32 %v548_v42, 0.0 }
 0x18f   :  { %v758_v44 = vsel %vm702_vm2, %v666_v43, 0.0  ;;  %3709 = vmatmul.msk.bf16.gmra.mxu0 %vm368_vm1, %v4935_v41 }
 0x190   :  { %v759_v45 = vadd.f32 %v758_v44, %v757_v40 }
 0x194   :  { %v550_v46 = vpop.f32.mrf.mxu0 }
 0x195   :  { %v667_v47 = vmax.f32 %v550_v46, 0.0 }
 0x197   :  { %v760_v48 = vsel %vm702_vm2, %v667_v47, 0.0 }
 0x198   :  { %v761_v49 = vadd.f32 %v760_v48, %v759_v45 }
 0x19c   :  { %v553_v51 = vpop.f32.mrf.mxu0 }
 0x19d   :  { %v668_v52 = vmax.f32 %v553_v51, 0.0 }
 0x19f   :  { %v762_v53 = vsel %vm702_vm2, %v668_v52, 0.0  ;;  %3710 = vmatmul.msk.bf16.gmra.mxu0 %vm368_vm1, %v4936_v50 }
 0x1a0   :  { %v763_v54 = vadd.f32 %v762_v53, %v761_v49 }
 0x1a4   :  { %v555_v55 = vpop.f32.mrf.mxu0 }
 0x1a5   :  { %v669_v56 = vmax.f32 %v555_v55, 0.0 }
 0x1a7   :  { %v764_v57 = vsel %vm702_vm2, %v669_v56, 0.0 }
 0x1a8   :  { %v5607_v58 = vadd.f32 %v764_v57, %v763_v54 }
 0x1ac   :  { %v558_v60 = vpop.f32.mrf.mxu0 }
 0x1ad   :  { %v670_v61 = vmax.f32 %v558_v60, 0.0 }
 0x1af   :  { %3711 = vmatmul.msk.bf16.gmra.mxu0 %vm368_vm1, %v4937_v59  ;;  %v772_v0 = vsel %vm702_vm2, %v670_v61, 0.0 }
 0x1b4   :  { %v560_v62 = vpop.f32.mrf.mxu0 }
 0x1b5   :  { %v671_v63 = vmax.f32 %v560_v62, 0.0 }
 0x1b7   :  { %v773_v1 = vsel %vm702_vm2, %v671_v63, 0.0 }
 0x1b8   :  { %v774_v2 = vadd.f32 %v773_v1, %v772_v0 }
 0x1bc   :  { %v563_v5 = vpop.f32.mrf.mxu0 }
 0x1bd   :  { %v672_v6 = vmax.f32 %v563_v5, 0.0 }
 0x1bf   :  { %v775_v7 = vsel %vm702_vm2, %v672_v6, 0.0  ;;  %3712 = vmatmul.msk.bf16.gmra.mxu0 %vm368_vm1, %v4938_v3 }
 0x1c0   :  { %v776_v8 = vadd.f32 %v775_v7, %v774_v2 }
 0x1c4   :  { %v565_v9 = vpop.f32.mrf.mxu0 }
 0x1c5   :  { %v673_v10 = vmax.f32 %v565_v9, 0.0  ;;  %v845_v9 = vld [vmem:[%s5934_s3] sm:$0xff] }
 0x1c7   :  { %v777_v11 = vsel %vm702_vm2, %v673_v10, 0.0 }
 0x1c8   :  { %v778_v12 = vadd.f32 %v777_v11, %v776_v8  ;;  %v872_v11 = vunpack.c.h.b16 %v845_v9 }
 0x1cc   :  { %v568_v16 = vpop.f32.mrf.mxu0 }
 0x1cd   :  { %v674_v17 = vmax.f32 %v568_v16, 0.0 }
 0x1cf   :  { %v779_v18 = vsel %vm702_vm2, %v674_v17, 0.0  ;;  %3713 = vmatmul.msk.bf16.gmra.mxu0 %vm368_vm1, %v4939_v14  ;;  %v880_v14 = vpack.c.b16 %v872_v11, %v872_v11 }
 0x1d0   :  { %v780_v19 = vadd.f32 %v779_v18, %v778_v12 }
 0x1d1   :  { %v895_v17 = vsel %vm890_vm3, %v880_v14, 0 }
 0x1d2   :  { %935 = vmatpush.bf16.msrb.mxu2 %v895_v17 }
 0x1d4   :  { %v570_v20 = vpop.f32.mrf.mxu0  ;;  %v5656_v8 = vpop.f32.mrf.mxu2 }
 0x1d5   :  { %v675_v21 = vmax.f32 %v570_v20, 0.0 }
 0x1d7   :  { %v781_v22 = vsel %vm702_vm2, %v675_v21, 0.0 }
 0x1d8   :  { %v782_v23 = vadd.f32 %v781_v22, %v780_v19 }
 0x1dc   :  { %v573_v25 = vpop.f32.mrf.mxu0 }
 0x1dd   :  { %v676_v26 = vmax.f32 %v573_v25, 0.0 }
 0x1df   :  { %v783_v27 = vsel %vm702_vm2, %v676_v26, 0.0  ;;  %3714 = vmatmul.msk.bf16.gmra.mxu0 %vm368_vm1, %v4940_v24  ;;  %v630_v26 = vpop.f32.mrf.mxu2 }
 0x1e0   :  { %v784_v28 = vadd.f32 %v783_v27, %v782_v23 }
 0x1e4   :  { %v575_v29 = vpop.f32.mrf.mxu0 }
 0x1e5   :  { %v677_v30 = vmax.f32 %v575_v29, 0.0 }
 0x1e7   :  { %v785_v31 = vsel %vm702_vm2, %v677_v30, 0.0  ;;  %v623_v30 = vpop.f32.mrf.mxu1 }
 0x1e8   :  { %v786_v32 = vadd.f32 %v785_v31, %v784_v28 }
 0x1ec   :  { %v578_v34 = vpop.f32.mrf.mxu0 }
 0x1ed   :  { %v678_v35 = vmax.f32 %v578_v34, 0.0 }
 0x1ef   :  { %v787_v36 = vsel %vm702_vm2, %v678_v35, 0.0  ;;  %3715 = vmatmul.msk.bf16.gmra.mxu0 %vm368_vm1, %v4941_v33 }
 0x1f0   :  { %v788_v37 = vadd.f32 %v787_v36, %v786_v32 }
 0x1f4   :  { %v580_v38 = vpop.f32.mrf.mxu0 }
 0x1f5   :  { %v679_v39 = vmax.f32 %v580_v38, 0.0  ;;  %v846_v38 = vld [vmem:[%s5934_s3 + $0x8] sm:$0xff] }
 0x1f7   :  { %v789_v40 = vsel %vm702_vm2, %v679_v39, 0.0 }
 0x1f8   :  { %v790_v41 = vadd.f32 %v789_v40, %v788_v37 }
 0x1fc   :  { %v583_v42 = vpop.f32.mrf.mxu0 }
 0x1fd   :  { %v680_v43 = vmax.f32 %v583_v42, 0.0  ;;  %v873_v42 = vunpack.c.l.b16 %v846_v38 }
 0x1ff   :  { %v791_v44 = vsel %vm702_vm2, %v680_v43, 0.0 }
 0x200   :  { %v792_v45 = vadd.f32 %v791_v44, %v790_v41  ;;  %v871_v41 = vunpack.c.l.b16 %v845_v9 }
 0x204   :  { %v585_v46 = vpop.f32.mrf.mxu0 }
 0x205   :  { %v681_v47 = vmax.f32 %v585_v46, 0.0  ;;  %v881_v46 = vpack.c.b16 %v873_v42, %v873_v42 }
 0x207   :  { %v793_v48 = vsel %vm702_vm2, %v681_v47, 0.0 }
 0x208   :  { %v794_v49 = vadd.f32 %v793_v48, %v792_v45  ;;  %v879_v45 = vpack.c.b16 %v871_v41, %v871_v41  ;;  %v633_v48 = vpop.f32.mrf.mxu2 }
 0x20c   :  { %v588_v50 = vpop.f32.mrf.mxu0 }
 0x20d   :  { %v682_v51 = vmax.f32 %v588_v50, 0.0  ;;  %v892_v50 = vsel %vm890_vm3, %v879_v45, 0 }
 0x20e   :  { %922 = vmatpush.bf16.msrb.mxu1 %v892_v50 }
 0x20f   :  { %v795_v52 = vsel %vm702_vm2, %v682_v51, 0.0  ;;  %v898_v51 = vsel %vm890_vm3, %v881_v46, 0  ;;  %v5709_v46 = vld [vmem:[%s5935_s4] sm:$0xff] }
 0x210   :  { %v796_v53 = vadd.f32 %v795_v52, %v794_v49  ;;  %948 = vmatpush.bf16.msra.mxu3 %v898_v51 }
 0x214   :  { %v590_v54 = vpop.f32.mrf.mxu0 }
 0x215   :  { %v683_v55 = vmax.f32 %v590_v54, 0.0 }
 0x217   :  { %v797_v56 = vsel %vm702_vm2, %v683_v55, 0.0  ;;  %v696_v55 = vmax.f32 %v623_v30, 0.0 }
 0x218   :  { %v798_v57 = vadd.f32 %v797_v56, %v796_v53  ;;  %v625_v53 = vpop.f32.mrf.mxu1 }
 0x21c   :  { %v593_v59 = vpop.f32.mrf.mxu0 }
 0x21d   :  { %v684_v60 = vmax.f32 %v593_v59, 0.0 }
 0x21f   :  { %v799_v61 = vsel %vm702_vm2, %v684_v60, 0.0  ;;  %v697_v60 = vmax.f32 %v625_v53, 0.0 }
 0x220   :  { %v800_v62 = vadd.f32 %v799_v61, %v798_v57  ;;  %v874_v57 = vunpack.c.h.b16 %v846_v38 }
 0x221   :  { %v825_v9 = vsel %vm702_vm2, %v697_v60, 0.0 }
 0x224   :  { %v595_v63 = vpop.f32.mrf.mxu0 }
 0x225   :  { %v685_v7 = vmax.f32 %v595_v63, 0.0  ;;  %v698_v63 = vmax.f32 %v5656_v8, 0.0  ;;  %v766_v8 = vrot.slane %v5607_v58, 4 }
 0x227   :  { %v801_v12 = vsel %vm702_vm2, %v685_v7, 0.0  ;;  %v699_v7 = vmax.f32 %v630_v26, 0.0  ;;  %v827_v14 = vsel %vm702_vm2, %v698_v63, 0.0 }
 0x228   :  { %v802_v18 = vadd.f32 %v801_v12, %v800_v62  ;;  %v882_v62 = vpack.c.b16 %v874_v57, %v874_v57  ;;  %v853_v57 = vperm.slane %v5709_v46, 2 }
 0x22c   :  { %v598_v0 = vpop.f32.mrf.mxu0 }
 0x22d   :  { %v686_v10 = vmax.f32 %v598_v0, 0.0 }
 0x22f   :  { %v803_v15 = vsel %vm702_vm2, %v686_v10, 0.0 }
 0x230   :  { %v804_v22 = vadd.f32 %v803_v15, %v802_v18  ;;  %v700_v15 = vmax.f32 %v633_v48, 0.0  ;;  %v5715_v48 = vld [vmem:[%s5935_s4 + $0x8] sm:$0xff] }
 0x231   :  { %v1046_v53 = vperm.slane %v5715_v48, 0 }
 0x234   :  { %v600_v1 = vpop.f32.mrf.mxu0 }
 0x235   :  { %v687_v13 = vmax.f32 %v600_v1, 0.0  ;;  %v847_v1 = vld [vmem:[%s5934_s3 + $0x10] sm:$0xff] }
 0x237   :  { %v805_v20 = vsel %vm702_vm2, %v687_v13, 0.0  ;;  %v635_v13 = vpop.f32.mrf.mxu2 }
 0x238   :  { %v806_v25 = vadd.f32 %v805_v20, %v804_v22  ;;  %v701_v20 = vmax.f32 %v635_v13, 0.0  ;;  %v854_v13 = vperm.slane %v5709_v46, 3 }
 0x23c   :  { %v603_v2 = vpop.f32.mrf.mxu0 }
 0x23d   :  { %v688_v16 = vmax.f32 %v603_v2, 0.0  ;;  %v823_v2 = vsel %vm702_vm2, %v696_v55, 0.0  ;;  %v852_v55 = vperm.slane %v5709_v46, 1 }
 0x23f   :  { %v807_v23 = vsel %vm702_vm2, %v688_v16, 0.0 }
 0x240   :  { %v808_v29 = vadd.f32 %v807_v23, %v806_v25  ;;  %v831_v23 = vsel %vm702_vm2, %v700_v15, 0.0  ;;  %v833_v25 = vsel %vm702_vm2, %v701_v20, 0.0  ;;  %v1049_v20 = vperm.slane %v5715_v48, 3 }
 0x244   :  { %v605_v3 = vpop.f32.mrf.mxu0 }
 0x245   :  { %v689_v21 = vmax.f32 %v605_v3, 0.0  ;;  %v875_v3 = vunpack.c.l.b16 %v847_v1 }
 0x247   :  { %v809_v27 = vsel %vm702_vm2, %v689_v21, 0.0  ;;  %v883_v10 = vpack.c.b16 %v875_v3, %v875_v3  ;;  %v767_v21 = vadd.f32 %v766_v8, %v5607_v58 }
 0x248   :  { %v810_v33 = vadd.f32 %v809_v27, %v808_v29 }
 0x249   :  { %v904_v16 = vsel %vm890_vm3, %v883_v10, 0  ;;  %v768_v26 = vrot.slane %v767_v21, 2 }
 0x24a   :  { %974 = vmatpush.bf16.msra.mxu2 %v904_v16 }
 0x24b   :  { %v769_v29 = vadd.f32 %v768_v26, %v767_v21 }
 0x24c   :  { %v608_v4 = vpop.f32.mrf.mxu0 }
 0x24d   :  { %v690_v24 = vmax.f32 %v608_v4, 0.0  ;;  %v901_v4 = vsel %vm890_vm3, %v882_v62, 0 }
 0x24e   :  { %961 = vmatpush.bf16.msra.mxu1 %v901_v4 }
 0x24f   :  { %v811_v31 = vsel %vm702_vm2, %v690_v24, 0.0 }
 0x250   :  { %v812_v37 = vadd.f32 %v811_v31, %v810_v33  ;;  %v770_v33 = vrot.slane %v769_v29, 1 }
 0x254   :  { %v610_v5 = vpop.f32.mrf.mxu0 }
 0x255   :  { %v691_v28 = vmax.f32 %v610_v5, 0.0  ;;  %v876_v5 = vunpack.c.h.b16 %v847_v1  ;;  %v1047_v1 = vperm.slane %v5715_v48, 1 }
 0x257   :  { %v813_v35 = vsel %vm702_vm2, %v691_v28, 0.0  ;;  %v884_v11 = vpack.c.b16 %v876_v5, %v876_v5  ;;  %v1048_v5 = vperm.slane %v5715_v48, 2 }
 0x258   :  { %v814_v43 = vadd.f32 %v813_v35, %v812_v37  ;;  %v771_v37 = vadd.f32 %v770_v33, %v769_v29 }
 0x259   :  { %v907_v17 = vsel %vm890_vm3, %v884_v11, 0 }
 0x25a   :  { %987 = vmatpush.bf16.msrb.mxu3 %v907_v17 }
 0x25c   :  { %v613_v6 = vpop.f32.mrf.mxu0 }
 0x25d   :  { %v692_v32 = vmax.f32 %v613_v6, 0.0 }
 0x25f   :  { %v815_v39 = vsel %vm702_vm2, %v692_v32, 0.0  ;;  %v848_v32 = vld [vmem:[%s5934_s3 + $0x18] sm:$0xff]  ;;  %s134_s3 = sld [smem:[#allocation5]] }
 0x260   :  { %v816_v47 = vadd.f32 %v815_v39, %v814_v43  ;;  %v878_v35 = vunpack.c.h.b16 %v848_v32 }
 0x262   :  { %v886_v39 = vpack.c.b16 %v878_v35, %v878_v35  ;;  %v1051_v35 = vperm.slane %v5715_v48, 5 }
 0x264   :  { %v615_v19 = vpop.f32.mrf.mxu0 }
 0x265   :  { %v693_v36 = vmax.f32 %v615_v19, 0.0  ;;  %v829_v19 = vsel %vm702_vm2, %v699_v7, 0.0  ;;  %v5717_v50 = vstv %s134_s3 }
 0x267   :  { %v817_v44 = vsel %vm702_vm2, %v693_v36, 0.0  ;;  %v877_v36 = vunpack.c.l.b16 %v848_v32 }
 0x268   :  { %v818_v52 = vadd.f32 %v817_v44, %v816_v47  ;;  %v913_v44 = vsel %vm890_vm3, %v886_v39, 0  ;;  %v851_v47 = vperm.slane %v5709_v46, 0 }
 0x269   :  { %v885_v41 = vpack.c.b16 %v877_v36, %v877_v36 }
 0x26b   :  { %v910_v45 = vsel %vm890_vm3, %v885_v41, 0 }
 0x26c   :  { %v618_v34 = vpop.f32.mrf.mxu0 }
 0x26d   :  { %v694_v40 = vmax.f32 %v618_v34, 0.0 }
 0x26f   :  { %v819_v49 = vsel %vm702_vm2, %v694_v40, 0.0 }
 0x270   :  { %v820_v59 = vadd.f32 %v819_v49, %v818_v52  ;;  %v5722_v52 = vld [vmem:[%s5935_s4 + $0x10] sm:$0xff] }
 0x271   :  { %v1074_v10 = vperm.slane %v5722_v52, 2 }
 0x274   :  { %v620_v54 = vpop.f32.mrf.mxu0 }
 0x275   :  { %v695_v56 = vmax.f32 %v620_v54, 0.0 }
 0x277   :  { %v821_v61 = vsel %vm702_vm2, %v695_v56, 0.0  ;;  %v1072_v56 = vperm.slane %v5722_v52, 0 }
 0x278   :  { %v822_v0 = vadd.f32 %v821_v61, %v820_v59 }
 0x27a   :  { %v824_v6 = vadd.f32 %v823_v2, %v822_v0 }
 0x27c   :  { %v826_v12 = vadd.f32 %v825_v9, %v824_v6  ;;  %v1073_v6 = vperm.slane %v5722_v52, 1 }
 0x27e   :  { %v828_v18 = vadd.f32 %v827_v14, %v826_v12 }
 0x280   :  { %v830_v22 = vadd.f32 %v829_v19, %v828_v18 }
 0x282   :  { %v832_v24 = vadd.f32 %v831_v23, %v830_v22  ;;  %v855_v22 = vperm.slane %v5709_v46, 4  ;;  %v1075_v23 = vperm.slane %v5722_v52, 3 }
 0x284   :  { %v834_v27 = vadd.f32 %v833_v25, %v832_v24  ;;  %v856_v24 = vperm.slane %v5709_v46, 5 }
 0x286   :  { %v835_v28 = vrot.slane %v834_v27, 4 }
 0x288   :  { %v836_v30 = vadd.f32 %v835_v28, %v834_v27 }
 0x28a   :  { %v837_v31 = vrot.slane %v836_v30, 2 }
 0x28c   :  { %v838_v34 = vadd.f32 %v837_v31, %v836_v30  ;;  %v1050_v31 = vperm.slane %v5715_v48, 4 }
 0x28e   :  { %v839_v58 = vrot.slane %v838_v34, 1 }
 0x290   :  { %v840_v38 = vadd.f32 %v839_v58, %v838_v34  ;;  %v1076_v58 = vperm.slane %v5722_v52, 4 }
 0x292   :  { %v842_v40 = vsel %vm841_vm4, %v771_v37, %v840_v38  ;;  %v1077_v38 = vperm.slane %v5722_v52, 5 }
 0x293   :  { %v843_v42 = vmul.f32 0.00390625, %v842_v40 }
 0x295   :  { %v844_v43 = vpack.c.bf16 %v843_v42, %v843_v42  ;;  %v857_v42 = vperm.slane %v5709_v46, 6 }
 0x297   :  { %3719 = vmatmul.msk.bf16.vlgmr.msrb.gmra.mxu1 %vm702_vm2, %v844_v43  ;;  %3720 = vmatmul.msk.bf16.vlgmr.msrb.gmra.mxu2 %vm702_vm2, %v844_v43 }
 0x298   :  { %3721 = vmatmul.msk.bf16.vlgmr.msra.gmra.mxu3 %vm702_vm2, %v844_v43  ;;  %1013 = vmatpush.bf16.msrb.mxu2 %v913_v44 }
 0x299   :  { %1000 = vmatpush.bf16.msrb.mxu1 %v910_v45 }
 0x2a7   :  { %3722 = vmatmul.msk.bf16.vlgmr.msra.gmra.mxu1 %vm702_vm2, %v844_v43  ;;  %3723 = vmatmul.msk.bf16.vlgmr.msra.gmra.mxu2 %vm702_vm2, %v844_v43 }
 0x2a8   :  { %3724 = vmatmul.msk.bf16.vlgmr.msrb.gmra.mxu3 %vm702_vm2, %v844_v43 }
 0x2b7   :  { %3725 = vmatmul.msk.bf16.vlgmr.msrb.gmra.mxu1 %vm702_vm2, %v844_v43  ;;  %3726 = vmatmul.msk.bf16.vlgmr.msrb.gmra.mxu2 %vm702_vm2, %v844_v43 }
 0x314   :  { %v924_v49 = vpop.f32.mrf.mxu1 }
 0x315   :  { %v925_v51 = vadd.f32 %v924_v49, %v851_v47 }
 0x317   :  { %vm1019_vm5 = vcmp.ge.f32.partialorder %v925_v51, 0.0  ;;  %v1028_v54 = vmul.f32 %v5717_v50, %v925_v51 }
 0x319   :  { %v1036_v59 = vsel %vm1019_vm5, %v925_v51, %v1028_v54 }
 0x31a   :  { %v1062_v60 = vmul.f32 %v1046_v53, %v1036_v59  ;;  %v937_v61 = vpop.f32.mrf.mxu2  ;;  %v1052_v53 = vperm.slane %v5715_v48, 6 }
 0x31b   :  { %v938_v62 = vadd.f32 %v937_v61, %v852_v55  ;;  %v950_v63 = vpop.f32.mrf.mxu3  ;;  %v858_v55 = vperm.slane %v5709_v46, 7 }
 0x31c   :  { %v5729_v0 = vadd.f32 %v1072_v56, %v1062_v60  ;;  %v951_v2 = vadd.f32 %v950_v63, %v853_v57  ;;  %v926_v3 = vpop.f32.mrf.mxu1  ;;  %v1078_v56 = vperm.slane %v5722_v52, 6  ;;  %v1053_v63 = vperm.slane %v5715_v48, 7 }
 0x31d   :  { %vm1020_vm6 = vcmp.ge.f32.partialorder %v938_v62, 0.0  ;;  %v1029_v4 = vmul.f32 %v5717_v50, %v938_v62  ;;  %v1079_v3 = vperm.slane %v5722_v52, 7 }
 0x31e   :  { %vm1021_vm7 = vcmp.ge.f32.partialorder %v951_v2, 0.0  ;;  %v1030_v7 = vmul.f32 %v5717_v50, %v951_v2 }
 0x31f   :  { %v1037_v9 = vsel %vm1020_vm6, %v938_v62, %v1029_v4 }
 0x320   :  { %v1063_v11 = vmul.f32 %v1047_v1, %v1037_v9  ;;  %v1038_v8 = vsel %vm1021_vm7, %v951_v2, %v1030_v7 }
 0x321   :  { %v1064_v12 = vmul.f32 %v1048_v5, %v1038_v8 }
 0x322   :  { %v5738_v14 = vadd.f32 %v1073_v6, %v1063_v11  ;;  %v939_v15 = vpop.f32.mrf.mxu2 }
 0x323   :  { %v5740_v16 = vadd.f32 %v1074_v10, %v1064_v12  ;;  %v952_v17 = vpop.f32.mrf.mxu3 }
 0x324   :  { %v963_v18 = vpop.f32.mrf.mxu1 }
 0x325   :  { %v964_v19 = vadd.f32 %v963_v18, %v854_v13 }
 0x327   :  { %vm1022_vm8 = vcmp.ge.f32.partialorder %v964_v19, 0.0  ;;  %v1031_v21 = vmul.f32 %v5717_v50, %v964_v19 }
 0x329   :  { %v1039_v25 = vsel %vm1022_vm8, %v964_v19, %v1031_v21 }
 0x32a   :  { %v1065_v26 = vmul.f32 %v1049_v20, %v1039_v25  ;;  %v976_v27 = vpop.f32.mrf.mxu2 }
 0x32b   :  { %v977_v28 = vadd.f32 %v976_v27, %v855_v22  ;;  %v989_v29 = vpop.f32.mrf.mxu3 }
 0x32c   :  { %v5747_v30 = vadd.f32 %v1075_v23, %v1065_v26  ;;  %v990_v32 = vadd.f32 %v989_v29, %v856_v24  ;;  %v965_v33 = vpop.f32.mrf.mxu1 }
 0x32d   :  { %vm1023_vm9 = vcmp.ge.f32.partialorder %v977_v28, 0.0  ;;  %v1032_v34 = vmul.f32 %v5717_v50, %v977_v28 }
 0x32e   :  { %vm1024_vm10 = vcmp.ge.f32.partialorder %v990_v32, 0.0  ;;  %v1033_v36 = vmul.f32 %v5717_v50, %v990_v32 }
 0x32f   :  { %v1040_v37 = vsel %vm1023_vm9, %v977_v28, %v1032_v34 }
 0x330   :  { %v1066_v39 = vmul.f32 %v1050_v31, %v1040_v37  ;;  %v1041_v40 = vsel %vm1024_vm10, %v990_v32, %v1033_v36 }
 0x331   :  { %v1067_v41 = vmul.f32 %v1051_v35, %v1041_v40 }
 0x332   :  { %v5756_v43 = vadd.f32 %v1076_v58, %v1066_v39  ;;  %v978_v44 = vpop.f32.mrf.mxu2 }
 0x333   :  { %v5758_v45 = vadd.f32 %v1077_v38, %v1067_v41  ;;  %v991_v47 = vpop.f32.mrf.mxu3 }
 0x334   :  { %v1002_v49 = vpop.f32.mrf.mxu1 }
 0x335   :  { %v1003_v51 = vadd.f32 %v1002_v49, %v857_v42 }
 0x337   :  { %vm1025_vm11 = vcmp.ge.f32.partialorder %v1003_v51, 0.0  ;;  %v1034_v54 = vmul.f32 %v5717_v50, %v1003_v51 }
 0x339   :  { %v1042_v57 = vsel %vm1025_vm11, %v1003_v51, %v1034_v54 }
 0x33a   :  { %v1068_v59 = vmul.f32 %v1052_v53, %v1042_v57  ;;  %v1015_v60 = vpop.f32.mrf.mxu2 }
 0x33b   :  { %v1016_v61 = vadd.f32 %v1015_v60, %v858_v55 }
 0x33c   :  { %v5764_v62 = vadd.f32 %v1078_v56, %v1068_v59  ;;  %v1004_v1 = vpop.f32.mrf.mxu1 }
 0x33d   :  { %vm1026_vm12 = vcmp.ge.f32.partialorder %v1016_v61, 0.0  ;;  %v1035_v2 = vmul.f32 %v5717_v50, %v1016_v61 }
 0x33f   :  { %v1043_v4 = vsel %vm1026_vm12, %v1016_v61, %v1035_v2 }
 0x340   :  { %v1069_v5 = vmul.f32 %v1053_v63, %v1043_v4 }
 0x342   :  { %v5769_v6 = vadd.f32 %v1079_v3, %v1069_v5  ;;  %v1017_v46 = vpop.f32.mrf.mxu2 }
 0x343   :  { %5313 = dma.done.wait [#allocation4], 32768 }
 0x344   :  { %5314 = vsyncadd [#allocation4], 4294934528  ;;  %v3841_v7 = vld [vmem:[#allocation2 + $0xe0] sm:$0xf]  ;;  %v4976_v9 = vld [vmem:[#allocation2 + $0xec] sm:$0xf0] }
 0x345   :  { %v3969_v10 = vld [vmem:[#allocation2 + $0x1e0] sm:$0xf]  ;;  %v3842_v11 = vor.u32 %v4976_v9, %v3841_v7  ;;  %v5008_v8 = vld [vmem:[#allocation2 + $0x1ec] sm:$0xf0] }
 0x346   :  { %v3825_v12 = vld [vmem:[#allocation2 + $0xc0] sm:$0xf]  ;;  %v4972_v48 = vld [vmem:[#allocation2 + $0xcc] sm:$0xf0]  ;;  %v3970_v13 = vor.u32 %v5008_v8, %v3969_v10 }
 0x347   :  { %v3953_v15 = vld [vmem:[#allocation2 + $0x1c0] sm:$0xf]  ;;  %v5004_v17 = vld [vmem:[#allocation2 + $0x1cc] sm:$0xf0]  ;;  %2644 = vmatpush.bf16.msra.mxu3 %v3842_v11  ;;  %v3826_v52 = vor.u32 %v4972_v48, %v3825_v12 }
 0x348   :  { %v4097_v50 = vld [vmem:[#allocation2 + $0x2e0] sm:$0xf]  ;;  %v5040_v18 = vld [vmem:[#allocation2 + $0x2ec] sm:$0xf0]  ;;  %2657 = vmatpush.bf16.msra.mxu1 %v3970_v13  ;;  %v3954_v19 = vor.u32 %v5004_v17, %v3953_v15 }
 0x349   :  { %v4098_v20 = vor.u32 %v5040_v18, %v4097_v50  ;;  %v3809_v21 = vld [vmem:[#allocation2 + $0xa0] sm:$0xf]  ;;  %v4968_v22 = vld [vmem:[#allocation2 + $0xac] sm:$0xf0] }
 0x34a   :  { %v4081_v23 = vld [vmem:[#allocation2 + $0x2c0] sm:$0xf]  ;;  %v5000_v25 = vld [vmem:[#allocation2 + $0x1ac] sm:$0xf0]  ;;  %v3810_v28 = vor.u32 %v4968_v22, %v3809_v21 }
 0x34b   :  { %v3937_v24 = vld [vmem:[#allocation2 + $0x1a0] sm:$0xf]  ;;  %v5036_v26 = vld [vmem:[#allocation2 + $0x2cc] sm:$0xf0]  ;;  %2670 = vmatpush.bf16.msra.mxu2 %v4098_v20  ;;  %2645 = vmatpush.bf16.msra.mxu3 %v3826_v52 }
 0x34c   :  { %v4082_v27 = vor.u32 %v5036_v26, %v4081_v23  ;;  %v4065_v29 = vld [vmem:[#allocation2 + $0x2a0] sm:$0xf]  ;;  %v5032_v31 = vld [vmem:[#allocation2 + $0x2ac] sm:$0xf0]  ;;  %2658 = vmatpush.bf16.msra.mxu1 %v3954_v19  ;;  %v3938_v32 = vor.u32 %v5000_v25, %v3937_v24 }
 0x34d   :  { %v3793_v33 = vld [vmem:[#allocation2 + $0x80] sm:$0xf]  ;;  %v4964_v34 = vld [vmem:[#allocation2 + $0x8c] sm:$0xf0]  ;;  %v4066_v36 = vor.u32 %v5032_v31, %v4065_v29 }
 0x34e   :  { %v3921_v35 = vld [vmem:[#allocation2 + $0x180] sm:$0xf]  ;;  %v4996_v58 = vld [vmem:[#allocation2 + $0x18c] sm:$0xf0]  ;;  %v3794_v37 = vor.u32 %v4964_v34, %v3793_v33 }
 0x34f   :  { %2671 = vmatpush.bf16.msra.mxu2 %v4082_v27  ;;  %2646 = vmatpush.bf16.msra.mxu3 %v3810_v28  ;;  %v4049_v38 = vld [vmem:[#allocation2 + $0x280] sm:$0xf]  ;;  %v5028_v39 = vld [vmem:[#allocation2 + $0x28c] sm:$0xf0]  ;;  %v3922_v40 = vor.u32 %v4996_v58, %v3921_v35  ;;  %v5773_v35 = vpack.c.bf16 %v5729_v0, %v5729_v0 }
 0x350   :  { %2659 = vmatpush.bf16.msra.mxu1 %v3938_v32  ;;  %v3777_v41 = vld [vmem:[#allocation2 + $0x60] sm:$0xf]  ;;  %v4960_v42 = vld [vmem:[#allocation2 + $0x6c] sm:$0xf0]  ;;  %v4050_v49 = vor.u32 %v5028_v39, %v4049_v38 }
 0x351   :  { %v3905_v44 = vld [vmem:[#allocation2 + $0x160] sm:$0xf]  ;;  %v4992_v47 = vld [vmem:[#allocation2 + $0x16c] sm:$0xf0]  ;;  %v3778_v51 = vor.u32 %v4960_v42, %v3777_v41 }
 0x352   :  { %v4033_v53 = vld [vmem:[#allocation2 + $0x260] sm:$0xf]  ;;  %v5024_v54 = vld [vmem:[#allocation2 + $0x26c] sm:$0xf0]  ;;  %v3906_v55 = vor.u32 %v4992_v47, %v3905_v44  ;;  %v5781_v44 = vpack.c.bf16 %v5740_v16, %v5740_v16 }
 0x353   :  { %2672 = vmatpush.bf16.msra.mxu2 %v4066_v36  ;;  %2647 = vmatpush.bf16.msra.mxu3 %v3794_v37  ;;  %v3761_v56 = vld [vmem:[#allocation2 + $0x40] sm:$0xf]  ;;  %v4956_v57 = vld [vmem:[#allocation2 + $0x4c] sm:$0xf0]  ;;  %v4034_v61 = vor.u32 %v5024_v54, %v4033_v53  ;;  %v5777_v36 = vpack.c.bf16 %v5738_v14, %v5738_v14 }
 0x354   :  { %2660 = vmatpush.bf16.msra.mxu1 %v3922_v40  ;;  %v3889_v59 = vld [vmem:[#allocation2 + $0x140] sm:$0xf]  ;;  %v4988_v60 = vld [vmem:[#allocation2 + $0x14c] sm:$0xf0]  ;;  %v3762_v63 = vor.u32 %v4956_v57, %v3761_v56 }
 0x355   :  { %v4017_v1 = vld [vmem:[#allocation2 + $0x240] sm:$0xf]  ;;  %v5020_v2 = vld [vmem:[#allocation2 + $0x24c] sm:$0xf0]  ;;  %v3890_v3 = vor.u32 %v4988_v60, %v3889_v59 }
 0x356   :  { %v3745_v4 = vld [vmem:[#allocation2 + $0x20] sm:$0xf]  ;;  %v4952_v5 = vld [vmem:[#allocation2 + $0x2c] sm:$0xf0]  ;;  %v4018_v9 = vor.u32 %v5020_v2, %v4017_v1 }
 0x357   :  { %2673 = vmatpush.bf16.msra.mxu2 %v4050_v49  ;;  %2648 = vmatpush.bf16.msra.mxu3 %v3778_v51  ;;  %v3873_v46 = vld [vmem:[#allocation2 + $0x120] sm:$0xf]  ;;  %v4984_v7 = vld [vmem:[#allocation2 + $0x12c] sm:$0xf0]  ;;  %v3746_v10 = vor.u32 %v4952_v5, %v3745_v4 }
 0x358   :  { %2661 = vmatpush.bf16.msra.mxu1 %v3906_v55  ;;  %v4001_v11 = vld [vmem:[#allocation2 + $0x220] sm:$0xf]  ;;  %v5016_v8 = vld [vmem:[#allocation2 + $0x22c] sm:$0xf0]  ;;  %v3874_v12 = vor.u32 %v4984_v7, %v3873_v46 }
 0x359   :  { %v3729_v48 = vld [vmem:[#allocation2] sm:$0xf]  ;;  %v4948_v13 = vld [vmem:[#allocation2 + $0xc] sm:$0xf0]  ;;  %v4002_v18 = vor.u32 %v5016_v8, %v4001_v11 }
 0x35a   :  { %v3857_v15 = vld [vmem:[#allocation2 + $0x100] sm:$0xf]  ;;  %v4980_v17 = vld [vmem:[#allocation2 + $0x10c] sm:$0xf0]  ;;  %v3730_v21 = vor.u32 %v4948_v13, %v3729_v48 }
 0x35b   :  { %2674 = vmatpush.bf16.msra.mxu2 %v4034_v61  ;;  %2649 = vmatpush.bf16.msra.mxu3 %v3762_v63  ;;  %v4225_v50 = vld [vmem:[#allocation2 + $0x3e0] sm:$0xf]  ;;  %v5072_v52 = vld [vmem:[#allocation2 + $0x3ec] sm:$0xf0]  ;;  %v3858_v24 = vor.u32 %v4980_v17, %v3857_v15 }
 0x35c   :  { %2662 = vmatpush.bf16.msra.mxu1 %v3890_v3  ;;  %v4353_v19 = vld [vmem:[#allocation2 + $0x4e0] sm:$0xf]  ;;  %v5104_v20 = vld [vmem:[#allocation2 + $0x4ec] sm:$0xf0]  ;;  %v4226_v25 = vor.u32 %v5072_v52, %v4225_v50 }
 0x35d   :  { %v3985_v22 = vld [vmem:[#allocation2 + $0x200] sm:$0xf]  ;;  %v5012_v23 = vld [vmem:[#allocation2 + $0x20c] sm:$0xf0]  ;;  %v4354_v28 = vor.u32 %v5104_v20, %v4353_v19 }
 0x35e   :  { %v4481_v26 = vld [vmem:[#allocation2 + $0x5e0] sm:$0xf]  ;;  %v5136_v27 = vld [vmem:[#allocation2 + $0x5ec] sm:$0xf0]  ;;  %v3986_v32 = vor.u32 %v5012_v23, %v3985_v22 }
 0x35f   :  { %2675 = vmatpush.bf16.msra.mxu2 %v4018_v9  ;;  %2650 = vmatpush.bf16.msra.mxu3 %v3746_v10  ;;  %v4209_v29 = vld [vmem:[#allocation2 + $0x3c0] sm:$0xf]  ;;  %v5068_v31 = vld [vmem:[#allocation2 + $0x3cc] sm:$0xf0]  ;;  %v4482_v58 = vor.u32 %v5136_v27, %v4481_v26 }
 0x360   :  { %2663 = vmatpush.bf16.msra.mxu1 %v3874_v12  ;;  %v4337_v33 = vld [vmem:[#allocation2 + $0x4c0] sm:$0xf]  ;;  %v5100_v34 = vld [vmem:[#allocation2 + $0x4cc] sm:$0xf0]  ;;  %v4210_v37 = vor.u32 %v5068_v31, %v4209_v29 }
 0x361   :  { %v4465_v38 = vld [vmem:[#allocation2 + $0x5c0] sm:$0xf]  ;;  %v5132_v39 = vld [vmem:[#allocation2 + $0x5cc] sm:$0xf0]  ;;  %v4338_v40 = vor.u32 %v5100_v34, %v4337_v33 }
 0x362   :  { %v4193_v41 = vld [vmem:[#allocation2 + $0x3a0] sm:$0xf]  ;;  %v5064_v42 = vld [vmem:[#allocation2 + $0x3ac] sm:$0xf0]  ;;  %v4466_v14 = vor.u32 %v5132_v39, %v4465_v38 }
 0x363   :  { %2676 = vmatpush.bf16.msra.mxu2 %v4002_v18  ;;  %2651 = vmatpush.bf16.msra.mxu3 %v3730_v21  ;;  %v4321_v0 = vld [vmem:[#allocation2 + $0x4a0] sm:$0xf]  ;;  %v5096_v47 = vld [vmem:[#allocation2 + $0x4ac] sm:$0xf0]  ;;  %v4194_v49 = vor.u32 %v5064_v42, %v4193_v41 }
 0x364   :  { %2664 = vmatpush.bf16.msra.mxu1 %v3858_v24  ;;  %v4449_v51 = vld [vmem:[#allocation2 + $0x5a0] sm:$0xf]  ;;  %v5128_v53 = vld [vmem:[#allocation2 + $0x5ac] sm:$0xf0]  ;;  %v4322_v54 = vor.u32 %v5096_v47, %v4321_v0  ;;  %v4974_v47 = vld [vmem:[#allocation2 + $0xe4] sm:$0xf] }
 0x365   :  { %v4177_v55 = vld [vmem:[#allocation2 + $0x380] sm:$0xf]  ;;  %v5060_v56 = vld [vmem:[#allocation2 + $0x38c] sm:$0xf0]  ;;  %v4450_v59 = vor.u32 %v5128_v53, %v4449_v51 }
 0x366   :  { %2652 = vmatmul.bf16.vlgmr.msra.gmra.mxu3 %v5773_v35  ;;  %v4305_v16 = vld [vmem:[#allocation2 + $0x480] sm:$0xf]  ;;  %v5092_v57 = vld [vmem:[#allocation2 + $0x48c] sm:$0xf0]  ;;  %v4178_v60 = vor.u32 %v5060_v56, %v4177_v55  ;;  %v5788_v55 = vpack.c.bf16 %v5747_v30, %v5747_v30 }
 0x367   :  { %2683 = vmatpush.bf16.msrb.mxu3 %v4226_v25  ;;  %2677 = vmatpush.bf16.msra.mxu2 %v3986_v32  ;;  %v4433_v61 = vld [vmem:[#allocation2 + $0x580] sm:$0xf]  ;;  %v5124_v63 = vld [vmem:[#allocation2 + $0x58c] sm:$0xf0]  ;;  %v4306_v1 = vor.u32 %v5092_v57, %v4305_v16 }
 0x368   :  { %2696 = vmatpush.bf16.msrb.mxu1 %v4354_v28  ;;  %v4161_v2 = vld [vmem:[#allocation2 + $0x360] sm:$0xf]  ;;  %v5056_v3 = vld [vmem:[#allocation2 + $0x36c] sm:$0xf0]  ;;  %v4434_v46 = vor.u32 %v5124_v63, %v4433_v61  ;;  %v4970_v61 = vld [vmem:[#allocation2 + $0xc4] sm:$0xf] }
 0x369   :  { %2665 = vmatmul.bf16.vlgmr.msra.gmra.mxu1 %v5777_v36  ;;  %v4289_v4 = vld [vmem:[#allocation2 + $0x460] sm:$0xf]  ;;  %v5088_v5 = vld [vmem:[#allocation2 + $0x46c] sm:$0xf0]  ;;  %v4162_v7 = vor.u32 %v5056_v3, %v4161_v2  ;;  %v3827_v63 = vld [vmem:[#allocation2 + $0xd0] sm:$0xf0]  ;;  %v5796_v2 = vpack.c.bf16 %v5758_v45, %v5758_v45 }
 0x36a   :  { %2678 = vmatmul.bf16.vlgmr.msra.gmra.mxu2 %v5781_v44  ;;  %v4417_v9 = vld [vmem:[#allocation2 + $0x560] sm:$0xf]  ;;  %v5120_v10 = vld [vmem:[#allocation2 + $0x56c] sm:$0xf0]  ;;  %v4290_v11 = vor.u32 %v5088_v5, %v4289_v4 }
 0x36b   :  { %2709 = vmatpush.bf16.msrb.mxu2 %v4482_v58  ;;  %2684 = vmatpush.bf16.msrb.mxu3 %v4210_v37  ;;  %v4145_v8 = vld [vmem:[#allocation2 + $0x340] sm:$0xf]  ;;  %v5052_v12 = vld [vmem:[#allocation2 + $0x34c] sm:$0xf0]  ;;  %v4418_v15 = vor.u32 %v5120_v10, %v4417_v9  ;;  %v3811_v9 = vld [vmem:[#allocation2 + $0xb0] sm:$0xf0] }
 0x36c   :  { %2697 = vmatpush.bf16.msrb.mxu1 %v4338_v40  ;;  %v4273_v48 = vld [vmem:[#allocation2 + $0x440] sm:$0xf]  ;;  %v5084_v13 = vld [vmem:[#allocation2 + $0x44c] sm:$0xf0]  ;;  %v4146_v17 = vor.u32 %v5052_v12, %v4145_v8 }
 0x36d   :  { %v4401_v50 = vld [vmem:[#allocation2 + $0x540] sm:$0xf]  ;;  %v5116_v52 = vld [vmem:[#allocation2 + $0x54c] sm:$0xf0]  ;;  %v4274_v18 = vor.u32 %v5084_v13, %v4273_v48 }
 0x36e   :  { %v4129_v19 = vld [vmem:[#allocation2 + $0x320] sm:$0xf]  ;;  %v5048_v20 = vld [vmem:[#allocation2 + $0x32c] sm:$0xf0]  ;;  %v4402_v23 = vor.u32 %v5116_v52, %v4401_v50 }
 0x36f   :  { %2710 = vmatpush.bf16.msrb.mxu2 %v4466_v14  ;;  %2685 = vmatpush.bf16.msrb.mxu3 %v4194_v49  ;;  %v4257_v21 = vld [vmem:[#allocation2 + $0x420] sm:$0xf]  ;;  %v5080_v22 = vld [vmem:[#allocation2 + $0x42c] sm:$0xf0]  ;;  %v4130_v24 = vor.u32 %v5048_v20, %v4129_v19  ;;  %v3843_v14 = vld [vmem:[#allocation2 + $0xf0] sm:$0xf0] }
 0x370   :  { %2698 = vmatpush.bf16.msrb.mxu1 %v4322_v54  ;;  %v4385_v25 = vld [vmem:[#allocation2 + $0x520] sm:$0xf]  ;;  %v5112_v26 = vld [vmem:[#allocation2 + $0x52c] sm:$0xf0]  ;;  %v4258_v27 = vor.u32 %v5080_v22, %v4257_v21  ;;  %v3846_v57 = vor.u32 %v4974_v47, %v3843_v14  ;;  %v3747_v47 = vld [vmem:[#allocation2 + $0x30] sm:$0xf0] }
 0x371   :  { %v4113_v28 = vld [vmem:[#allocation2 + $0x300] sm:$0xf]  ;;  %v5044_v29 = vld [vmem:[#allocation2 + $0x30c] sm:$0xf0]  ;;  %v4386_v58 = vor.u32 %v5112_v26, %v4385_v25 }
 0x372   :  { %v4241_v31 = vld [vmem:[#allocation2 + $0x400] sm:$0xf]  ;;  %v5076_v32 = vld [vmem:[#allocation2 + $0x40c] sm:$0xf0]  ;;  %v4114_v39 = vor.u32 %v5044_v29, %v4113_v28 }
 0x373   :  { %2711 = vmatpush.bf16.msrb.mxu2 %v4450_v59  ;;  %2686 = vmatpush.bf16.msrb.mxu3 %v4178_v60  ;;  %v4609_v33 = vld [vmem:[#allocation2 + $0x6e0] sm:$0xf]  ;;  %v5168_v34 = vld [vmem:[#allocation2 + $0x6ec] sm:$0xf0]  ;;  %v4242_v42 = vor.u32 %v5076_v32, %v4241_v31  ;;  %v5792_v59 = vpack.c.bf16 %v5756_v43, %v5756_v43  ;;  %v3830_v43 = vor.u32 %v4970_v61, %v3827_v63  ;;  %v4099_v61 = vld [vmem:[#allocation2 + $0x2f0] sm:$0xf0] }
 0x374   :  { %2699 = vmatpush.bf16.msrb.mxu1 %v4306_v1  ;;  %v4737_v37 = vld [vmem:[#allocation2 + $0x7e0] sm:$0xf]  ;;  %v5200_v38 = vld [vmem:[#allocation2 + $0x7ec] sm:$0xf0]  ;;  %v4610_v0 = vor.u32 %v5168_v34, %v4609_v33  ;;  %v4954_v33 = vld [vmem:[#allocation2 + $0x44] sm:$0xf] }
 0x375   :  { %v4369_v40 = vld [vmem:[#allocation2 + $0x500] sm:$0xf]  ;;  %v5108_v41 = vld [vmem:[#allocation2 + $0x50c] sm:$0xf0]  ;;  %v4738_v49 = vor.u32 %v5200_v38, %v4737_v37  ;;  %v3763_v34 = vld [vmem:[#allocation2 + $0x50] sm:$0xf0] }
 0x376   :  { %v4593_v51 = vld [vmem:[#allocation2 + $0x6c0] sm:$0xf]  ;;  %v5164_v53 = vld [vmem:[#allocation2 + $0x6cc] sm:$0xf0]  ;;  %v4370_v54 = vor.u32 %v5108_v41, %v4369_v40  ;;  %v3766_v41 = vor.u32 %v4954_v33, %v3763_v34  ;;  %v4990_v34 = vld [vmem:[#allocation2 + $0x164] sm:$0xf] }
 0x377   :  { %2712 = vmatpush.bf16.msrb.mxu2 %v4434_v46  ;;  %2687 = vmatpush.bf16.msrb.mxu3 %v4162_v7  ;;  %v4721_v56 = vld [vmem:[#allocation2 + $0x7c0] sm:$0xf]  ;;  %v5196_v16 = vld [vmem:[#allocation2 + $0x7cc] sm:$0xf0]  ;;  %v4594_v60 = vor.u32 %v5164_v53, %v4593_v51  ;;  %v4966_v7 = vld [vmem:[#allocation2 + $0xa4] sm:$0xf] }
 0x378   :  { %2700 = vmatpush.bf16.msrb.mxu1 %v4290_v11  ;;  %v4722_v1 = vor.u32 %v5196_v16, %v4721_v56  ;;  %v4577_v30 = vld [vmem:[#allocation2 + $0x6a0] sm:$0xf]  ;;  %v5160_v3 = vld [vmem:[#allocation2 + $0x6ac] sm:$0xf0]  ;;  %v3814_v48 = vor.u32 %v4966_v7, %v3811_v9  ;;  %v5006_v56 = vld [vmem:[#allocation2 + $0x1e4] sm:$0xf] }
 0x379   :  { %v4705_v4 = vld [vmem:[#allocation2 + $0x7a0] sm:$0xf]  ;;  %v5192_v5 = vld [vmem:[#allocation2 + $0x7ac] sm:$0xf0]  ;;  %v4578_v46 = vor.u32 %v5160_v3, %v4577_v30  ;;  %v3971_v16 = vld [vmem:[#allocation2 + $0x1f0] sm:$0xf0] }
 0x37a   :  { %v4706_v45 = vor.u32 %v5192_v5, %v4705_v4  ;;  %v4561_v10 = vld [vmem:[#allocation2 + $0x680] sm:$0xf]  ;;  %v5156_v11 = vld [vmem:[#allocation2 + $0x68c] sm:$0xf0]  ;;  %v3731_v30 = vld [vmem:[#allocation2 + $0x10] sm:$0xf0]  ;;  %v3974_v4 = vor.u32 %v5006_v56, %v3971_v16 }
 0x37b   :  { %2713 = vmatpush.bf16.msrb.mxu2 %v4418_v15  ;;  %2688 = vmatpush.bf16.msrb.mxu3 %v4146_v17  ;;  %v4689_v8 = vld [vmem:[#allocation2 + $0x780] sm:$0xf]  ;;  %v5188_v12 = vld [vmem:[#allocation2 + $0x78c] sm:$0xf0]  ;;  %v4562_v13 = vor.u32 %v5156_v11, %v4561_v10  ;;  %v4962_v15 = vld [vmem:[#allocation2 + $0x84] sm:$0xf] }
 0x37c   :  { %2701 = vmatpush.bf16.msrb.mxu1 %v4274_v18  ;;  %v3795_v17 = vld [vmem:[#allocation2 + $0x90] sm:$0xf0]  ;;  %v4690_v50 = vor.u32 %v5188_v12, %v4689_v8  ;;  %v4545_v52 = vld [vmem:[#allocation2 + $0x660] sm:$0xf]  ;;  %v5152_v18 = vld [vmem:[#allocation2 + $0x66c] sm:$0xf0] }
 0x37d   :  { %v4673_v19 = vld [vmem:[#allocation2 + $0x760] sm:$0xf]  ;;  %v5184_v20 = vld [vmem:[#allocation2 + $0x76c] sm:$0xf0]  ;;  %v3798_v21 = vor.u32 %v4962_v15, %v3795_v17  ;;  %v4546_v22 = vor.u32 %v5152_v18, %v4545_v52  ;;  %v5070_v5 = vld [vmem:[#allocation2 + $0x3e4] sm:$0xf] }
 0x37e   :  { %v4674_v25 = vor.u32 %v5184_v20, %v4673_v19  ;;  %v4529_v26 = vld [vmem:[#allocation2 + $0x640] sm:$0xf]  ;;  %v5180_v29 = vld [vmem:[#allocation2 + $0x74c] sm:$0xf0]  ;;  %v5002_v7 = vld [vmem:[#allocation2 + $0x1c4] sm:$0xf] }
 0x37f   :  { %2714 = vmatpush.bf16.msrb.mxu2 %v4402_v23  ;;  %2689 = vmatpush.bf16.msrb.mxu3 %v4130_v24  ;;  %v4958_v23 = vld [vmem:[#allocation2 + $0x64] sm:$0xf]  ;;  %v3779_v24 = vld [vmem:[#allocation2 + $0x70] sm:$0xf0]  ;;  %v4657_v28 = vld [vmem:[#allocation2 + $0x740] sm:$0xf] }
 0x380   :  { %2702 = vmatpush.bf16.msrb.mxu1 %v4258_v27  ;;  %v5148_v27 = vld [vmem:[#allocation2 + $0x64c] sm:$0xf0]  ;;  %v3782_v31 = vor.u32 %v4958_v23, %v3779_v24  ;;  %v4513_v37 = vld [vmem:[#allocation2 + $0x620] sm:$0xf]  ;;  %v3955_v9 = vld [vmem:[#allocation2 + $0x1d0] sm:$0xf0] }
 0x381   :  { %v4530_v32 = vor.u32 %v5148_v27, %v4529_v26  ;;  %v5144_v38 = vld [vmem:[#allocation2 + $0x62c] sm:$0xf0]  ;;  %v4625_v53 = vld [vmem:[#allocation2 + $0x700] sm:$0xf]  ;;  %v5034_v11 = vld [vmem:[#allocation2 + $0x2c4] sm:$0xf] }
 0x382   :  { %v5176_v40 = vld [vmem:[#allocation2 + $0x72c] sm:$0xf0]  ;;  %v4083_v8 = vld [vmem:[#allocation2 + $0x2d0] sm:$0xf0]  ;;  %v5066_v15 = vld [vmem:[#allocation2 + $0x3c4] sm:$0xf] }
 0x383   :  { %2715 = vmatpush.bf16.msrb.mxu2 %v4386_v58  ;;  %2690 = vmatpush.bf16.msrb.mxu3 %v4114_v39  ;;  %v4658_v58 = vor.u32 %v5180_v29, %v4657_v28  ;;  %v4641_v39 = vld [vmem:[#allocation2 + $0x720] sm:$0xf]  ;;  %v5140_v51 = vld [vmem:[#allocation2 + $0x60c] sm:$0xf0]  ;;  %v4211_v17 = vld [vmem:[#allocation2 + $0x3d0] sm:$0xf0] }
 0x384   :  { %2703 = vmatpush.bf16.msrb.mxu1 %v4242_v42  ;;  %v4514_v42 = vor.u32 %v5144_v38, %v4513_v37  ;;  %v4642_v14 = vor.u32 %v5176_v40, %v4641_v39  ;;  %v4998_v52 = vld [vmem:[#allocation2 + $0x1a4] sm:$0xf]  ;;  %v3939_v18 = vld [vmem:[#allocation2 + $0x1b0] sm:$0xf0]  ;;  %v4214_v20 = vor.u32 %v5066_v15, %v4211_v17 }
 0x385   :  { %v4067_v19 = vld [vmem:[#allocation2 + $0x2b0] sm:$0xf0]  ;;  %v4994_v24 = vld [vmem:[#allocation2 + $0x184] sm:$0xf] }
 0x386   :  { %2691 = vmatmul.bf16.vlgmr.msrb.gmra.mxu3 %v5788_v55  ;;  %v5026_v26 = vld [vmem:[#allocation2 + $0x284] sm:$0xf]  ;;  %v4051_v27 = vld [vmem:[#allocation2 + $0x290] sm:$0xf0] }
 0x387   :  { %2722 = vmatpush.bf16.msra.mxu3 %v4610_v0  ;;  %2716 = vmatpush.bf16.msrb.mxu2 %v4370_v54  ;;  %v4950_v0 = vld [vmem:[#allocation2 + $0x24] sm:$0xf]  ;;  %v5172_v54 = vld [vmem:[#allocation2 + $0x70c] sm:$0xf0]  ;;  %v4054_v33 = vor.u32 %v5026_v26, %v4051_v27  ;;  %v4035_v38 = vld [vmem:[#allocation2 + $0x270] sm:$0xf0] }
 0x388   :  { %2735 = vmatpush.bf16.msra.mxu1 %v4738_v49  ;;  %v4497_v49 = vld [vmem:[#allocation2 + $0x600] sm:$0xf]  ;;  %v4626_v3 = vor.u32 %v5172_v54, %v4625_v53  ;;  %v5022_v37 = vld [vmem:[#allocation2 + $0x264] sm:$0xf]  ;;  %v4147_v16 = vld [vmem:[#allocation2 + $0x350] sm:$0xf0] }
 0x389   :  { %2704 = vmatmul.bf16.vlgmr.msrb.gmra.mxu1 %v5792_v59  ;;  %v4498_v63 = vor.u32 %v5140_v51, %v4497_v49  ;;  %v5018_v49 = vld [vmem:[#allocation2 + $0x244] sm:$0xf]  ;;  %v4019_v51 = vld [vmem:[#allocation2 + $0x250] sm:$0xf0] }
 0x38a   :  { %2717 = vmatmul.bf16.vlgmr.msrb.gmra.mxu2 %v5796_v2  ;;  %v5050_v56 = vld [vmem:[#allocation2 + $0x344] sm:$0xf]  ;;  %v4483_v15 = vld [vmem:[#allocation2 + $0x5f0] sm:$0xf0] }
 0x38b   :  { %2748 = vmatpush.bf16.msra.mxu2 %v3846_v57  ;;  %2723 = vmatpush.bf16.msra.mxu3 %v4594_v60  ;;  %v3750_v57 = vor.u32 %v4950_v0, %v3747_v47  ;;  %v5038_v60 = vld [vmem:[#allocation2 + $0x2e4] sm:$0xf]  ;;  %v4038_v0 = vor.u32 %v5022_v37, %v4035_v38 }
 0x38c   :  { %2736 = vmatpush.bf16.msra.mxu1 %v4722_v1  ;;  %v4946_v1 = vld [vmem:[#allocation2 + $0x4] sm:$0xf] }
 0x38d   :  { %v3734_v10 = vor.u32 %v4946_v1, %v3731_v30  ;;  %v4986_v47 = vld [vmem:[#allocation2 + $0x144] sm:$0xf]  ;;  %v4003_v1 = vld [vmem:[#allocation2 + $0x230] sm:$0xf0]  ;;  %v4150_v30 = vor.u32 %v5050_v56, %v4147_v16 }
 0x38e   :  { %v5086_v16 = vld [vmem:[#allocation2 + $0x464] sm:$0xf] }
 0x38f   :  { %2749 = vmatpush.bf16.msra.mxu2 %v3830_v43  ;;  %2724 = vmatpush.bf16.msra.mxu3 %v4578_v46  ;;  %v4227_v43 = vld [vmem:[#allocation2 + $0x3f0] sm:$0xf0]  ;;  %v4102_v46 = vor.u32 %v5038_v60, %v4099_v61  ;;  %v4982_v60 = vld [vmem:[#allocation2 + $0x124] sm:$0xf] }
 0x390   :  { %2737 = vmatpush.bf16.msra.mxu1 %v4706_v45  ;;  %v5803_v45 = vpack.c.bf16 %v5764_v62, %v5764_v62  ;;  %v4230_v12 = vor.u32 %v5070_v5, %v4227_v43  ;;  %v5030_v62 = vld [vmem:[#allocation2 + $0x2a4] sm:$0xf]  ;;  %v3875_v61 = vld [vmem:[#allocation2 + $0x130] sm:$0xf0] }
 0x391   :  { %v4070_v23 = vor.u32 %v5030_v62, %v4067_v19  ;;  %v4131_v5 = vld [vmem:[#allocation2 + $0x330] sm:$0xf0]  ;;  %v5166_v19 = vld [vmem:[#allocation2 + $0x6e4] sm:$0xf] }
 0x393   :  { %2750 = vmatpush.bf16.msra.mxu2 %v3814_v48  ;;  %2725 = vmatpush.bf16.msra.mxu3 %v4562_v13  ;;  %v5807_v48 = vpack.c.bf16 %v5769_v6, %v5769_v6  ;;  %v3958_v13 = vor.u32 %v5002_v7, %v3955_v9  ;;  %v3942_v6 = vor.u32 %v4998_v52, %v3939_v18  ;;  %v3859_v7 = vld [vmem:[#allocation2 + $0x110] sm:$0xf0]  ;;  %v5010_v9 = vld [vmem:[#allocation2 + $0x204] sm:$0xf] }
 0x394   :  { %2738 = vmatpush.bf16.msra.mxu1 %v4690_v50  ;;  %v4086_v50 = vor.u32 %v5034_v11, %v4083_v8  ;;  %v5102_v11 = vld [vmem:[#allocation2 + $0x4e4] sm:$0xf]  ;;  %v4355_v8 = vld [vmem:[#allocation2 + $0x4f0] sm:$0xf0] }
 0x395   :  { %v4115_v52 = vld [vmem:[#allocation2 + $0x310] sm:$0xf0]  ;;  %v4358_v62 = vor.u32 %v5102_v11, %v4355_v8  ;;  %v5146_v11 = vld [vmem:[#allocation2 + $0x644] sm:$0xf] }
 0x396   :  { %v4531_v8 = vld [vmem:[#allocation2 + $0x650] sm:$0xf0] }
 0x397   :  { %2751 = vmatpush.bf16.msra.mxu2 %v3798_v21  ;;  %2726 = vmatpush.bf16.msra.mxu3 %v4546_v22  ;;  %v5062_v21 = vld [vmem:[#allocation2 + $0x3a4] sm:$0xf]  ;;  %v4195_v22 = vld [vmem:[#allocation2 + $0x3b0] sm:$0xf0] }
 0x398   :  { %2739 = vmatpush.bf16.msra.mxu1 %v4674_v25  ;;  %v3923_v25 = vld [vmem:[#allocation2 + $0x190] sm:$0xf0]  ;;  %v4198_v28 = vor.u32 %v5062_v21, %v4195_v22  ;;  %v5098_v21 = vld [vmem:[#allocation2 + $0x4c4] sm:$0xf] }
 0x399   :  { %v3926_v29 = vor.u32 %v4994_v24, %v3923_v25  ;;  %v4339_v22 = vld [vmem:[#allocation2 + $0x4d0] sm:$0xf0]  ;;  %v5130_v24 = vld [vmem:[#allocation2 + $0x5c4] sm:$0xf] }
 0x39a   :  { %v4467_v25 = vld [vmem:[#allocation2 + $0x5d0] sm:$0xf0]  ;;  %v4342_v27 = vor.u32 %v5098_v21, %v4339_v22  ;;  %v5106_v22 = vld [vmem:[#allocation2 + $0x504] sm:$0xf] }
 0x39b   :  { %2752 = vmatpush.bf16.msra.mxu2 %v3782_v31  ;;  %2727 = vmatpush.bf16.msra.mxu3 %v4530_v32  ;;  %v5058_v31 = vld [vmem:[#allocation2 + $0x384] sm:$0xf]  ;;  %v4179_v32 = vld [vmem:[#allocation2 + $0x390] sm:$0xf0] }
 0x39c   :  { %2740 = vmatpush.bf16.msra.mxu1 %v4658_v58  ;;  %v3907_v58 = vld [vmem:[#allocation2 + $0x170] sm:$0xf0]  ;;  %v4182_v39 = vor.u32 %v5058_v31, %v4179_v32  ;;  %v4470_v31 = vor.u32 %v5130_v24, %v4467_v25  ;;  %v5094_v32 = vld [vmem:[#allocation2 + $0x4a4] sm:$0xf] }
 0x39d   :  { %v3910_v40 = vor.u32 %v4990_v34, %v3907_v58  ;;  %v5126_v34 = vld [vmem:[#allocation2 + $0x5a4] sm:$0xf]  ;;  %v4451_v58 = vld [vmem:[#allocation2 + $0x5b0] sm:$0xf0] }
 0x39e   :  { %v4243_v21 = vld [vmem:[#allocation2 + $0x410] sm:$0xf0]  ;;  %v5198_v24 = vld [vmem:[#allocation2 + $0x7e4] sm:$0xf] }
 0x39f   :  { %2753 = vmatpush.bf16.msra.mxu2 %v3766_v41  ;;  %2728 = vmatpush.bf16.msra.mxu3 %v4514_v42  ;;  %v5054_v41 = vld [vmem:[#allocation2 + $0x364] sm:$0xf]  ;;  %v4163_v42 = vld [vmem:[#allocation2 + $0x370] sm:$0xf0] }
 0x3a0   :  { %2741 = vmatpush.bf16.msra.mxu1 %v4642_v14  ;;  %v3891_v14 = vld [vmem:[#allocation2 + $0x150] sm:$0xf0]  ;;  %v4166_v53 = vor.u32 %v5054_v41, %v4163_v42  ;;  %v4454_v41 = vor.u32 %v5126_v34, %v4451_v58  ;;  %v5090_v42 = vld [vmem:[#allocation2 + $0x484] sm:$0xf]  ;;  %v3977_v58 = vld [vmem:[#allocation2 + $0x1e8] sm:$0xf] }
 0x3a1   :  { %v3894_v54 = vor.u32 %v4986_v47, %v3891_v14  ;;  %v5122_v47 = vld [vmem:[#allocation2 + $0x584] sm:$0xf]  ;;  %v4435_v14 = vld [vmem:[#allocation2 + $0x590] sm:$0xf0] }
 0x3a2   :  { %v4438_v56 = vor.u32 %v5122_v47, %v4435_v14  ;;  %v4739_v25 = vld [vmem:[#allocation2 + $0x7f0] sm:$0xf0] }
 0x3a3   :  { %2754 = vmatpush.bf16.msra.mxu2 %v3750_v57  ;;  %2729 = vmatpush.bf16.msra.mxu3 %v4498_v63  ;;  %v4022_v57 = vor.u32 %v5018_v49, %v4019_v51  ;;  %v5014_v63 = vld [vmem:[#allocation2 + $0x224] sm:$0xf]  ;;  %v4742_v34 = vor.u32 %v5198_v24, %v4739_v25  ;;  %v3897_v25 = vld [vmem:[#allocation2 + $0x148] sm:$0xf] }
 0x3a4   :  { %2742 = vmatpush.bf16.msra.mxu1 %v4626_v3  ;;  %v3878_v3 = vor.u32 %v4982_v60, %v3875_v61  ;;  %v4006_v43 = vor.u32 %v5014_v63, %v4003_v1  ;;  %v5118_v60 = vld [vmem:[#allocation2 + $0x564] sm:$0xf]  ;;  %v4419_v61 = vld [vmem:[#allocation2 + $0x570] sm:$0xf0] }
 0x3a6   :  { %2730 = vmatmul.bf16.vlgmr.msra.gmra.mxu3 %v5803_v45 }
 0x3a7   :  { %2761 = vmatpush.bf16.msrb.mxu3 %v3974_v4  ;;  %2755 = vmatpush.bf16.msra.mxu2 %v3734_v10  ;;  %v5046_v4 = vld [vmem:[#allocation2 + $0x324] sm:$0xf]  ;;  %v3987_v10 = vld [vmem:[#allocation2 + $0x210] sm:$0xf0] }
 0x3a8   :  { %2774 = vmatpush.bf16.msrb.mxu1 %v4102_v46  ;;  %v4978_v46 = vld [vmem:[#allocation2 + $0x104] sm:$0xf]  ;;  %v3990_v18 = vor.u32 %v5010_v9, %v3987_v10 }
 0x3a9   :  { %2743 = vmatmul.bf16.vlgmr.msra.gmra.mxu1 %v5807_v48  ;;  %v3862_v17 = vor.u32 %v4978_v46, %v3859_v7  ;;  %v5114_v46 = vld [vmem:[#allocation2 + $0x544] sm:$0xf]  ;;  %v4403_v7 = vld [vmem:[#allocation2 + $0x550] sm:$0xf0] }
 0x3aa   :  { %2756 = vmatmul.bf16.vlgmr.msra.gmra.mxu2 %v5773_v35 }
 0x3ab   :  { %2787 = vmatpush.bf16.msrb.mxu2 %v4230_v12  ;;  %2762 = vmatpush.bf16.msrb.mxu3 %v3958_v13  ;;  %v4134_v12 = vor.u32 %v5046_v4, %v4131_v5  ;;  %v5134_v13 = vld [vmem:[#allocation2 + $0x5e4] sm:$0xf]  ;;  %v4422_v4 = vor.u32 %v5118_v60, %v4419_v61 }
 0x3ac   :  { %2775 = vmatpush.bf16.msrb.mxu1 %v4086_v50  ;;  %v5042_v50 = vld [vmem:[#allocation2 + $0x304] sm:$0xf] }
 0x3ad   :  { %v5082_v5 = vld [vmem:[#allocation2 + $0x444] sm:$0xf] }
 0x3af   :  { %2788 = vmatpush.bf16.msrb.mxu2 %v4214_v20  ;;  %2763 = vmatpush.bf16.msrb.mxu3 %v3942_v6  ;;  %v4611_v20 = vld [vmem:[#allocation2 + $0x6f0] sm:$0xf0]  ;;  %v4486_v6 = vor.u32 %v5134_v13, %v4483_v15  ;;  %v5078_v13 = vld [vmem:[#allocation2 + $0x424] sm:$0xf] }
 0x3b0   :  { %2776 = vmatpush.bf16.msrb.mxu1 %v4070_v23  ;;  %v4118_v23 = vor.u32 %v5042_v50, %v4115_v52  ;;  %v4614_v26 = vor.u32 %v5166_v19, %v4611_v20  ;;  %v4259_v15 = vld [vmem:[#allocation2 + $0x430] sm:$0xf0]  ;;  %v4534_v52 = vor.u32 %v5146_v11, %v4531_v8  ;;  %v5182_v8 = vld [vmem:[#allocation2 + $0x764] sm:$0xf] }
 0x3b1   :  { %v4387_v50 = vld [vmem:[#allocation2 + $0x530] sm:$0xf0] }
 0x3b2   :  { %v4515_v19 = vld [vmem:[#allocation2 + $0x630] sm:$0xf0] }
 0x3b3   :  { %2789 = vmatpush.bf16.msrb.mxu2 %v4198_v28  ;;  %2764 = vmatpush.bf16.msrb.mxu3 %v3926_v29  ;;  %v5162_v28 = vld [vmem:[#allocation2 + $0x6c4] sm:$0xf]  ;;  %v4595_v29 = vld [vmem:[#allocation2 + $0x6d0] sm:$0xf0] }
 0x3b4   :  { %2777 = vmatpush.bf16.msrb.mxu1 %v4054_v33  ;;  %v4323_v33 = vld [vmem:[#allocation2 + $0x4b0] sm:$0xf0]  ;;  %v4598_v37 = vor.u32 %v5162_v28, %v4595_v29  ;;  %v4977_v28 = vld [vmem:[#allocation2 + $0xf4] sm:$0xf0] }
 0x3b5   :  { %v4326_v38 = vor.u32 %v5094_v32, %v4323_v33  ;;  %v4499_v32 = vld [vmem:[#allocation2 + $0x610] sm:$0xf0] }
 0x3b7   :  { %2790 = vmatpush.bf16.msrb.mxu2 %v4182_v39  ;;  %2765 = vmatpush.bf16.msrb.mxu3 %v3910_v40  ;;  %v5158_v39 = vld [vmem:[#allocation2 + $0x6a4] sm:$0xf]  ;;  %v4579_v40 = vld [vmem:[#allocation2 + $0x6b0] sm:$0xf0] }
 0x3b8   :  { %2778 = vmatpush.bf16.msrb.mxu1 %v4038_v0  ;;  %v4307_v0 = vld [vmem:[#allocation2 + $0x490] sm:$0xf0]  ;;  %v4582_v49 = vor.u32 %v5158_v39, %v4579_v40  ;;  %v5194_v39 = vld [vmem:[#allocation2 + $0x7c4] sm:$0xf] }
 0x3b9   :  { %v4310_v51 = vor.u32 %v5090_v42, %v4307_v0  ;;  %v4723_v40 = vld [vmem:[#allocation2 + $0x7d0] sm:$0xf0]  ;;  %v3833_v42 = vld [vmem:[#allocation2 + $0xc8] sm:$0xf]  ;;  %v4973_v0 = vld [vmem:[#allocation2 + $0xd4] sm:$0xf0] }
 0x3ba   :  { %v4726_v14 = vor.u32 %v5194_v39, %v4723_v40  ;;  %v4985_v39 = vld [vmem:[#allocation2 + $0x134] sm:$0xf0] }
 0x3bb   :  { %2791 = vmatpush.bf16.msrb.mxu2 %v4166_v53  ;;  %2766 = vmatpush.bf16.msrb.mxu3 %v3894_v54  ;;  %v5154_v53 = vld [vmem:[#allocation2 + $0x684] sm:$0xf]  ;;  %v4563_v54 = vld [vmem:[#allocation2 + $0x690] sm:$0xf0] }
 0x3bc   :  { %2779 = vmatpush.bf16.msrb.mxu1 %v4022_v57  ;;  %v4291_v57 = vld [vmem:[#allocation2 + $0x470] sm:$0xf0]  ;;  %v4566_v63 = vor.u32 %v5154_v53, %v4563_v54  ;;  %v3834_v53 = vor.u32 %v4973_v0, %v3833_v42  ;;  %v5190_v54 = vld [vmem:[#allocation2 + $0x7a4] sm:$0xf] }
 0x3bd   :  { %v4294_v1 = vor.u32 %v5086_v16, %v4291_v57  ;;  %v3817_v16 = vld [vmem:[#allocation2 + $0xa8] sm:$0xf]  ;;  %v4969_v57 = vld [vmem:[#allocation2 + $0xb4] sm:$0xf0]  ;;  %v5170_v0 = vld [vmem:[#allocation2 + $0x704] sm:$0xf] }
 0x3bf   :  { %2792 = vmatpush.bf16.msrb.mxu2 %v4150_v30  ;;  %2767 = vmatpush.bf16.msrb.mxu3 %v3878_v3  ;;  %v5150_v30 = vld [vmem:[#allocation2 + $0x664] sm:$0xf]  ;;  %v4547_v3 = vld [vmem:[#allocation2 + $0x670] sm:$0xf0] }
 0x3c0   :  { %2780 = vmatpush.bf16.msrb.mxu1 %v4006_v43  ;;  %v4275_v43 = vld [vmem:[#allocation2 + $0x450] sm:$0xf0]  ;;  %v4550_v9 = vor.u32 %v5150_v30, %v4547_v3  ;;  %v3818_v30 = vor.u32 %v4969_v57, %v3817_v16  ;;  %v5186_v3 = vld [vmem:[#allocation2 + $0x784] sm:$0xf]  ;;  %v4233_v16 = vld [vmem:[#allocation2 + $0x3e8] sm:$0xf] }
 0x3c1   :  { %v4278_v10 = vor.u32 %v5082_v5, %v4275_v43  ;;  %v3801_v5 = vld [vmem:[#allocation2 + $0x88] sm:$0xf]  ;;  %v4965_v43 = vld [vmem:[#allocation2 + $0x94] sm:$0xf0] }
 0x3c2   :  { %v3802_v11 = vor.u32 %v4965_v43, %v3801_v5  ;;  %v5073_v57 = vld [vmem:[#allocation2 + $0x3f4] sm:$0xf0] }
 0x3c3   :  { %2793 = vmatpush.bf16.msrb.mxu2 %v4134_v12  ;;  %2768 = vmatpush.bf16.msrb.mxu3 %v3862_v17  ;;  %v4406_v12 = vor.u32 %v5114_v46, %v4403_v7  ;;  %v5110_v17 = vld [vmem:[#allocation2 + $0x524] sm:$0xf]  ;;  %v4234_v43 = vor.u32 %v5073_v57, %v4233_v16  ;;  %v4281_v57 = vld [vmem:[#allocation2 + $0x448] sm:$0xf] }
 0x3c4   :  { %2781 = vmatpush.bf16.msrb.mxu1 %v3990_v18  ;;  %v4262_v18 = vor.u32 %v5078_v13, %v4259_v15  ;;  %v4390_v20 = vor.u32 %v5110_v17, %v4387_v50  ;;  %v3785_v13 = vld [vmem:[#allocation2 + $0x68] sm:$0xf]  ;;  %v4961_v15 = vld [vmem:[#allocation2 + $0x74] sm:$0xf0] }
 0x3c6   :  { %2769 = vmatmul.bf16.vlgmr.msrb.gmra.mxu3 %v5777_v36 }
 0x3c7   :  { %2800 = vmatpush.bf16.msra.mxu3 %v4358_v62  ;;  %2794 = vmatpush.bf16.msrb.mxu2 %v4118_v23  ;;  %v5142_v62 = vld [vmem:[#allocation2 + $0x624] sm:$0xf]  ;;  %v4371_v23 = vld [vmem:[#allocation2 + $0x510] sm:$0xf0] }
 0x3c8   :  { %2813 = vmatpush.bf16.msra.mxu1 %v4486_v6  ;;  %v5074_v6 = vld [vmem:[#allocation2 + $0x404] sm:$0xf]  ;;  %v4374_v33 = vor.u32 %v5106_v22, %v4371_v23  ;;  %v4957_v22 = vld [vmem:[#allocation2 + $0x54] sm:$0xf0] }
 0x3c9   :  { %2782 = vmatmul.bf16.vlgmr.msrb.gmra.mxu1 %v5781_v44  ;;  %v4246_v29 = vor.u32 %v5074_v6, %v4243_v21  ;;  %v4659_v6 = vld [vmem:[#allocation2 + $0x750] sm:$0xf0]  ;;  %v3769_v21 = vld [vmem:[#allocation2 + $0x48] sm:$0xf] }
 0x3ca   :  { %2795 = vmatmul.bf16.vlgmr.msrb.gmra.mxu2 %v5788_v55 }
 0x3cb   :  { %2826 = vmatpush.bf16.msra.mxu2 %v4614_v26  ;;  %2801 = vmatpush.bf16.msra.mxu3 %v4342_v27  ;;  %v4518_v26 = vor.u32 %v5142_v62, %v4515_v19  ;;  %v3849_v27 = vld [vmem:[#allocation2 + $0xe8] sm:$0xf]  ;;  %v3786_v19 = vor.u32 %v4961_v15, %v3785_v13 }
 0x3cc   :  { %2814 = vmatpush.bf16.msra.mxu1 %v4470_v31  ;;  %v5138_v31 = vld [vmem:[#allocation2 + $0x604] sm:$0xf]  ;;  %v4345_v15 = vld [vmem:[#allocation2 + $0x4c8] sm:$0xf] }
 0x3cf   :  { %2827 = vmatpush.bf16.msra.mxu2 %v4598_v37  ;;  %2802 = vmatpush.bf16.msra.mxu3 %v4326_v38  ;;  %v5009_v37 = vld [vmem:[#allocation2 + $0x1f4] sm:$0xf0]  ;;  %v3850_v38 = vor.u32 %v4977_v28, %v3849_v27  ;;  %v3770_v27 = vor.u32 %v4957_v22, %v3769_v21  ;;  %v5174_v28 = vld [vmem:[#allocation2 + $0x724] sm:$0xf]  ;;  %v4329_v21 = vld [vmem:[#allocation2 + $0x4a8] sm:$0xf] }
 0x3d0   :  { %2815 = vmatpush.bf16.msra.mxu1 %v4454_v41  ;;  %v4502_v41 = vor.u32 %v5138_v31, %v4499_v32  ;;  %v3978_v47 = vor.u32 %v5009_v37, %v3977_v58  ;;  %v3753_v32 = vld [vmem:[#allocation2 + $0x28] sm:$0xf]  ;;  %v5097_v22 = vld [vmem:[#allocation2 + $0x4b4] sm:$0xf0] }
 0x3d3   :  { %2828 = vmatpush.bf16.msra.mxu2 %v4582_v49  ;;  %2803 = vmatpush.bf16.msra.mxu3 %v4310_v51  ;;  %v3961_v49 = vld [vmem:[#allocation2 + $0x1c8] sm:$0xf]  ;;  %v5005_v51 = vld [vmem:[#allocation2 + $0x1d4] sm:$0xf0] }
 0x3d4   :  { %2816 = vmatpush.bf16.msra.mxu1 %v4438_v56  ;;  %v4707_v56 = vld [vmem:[#allocation2 + $0x7b0] sm:$0xf0]  ;;  %v3962_v60 = vor.u32 %v5005_v51, %v3961_v49  ;;  %v4949_v51 = vld [vmem:[#allocation2 + $0x14] sm:$0xf0] }
 0x3d5   :  { %v4710_v61 = vor.u32 %v5190_v54, %v4707_v56  ;;  %v5041_v54 = vld [vmem:[#allocation2 + $0x2f4] sm:$0xf0] }
 0x3d7   :  { %2829 = vmatpush.bf16.msra.mxu2 %v4566_v63  ;;  %2804 = vmatpush.bf16.msra.mxu3 %v4294_v1  ;;  %v3945_v63 = vld [vmem:[#allocation2 + $0x1a8] sm:$0xf]  ;;  %v5001_v1 = vld [vmem:[#allocation2 + $0x1b4] sm:$0xf0] }
 0x3d8   :  { %2817 = vmatpush.bf16.msra.mxu1 %v4422_v4  ;;  %v4691_v4 = vld [vmem:[#allocation2 + $0x790] sm:$0xf0]  ;;  %v3946_v46 = vor.u32 %v5001_v1, %v3945_v63  ;;  %v4981_v63 = vld [vmem:[#allocation2 + $0x114] sm:$0xf0] }
 0x3d9   :  { %v4694_v7 = vor.u32 %v5186_v3, %v4691_v4  ;;  %v4361_v3 = vld [vmem:[#allocation2 + $0x4e8] sm:$0xf]  ;;  %v5105_v4 = vld [vmem:[#allocation2 + $0x4f4] sm:$0xf0] }
 0x3db   :  { %2830 = vmatpush.bf16.msra.mxu2 %v4550_v9  ;;  %2805 = vmatpush.bf16.msra.mxu3 %v4278_v10  ;;  %v3929_v9 = vld [vmem:[#allocation2 + $0x188] sm:$0xf]  ;;  %v4997_v10 = vld [vmem:[#allocation2 + $0x194] sm:$0xf0] }
 0x3dc   :  { %2818 = vmatpush.bf16.msra.mxu1 %v4406_v12  ;;  %v4675_v12 = vld [vmem:[#allocation2 + $0x770] sm:$0xf0]  ;;  %v3930_v17 = vor.u32 %v4997_v10, %v3929_v9  ;;  %v4217_v10 = vld [vmem:[#allocation2 + $0x3c8] sm:$0xf] }
 0x3dd   :  { %v4678_v50 = vor.u32 %v5182_v8, %v4675_v12  ;;  %v4362_v8 = vor.u32 %v5105_v4, %v4361_v3  ;;  %v4137_v4 = vld [vmem:[#allocation2 + $0x328] sm:$0xf] }
 0x3df   :  { %2831 = vmatpush.bf16.msra.mxu2 %v4534_v52  ;;  %2806 = vmatpush.bf16.msra.mxu3 %v4262_v18  ;;  %v3913_v52 = vld [vmem:[#allocation2 + $0x168] sm:$0xf]  ;;  %v4993_v18 = vld [vmem:[#allocation2 + $0x174] sm:$0xf0] }
 0x3e0   :  { %2819 = vmatpush.bf16.msra.mxu1 %v4390_v20  ;;  %v5178_v20 = vld [vmem:[#allocation2 + $0x744] sm:$0xf]  ;;  %v3914_v23 = vor.u32 %v4993_v18, %v3913_v52  ;;  %v4073_v52 = vld [vmem:[#allocation2 + $0x2a8] sm:$0xf]  ;;  %v5033_v18 = vld [vmem:[#allocation2 + $0x2b4] sm:$0xf0] }
 0x3e1   :  { %v4662_v24 = vor.u32 %v5178_v20, %v4659_v6  ;;  %v4074_v6 = vor.u32 %v5033_v18, %v4073_v52  ;;  %v5045_v52 = vld [vmem:[#allocation2 + $0x314] sm:$0xf0] }
 0x3e2   :  { %v5137_v18 = vld [vmem:[#allocation2 + $0x5f4] sm:$0xf0] }
 0x3e3   :  { %2832 = vmatpush.bf16.msra.mxu2 %v4518_v26  ;;  %2807 = vmatpush.bf16.msra.mxu3 %v4246_v29  ;;  %v4989_v26 = vld [vmem:[#allocation2 + $0x154] sm:$0xf0]  ;;  %v4643_v29 = vld [vmem:[#allocation2 + $0x730] sm:$0xf0] }
 0x3e4   :  { %2820 = vmatpush.bf16.msra.mxu1 %v4374_v33  ;;  %v4953_v33 = vld [vmem:[#allocation2 + $0x34] sm:$0xf0]  ;;  %v3898_v58 = vor.u32 %v4989_v26, %v3897_v25  ;;  %v4646_v37 = vor.u32 %v5174_v28, %v4643_v29  ;;  %v4185_v26 = vld [vmem:[#allocation2 + $0x388] sm:$0xf]  ;;  %v4330_v28 = vor.u32 %v5097_v22, %v4329_v21 }
 0x3e5   :  { %v3754_v42 = vor.u32 %v4953_v33, %v3753_v32  ;;  %v5029_v25 = vld [vmem:[#allocation2 + $0x294] sm:$0xf0]  ;;  %v4249_v21 = vld [vmem:[#allocation2 + $0x408] sm:$0xf] }
 0x3e6   :  { %2808 = vmatmul.bf16.vlgmr.msra.gmra.mxu3 %v5792_v59  ;;  %v2666_v62 = vpop.f32.mrf.mxu1  ;;  %v5093_v32 = vld [vmem:[#allocation2 + $0x494] sm:$0xf0] }
 0x3e7   :  { %2839 = vmatpush.bf16.msrb.mxu3 %v4742_v34  ;;  %2833 = vmatpush.bf16.msra.mxu2 %v4502_v41  ;;  %v5077_v22 = vld [vmem:[#allocation2 + $0x414] sm:$0xf0] }
 0x3e8   :  { %2852 = vmatpush.bf16.msrb.mxu1 %v3850_v38  ;;  %v3881_v38 = vld [vmem:[#allocation2 + $0x128] sm:$0xf] }
 0x3e9   :  { %2821 = vmatmul.bf16.vlgmr.msra.gmra.mxu1 %v5796_v2  ;;  %v2653_v31 = vpop.f32.mrf.mxu3  ;;  %v3882_v56 = vor.u32 %v4985_v39, %v3881_v38  ;;  %v5057_v38 = vld [vmem:[#allocation2 + $0x374] sm:$0xf0] }
 0x3ea   :  { %2834 = vmatmul.bf16.vlgmr.msra.gmra.mxu2 %v5803_v45  ;;  %v2667_v34 = vadd.f32 %v2666_v62, %v2653_v31  ;;  %v4201_v62 = vld [vmem:[#allocation2 + $0x3a8] sm:$0xf] }
 0x3eb   :  { %2865 = vmatpush.bf16.msrb.mxu2 %v3978_v47  ;;  %2840 = vmatpush.bf16.msrb.mxu3 %v4726_v14  ;;  %v4627_v47 = vld [vmem:[#allocation2 + $0x710] sm:$0xf0]  ;;  %v3737_v14 = vld [vmem:[#allocation2 + $0x8] sm:$0xf] }
 0x3ec   :  { %2853 = vmatpush.bf16.msrb.mxu1 %v3834_v53  ;;  %v4105_v53 = vld [vmem:[#allocation2 + $0x2e8] sm:$0xf]  ;;  %v3738_v1 = vor.u32 %v4949_v51, %v3737_v14  ;;  %v5021_v51 = vld [vmem:[#allocation2 + $0x254] sm:$0xf0] }
 0x3ed   :  { %v2679_v40 = vpop.f32.mrf.mxu2  ;;  %v4313_v31 = vld [vmem:[#allocation2 + $0x488] sm:$0xf] }
 0x3ee   :  { %v2668_v41 = vpop.f32.mrf.mxu1  ;;  %v5818_v49 = vadd.f32 %v2679_v40, %v2667_v34  ;;  %v4041_v34 = vld [vmem:[#allocation2 + $0x268] sm:$0xf]  ;;  %v4314_v39 = vor.u32 %v5093_v32, %v4313_v31  ;;  %v5133_v31 = vld [vmem:[#allocation2 + $0x5d4] sm:$0xf0]  ;;  %v4250_v32 = vor.u32 %v5077_v22, %v4249_v21 }
 0x3ef   :  { %2866 = vmatpush.bf16.msrb.mxu2 %v3962_v60  ;;  %2841 = vmatpush.bf16.msrb.mxu3 %v4710_v61  ;;  %v4630_v60 = vor.u32 %v5170_v0, %v4627_v47  ;;  %v3865_v61 = vld [vmem:[#allocation2 + $0x108] sm:$0xf]  ;;  %v5181_v21 = vld [vmem:[#allocation2 + $0x754] sm:$0xf0] }
 0x3f0   :  { %2854 = vmatpush.bf16.msrb.mxu1 %v3818_v30  ;;  %v4106_v30 = vor.u32 %v5041_v54, %v4105_v53  ;;  %v3866_v9 = vor.u32 %v4981_v63, %v3865_v61  ;;  %v4297_v41 = vld [vmem:[#allocation2 + $0x468] sm:$0xf]  ;;  %v5053_v54 = vld [vmem:[#allocation2 + $0x354] sm:$0xf0] }
 0x3f1   :  { %v2655_v5 = vpop.f32.mrf.mxu3  ;;  %v4025_v14 = vld [vmem:[#allocation2 + $0x248] sm:$0xf] }
 0x3f2   :  { %v4153_v53 = vld [vmem:[#allocation2 + $0x348] sm:$0xf]  ;;  %v4026_v16 = vor.u32 %v5021_v51, %v4025_v14  ;;  %v5049_v5 = vld [vmem:[#allocation2 + $0x334] sm:$0xf0] }
 0x3f3   :  { %2867 = vmatpush.bf16.msrb.mxu2 %v3946_v46  ;;  %2842 = vmatpush.bf16.msrb.mxu3 %v4694_v7  ;;  %v4089_v46 = vld [vmem:[#allocation2 + $0x2c8] sm:$0xf]  ;;  %v5037_v7 = vld [vmem:[#allocation2 + $0x2d4] sm:$0xf0]  ;;  %v4154_v63 = vor.u32 %v5053_v54, %v4153_v53 }
 0x3f4   :  { %2855 = vmatpush.bf16.msrb.mxu1 %v3802_v11  ;;  %v5069_v11 = vld [vmem:[#allocation2 + $0x3d4] sm:$0xf0]  ;;  %v4090_v13 = vor.u32 %v5037_v7, %v4089_v46  ;;  %v4713_v54 = vld [vmem:[#allocation2 + $0x7a8] sm:$0xf] }
 0x3f5   :  { %v2681_v12 = vpop.f32.mrf.mxu2  ;;  %v5161_v14 = vld [vmem:[#allocation2 + $0x6b4] sm:$0xf0] }
 0x3f6   :  { %v4138_v12 = vor.u32 %v5049_v5, %v4137_v4  ;;  %v5189_v4 = vld [vmem:[#allocation2 + $0x794] sm:$0xf0] }
 0x3f7   :  { %2868 = vmatpush.bf16.msrb.mxu2 %v3930_v17  ;;  %2843 = vmatpush.bf16.msrb.mxu3 %v4678_v50  ;;  %v5101_v17 = vld [vmem:[#allocation2 + $0x4d4] sm:$0xf0]  ;;  %v4218_v50 = vor.u32 %v5069_v11, %v4217_v10  ;;  %v4265_v10 = vld [vmem:[#allocation2 + $0x428] sm:$0xf] }
 0x3f8   :  { %2856 = vmatpush.bf16.msrb.mxu1 %v3786_v19  ;;  %v5065_v19 = vld [vmem:[#allocation2 + $0x3b4] sm:$0xf0]  ;;  %v4346_v20 = vor.u32 %v5101_v17, %v4345_v15  ;;  %v4121_v17 = vld [vmem:[#allocation2 + $0x308] sm:$0xf] }
 0x3f9   :  { %v5081_v11 = vld [vmem:[#allocation2 + $0x434] sm:$0xf0] }
 0x3fa   :  { %v5013_v15 = vld [vmem:[#allocation2 + $0x214] sm:$0xf0] }
 0x3fb   :  { %2869 = vmatpush.bf16.msrb.mxu2 %v3914_v23  ;;  %2844 = vmatpush.bf16.msrb.mxu3 %v4662_v24  ;;  %v4202_v23 = vor.u32 %v5065_v19, %v4201_v62  ;;  %v4057_v24 = vld [vmem:[#allocation2 + $0x288] sm:$0xf]  ;;  %v4266_v62 = vor.u32 %v5081_v11, %v4265_v10 }
 0x3fc   :  { %2857 = vmatpush.bf16.msrb.mxu1 %v3770_v27  ;;  %v5061_v27 = vld [vmem:[#allocation2 + $0x394] sm:$0xf0]  ;;  %v4058_v29 = vor.u32 %v5029_v25, %v4057_v24  ;;  %v4617_v19 = vld [vmem:[#allocation2 + $0x6e8] sm:$0xf] }
 0x3fd   :  { %v4186_v33 = vor.u32 %v5061_v27, %v4185_v26  ;;  %v4745_v25 = vld [vmem:[#allocation2 + $0x7e8] sm:$0xf]  ;;  %v5201_v26 = vld [vmem:[#allocation2 + $0x7f4] sm:$0xf0] }
 0x3ff   :  { %2870 = vmatpush.bf16.msrb.mxu2 %v3898_v58  ;;  %2845 = vmatpush.bf16.msrb.mxu3 %v4646_v37  ;;  %v5025_v58 = vld [vmem:[#allocation2 + $0x274] sm:$0xf0]  ;;  %v4169_v37 = vld [vmem:[#allocation2 + $0x368] sm:$0xf] }
 0x400   :  { %2858 = vmatpush.bf16.msrb.mxu1 %v3754_v42  ;;  %v4042_v40 = vor.u32 %v5025_v58, %v4041_v34  ;;  %v5089_v42 = vld [vmem:[#allocation2 + $0x474] sm:$0xf0]  ;;  %v4170_v47 = vor.u32 %v5057_v38, %v4169_v37  ;;  %v4746_v58 = vor.u32 %v5201_v26, %v4745_v25  ;;  %v4393_v25 = vld [vmem:[#allocation2 + $0x528] sm:$0xf] }
 0x401   :  { %v5165_v34 = vld [vmem:[#allocation2 + $0x6d4] sm:$0xf0] }
 0x402   :  { %v5113_v26 = vld [vmem:[#allocation2 + $0x534] sm:$0xf0] }
 0x403   :  { %2871 = vmatpush.bf16.msrb.mxu2 %v3882_v56  ;;  %2846 = vmatpush.bf16.msrb.mxu3 %v4630_v60  ;;  %v4298_v56 = vor.u32 %v5089_v42, %v4297_v41  ;;  %v5085_v60 = vld [vmem:[#allocation2 + $0x454] sm:$0xf0]  ;;  %v4457_v42 = vld [vmem:[#allocation2 + $0x5a8] sm:$0xf] }
 0x404   :  { %2859 = vmatpush.bf16.msrb.mxu1 %v3738_v1  ;;  %v4009_v1 = vld [vmem:[#allocation2 + $0x228] sm:$0xf] }
 0x406   :  { %2847 = vmatmul.bf16.vlgmr.msrb.gmra.mxu3 %v5807_v48  ;;  %v2705_v0 = vpop.f32.mrf.mxu1 }
 0x407   :  { %2878 = vmatpush.bf16.msra.mxu3 %v4106_v30  ;;  %2872 = vmatpush.bf16.msrb.mxu2 %v3866_v9  ;;  %v5017_v30 = vld [vmem:[#allocation2 + $0x234] sm:$0xf0] }
 0x408   :  { %2891 = vmatpush.bf16.msra.mxu1 %v4234_v43  ;;  %v4282_v43 = vor.u32 %v5085_v60, %v4281_v57  ;;  %v4010_v9 = vor.u32 %v5017_v30, %v4009_v1  ;;  %v4441_v57 = vld [vmem:[#allocation2 + $0x588] sm:$0xf]  ;;  %v5125_v60 = vld [vmem:[#allocation2 + $0x594] sm:$0xf0] }
 0x409   :  { %2860 = vmatmul.bf16.vlgmr.msrb.gmra.mxu1 %v5773_v35  ;;  %v2692_v61 = vpop.f32.mrf.mxu3  ;;  %v4442_v30 = vor.u32 %v5125_v60, %v4441_v57  ;;  %v3979_v57 = vld [vmem:[#allocation2 + $0x1f8] sm:$0xf0] }
 0x40a   :  { %2873 = vmatmul.bf16.vlgmr.msrb.gmra.mxu2 %v5777_v36  ;;  %v2693_v3 = vadd.f32 %v2692_v61, %v5818_v49  ;;  %v4489_v49 = vld [vmem:[#allocation2 + $0x5e8] sm:$0xf] }
 0x40b   :  { %2904 = vmatpush.bf16.msra.mxu2 %v4362_v8  ;;  %2879 = vmatpush.bf16.msra.mxu3 %v4090_v13  ;;  %v3993_v13 = vld [vmem:[#allocation2 + $0x208] sm:$0xf]  ;;  %v4490_v24 = vor.u32 %v5137_v18, %v4489_v49  ;;  %v5149_v18 = vld [vmem:[#allocation2 + $0x654] sm:$0xf0] }
 0x40c   :  { %2892 = vmatpush.bf16.msra.mxu1 %v4218_v50  ;;  %v2706_v46 = vadd.f32 %v2705_v0, %v2693_v3  ;;  %v5129_v0 = vld [vmem:[#allocation2 + $0x5b4] sm:$0xf0]  ;;  %v4569_v61 = vld [vmem:[#allocation2 + $0x688] sm:$0xf] }
 0x40d   :  { %v2718_v7 = vpop.f32.mrf.mxu2  ;;  %v4458_v53 = vor.u32 %v5129_v0, %v4457_v42  ;;  %v4697_v3 = vld [vmem:[#allocation2 + $0x788] sm:$0xf]  ;;  %v5109_v42 = vld [vmem:[#allocation2 + $0x514] sm:$0xf0] }
 0x40e   :  { %v2707_v8 = vpop.f32.mrf.mxu1  ;;  %v5824_v50 = vadd.f32 %v2718_v7, %v2706_v46  ;;  %v5121_v46 = vld [vmem:[#allocation2 + $0x574] sm:$0xf0]  ;;  %v4553_v7 = vld [vmem:[#allocation2 + $0x668] sm:$0xf]  ;;  %v4698_v10 = vor.u32 %v5189_v4, %v4697_v3  ;;  %v5039_v4 = vld [vmem:[#allocation2 + $0x2ec] sm:$0xf] }
 0x40f   :  { %2905 = vmatpush.bf16.msra.mxu2 %v4346_v20  ;;  %2880 = vmatpush.bf16.msra.mxu3 %v4074_v6  ;;  %v5169_v20 = vld [vmem:[#allocation2 + $0x6f4] sm:$0xf0]  ;;  %v3994_v6 = vor.u32 %v5013_v15, %v3993_v13  ;;  %v4537_v49 = vld [vmem:[#allocation2 + $0x648] sm:$0xf] }
 0x410   :  { %2893 = vmatpush.bf16.msra.mxu1 %v4202_v23  ;;  %v4122_v23 = vor.u32 %v5045_v52, %v4121_v17  ;;  %v5185_v13 = vld [vmem:[#allocation2 + $0x774] sm:$0xf0]  ;;  %v4409_v17 = vld [vmem:[#allocation2 + $0x548] sm:$0xf] }
 0x411   :  { %v2694_v27 = vpop.f32.mrf.mxu3  ;;  %v5117_v52 = vld [vmem:[#allocation2 + $0x554] sm:$0xf0]  ;;  %v4505_v0 = vld [vmem:[#allocation2 + $0x608] sm:$0xf] }
 0x413   :  { %2906 = vmatpush.bf16.msra.mxu2 %v4330_v28  ;;  %2881 = vmatpush.bf16.msra.mxu3 %v4058_v29  ;;  %v4618_v28 = vor.u32 %v5169_v20, %v4617_v19  ;;  %v4473_v29 = vld [vmem:[#allocation2 + $0x5c8] sm:$0xf]  ;;  %v4410_v20 = vor.u32 %v5117_v52, %v4409_v17 }
 0x414   :  { %2894 = vmatpush.bf16.msra.mxu1 %v4186_v33  ;;  %v4601_v33 = vld [vmem:[#allocation2 + $0x6c8] sm:$0xf]  ;;  %v4474_v38 = vor.u32 %v5133_v31, %v4473_v29  ;;  %v5145_v31 = vld [vmem:[#allocation2 + $0x634] sm:$0xf0] }
 0x415   :  { %v2720_v37 = vpop.f32.mrf.mxu2  ;;  %v4602_v41 = vor.u32 %v5165_v34, %v4601_v33  ;;  %v4521_v29 = vld [vmem:[#allocation2 + $0x628] sm:$0xf] }
 0x416   :  { %v4649_v37 = vld [vmem:[#allocation2 + $0x728] sm:$0xf] }
 0x417   :  { %2907 = vmatpush.bf16.msra.mxu2 %v4314_v39  ;;  %2882 = vmatpush.bf16.msra.mxu3 %v4042_v40  ;;  %v4729_v39 = vld [vmem:[#allocation2 + $0x7c8] sm:$0xf]  ;;  %v5197_v40 = vld [vmem:[#allocation2 + $0x7d4] sm:$0xf0] }
 0x418   :  { %2895 = vmatpush.bf16.msra.mxu1 %v4170_v47  ;;  %v4585_v47 = vld [vmem:[#allocation2 + $0x6a8] sm:$0xf]  ;;  %v4730_v51 = vor.u32 %v5197_v40, %v4729_v39 }
 0x41b   :  { %2908 = vmatpush.bf16.msra.mxu2 %v4298_v56  ;;  %2883 = vmatpush.bf16.msra.mxu3 %v4026_v16  ;;  %v5193_v56 = vld [vmem:[#allocation2 + $0x7b4] sm:$0xf0]  ;;  %v4586_v16 = vor.u32 %v5161_v14, %v4585_v47 }
 0x41c   :  { %2896 = vmatpush.bf16.msra.mxu1 %v4154_v63  ;;  %v5157_v63 = vld [vmem:[#allocation2 + $0x694] sm:$0xf0]  ;;  %v4714_v1 = vor.u32 %v5193_v56, %v4713_v54  ;;  %v5845_v54 = vstv %s5469_s28 }
 0x41d   :  { %v4570_v5 = vor.u32 %v5157_v63, %v4569_v61  ;;  %v5141_v14 = vld [vmem:[#allocation2 + $0x614] sm:$0xf0]  ;;  %v4633_v63 = vld [vmem:[#allocation2 + $0x708] sm:$0xf] }
 0x41f   :  { %2909 = vmatpush.bf16.msra.mxu2 %v4282_v43  ;;  %2884 = vmatpush.bf16.msra.mxu3 %v4010_v9  ;;  %v4425_v43 = vld [vmem:[#allocation2 + $0x568] sm:$0xf]  ;;  %v5153_v9 = vld [vmem:[#allocation2 + $0x674] sm:$0xf0] }
 0x420   :  { %2897 = vmatpush.bf16.msra.mxu1 %v4138_v12  ;;  %v4426_v11 = vor.u32 %v5121_v46, %v4425_v43  ;;  %v4681_v12 = vld [vmem:[#allocation2 + $0x768] sm:$0xf]  ;;  %v4554_v15 = vor.u32 %v5153_v9, %v4553_v7  ;;  %v4971_v9 = vld [vmem:[#allocation2 + $0xcc] sm:$0xf] }
 0x421   :  { %v4682_v19 = vor.u32 %v5185_v13, %v4681_v12  ;;  %v3963_v12 = vld [vmem:[#allocation2 + $0x1d8] sm:$0xf0] }
 0x423   :  { %2910 = vmatpush.bf16.msra.mxu2 %v4266_v62  ;;  %2885 = vmatpush.bf16.msra.mxu3 %v3994_v6  ;;  %v5832_v62 = vld [vmem:[%s5935_s4 + $0x18] sm:$0xf]  ;;  %v4665_v6 = vld [vmem:[#allocation2 + $0x748] sm:$0xf] }
 0x424   :  { %2898 = vmatpush.bf16.msra.mxu1 %v4122_v23  ;;  %v5837_v23 = vld [vmem:[%s5935_s4 + $0x1c] sm:$0xf] }
 0x425   :  { %v3076_v34 = vperm.slane %v5837_v23, 0 }
 0x426   :  { %2886 = vmatmul.bf16.vlgmr.msra.gmra.mxu3 %v5781_v44  ;;  %v2744_v8 = vpop.f32.mrf.mxu1 }
 0x427   :  { %2917 = vmatpush.bf16.msrb.mxu3 %v4490_v24  ;;  %2911 = vmatpush.bf16.msra.mxu2 %v4250_v32  ;;  %v4538_v24 = vor.u32 %v5149_v18, %v4537_v49  ;;  %v4666_v32 = vor.u32 %v5181_v21, %v4665_v6  ;;  %v5035_v49 = vld [vmem:[#allocation2 + $0x2cc] sm:$0xf]  ;;  %v4091_v18 = vld [vmem:[#allocation2 + $0x2d8] sm:$0xf0] }
 0x428   :  { %2930 = vmatpush.bf16.msrb.mxu1 %v4618_v28  ;;  %v3062_v28 = vperm.slane %v5832_v62, 0  ;;  %v3819_v6 = vld [vmem:[#allocation2 + $0xb8] sm:$0xf0]  ;;  %v4999_v21 = vld [vmem:[#allocation2 + $0x1ac] sm:$0xf] }
 0x429   :  { %2899 = vmatmul.bf16.vlgmr.msra.gmra.mxu1 %v5788_v55  ;;  %v2731_v22 = vpop.f32.mrf.mxu3 }
 0x42a   :  { %2912 = vmatmul.bf16.vlgmr.msra.gmra.mxu2 %v5792_v59  ;;  %v2732_v27 = vadd.f32 %v2731_v22, %v5824_v50  ;;  %v4377_v50 = vld [vmem:[#allocation2 + $0x508] sm:$0xf]  ;;  %v3947_v22 = vld [vmem:[#allocation2 + $0x1b8] sm:$0xf0] }
 0x42b   :  { %2943 = vmatpush.bf16.msrb.mxu2 %v4746_v58  ;;  %2918 = vmatpush.bf16.msrb.mxu3 %v4474_v38  ;;  %v4394_v58 = vor.u32 %v5113_v26, %v4393_v25  ;;  %v5177_v38 = vld [vmem:[#allocation2 + $0x734] sm:$0xf0]  ;;  %v4378_v61 = vor.u32 %v5109_v42, %v4377_v50  ;;  %v5031_v26 = vld [vmem:[#allocation2 + $0x2ac] sm:$0xf]  ;;  %v3787_v50 = vld [vmem:[#allocation2 + $0x78] sm:$0xf0] }
 0x42c   :  { %2931 = vmatpush.bf16.msrb.mxu1 %v4602_v41  ;;  %v2745_v33 = vadd.f32 %v2744_v8, %v2732_v27  ;;  %v4522_v41 = vor.u32 %v5145_v31, %v4521_v29  ;;  %v4650_v56 = vor.u32 %v5177_v38, %v4649_v37  ;;  %v5003_v8 = vld [vmem:[#allocation2 + $0x1cc] sm:$0xf]  ;;  %v4075_v27 = vld [vmem:[#allocation2 + $0x2b8] sm:$0xf0] }
 0x42d   :  { %v5842_v40 = vpop.f32.mrf.mxu2  ;;  %v4963_v29 = vld [vmem:[#allocation2 + $0x8c] sm:$0xf]  ;;  %v3803_v31 = vld [vmem:[#allocation2 + $0x98] sm:$0xf0] }
 0x42e   :  { %v2746_v39 = vpop.f32.mrf.mxu1  ;;  %v3070_v47 = vmul.f32 %v3062_v28, %v2745_v33  ;;  %v3950_v28 = vor.u32 %v4999_v21, %v3947_v22  ;;  %v3931_v33 = vld [vmem:[#allocation2 + $0x198] sm:$0xf0]  ;;  %v5027_v37 = vld [vmem:[#allocation2 + $0x28c] sm:$0xf] }
 0x42f   :  { %2944 = vmatpush.bf16.msrb.mxu2 %v4730_v51  ;;  %2919 = vmatpush.bf16.msrb.mxu3 %v4458_v53  ;;  %v4975_v51 = vld [vmem:[#allocation2 + $0xec] sm:$0xf]  ;;  %v3851_v53 = vld [vmem:[#allocation2 + $0xf8] sm:$0xf0] }
 0x430   :  { %2932 = vmatpush.bf16.msrb.mxu1 %v4586_v16  ;;  %v5007_v16 = vld [vmem:[#allocation2 + $0x1ec] sm:$0xf]  ;;  %v3084_v60 = vadd.f32 %v3076_v34, %v3070_v47  ;;  %v3854_v3 = vor.u32 %v4975_v51, %v3851_v53  ;;  %v4078_v34 = vor.u32 %v5031_v26, %v4075_v27  ;;  %v4059_v38 = vld [vmem:[#allocation2 + $0x298] sm:$0xf0] }
 0x431   :  { %v2733_v43 = vpop.f32.mrf.mxu3  ;;  %v3982_v7 = vor.u32 %v5007_v16, %v3979_v57  ;;  %v4991_v42 = vld [vmem:[#allocation2 + $0x16c] sm:$0xf]  ;;  %v4062_v47 = vor.u32 %v5027_v37, %v4059_v38  ;;  %v4043_v53 = vld [vmem:[#allocation2 + $0x278] sm:$0xf0] }
 0x432   :  { %vm3088_vm13 = vcmp.ge.f32.partialorder %v3084_v60, 0.0  ;;  %v3093_v46 = vmul.f32 %v5845_v54, %v3084_v60  ;;  %v5023_v51 = vld [vmem:[#allocation2 + $0x26c] sm:$0xf]  ;;  %v3867_v22 = vld [vmem:[#allocation2 + $0x118] sm:$0xf0] }
 0x433   :  { %2945 = vmatpush.bf16.msrb.mxu2 %v4714_v1  ;;  %2920 = vmatpush.bf16.msrb.mxu3 %v4442_v30  ;;  %v5173_v1 = vld [vmem:[#allocation2 + $0x714] sm:$0xf0]  ;;  %v4506_v30 = vor.u32 %v5141_v14, %v4505_v0  ;;  %v3915_v0 = vld [vmem:[#allocation2 + $0x178] sm:$0xf0]  ;;  %v4955_v57 = vld [vmem:[#allocation2 + $0x4c] sm:$0xf] }
 0x434   :  { %2933 = vmatpush.bf16.msrb.mxu1 %v4570_v5  ;;  %v4107_v5 = vld [vmem:[#allocation2 + $0x2f8] sm:$0xf0]  ;;  %v5848_v13 = vsel %vm3088_vm13, %v3084_v60, %v3093_v46  ;;  %v3918_v16 = vor.u32 %v4991_v42, %v3915_v0  ;;  %v4951_v43 = vld [vmem:[#allocation2 + $0x2c] sm:$0xf] }
 0x435   :  { %v2759_v17 = vpop.f32.mrf.mxu2  ;;  %v3771_v60 = vld [vmem:[#allocation2 + $0x58] sm:$0xf0]  ;;  %v4979_v21 = vld [vmem:[#allocation2 + $0x10c] sm:$0xf] }
 0x436   :  { %v3755_v46 = vld [vmem:[#allocation2 + $0x38] sm:$0xf0]  ;;  %v5103_v27 = vld [vmem:[#allocation2 + $0x4ec] sm:$0xf] }
 0x437   :  { %2946 = vmatpush.bf16.msrb.mxu2 %v4698_v10  ;;  %2921 = vmatpush.bf16.msrb.mxu3 %v4426_v11  ;;  %v3835_v10 = vld [vmem:[#allocation2 + $0xd8] sm:$0xf0]  ;;  %v4634_v11 = vor.u32 %v5173_v1, %v4633_v63  ;;  %v4046_v1 = vor.u32 %v5023_v51, %v4043_v53  ;;  %v5099_v0 = vld [vmem:[#allocation2 + $0x4cc] sm:$0xf] }
 0x438   :  { %2934 = vmatpush.bf16.msrb.mxu1 %v4554_v15  ;;  %v4110_v15 = vor.u32 %v5039_v4, %v4107_v5  ;;  %v3838_v52 = vor.u32 %v4971_v9, %v3835_v10  ;;  %v3899_v63 = vld [vmem:[#allocation2 + $0x158] sm:$0xf0]  ;;  %v4983_v9 = vld [vmem:[#allocation2 + $0x12c] sm:$0xf] }
 0x439   :  { %v4027_v4 = vld [vmem:[#allocation2 + $0x258] sm:$0xf0] }
 0x43a   :  { %v3883_v10 = vld [vmem:[#allocation2 + $0x138] sm:$0xf0] }
 0x43b   :  { %2947 = vmatpush.bf16.msrb.mxu2 %v4682_v19  ;;  %2922 = vmatpush.bf16.msrb.mxu3 %v4410_v20  ;;  %v3966_v19 = vor.u32 %v5003_v8, %v3963_v12  ;;  %v4967_v20 = vld [vmem:[#allocation2 + $0xac] sm:$0xf]  ;;  %v3758_v12 = vor.u32 %v4951_v43, %v3755_v46  ;;  %v4011_v17 = vld [vmem:[#allocation2 + $0x238] sm:$0xf0] }
 0x43c   :  { %2935 = vmatpush.bf16.msrb.mxu1 %v4538_v24  ;;  %v4094_v24 = vor.u32 %v5035_v49, %v4091_v18  ;;  %v3822_v25 = vor.u32 %v4967_v20, %v3819_v6  ;;  %v4947_v20 = vld [vmem:[#allocation2 + $0xc] sm:$0xf]  ;;  %v3739_v6 = vld [vmem:[#allocation2 + $0x18] sm:$0xf0] }
 0x43d   :  { %v4491_v37 = vld [vmem:[#allocation2 + $0x5f8] sm:$0xf0]  ;;  %v5059_v46 = vld [vmem:[#allocation2 + $0x38c] sm:$0xf] }
 0x43f   :  { %2948 = vmatpush.bf16.msrb.mxu2 %v4666_v32  ;;  %2923 = vmatpush.bf16.msrb.mxu3 %v4394_v58  ;;  %v4995_v32 = vld [vmem:[#allocation2 + $0x18c] sm:$0xf]  ;;  %v3806_v58 = vor.u32 %v4963_v29, %v3803_v31  ;;  %v3742_v29 = vor.u32 %v4947_v20, %v3739_v6  ;;  %v4427_v6 = vld [vmem:[#allocation2 + $0x578] sm:$0xf0] }
 0x440   :  { %2936 = vmatpush.bf16.msrb.mxu1 %v4522_v41  ;;  %v3934_v39 = vor.u32 %v4995_v32, %v3931_v33  ;;  %v4959_v41 = vld [vmem:[#allocation2 + $0x6c] sm:$0xf]  ;;  %v3995_v32 = vld [vmem:[#allocation2 + $0x218] sm:$0xf0]  ;;  %v3870_v33 = vor.u32 %v4979_v21, %v3867_v22 }
 0x441   :  { %v3790_v14 = vor.u32 %v4959_v41, %v3787_v50  ;;  %v5011_v31 = vld [vmem:[#allocation2 + $0x20c] sm:$0xf]  ;;  %v4219_v50 = vld [vmem:[#allocation2 + $0x3d8] sm:$0xf0] }
 0x442   :  { %v5067_v41 = vld [vmem:[#allocation2 + $0x3cc] sm:$0xf]  ;;  %v3998_v42 = vor.u32 %v5011_v31, %v3995_v32  ;;  %v4411_v31 = vld [vmem:[#allocation2 + $0x558] sm:$0xf0] }
 0x443   :  { %2949 = vmatpush.bf16.msrb.mxu2 %v4650_v56  ;;  %2924 = vmatpush.bf16.msrb.mxu3 %v4378_v61  ;;  %v4987_v61 = vld [vmem:[#allocation2 + $0x14c] sm:$0xf]  ;;  %v4222_v53 = vor.u32 %v5067_v41, %v4219_v50 }
 0x444   :  { %2937 = vmatpush.bf16.msrb.mxu1 %v4506_v30  ;;  %v3774_v30 = vor.u32 %v4955_v57, %v3771_v60  ;;  %v3902_v5 = vor.u32 %v4987_v61, %v3899_v63  ;;  %v5063_v60 = vld [vmem:[#allocation2 + $0x3ac] sm:$0xf]  ;;  %v4203_v61 = vld [vmem:[#allocation2 + $0x3b8] sm:$0xf0] }
 0x445   :  { %v5095_v63 = vld [vmem:[#allocation2 + $0x4ac] sm:$0xf] }
 0x446   :  { %2925 = vmatmul.bf16.vlgmr.msrb.gmra.mxu3 %v5796_v2  ;;  %v2783_v56 = vpop.f32.mrf.mxu1  ;;  %v5051_v22 = vld [vmem:[#allocation2 + $0x34c] sm:$0xf] }
 0x447   :  { %2956 = vmatpush.bf16.msra.mxu3 %v3854_v3  ;;  %2950 = vmatpush.bf16.msrb.mxu2 %v4634_v11  ;;  %v5019_v3 = vld [vmem:[#allocation2 + $0x24c] sm:$0xf] }
 0x448   :  { %2969 = vmatpush.bf16.msra.mxu1 %v3982_v7  ;;  %v4030_v8 = vor.u32 %v5019_v3, %v4027_v4  ;;  %v4206_v3 = vor.u32 %v5063_v60, %v4203_v61  ;;  %v5127_v4 = vld [vmem:[#allocation2 + $0x5ac] sm:$0xf]  ;;  %v4251_v61 = vld [vmem:[#allocation2 + $0x418] sm:$0xf0] }
 0x449   :  { %2938 = vmatmul.bf16.vlgmr.msrb.gmra.mxu1 %v5803_v45  ;;  %v2770_v7 = vpop.f32.mrf.mxu3 }
 0x44a   :  { %2951 = vmatmul.bf16.vlgmr.msrb.gmra.mxu2 %v5807_v48  ;;  %v2771_v11 = vadd.f32 %v2770_v7, %v5842_v40  ;;  %v4187_v7 = vld [vmem:[#allocation2 + $0x398] sm:$0xf0] }
 0x44b   :  { %2982 = vmatpush.bf16.msra.mxu2 %v4110_v15  ;;  %2957 = vmatpush.bf16.msra.mxu3 %v3838_v52  ;;  %v5015_v15 = vld [vmem:[#allocation2 + $0x22c] sm:$0xf] }
 0x44c   :  { %2970 = vmatpush.bf16.msra.mxu1 %v3966_v19  ;;  %v2784_v52 = vadd.f32 %v2783_v56, %v2771_v11  ;;  %v3886_v19 = vor.u32 %v4983_v9, %v3883_v10  ;;  %v4014_v40 = vor.u32 %v5015_v15, %v4011_v17  ;;  %v5131_v56 = vld [vmem:[#allocation2 + $0x5cc] sm:$0xf]  ;;  %v4315_v10 = vld [vmem:[#allocation2 + $0x498] sm:$0xf0] }
 0x44d   :  { %v2796_v49 = vpop.f32.mrf.mxu2  ;;  %v5091_v9 = vld [vmem:[#allocation2 + $0x48c] sm:$0xf]  ;;  %v4171_v17 = vld [vmem:[#allocation2 + $0x378] sm:$0xf0] }
 0x44e   :  { %v2785_v18 = vpop.f32.mrf.mxu1  ;;  %v5854_v26 = vadd.f32 %v2796_v49, %v2784_v52  ;;  %v5055_v15 = vld [vmem:[#allocation2 + $0x36c] sm:$0xf]  ;;  %v4299_v49 = vld [vmem:[#allocation2 + $0x478] sm:$0xf0] }
 0x44f   :  { %2983 = vmatpush.bf16.msra.mxu2 %v4094_v24  ;;  %2958 = vmatpush.bf16.msra.mxu3 %v3822_v25  ;;  %v5071_v24 = vld [vmem:[#allocation2 + $0x3ec] sm:$0xf]  ;;  %v4235_v25 = vld [vmem:[#allocation2 + $0x3f8] sm:$0xf0] }
 0x450   :  { %2971 = vmatpush.bf16.msra.mxu1 %v3950_v28  ;;  %v4363_v28 = vld [vmem:[#allocation2 + $0x4f8] sm:$0xf0]  ;;  %v5087_v52 = vld [vmem:[#allocation2 + $0x46c] sm:$0xf] }
 0x451   :  { %v2772_v38 = vpop.f32.mrf.mxu3  ;;  %v4302_v21 = vor.u32 %v5087_v52, %v4299_v49  ;;  %v5159_v49 = vld [vmem:[#allocation2 + $0x6ac] sm:$0xf] }
 0x452   :  { %v5079_v38 = vld [vmem:[#allocation2 + $0x42c] sm:$0xf] }
 0x453   :  { %2984 = vmatpush.bf16.msra.mxu2 %v4078_v34  ;;  %2959 = vmatpush.bf16.msra.mxu3 %v3806_v58  ;;  %v4238_v34 = vor.u32 %v5071_v24, %v4235_v25  ;;  %v5135_v58 = vld [vmem:[#allocation2 + $0x5ec] sm:$0xf]  ;;  %v4155_v24 = vld [vmem:[#allocation2 + $0x358] sm:$0xf0] }
 0x454   :  { %2972 = vmatpush.bf16.msra.mxu1 %v3934_v39  ;;  %v4366_v39 = vor.u32 %v5103_v27, %v4363_v28  ;;  %v5083_v25 = vld [vmem:[#allocation2 + $0x44c] sm:$0xf]  ;;  %v4158_v28 = vor.u32 %v5051_v22, %v4155_v24  ;;  %v4571_v22 = vld [vmem:[#allocation2 + $0x698] sm:$0xf0] }
 0x455   :  { %v2798_v51 = vpop.f32.mrf.mxu2  ;;  %v5187_v24 = vld [vmem:[#allocation2 + $0x78c] sm:$0xf] }
 0x457   :  { %2985 = vmatpush.bf16.msra.mxu2 %v4062_v47  ;;  %2960 = vmatpush.bf16.msra.mxu3 %v3790_v14  ;;  %v4347_v47 = vld [vmem:[#allocation2 + $0x4d8] sm:$0xf0]  ;;  %v4494_v14 = vor.u32 %v5135_v58, %v4491_v37 }
 0x458   :  { %2973 = vmatpush.bf16.msra.mxu1 %v3918_v16  ;;  %v4475_v16 = vld [vmem:[#allocation2 + $0x5d8] sm:$0xf0]  ;;  %v4350_v57 = vor.u32 %v5099_v0, %v4347_v47  ;;  %v5111_v47 = vld [vmem:[#allocation2 + $0x52c] sm:$0xf] }
 0x459   :  { %v4139_v58 = vld [vmem:[#allocation2 + $0x338] sm:$0xf0] }
 0x45b   :  { %2986 = vmatpush.bf16.msra.mxu2 %v4046_v1  ;;  %2961 = vmatpush.bf16.msra.mxu3 %v3774_v30  ;;  %v4331_v1 = vld [vmem:[#allocation2 + $0x4b8] sm:$0xf0]  ;;  %v4478_v30 = vor.u32 %v5131_v56, %v4475_v16  ;;  %v5043_v56 = vld [vmem:[#allocation2 + $0x30c] sm:$0xf] }
 0x45c   :  { %2974 = vmatpush.bf16.msra.mxu1 %v3902_v5  ;;  %v4459_v5 = vld [vmem:[#allocation2 + $0x5b8] sm:$0xf0]  ;;  %v4334_v43 = vor.u32 %v5095_v63, %v4331_v1 }
 0x45d   :  { %v4462_v11 = vor.u32 %v5127_v4, %v4459_v5  ;;  %v4123_v16 = vld [vmem:[#allocation2 + $0x318] sm:$0xf0]  ;;  %v5107_v5 = vld [vmem:[#allocation2 + $0x50c] sm:$0xf] }
 0x45e   :  { %v4619_v63 = vld [vmem:[#allocation2 + $0x6f8] sm:$0xf0]  ;;  %v4126_v4 = vor.u32 %v5043_v56, %v4123_v16 }
 0x45f   :  { %2987 = vmatpush.bf16.msra.mxu2 %v4030_v8  ;;  %2962 = vmatpush.bf16.msra.mxu3 %v3758_v12  ;;  %v5123_v8 = vld [vmem:[#allocation2 + $0x58c] sm:$0xf]  ;;  %v4443_v12 = vld [vmem:[#allocation2 + $0x598] sm:$0xf0] }
 0x460   :  { %2975 = vmatpush.bf16.msra.mxu1 %v3886_v19  ;;  %v4446_v18 = vor.u32 %v5123_v8, %v4443_v12  ;;  %v4174_v19 = vor.u32 %v5055_v15, %v4171_v17  ;;  %v5195_v12 = vld [vmem:[#allocation2 + $0x7cc] sm:$0xf] }
 0x463   :  { %2988 = vmatpush.bf16.msra.mxu2 %v4014_v40  ;;  %2963 = vmatpush.bf16.msra.mxu3 %v3742_v29  ;;  %v4283_v40 = vld [vmem:[#allocation2 + $0x458] sm:$0xf0]  ;;  %v5115_v29 = vld [vmem:[#allocation2 + $0x54c] sm:$0xf] }
 0x464   :  { %2976 = vmatpush.bf16.msra.mxu1 %v3870_v33  ;;  %v4286_v33 = vor.u32 %v5083_v25, %v4283_v40  ;;  %v4414_v41 = vor.u32 %v5115_v29, %v4411_v31  ;;  %v4699_v25 = vld [vmem:[#allocation2 + $0x798] sm:$0xf0]  ;;  %v5183_v29 = vld [vmem:[#allocation2 + $0x76c] sm:$0xf] }
 0x465   :  { %v4683_v31 = vld [vmem:[#allocation2 + $0x778] sm:$0xf0] }
 0x466   :  { %2964 = vmatmul.bf16.vlgmr.msra.gmra.mxu3 %v5773_v35  ;;  %v4190_v35 = vor.u32 %v5059_v46, %v4187_v7  ;;  %v2822_v20 = vpop.f32.mrf.mxu1 }
 0x467   :  { %2995 = vmatpush.bf16.msrb.mxu3 %v4238_v34  ;;  %2989 = vmatpush.bf16.msra.mxu2 %v3998_v42  ;;  %v5047_v34 = vld [vmem:[#allocation2 + $0x32c] sm:$0xf] }
 0x468   :  { %3008 = vmatpush.bf16.msrb.mxu1 %v4366_v39  ;;  %v4267_v39 = vld [vmem:[#allocation2 + $0x438] sm:$0xf0]  ;;  %v4142_v0 = vor.u32 %v5047_v34, %v4139_v58  ;;  %v5147_v34 = vld [vmem:[#allocation2 + $0x64c] sm:$0xf] }
 0x469   :  { %2977 = vmatmul.bf16.vlgmr.msra.gmra.mxu1 %v5777_v36  ;;  %v4318_v36 = vor.u32 %v5091_v9, %v4315_v10  ;;  %v2809_v32 = vpop.f32.mrf.mxu3  ;;  %v5179_v58 = vld [vmem:[#allocation2 + $0x74c] sm:$0xf] }
 0x46a   :  { %2990 = vmatmul.bf16.vlgmr.msra.gmra.mxu2 %v5781_v44  ;;  %v5119_v44 = vld [vmem:[#allocation2 + $0x56c] sm:$0xf]  ;;  %v2810_v37 = vadd.f32 %v2809_v32, %v5854_v26 }
 0x46b   :  { %3021 = vmatpush.bf16.msrb.mxu2 %v4494_v14  ;;  %2996 = vmatpush.bf16.msrb.mxu3 %v4222_v53  ;;  %v4430_v27 = vor.u32 %v5119_v44, %v4427_v6  ;;  %v4395_v14 = vld [vmem:[#allocation2 + $0x538] sm:$0xf0]  ;;  %v4270_v53 = vor.u32 %v5079_v38, %v4267_v39  ;;  %v5167_v26 = vld [vmem:[#allocation2 + $0x6ec] sm:$0xf]  ;;  %v3063_v38 = vperm.slane %v5832_v62, 1 }
 0x46c   :  { %3009 = vmatpush.bf16.msrb.mxu1 %v4350_v57  ;;  %v2823_v50 = vadd.f32 %v2822_v20, %v2810_v37  ;;  %v5075_v57 = vld [vmem:[#allocation2 + $0x40c] sm:$0xf]  ;;  %v4398_v1 = vor.u32 %v5111_v47, %v4395_v14  ;;  %v4622_v7 = vor.u32 %v5167_v26, %v4619_v63  ;;  %v4715_v20 = vld [vmem:[#allocation2 + $0x7b8] sm:$0xf0]  ;;  %v3077_v14 = vperm.slane %v5837_v23, 1 }
 0x46d   :  { %v2835_v42 = vpop.f32.mrf.mxu2  ;;  %v4254_v46 = vor.u32 %v5075_v57, %v4251_v61  ;;  %v4667_v37 = vld [vmem:[#allocation2 + $0x758] sm:$0xf0]  ;;  %v5139_v63 = vld [vmem:[#allocation2 + $0x60c] sm:$0xf] }
 0x46e   :  { %v2824_v51 = vpop.f32.mrf.mxu1  ;;  %v5860_v60 = vadd.f32 %v2835_v42, %v2823_v50  ;;  %v4670_v50 = vor.u32 %v5179_v58, %v4667_v37  ;;  %v5143_v42 = vld [vmem:[#allocation2 + $0x62c] sm:$0xf] }
 0x46f   :  { %3022 = vmatpush.bf16.msrb.mxu2 %v4478_v30  ;;  %2997 = vmatpush.bf16.msrb.mxu3 %v4206_v3  ;;  %v5199_v30 = vld [vmem:[#allocation2 + $0x7ec] sm:$0xf]  ;;  %v4747_v3 = vld [vmem:[#allocation2 + $0x7f8] sm:$0xf0] }
 0x470   :  { %3010 = vmatpush.bf16.msrb.mxu1 %v4334_v43  ;;  %v4379_v43 = vld [vmem:[#allocation2 + $0x518] sm:$0xf0]  ;;  %v4750_v10 = vor.u32 %v5199_v30, %v4747_v3  ;;  %v5175_v51 = vld [vmem:[#allocation2 + $0x72c] sm:$0xf] }
 0x471   :  { %v2811_v9 = vpop.f32.mrf.mxu3  ;;  %v4382_v8 = vor.u32 %v5107_v5, %v4379_v43  ;;  %v4635_v5 = vld [vmem:[#allocation2 + $0x718] sm:$0xf0] }
 0x473   :  { %3023 = vmatpush.bf16.msrb.mxu2 %v4462_v11  ;;  %2998 = vmatpush.bf16.msrb.mxu3 %v4190_v35  ;;  %v5163_v11 = vld [vmem:[#allocation2 + $0x6cc] sm:$0xf]  ;;  %v4603_v35 = vld [vmem:[#allocation2 + $0x6d8] sm:$0xf0] }
 0x474   :  { %3011 = vmatpush.bf16.msrb.mxu1 %v4318_v36  ;;  %v4731_v36 = vld [vmem:[#allocation2 + $0x7d8] sm:$0xf0]  ;;  %v4606_v17 = vor.u32 %v5163_v11, %v4603_v35 }
 0x475   :  { %v2837_v15 = vpop.f32.mrf.mxu2  ;;  %v4734_v52 = vor.u32 %v5195_v12, %v4731_v36 }
 0x477   :  { %3024 = vmatpush.bf16.msrb.mxu2 %v4446_v18  ;;  %2999 = vmatpush.bf16.msrb.mxu3 %v4174_v19  ;;  %v4587_v18 = vld [vmem:[#allocation2 + $0x6b8] sm:$0xf0]  ;;  %v5191_v19 = vld [vmem:[#allocation2 + $0x7ac] sm:$0xf] }
 0x478   :  { %3012 = vmatpush.bf16.msrb.mxu1 %v4302_v21  ;;  %v4590_v44 = vor.u32 %v5159_v49, %v4587_v18  ;;  %v4718_v6 = vor.u32 %v5191_v19, %v4715_v20  ;;  %v5155_v21 = vld [vmem:[#allocation2 + $0x68c] sm:$0xf] }
 0x479   :  { %v4574_v40 = vor.u32 %v5155_v21, %v4571_v22  ;;  %v3064_v21 = vperm.slane %v5832_v62, 2 }
 0x47b   :  { %3025 = vmatpush.bf16.msrb.mxu2 %v4430_v27  ;;  %3000 = vmatpush.bf16.msrb.mxu3 %v4158_v28  ;;  %v4702_v27 = vor.u32 %v5187_v24, %v4699_v25  ;;  %v4555_v28 = vld [vmem:[#allocation2 + $0x678] sm:$0xf0] }
 0x47c   :  { %3013 = vmatpush.bf16.msrb.mxu1 %v4286_v33  ;;  %v4686_v33 = vor.u32 %v5183_v29, %v4683_v31 }
 0x47f   :  { %3026 = vmatpush.bf16.msrb.mxu2 %v4414_v41  ;;  %3001 = vmatpush.bf16.msrb.mxu3 %v4142_v0  ;;  %v4523_v0 = vld [vmem:[#allocation2 + $0x638] sm:$0xf0] }
 0x480   :  { %3014 = vmatpush.bf16.msrb.mxu1 %v4270_v53  ;;  %v4651_v53 = vld [vmem:[#allocation2 + $0x738] sm:$0xf0]  ;;  %v4526_v16 = vor.u32 %v5143_v42, %v4523_v0 }
 0x481   :  { %v4654_v26 = vor.u32 %v5175_v51, %v4651_v53 }
 0x483   :  { %3027 = vmatpush.bf16.msrb.mxu2 %v4398_v1  ;;  %3002 = vmatpush.bf16.msrb.mxu3 %v4126_v4  ;;  %v4507_v1 = vld [vmem:[#allocation2 + $0x618] sm:$0xf0]  ;;  %v5171_v4 = vld [vmem:[#allocation2 + $0x70c] sm:$0xf] }
 0x484   :  { %3015 = vmatpush.bf16.msrb.mxu1 %v4254_v46  ;;  %v4510_v43 = vor.u32 %v5139_v63, %v4507_v1  ;;  %v4638_v46 = vor.u32 %v5171_v4, %v4635_v5 }
 0x486   :  { %3003 = vmatmul.bf16.vlgmr.msrb.gmra.mxu3 %v5788_v55  ;;  %v5151_v55 = vld [vmem:[#allocation2 + $0x66c] sm:$0xf]  ;;  %v2861_v32 = vpop.f32.mrf.mxu1 }
 0x487   :  { %3034 = vmatpush.bf16.msra.mxu3 %v4622_v7  ;;  %3028 = vmatpush.bf16.msrb.mxu2 %v4382_v8 }
 0x488   :  { %3047 = vmatpush.bf16.msra.mxu1 %v4750_v10 }
 0x489   :  { %3016 = vmatmul.bf16.vlgmr.msrb.gmra.mxu1 %v5792_v59  ;;  %v4558_v59 = vor.u32 %v5151_v55, %v4555_v28  ;;  %v2848_v41 = vpop.f32.mrf.mxu3 }
 0x48a   :  { %3029 = vmatmul.bf16.vlgmr.msrb.gmra.mxu2 %v5796_v2  ;;  %v4539_v2 = vld [vmem:[#allocation2 + $0x658] sm:$0xf0]  ;;  %v2849_v47 = vadd.f32 %v2848_v41, %v5860_v60 }
 0x48b   :  { %3035 = vmatpush.bf16.msra.mxu3 %v4606_v17  ;;  %v4542_v39 = vor.u32 %v5147_v34, %v4539_v2 }
 0x48c   :  { %3048 = vmatpush.bf16.msra.mxu1 %v4734_v52  ;;  %v3071_v56 = vmul.f32 %v3063_v38, %v2849_v47 }
 0x48d   :  { %v2874_v57 = vpop.f32.mrf.mxu2 }
 0x48e   :  { %v2863_v61 = vpop.f32.mrf.mxu1  ;;  %v2875_v30 = vadd.f32 %v2874_v57, %v2861_v32  ;;  %v3085_v3 = vadd.f32 %v3077_v14, %v3071_v56 }
 0x48f   :  { %3036 = vmatpush.bf16.msra.mxu3 %v4590_v44  ;;  %v3079_v61 = vperm.slane %v5837_v23, 3 }
 0x490   :  { %3049 = vmatpush.bf16.msra.mxu1 %v4718_v6  ;;  %vm3089_vm14 = vcmp.ge.f32.partialorder %v3085_v3, 0.0  ;;  %v3094_v60 = vmul.f32 %v5845_v54, %v3085_v3 }
 0x491   :  { %v2850_v7 = vpop.f32.mrf.mxu3 }
 0x492   :  { %v5869_v9 = vsel %vm3089_vm14, %v3085_v3, %v3094_v60 }
 0x493   :  { %3037 = vmatpush.bf16.msra.mxu3 %v4574_v40 }
 0x494   :  { %3050 = vmatpush.bf16.msra.mxu1 %v4702_v27 }
 0x495   :  { %v2876_v10 = vpop.f32.mrf.mxu2 }
 0x497   :  { %3038 = vmatpush.bf16.msra.mxu3 %v4558_v59 }
 0x498   :  { %3051 = vmatpush.bf16.msra.mxu1 %v4686_v33 }
 0x49b   :  { %3039 = vmatpush.bf16.msra.mxu3 %v4542_v39 }
 0x49c   :  { %3052 = vmatpush.bf16.msra.mxu1 %v4670_v50 }
 0x49f   :  { %3040 = vmatpush.bf16.msra.mxu3 %v4526_v16  ;;  %v3065_v16 = vperm.slane %v5832_v62, 3 }
 0x4a0   :  { %3053 = vmatpush.bf16.msra.mxu1 %v4654_v26 }
 0x4a3   :  { %3041 = vmatpush.bf16.msra.mxu3 %v4510_v43 }
 0x4a4   :  { %3054 = vmatpush.bf16.msra.mxu1 %v4638_v46 }
 0x4a6   :  { %3042 = vmatmul.bf16.vlgmr.msra.gmra.mxu3 %v5803_v45  ;;  %v2900_v11 = vpop.f32.mrf.mxu1 }
 0x4a7   :  { %3055 = vmatmul.bf16.vlgmr.msra.gmra.mxu1 %v5807_v48  ;;  %v3078_v48 = vperm.slane %v5837_v23, 2 }
 0x4a9   :  { %v2887_v35 = vpop.f32.mrf.mxu3 }
 0x4aa   :  { %v2888_v8 = vadd.f32 %v2887_v35, %v2875_v30 }
 0x4ac   :  { %v2901_v12 = vadd.f32 %v2900_v11, %v2888_v8 }
 0x4ad   :  { %v2913_v36 = vpop.f32.mrf.mxu2 }
 0x4ae   :  { %v2902_v15 = vpop.f32.mrf.mxu1  ;;  %v2914_v17 = vadd.f32 %v2913_v36, %v2901_v12 }
 0x4b1   :  { %v2889_v52 = vpop.f32.mrf.mxu3 }
 0x4b5   :  { %v2915_v49 = vpop.f32.mrf.mxu2 }
 0x4c6   :  { %v2939_v18 = vpop.f32.mrf.mxu1 }
 0x4c9   :  { %v2926_v19 = vpop.f32.mrf.mxu3 }
 0x4ca   :  { %v2927_v20 = vadd.f32 %v2926_v19, %v2914_v17 }
 0x4cc   :  { %v2940_v44 = vadd.f32 %v2939_v18, %v2927_v20 }
 0x4cd   :  { %v2952_v6 = vpop.f32.mrf.mxu2 }
 0x4ce   :  { %v2941_v22 = vpop.f32.mrf.mxu1  ;;  %v2953_v45 = vadd.f32 %v2952_v6, %v2940_v44 }
 0x4d0   :  { %v3072_v24 = vmul.f32 %v3064_v21, %v2953_v45 }
 0x4d1   :  { %v2928_v25 = vpop.f32.mrf.mxu3 }
 0x4d2   :  { %v3086_v40 = vadd.f32 %v3078_v48, %v3072_v24 }
 0x4d4   :  { %vm3090_vm15 = vcmp.ge.f32.partialorder %v3086_v40, 0.0  ;;  %v3095_v27 = vmul.f32 %v5845_v54, %v3086_v40 }
 0x4d5   :  { %v2954_v55 = vpop.f32.mrf.mxu2 }
 0x4d6   :  { %v5876_v28 = vsel %vm3090_vm15, %v3086_v40, %v3095_v27 }
 0x4e6   :  { %v2978_v29 = vpop.f32.mrf.mxu1 }
 0x4e9   :  { %v2965_v31 = vpop.f32.mrf.mxu3 }
 0x4ea   :  { %v2979_v50 = vadd.f32 %v2978_v29, %v2965_v31 }
 0x4ed   :  { %v2991_v59 = vpop.f32.mrf.mxu2 }
 0x4ee   :  { %v2980_v32 = vpop.f32.mrf.mxu1  ;;  %v2992_v42 = vadd.f32 %v2991_v59, %v2979_v50 }
 0x4f1   :  { %v2967_v33 = vpop.f32.mrf.mxu3 }
 0x4f5   :  { %v2993_v34 = vpop.f32.mrf.mxu2 }
 0x506   :  { %v3017_v2 = vpop.f32.mrf.mxu1 }
 0x509   :  { %v3004_v58 = vpop.f32.mrf.mxu3 }
 0x50a   :  { %v3005_v0 = vadd.f32 %v3004_v58, %v2992_v42 }
 0x50c   :  { %v3018_v47 = vadd.f32 %v3017_v2, %v3005_v0 }
 0x50d   :  { %v3030_v37 = vpop.f32.mrf.mxu2 }
 0x50e   :  { %v3019_v38 = vpop.f32.mrf.mxu1  ;;  %v3031_v51 = vadd.f32 %v3030_v37, %v3018_v47 }
 0x511   :  { %v3006_v39 = vpop.f32.mrf.mxu3 }
 0x515   :  { %v3032_v41 = vpop.f32.mrf.mxu2 }
 0x524   :  { %v3056_v14 = vpop.f32.mrf.mxu1 }
 0x529   :  { %v3043_v53 = vpop.f32.mrf.mxu3 }
 0x52a   :  { %v3044_v56 = vadd.f32 %v3043_v53, %v3031_v51 }
 0x52c   :  { %v3057_v57 = vadd.f32 %v3056_v14, %v3044_v56  ;;  %v3058_v26 = vpop.f32.mrf.mxu1 }
 0x52e   :  { %v3073_v63 = vmul.f32 %v3065_v16, %v3057_v57 }
 0x530   :  { %v3087_v1 = vadd.f32 %v3079_v61, %v3073_v63 }
 0x531   :  { %v3045_v30 = vpop.f32.mrf.mxu3 }
 0x532   :  { %vm3091_vm0 = vcmp.ge.f32.partialorder %v3087_v1, 0.0  ;;  %v3096_v3 = vmul.f32 %v5845_v54, %v3087_v1 }
 0x534   :  { %v5881_v4 = vsel %vm3091_vm0, %v3087_v1, %v3096_v3 }
 0x535   :  { %5315 = dma.done.wait [#allocation4 + $0x1], 4096 }
 0x536   :  { %5316 = vsyncadd [#allocation4 + $0x1], 4294963200  ;;  %v5209_v5 = vld [vmem:[#allocation3 + $0x48] sm:$0xff]  ;;  %v5217_v60 = vld [vmem:[#allocation3 + $0x78] sm:$0xff]  ;;  %v3105_v22 = vpack.c.bf16 %v5848_v13, %v5848_v13  ;;  %v3106_v48 = vpack.c.bf16 %v5869_v9, %v5869_v9  ;;  %v3107_v25 = vpack.c.bf16 %v5876_v28, %v5876_v28  ;;  %v3108_v31 = vpack.c.bf16 %v5881_v4, %v5881_v4  ;;  %s3526_s17 = sshll.u32 %s5939_s8, 4  ;;  %s3527_s17 = int_to_ptr.hbm [resolvable:$true] %s3526_s17 }
 0x537   :  { %3369 = vmatpush.bf16.msra.mxu2 %v5209_v5  ;;  %v5208_v43 = vld [vmem:[#allocation3 + $0x30] sm:$0xff]  ;;  %3382 = vmatpush.bf16.msrb.mxu3 %v5217_v60  ;;  %v5216_v62 = vld [vmem:[#allocation3 + $0x8] sm:$0xff]  ;;  %v5225_v46 = vld [vmem:[#allocation3 + $0xc0] sm:$0xff]  ;;  %v3422_v16 = vstv %s5474_s9  ;;  %s5321_s9 = smov [#allocation8]   ;;  %vm3517_vm2 = vcmask 17408  }
 0x538   :  { %3395 = vmatpush.bf16.msrb.mxu1 %v5225_v46  ;;  %v5224_v23 = vld [vmem:[#allocation3 + $0x70] sm:$0xff]  ;;  %v5207_v7 = vld [vmem:[#allocation3 + $0x68] sm:$0xff]  ;;  %v5214_v35 = vld [vmem:[#allocation3 + $0x60] sm:$0xff]  ;;  %s3524_s15 = sshll.u32 %s5321_s9, 4  ;;  %s3525_s15 = int_to_ptr.vmem [resolvable:$true] %s3524_s15 }
 0x539   :  { %v5215_v10 = vld [vmem:[#allocation3 + $0xf0] sm:$0xff]  ;;  %v5222_v8 = vld [vmem:[#allocation3 + $0xe0] sm:$0xff]  ;;  %v5205_v12 = vld [vmem:[#allocation3 + $0x18] sm:$0xff] }
 0x53a   :  { %v5223_v11 = vld [vmem:[#allocation3 + $0x90] sm:$0xff]  ;;  %v5213_v36 = vld [vmem:[#allocation3 + $0xb8] sm:$0xff]  ;;  %v5221_v15 = vld [vmem:[#allocation3 + $0xc8] sm:$0xff] }
 0x53b   :  { %3370 = vmatpush.bf16.msra.mxu2 %v5208_v43  ;;  %3383 = vmatpush.bf16.msrb.mxu3 %v5216_v62  ;;  %v5206_v54 = vld [vmem:[#allocation3 + $0x50] sm:$0xff]  ;;  %v5204_v17 = vld [vmem:[#allocation3 + $0xd8] sm:$0xff]  ;;  %v5212_v52 = vld [vmem:[#allocation3 + $0xe8] sm:$0xff] }
 0x53c   :  { %3396 = vmatpush.bf16.msrb.mxu1 %v5224_v23  ;;  %v5220_v49 = vld [vmem:[#allocation3 + $0x40] sm:$0xff]  ;;  %v5211_v19 = vld [vmem:[#allocation3 + $0x88] sm:$0xff]  ;;  %v5219_v20 = vld [vmem:[#allocation3 + $0x58] sm:$0xff] }
 0x53d   :  { %v5203_v18 = vld [vmem:[#allocation3] sm:$0xff]  ;;  %v5202_v44 = vld [vmem:[#allocation3 + $0xb0] sm:$0xff]  ;;  %v5233_v6 = vld [vmem:[#allocation3 + $0x98] sm:$0xff] }
 0x53e   :  { %v5210_v21 = vld [vmem:[#allocation3 + $0x80] sm:$0xff]  ;;  %v5218_v45 = vld [vmem:[#allocation3 + $0x38] sm:$0xff]  ;;  %v5229_v27 = vld [vmem:[#allocation3 + $0x28] sm:$0xff] }
 0x53f   :  { %3371 = vmatpush.bf16.msra.mxu2 %v5207_v7  ;;  %3384 = vmatpush.bf16.msrb.mxu3 %v5215_v10  ;;  %v5232_v24 = vld [vmem:[#allocation3 + $0x20] sm:$0xff]  ;;  %v5231_v40 = vld [vmem:[#allocation3 + $0xf8] sm:$0xff]  ;;  %v5228_v55 = vld [vmem:[#allocation3 + $0x10] sm:$0xff] }
 0x540   :  { %3397 = vmatpush.bf16.msrb.mxu1 %v5223_v11  ;;  %v5230_v13 = vld [vmem:[#allocation3 + $0xa0] sm:$0xff]  ;;  %v5227_v9 = vld [vmem:[#allocation3 + $0xd0] sm:$0xff]  ;;  %v5226_v29 = vld [vmem:[#allocation3 + $0xa8] sm:$0xff] }
 0x541   :  { %v5241_v28 = vld [vmem:[%s5936_s5 + $0x38] sm:$0xff]  ;;  %v5240_v59 = vld [vmem:[%s5936_s5 + $0x30] sm:$0xff]  ;;  %v5239_v32 = vld [vmem:[%s5936_s5 + $0x28] sm:$0xff] }
 0x542   :  { %v5238_v33 = vld [vmem:[%s5936_s5 + $0x20] sm:$0xff]  ;;  %v5237_v34 = vld [vmem:[%s5936_s5 + $0x18] sm:$0xff]  ;;  %v5236_v2 = vld [vmem:[%s5936_s5 + $0x10] sm:$0xff] }
 0x543   :  { %3372 = vmatpush.bf16.msra.mxu2 %v5206_v54  ;;  %3385 = vmatpush.bf16.msrb.mxu3 %v5214_v35  ;;  %v5235_v38 = vld [vmem:[%s5936_s5 + $0x8] sm:$0xff]  ;;  %v5234_v41 = vld [vmem:[%s5936_s5] sm:$0xff] }
 0x544   :  { %3398 = vmatpush.bf16.msrb.mxu1 %v5222_v8  ;;  %v5247_v47 = vld [vmem:[%s5935_s4 + $0x20] ss:$0 sm:$0xff]  ;;  %v5248_v61 = vld [vmem:[%s5935_s4 + $0x21] ss:$0 sm:$0xff]  ;;  %v5249_v63 = vld [vmem:[%s5935_s4 + $0x22] ss:$0 sm:$0xff] }
 0x545   :  { %v5250_v60 = vld [vmem:[%s5935_s4 + $0x23] ss:$0 sm:$0xff] }
 0x547   :  { %3373 = vmatpush.bf16.msra.mxu2 %v5205_v12  ;;  %3386 = vmatpush.bf16.msrb.mxu3 %v5213_v36 }
 0x548   :  { %3399 = vmatpush.bf16.msrb.mxu1 %v5221_v15 }
 0x54b   :  { %3374 = vmatpush.bf16.msra.mxu2 %v5204_v17  ;;  %3387 = vmatpush.bf16.msrb.mxu3 %v5212_v52 }
 0x54c   :  { %3400 = vmatpush.bf16.msrb.mxu1 %v5220_v49 }
 0x54f   :  { %3375 = vmatpush.bf16.msra.mxu2 %v5203_v18  ;;  %3388 = vmatpush.bf16.msrb.mxu3 %v5211_v19 }
 0x550   :  { %3401 = vmatpush.bf16.msrb.mxu1 %v5219_v20 }
 0x553   :  { %3376 = vmatpush.bf16.msra.mxu2 %v5202_v44  ;;  %3389 = vmatpush.bf16.msrb.mxu3 %v5210_v21 }
 0x554   :  { %3402 = vmatpush.bf16.msrb.mxu1 %v5218_v45 }
 0x556   :  { %3377 = vmatmul.bf16.vlgmr.msra.gmra.mxu2 %v3105_v22  ;;  %3390 = vmatmul.bf16.vlgmr.msrb.gmra.mxu3 %v3106_v48 }
 0x557   :  { %3408 = vmatpush.bf16.msrb.mxu2 %v5233_v6  ;;  %3403 = vmatmul.bf16.vlgmr.msrb.gmra.mxu1 %v3107_v25 }
 0x558   :  { %3504 = vmatpush.bf16.msra.mxu3 %v5241_v28 }
 0x55b   :  { %3409 = vmatpush.bf16.msrb.mxu2 %v5232_v24 }
 0x55c   :  { %3505 = vmatpush.bf16.msra.mxu3 %v5240_v59 }
 0x55f   :  { %3410 = vmatpush.bf16.msrb.mxu2 %v5231_v40 }
 0x560   :  { %3506 = vmatpush.bf16.msra.mxu3 %v5239_v32 }
 0x563   :  { %3411 = vmatpush.bf16.msrb.mxu2 %v5230_v13 }
 0x564   :  { %3507 = vmatpush.bf16.msra.mxu3 %v5238_v33 }
 0x567   :  { %3412 = vmatpush.bf16.msrb.mxu2 %v5229_v27 }
 0x568   :  { %3508 = vmatpush.bf16.msra.mxu3 %v5237_v34 }
 0x56b   :  { %3413 = vmatpush.bf16.msrb.mxu2 %v5228_v55 }
 0x56c   :  { %3509 = vmatpush.bf16.msra.mxu3 %v5236_v2 }
 0x56f   :  { %3414 = vmatpush.bf16.msrb.mxu2 %v5227_v9 }
 0x570   :  { %3510 = vmatpush.bf16.msra.mxu3 %v5235_v38 }
 0x573   :  { %3415 = vmatpush.bf16.msrb.mxu2 %v5226_v29 }
 0x574   :  { %3511 = vmatpush.bf16.msra.mxu3 %v5234_v41 }
 0x576   :  { %3416 = vmatmul.bf16.vlgmr.msrb.gmra.mxu2 %v3108_v31 }
 0x5d4   :  { %v3404_v58 = vpop.f32.mrf.mxu1 }
 0x5d9   :  { %v3378_v37 = vpop.f32.mrf.mxu2  ;;  %v3391_v39 = vpop.f32.mrf.mxu3 }
 0x5da   :  { %v3379_v14 = vadd.f32 %v5247_v47, %v3378_v37 }
 0x5dc   :  { %v3406_v50 = vpop.f32.mrf.mxu1  ;;  %v3392_v51 = vadd.f32 %v3391_v39, %v3379_v14 }
 0x5de   :  { %v3405_v53 = vadd.f32 %v3404_v58, %v3392_v51 }
 0x5e1   :  { %v3380_v42 = vpop.f32.mrf.mxu2  ;;  %v3393_v0 = vpop.f32.mrf.mxu3 }
 0x5f9   :  { %v3417_v56 = vpop.f32.mrf.mxu2 }
 0x5fa   :  { %v3418_v57 = vadd.f32 %v3417_v56, %v3405_v53 }
 0x5fc   :  { %vm3421_vm1 = vcmp.ge.f32.partialorder %v3418_v57, 0.0  ;;  %v3423_v26 = vmul.f32 %v3422_v16, %v3418_v57 }
 0x5fe   :  { %v3424_v1 = vsel %vm3421_vm1, %v3418_v57, %v3423_v26 }
 0x5ff   :  { %v3429_v30 = vmul.f32 %v5248_v61, %v3424_v1 }
 0x601   :  { %v3419_v3 = vpop.f32.mrf.mxu2  ;;  %v3434_v4 = vadd.f32 %v5249_v63, %v3429_v30 }
 0x603   :  { %v3435_v5 = vpack.c.bf16 %v3434_v4, %v3434_v4 }
 0x605   :  { %3512 = vmatmul.bf16.vlgmr.msra.gmra.mxu3 %v3435_v5 }
 0x688   :  { %v3513_v43 = vpop.f32.mrf.mxu3 }
 0x689   :  { %v3514_v62 = vadd.f32 %v5250_v60, %v3513_v43 }
 0x68b   :  { %3518 = vst.msk [vmem:[#allocation8] sm:$0x3] %vm3517_vm2, %v3514_v62 }
 0x68c   :  { %3529 = dma.vmem_to_hbm [thread:$0]  %s3525_s15, 32, %s3527_s17, [#allocation6]  }
 0x690   :  { %v3515_v46 = vpop.f32.mrf.mxu3 }
 0x691   :  { %5317 = dma.done.wait [#allocation6], 32  }
 0x692   :  { %5318 = vsyncadd [#allocation6], 4294967264 }
 0x693   :  { %3534 = vsyncpa [#allocation6], 1 }
 0x694   :  { %3535 = vsyncpa [#allocation7], 1 }
 0x695   :  { %3536 = vsyncmov [#allocation4] }
 0x698   :  { %s3537_s4 = vpop.sfrf %3536 }
 0x699   :  { %p4911_p0 = scmp.ne.s32.totalorder %s3537_s4, 0 }
 0x69b   :  { %3541 = shalt.err (%p4911_p0)  }
 0x69c   :  { %3543 = vsyncmov [#allocation4 + $0x1] }
 0x69f   :  { %s3544_s28 = vpop.sfrf %3543 }
 0x6a0   :  { %p4912_p1 = scmp.ne.s32.totalorder %s3544_s28, 0 }
 0x6a2   :  { %3548 = shalt.err (%p4912_p1)  }

// kernel: fwd.1
= control target key start
LH: loop header
LB: loop body
LE: loop exit
PB: predicated region body
PF: predicated region fallthrough
CT: control target
= control target key end

     0   :  { %13 = vsyncpa [#allocation7], 0  ;;  %s5931_s0 = inlined_call_operand.vmem [shape: bf16[512,10], index: 0, kind: input, shape index: {}]   ;;  %s5932_s1 = inlined_call_operand.vmem [shape: bf16[10,8], index: 1, kind: input, shape index: {}]   ;;  %s5933_s2 = inlined_call_operand.vmem [shape: f32[3], index: 2, kind: input, shape index: {}]   ;;  %s5934_s3 = inlined_call_operand.vmem [shape: bf16[8,1024], index: 3, kind: input, shape index: {}]   ;;  %s5935_s4 = inlined_call_operand.vmem [shape: f32[1,4483], index: 4, kind: input, shape index: {}]   ;;  %s5936_s5 = inlined_call_operand.vmem [shape: bf16[128,3], index: 5, kind: input, shape index: {}]   ;;  %s5937_s6 = inlined_call_operand.hbm [shape: bf16[1024,512], index: 6, kind: input, shape index: {}]   ;;  %s5938_s7 = inlined_call_operand.vmem [shape: bf16[512,128], index: 7, kind: input, shape index: {}]   ;;  %s5939_s8 = inlined_call_operand.hbm [shape: f32[2,3], index: 8, kind: output, shape index: {}]  }
   0x1   :  { %14 = vsyncpa [#allocation6], 0  ;;  %s24_s29 = sshll.u32 %s5933_s2, 4  ;;  %s5319_s30 = smov [#allocation5]   ;;  %s25_s29 = int_to_ptr.vmem [resolvable:$true] %s24_s29 }
   0x2   :  { %27 = dma.vmem_to_smem %s25_s29, 16, %s5319_s30, [#allocation7]  }
   0x3   :  { %5311 = dma.done.wait [#allocation7], 16  }
   0x4   :  { %5312 = vsyncadd [#allocation7], 4294967280 }
   0x5   :  { %38 = sfence }
   0x6   :  { %s47_s11 = sshll.u32 %s5937_s6, 4  ;;  %v64_v0 = vld [vmem:[%s5938_s7] sm:$0xff]  ;;  %v66_v1 = vld [vmem:[%s5938_s7 + $0x8] sm:$0xff]  ;;  %v68_v2 = vld [vmem:[%s5938_s7 + $0x10] sm:$0xff]  ;;  %s5320_s17 = smov [#allocation2]   ;;  %s48_s11 = int_to_ptr.hbm [resolvable:$true] %s47_s11 }
   0x7   :  { %s49_s18 = sshll.u32 %s5320_s17, 4  ;;  %65 = vst [vmem:[#allocation3 + $0xb0] sm:$0xff] %v64_v0  ;;  %v70_v3 = vld [vmem:[%s5938_s7 + $0x18] sm:$0xff]  ;;  %v72_v4 = vld [vmem:[%s5938_s7 + $0x20] sm:$0xff]  ;;  %v74_v5 = vld [vmem:[%s5938_s7 + $0x28] sm:$0xff]  ;;  %s50_s18 = int_to_ptr.vmem [resolvable:$true] %s49_s18 }
   0x8   :  { %67 = vst [vmem:[#allocation3] sm:$0xff] %v66_v1  ;;  %52 = dma.hbm_to_vmem [thread:$0]  %s48_s11, 32768, %s50_s18, [#allocation4]  ;;  %v76_v6 = vld [vmem:[%s5938_s7 + $0x30] sm:$0xff]  ;;  %v78_v7 = vld [vmem:[%s5938_s7 + $0x38] sm:$0xff]  ;;  %v80_v8 = vld [vmem:[%s5938_s7 + $0x40] sm:$0xff] }
   0x9   :  { %69 = vst [vmem:[#allocation3 + $0xd8] sm:$0xff] %v68_v2  ;;  %v82_v9 = vld [vmem:[%s5938_s7 + $0x48] sm:$0xff]  ;;  %v84_v10 = vld [vmem:[%s5938_s7 + $0x50] sm:$0xff]  ;;  %v86_v11 = vld [vmem:[%s5938_s7 + $0x58] sm:$0xff] }
   0xa   :  { %71 = vst [vmem:[#allocation3 + $0x18] sm:$0xff] %v70_v3  ;;  %v88_v12 = vld [vmem:[%s5938_s7 + $0x60] sm:$0xff]  ;;  %v90_v13 = vld [vmem:[%s5938_s7 + $0x68] sm:$0xff]  ;;  %v92_v14 = vld [vmem:[%s5938_s7 + $0x70] sm:$0xff] }
   0xb   :  { %73 = vst [vmem:[#allocation3 + $0x50] sm:$0xff] %v72_v4  ;;  %v94_v15 = vld [vmem:[%s5938_s7 + $0x78] sm:$0xff]  ;;  %v96_v16 = vld [vmem:[%s5938_s7 + $0x80] sm:$0xff]  ;;  %v98_v17 = vld [vmem:[%s5938_s7 + $0x88] sm:$0xff] }
   0xc   :  { %75 = vst [vmem:[#allocation3 + $0x68] sm:$0xff] %v74_v5  ;;  %v100_v18 = vld [vmem:[%s5938_s7 + $0x90] sm:$0xff]  ;;  %v102_v19 = vld [vmem:[%s5938_s7 + $0x98] sm:$0xff]  ;;  %v104_v20 = vld [vmem:[%s5938_s7 + $0xa0] sm:$0xff] }
   0xd   :  { %77 = vst [vmem:[#allocation3 + $0x30] sm:$0xff] %v76_v6  ;;  %v106_v21 = vld [vmem:[%s5938_s7 + $0xa8] sm:$0xff]  ;;  %v108_v22 = vld [vmem:[%s5938_s7 + $0xb0] sm:$0xff]  ;;  %v110_v23 = vld [vmem:[%s5938_s7 + $0xb8] sm:$0xff] }
   0xe   :  { %79 = vst [vmem:[#allocation3 + $0x48] sm:$0xff] %v78_v7  ;;  %v112_v24 = vld [vmem:[%s5938_s7 + $0xc0] sm:$0xff]  ;;  %v114_v25 = vld [vmem:[%s5938_s7 + $0xc8] sm:$0xff]  ;;  %v116_v26 = vld [vmem:[%s5938_s7 + $0xd0] sm:$0xff] }
   0xf   :  { %81 = vst [vmem:[#allocation3 + $0x80] sm:$0xff] %v80_v8  ;;  %v118_v27 = vld [vmem:[%s5938_s7 + $0xd8] sm:$0xff]  ;;  %v120_v28 = vld [vmem:[%s5938_s7 + $0xe0] sm:$0xff]  ;;  %v122_v29 = vld [vmem:[%s5938_s7 + $0xe8] sm:$0xff] }
  0x10   :  { %83 = vst [vmem:[#allocation3 + $0x88] sm:$0xff] %v82_v9  ;;  %v124_v30 = vld [vmem:[%s5938_s7 + $0xf0] sm:$0xff]  ;;  %v126_v31 = vld [vmem:[%s5938_s7 + $0xf8] sm:$0xff] }
  0x11   :  { %85 = vst [vmem:[#allocation3 + $0xe8] sm:$0xff] %v84_v10 }
  0x12   :  { %87 = vst [vmem:[#allocation3 + $0xb8] sm:$0xff] %v86_v11 }
  0x13   :  { %89 = vst [vmem:[#allocation3 + $0x60] sm:$0xff] %v88_v12 }
  0x14   :  { %91 = vst [vmem:[#allocation3 + $0xf0] sm:$0xff] %v90_v13 }
  0x15   :  { %93 = vst [vmem:[#allocation3 + $0x8] sm:$0xff] %v92_v14 }
  0x16   :  { %95 = vst [vmem:[#allocation3 + $0x78] sm:$0xff] %v94_v15 }
  0x17   :  { %97 = vst [vmem:[#allocation3 + $0x38] sm:$0xff] %v96_v16 }
  0x18   :  { %99 = vst [vmem:[#allocation3 + $0x58] sm:$0xff] %v98_v17 }
  0x19   :  { %101 = vst [vmem:[#allocation3 + $0x40] sm:$0xff] %v100_v18 }
  0x1a   :  { %103 = vst [vmem:[#allocation3 + $0xc8] sm:$0xff] %v102_v19 }
  0x1b   :  { %105 = vst [vmem:[#allocation3 + $0xe0] sm:$0xff] %v104_v20 }
  0x1c   :  { %107 = vst [vmem:[#allocation3 + $0x90] sm:$0xff] %v106_v21 }
  0x1d   :  { %109 = vst [vmem:[#allocation3 + $0x70] sm:$0xff] %v108_v22 }
  0x1e   :  { %111 = vst [vmem:[#allocation3 + $0xc0] sm:$0xff] %v110_v23 }
  0x1f   :  { %113 = vst [vmem:[#allocation3 + $0xa8] sm:$0xff] %v112_v24 }
  0x20   :  { %115 = vst [vmem:[#allocation3 + $0xd0] sm:$0xff] %v114_v25 }
  0x21   :  { %117 = vst [vmem:[#allocation3 + $0x10] sm:$0xff] %v116_v26 }
  0x22   :  { %119 = vst [vmem:[#allocation3 + $0x28] sm:$0xff] %v118_v27 }
  0x23   :  { %121 = vst [vmem:[#allocation3 + $0xa0] sm:$0xff] %v120_v28 }
  0x24   :  { %123 = vst [vmem:[#allocation3 + $0xf8] sm:$0xff] %v122_v29 }
  0x25   :  { %125 = vst [vmem:[#allocation3 + $0x20] sm:$0xff] %v124_v30 }
  0x26   :  { %127 = vst [vmem:[#allocation3 + $0x98] sm:$0xff] %v126_v31 }
  0x27   :  { %133 = vsyncadd [#allocation4 + $0x1], 4096  ;;  %s5469_s28 = sld [smem:[#allocation5 + $0x1]]  ;;  %v3685_v32 = vld [vmem:[%s5932_s1] sm:$0xf]  ;;  %vm465_vm0 = vcmask 1044480  }
  0x28   :  { %s5474_s9 = sld [smem:[#allocation5 + $0x2]]  ;;  %v4945_v33 = vld [vmem:[%s5932_s1] sm:$0x10]  ;;  %vm368_vm1 = vcmask 80896   ;;  %v4914_v37 = vld [vmem:[%s5931_s0 + $0x8] sm:$0xff]  ;;  %v4915_v38 = vld [vmem:[%s5931_s0 + $0x10] sm:$0xff] }
  0x29   :  { %v3686_v34 = vor.u32 %v4945_v33, %v3685_v32  ;;  %v4913_v36 = vld [vmem:[%s5931_s0] sm:$0xff]  ;;  %v4916_v39 = vld [vmem:[%s5931_s0 + $0x18] sm:$0xff]  ;;  %v4918_v41 = vld [vmem:[%s5931_s0 + $0x28] sm:$0xff]  ;;  %vm702_vm2 = vcmask 64512   ;;  %vm890_vm3 = vcmask 1043456   ;;  %vm841_vm4 = vcmask 1040384  }
  0x2a   :  { %v4917_v40 = vld [vmem:[%s5931_s0 + $0x20] sm:$0xff]  ;;  %v4919_v42 = vld [vmem:[%s5931_s0 + $0x30] sm:$0xff]  ;;  %v4920_v43 = vld [vmem:[%s5931_s0 + $0x38] sm:$0xff] }
  0x2b   :  { %v467_v35 = vsel %vm465_vm0, %v3686_v34, 0  ;;  %v4921_v44 = vld [vmem:[%s5931_s0 + $0x40] sm:$0xff]  ;;  %v4922_v52 = vld [vmem:[%s5931_s0 + $0x48] sm:$0xff]  ;;  %v4923_v61 = vld [vmem:[%s5931_s0 + $0x50] sm:$0xff] }
  0x2c   :  { %476 = vmatpush.bf16.msra.mxu0 %v467_v35  ;;  %5243 = vmatpush.bf16.msra.mxu2 %v467_v35  ;;  %v4924_v6 = vld [vmem:[%s5931_s0 + $0x58] sm:$0xff]  ;;  %v4925_v15 = vld [vmem:[%s5931_s0 + $0x60] sm:$0xff]  ;;  %v4926_v24 = vld [vmem:[%s5931_s0 + $0x68] sm:$0xff] }
  0x2d   :  { %5242 = vmatpush.bf16.msra.mxu1 %v467_v35  ;;  %v4927_v33 = vld [vmem:[%s5931_s0 + $0x70] sm:$0xff] }
  0x2f   :  { %3687 = vmatmul.msk.bf16.vlgmr.msra.gmra.mxu0 %vm368_vm1, %v4913_v36 }
  0x3f   :  { %3688 = vmatmul.msk.bf16.gmra.mxu0 %vm368_vm1, %v4914_v37 }
  0x4f   :  { %3689 = vmatmul.msk.bf16.gmra.mxu0 %vm368_vm1, %v4915_v38 }
  0x5f   :  { %3690 = vmatmul.msk.bf16.gmra.mxu0 %vm368_vm1, %v4916_v39 }
  0x6f   :  { %3691 = vmatmul.msk.bf16.gmra.mxu0 %vm368_vm1, %v4917_v40 }
  0x7f   :  { %3692 = vmatmul.msk.bf16.gmra.mxu0 %vm368_vm1, %v4918_v41 }
  0x8f   :  { %3693 = vmatmul.msk.bf16.gmra.mxu0 %vm368_vm1, %v4919_v42  ;;  %v4928_v42 = vld [vmem:[%s5931_s0 + $0x78] sm:$0xff] }
  0x9f   :  { %3694 = vmatmul.msk.bf16.gmra.mxu0 %vm368_vm1, %v4920_v43 }
  0xac   :  { %v478_v45 = vpop.f32.mrf.mxu0 }
  0xad   :  { %v638_v46 = vmax.f32 %v478_v45, 0.0 }
  0xaf   :  { %3695 = vmatmul.msk.bf16.gmra.mxu0 %vm368_vm1, %v4921_v44  ;;  %v703_v49 = vsel %vm702_vm2, %v638_v46, 0.0 }
  0xb4   :  { %v480_v47 = vpop.f32.mrf.mxu0 }
  0xb5   :  { %v639_v48 = vmax.f32 %v480_v47, 0.0 }
  0xb7   :  { %v704_v50 = vsel %vm702_vm2, %v639_v48, 0.0 }
  0xb8   :  { %v705_v51 = vadd.f32 %v704_v50, %v703_v49 }
  0xbc   :  { %v483_v53 = vpop.f32.mrf.mxu0 }
  0xbd   :  { %v640_v54 = vmax.f32 %v483_v53, 0.0 }
  0xbf   :  { %v706_v55 = vsel %vm702_vm2, %v640_v54, 0.0  ;;  %3696 = vmatmul.msk.bf16.gmra.mxu0 %vm368_vm1, %v4922_v52 }
  0xc0   :  { %v707_v56 = vadd.f32 %v706_v55, %v705_v51  ;;  %v4929_v51 = vld [vmem:[%s5931_s0 + $0x80] sm:$0xff] }
  0xc4   :  { %v485_v57 = vpop.f32.mrf.mxu0 }
  0xc5   :  { %v641_v58 = vmax.f32 %v485_v57, 0.0 }
  0xc7   :  { %v708_v59 = vsel %vm702_vm2, %v641_v58, 0.0 }
  0xc8   :  { %v709_v60 = vadd.f32 %v708_v59, %v707_v56 }
  0xcc   :  { %v488_v62 = vpop.f32.mrf.mxu0 }
  0xcd   :  { %v642_v63 = vmax.f32 %v488_v62, 0.0 }
  0xcf   :  { %v710_v0 = vsel %vm702_vm2, %v642_v63, 0.0  ;;  %3697 = vmatmul.msk.bf16.gmra.mxu0 %vm368_vm1, %v4923_v61 }
  0xd0   :  { %v711_v1 = vadd.f32 %v710_v0, %v709_v60  ;;  %v4930_v60 = vld [vmem:[%s5931_s0 + $0x88] sm:$0xff] }
  0xd4   :  { %v490_v2 = vpop.f32.mrf.mxu0 }
  0xd5   :  { %v643_v3 = vmax.f32 %v490_v2, 0.0 }
  0xd7   :  { %v712_v4 = vsel %vm702_vm2, %v643_v3, 0.0 }
  0xd8   :  { %v713_v5 = vadd.f32 %v712_v4, %v711_v1 }
  0xdc   :  { %v493_v7 = vpop.f32.mrf.mxu0 }
  0xdd   :  { %v644_v8 = vmax.f32 %v493_v7, 0.0 }
  0xdf   :  { %v714_v9 = vsel %vm702_vm2, %v644_v8, 0.0  ;;  %3698 = vmatmul.msk.bf16.gmra.mxu0 %vm368_vm1, %v4924_v6 }
  0xe0   :  { %v715_v10 = vadd.f32 %v714_v9, %v713_v5  ;;  %v4931_v5 = vld [vmem:[%s5931_s0 + $0x90] sm:$0xff] }
  0xe4   :  { %v495_v11 = vpop.f32.mrf.mxu0 }
  0xe5   :  { %v645_v12 = vmax.f32 %v495_v11, 0.0 }
  0xe7   :  { %v716_v13 = vsel %vm702_vm2, %v645_v12, 0.0 }
  0xe8   :  { %v717_v14 = vadd.f32 %v716_v13, %v715_v10 }
  0xec   :  { %v498_v16 = vpop.f32.mrf.mxu0 }
  0xed   :  { %v646_v17 = vmax.f32 %v498_v16, 0.0 }
  0xef   :  { %v718_v18 = vsel %vm702_vm2, %v646_v17, 0.0  ;;  %3699 = vmatmul.msk.bf16.gmra.mxu0 %vm368_vm1, %v4925_v15 }
  0xf0   :  { %v719_v19 = vadd.f32 %v718_v18, %v717_v14  ;;  %v4932_v14 = vld [vmem:[%s5931_s0 + $0x98] sm:$0xff] }
  0xf4   :  { %v500_v20 = vpop.f32.mrf.mxu0 }
  0xf5   :  { %v647_v21 = vmax.f32 %v500_v20, 0.0 }
  0xf7   :  { %v720_v22 = vsel %vm702_vm2, %v647_v21, 0.0 }
  0xf8   :  { %v721_v23 = vadd.f32 %v720_v22, %v719_v19 }
  0xfc   :  { %v503_v25 = vpop.f32.mrf.mxu0 }
  0xfd   :  { %v648_v26 = vmax.f32 %v503_v25, 0.0 }
  0xff   :  { %v722_v27 = vsel %vm702_vm2, %v648_v26, 0.0  ;;  %3700 = vmatmul.msk.bf16.gmra.mxu0 %vm368_vm1, %v4926_v24 }
 0x100   :  { %v723_v28 = vadd.f32 %v722_v27, %v721_v23  ;;  %v4933_v23 = vld [vmem:[%s5931_s0 + $0xa0] sm:$0xff] }
 0x104   :  { %v505_v29 = vpop.f32.mrf.mxu0 }
 0x105   :  { %v649_v30 = vmax.f32 %v505_v29, 0.0 }
 0x107   :  { %v724_v31 = vsel %vm702_vm2, %v649_v30, 0.0 }
 0x108   :  { %v725_v32 = vadd.f32 %v724_v31, %v723_v28 }
 0x10c   :  { %v508_v34 = vpop.f32.mrf.mxu0 }
 0x10d   :  { %v650_v35 = vmax.f32 %v508_v34, 0.0 }
 0x10f   :  { %v726_v36 = vsel %vm702_vm2, %v650_v35, 0.0  ;;  %3701 = vmatmul.msk.bf16.gmra.mxu0 %vm368_vm1, %v4927_v33 }
 0x110   :  { %v727_v37 = vadd.f32 %v726_v36, %v725_v32  ;;  %v4934_v32 = vld [vmem:[%s5931_s0 + $0xa8] sm:$0xff] }
 0x114   :  { %v510_v38 = vpop.f32.mrf.mxu0 }
 0x115   :  { %v651_v39 = vmax.f32 %v510_v38, 0.0 }
 0x117   :  { %v728_v40 = vsel %vm702_vm2, %v651_v39, 0.0 }
 0x118   :  { %v729_v41 = vadd.f32 %v728_v40, %v727_v37 }
 0x11c   :  { %v513_v43 = vpop.f32.mrf.mxu0 }
 0x11d   :  { %v652_v44 = vmax.f32 %v513_v43, 0.0 }
 0x11f   :  { %v730_v45 = vsel %vm702_vm2, %v652_v44, 0.0  ;;  %3702 = vmatmul.msk.bf16.gmra.mxu0 %vm368_vm1, %v4928_v42 }
 0x120   :  { %v731_v46 = vadd.f32 %v730_v45, %v729_v41  ;;  %v4935_v41 = vld [vmem:[%s5931_s0 + $0xb0] sm:$0xff] }
 0x124   :  { %v515_v47 = vpop.f32.mrf.mxu0 }
 0x125   :  { %v653_v48 = vmax.f32 %v515_v47, 0.0 }
 0x127   :  { %v732_v49 = vsel %vm702_vm2, %v653_v48, 0.0 }
 0x128   :  { %v733_v50 = vadd.f32 %v732_v49, %v731_v46 }
 0x12c   :  { %v518_v52 = vpop.f32.mrf.mxu0 }
 0x12d   :  { %v654_v53 = vmax.f32 %v518_v52, 0.0 }
 0x12f   :  { %v734_v54 = vsel %vm702_vm2, %v654_v53, 0.0  ;;  %3703 = vmatmul.msk.bf16.gmra.mxu0 %vm368_vm1, %v4929_v51 }
 0x130   :  { %v735_v55 = vadd.f32 %v734_v54, %v733_v50  ;;  %v4936_v50 = vld [vmem:[%s5931_s0 + $0xb8] sm:$0xff] }
 0x134   :  { %v520_v56 = vpop.f32.mrf.mxu0 }
 0x135   :  { %v655_v57 = vmax.f32 %v520_v56, 0.0 }
 0x137   :  { %v736_v58 = vsel %vm702_vm2, %v655_v57, 0.0 }
 0x138   :  { %v737_v59 = vadd.f32 %v736_v58, %v735_v55 }
 0x13c   :  { %v523_v61 = vpop.f32.mrf.mxu0 }
 0x13d   :  { %v656_v62 = vmax.f32 %v523_v61, 0.0 }
 0x13f   :  { %v738_v63 = vsel %vm702_vm2, %v656_v62, 0.0  ;;  %3704 = vmatmul.msk.bf16.gmra.mxu0 %vm368_vm1, %v4930_v60 }
 0x140   :  { %v739_v0 = vadd.f32 %v738_v63, %v737_v59  ;;  %v4937_v59 = vld [vmem:[%s5931_s0 + $0xc0] sm:$0xff] }
 0x144   :  { %v525_v1 = vpop.f32.mrf.mxu0 }
 0x145   :  { %v657_v2 = vmax.f32 %v525_v1, 0.0 }
 0x147   :  { %v740_v3 = vsel %vm702_vm2, %v657_v2, 0.0 }
 0x148   :  { %v741_v4 = vadd.f32 %v740_v3, %v739_v0  ;;  %v4938_v3 = vld [vmem:[%s5931_s0 + $0xc8] sm:$0xff] }
 0x14c   :  { %v528_v6 = vpop.f32.mrf.mxu0 }
 0x14d   :  { %v658_v7 = vmax.f32 %v528_v6, 0.0 }
 0x14f   :  { %v742_v8 = vsel %vm702_vm2, %v658_v7, 0.0  ;;  %3705 = vmatmul.msk.bf16.gmra.mxu0 %vm368_vm1, %v4931_v5 }
 0x150   :  { %v743_v9 = vadd.f32 %v742_v8, %v741_v4  ;;  %v4943_v4 = vld [vmem:[%s5931_s0 + $0xf0] sm:$0xff] }
 0x151   :  { %3717 = vmatmul.msk.bf16.vlgmr.msra.gmra.mxu2 %vm368_vm1, %v4943_v4 }
 0x154   :  { %v530_v10 = vpop.f32.mrf.mxu0 }
 0x155   :  { %v659_v11 = vmax.f32 %v530_v10, 0.0 }
 0x157   :  { %v744_v12 = vsel %vm702_vm2, %v659_v11, 0.0 }
 0x158   :  { %v745_v13 = vadd.f32 %v744_v12, %v743_v9 }
 0x15c   :  { %v533_v15 = vpop.f32.mrf.mxu0 }
 0x15d   :  { %v660_v16 = vmax.f32 %v533_v15, 0.0  ;;  %v4944_v15 = vld [vmem:[%s5931_s0 + $0xf8] sm:$0xff] }
 0x15f   :  { %v746_v17 = vsel %vm702_vm2, %v660_v16, 0.0  ;;  %3706 = vmatmul.msk.bf16.gmra.mxu0 %vm368_vm1, %v4932_v14  ;;  %v4939_v14 = vld [vmem:[%s5931_s0 + $0xd0] sm:$0xff] }
 0x160   :  { %v747_v18 = vadd.f32 %v746_v17, %v745_v13  ;;  %v4942_v13 = vld [vmem:[%s5931_s0 + $0xe8] sm:$0xff] }
 0x161   :  { %3716 = vmatmul.msk.bf16.vlgmr.msra.gmra.mxu1 %vm368_vm1, %v4942_v13  ;;  %3718 = vmatmul.msk.bf16.gmra.mxu2 %vm368_vm1, %v4944_v15 }
 0x164   :  { %v535_v19 = vpop.f32.mrf.mxu0 }
 0x165   :  { %v661_v20 = vmax.f32 %v535_v19, 0.0 }
 0x167   :  { %v748_v21 = vsel %vm702_vm2, %v661_v20, 0.0 }
 0x168   :  { %v749_v22 = vadd.f32 %v748_v21, %v747_v18 }
 0x16c   :  { %v538_v24 = vpop.f32.mrf.mxu0 }
 0x16d   :  { %v662_v25 = vmax.f32 %v538_v24, 0.0  ;;  %v4940_v24 = vld [vmem:[%s5931_s0 + $0xd8] sm:$0xff] }
 0x16f   :  { %v750_v26 = vsel %vm702_vm2, %v662_v25, 0.0  ;;  %3707 = vmatmul.msk.bf16.gmra.mxu0 %vm368_vm1, %v4933_v23 }
 0x170   :  { %v751_v27 = vadd.f32 %v750_v26, %v749_v22 }
 0x174   :  { %v540_v28 = vpop.f32.mrf.mxu0 }
 0x175   :  { %v663_v29 = vmax.f32 %v540_v28, 0.0 }
 0x177   :  { %v752_v30 = vsel %vm702_vm2, %v663_v29, 0.0 }
 0x178   :  { %v753_v31 = vadd.f32 %v752_v30, %v751_v27 }
 0x17c   :  { %v543_v33 = vpop.f32.mrf.mxu0 }
 0x17d   :  { %v664_v34 = vmax.f32 %v543_v33, 0.0  ;;  %v4941_v33 = vld [vmem:[%s5931_s0 + $0xe0] sm:$0xff] }
 0x17f   :  { %v754_v35 = vsel %vm702_vm2, %v664_v34, 0.0  ;;  %3708 = vmatmul.msk.bf16.gmra.mxu0 %vm368_vm1, %v4934_v32 }
 0x180   :  { %v755_v36 = vadd.f32 %v754_v35, %v753_v31 }
 0x184   :  { %v545_v37 = vpop.f32.mrf.mxu0 }
 0x185   :  { %v665_v38 = vmax.f32 %v545_v37, 0.0 }
 0x187   :  { %v756_v39 = vsel %vm702_vm2, %v665_v38, 0.0 }
 0x188   :  { %v757_v40 = vadd.f32 %v756_v39, %v755_v36 }
 0x18c   :  { %v548_v42 = vpop.f32.mrf.mxu0 }
 0x18d   :  { %v666_v43 = vmax.f32 %v548_v42, 0.0 }
 0x18f   :  { %v758_v44 = vsel %vm702_vm2, %v666_v43, 0.0  ;;  %3709 = vmatmul.msk.bf16.gmra.mxu0 %vm368_vm1, %v4935_v41 }
 0x190   :  { %v759_v45 = vadd.f32 %v758_v44, %v757_v40 }
 0x194   :  { %v550_v46 = vpop.f32.mrf.mxu0 }
 0x195   :  { %v667_v47 = vmax.f32 %v550_v46, 0.0 }
 0x197   :  { %v760_v48 = vsel %vm702_vm2, %v667_v47, 0.0 }
 0x198   :  { %v761_v49 = vadd.f32 %v760_v48, %v759_v45 }
 0x19c   :  { %v553_v51 = vpop.f32.mrf.mxu0 }
 0x19d   :  { %v668_v52 = vmax.f32 %v553_v51, 0.0 }
 0x19f   :  { %v762_v53 = vsel %vm702_vm2, %v668_v52, 0.0  ;;  %3710 = vmatmul.msk.bf16.gmra.mxu0 %vm368_vm1, %v4936_v50 }
 0x1a0   :  { %v763_v54 = vadd.f32 %v762_v53, %v761_v49 }
 0x1a4   :  { %v555_v55 = vpop.f32.mrf.mxu0 }
 0x1a5   :  { %v669_v56 = vmax.f32 %v555_v55, 0.0 }
 0x1a7   :  { %v764_v57 = vsel %vm702_vm2, %v669_v56, 0.0 }
 0x1a8   :  { %v5607_v58 = vadd.f32 %v764_v57, %v763_v54 }
 0x1ac   :  { %v558_v60 = vpop.f32.mrf.mxu0 }
 0x1ad   :  { %v670_v61 = vmax.f32 %v558_v60, 0.0 }
 0x1af   :  { %3711 = vmatmul.msk.bf16.gmra.mxu0 %vm368_vm1, %v4937_v59  ;;  %v772_v0 = vsel %vm702_vm2, %v670_v61, 0.0 }
 0x1b4   :  { %v560_v62 = vpop.f32.mrf.mxu0 }
 0x1b5   :  { %v671_v63 = vmax.f32 %v560_v62, 0.0 }
 0x1b7   :  { %v773_v1 = vsel %vm702_vm2, %v671_v63, 0.0 }
 0x1b8   :  { %v774_v2 = vadd.f32 %v773_v1, %v772_v0 }
 0x1bc   :  { %v563_v5 = vpop.f32.mrf.mxu0 }
 0x1bd   :  { %v672_v6 = vmax.f32 %v563_v5, 0.0 }
 0x1bf   :  { %v775_v7 = vsel %vm702_vm2, %v672_v6, 0.0  ;;  %3712 = vmatmul.msk.bf16.gmra.mxu0 %vm368_vm1, %v4938_v3 }
 0x1c0   :  { %v776_v8 = vadd.f32 %v775_v7, %v774_v2 }
 0x1c4   :  { %v565_v9 = vpop.f32.mrf.mxu0 }
 0x1c5   :  { %v673_v10 = vmax.f32 %v565_v9, 0.0  ;;  %v845_v9 = vld [vmem:[%s5934_s3] sm:$0xff] }
 0x1c7   :  { %v777_v11 = vsel %vm702_vm2, %v673_v10, 0.0 }
 0x1c8   :  { %v778_v12 = vadd.f32 %v777_v11, %v776_v8  ;;  %v872_v11 = vunpack.c.h.b16 %v845_v9 }
 0x1cc   :  { %v568_v16 = vpop.f32.mrf.mxu0 }
 0x1cd   :  { %v674_v17 = vmax.f32 %v568_v16, 0.0 }
 0x1cf   :  { %v779_v18 = vsel %vm702_vm2, %v674_v17, 0.0  ;;  %3713 = vmatmul.msk.bf16.gmra.mxu0 %vm368_vm1, %v4939_v14  ;;  %v880_v14 = vpack.c.b16 %v872_v11, %v872_v11 }
 0x1d0   :  { %v780_v19 = vadd.f32 %v779_v18, %v778_v12 }
 0x1d1   :  { %v895_v17 = vsel %vm890_vm3, %v880_v14, 0 }
 0x1d2   :  { %935 = vmatpush.bf16.msrb.mxu2 %v895_v17 }
 0x1d4   :  { %v570_v20 = vpop.f32.mrf.mxu0  ;;  %v5656_v8 = vpop.f32.mrf.mxu2 }
 0x1d5   :  { %v675_v21 = vmax.f32 %v570_v20, 0.0 }
 0x1d7   :  { %v781_v22 = vsel %vm702_vm2, %v675_v21, 0.0 }
 0x1d8   :  { %v782_v23 = vadd.f32 %v781_v22, %v780_v19 }
 0x1dc   :  { %v573_v25 = vpop.f32.mrf.mxu0 }
 0x1dd   :  { %v676_v26 = vmax.f32 %v573_v25, 0.0 }
 0x1df   :  { %v783_v27 = vsel %vm702_vm2, %v676_v26, 0.0  ;;  %3714 = vmatmul.msk.bf16.gmra.mxu0 %vm368_vm1, %v4940_v24  ;;  %v630_v26 = vpop.f32.mrf.mxu2 }
 0x1e0   :  { %v784_v28 = vadd.f32 %v783_v27, %v782_v23 }
 0x1e4   :  { %v575_v29 = vpop.f32.mrf.mxu0 }
 0x1e5   :  { %v677_v30 = vmax.f32 %v575_v29, 0.0 }
 0x1e7   :  { %v785_v31 = vsel %vm702_vm2, %v677_v30, 0.0  ;;  %v623_v30 = vpop.f32.mrf.mxu1 }
 0x1e8   :  { %v786_v32 = vadd.f32 %v785_v31, %v784_v28 }
 0x1ec   :  { %v578_v34 = vpop.f32.mrf.mxu0 }
 0x1ed   :  { %v678_v35 = vmax.f32 %v578_v34, 0.0 }
 0x1ef   :  { %v787_v36 = vsel %vm702_vm2, %v678_v35, 0.0  ;;  %3715 = vmatmul.msk.bf16.gmra.mxu0 %vm368_vm1, %v4941_v33 }
 0x1f0   :  { %v788_v37 = vadd.f32 %v787_v36, %v786_v32 }
 0x1f4   :  { %v580_v38 = vpop.f32.mrf.mxu0 }
 0x1f5   :  { %v679_v39 = vmax.f32 %v580_v38, 0.0  ;;  %v846_v38 = vld [vmem:[%s5934_s3 + $0x8] sm:$0xff] }
 0x1f7   :  { %v789_v40 = vsel %vm702_vm2, %v679_v39, 0.0 }
 0x1f8   :  { %v790_v41 = vadd.f32 %v789_v40, %v788_v37 }
 0x1fc   :  { %v583_v42 = vpop.f32.mrf.mxu0 }
 0x1fd   :  { %v680_v43 = vmax.f32 %v583_v42, 0.0  ;;  %v873_v42 = vunpack.c.l.b16 %v846_v38 }
 0x1ff   :  { %v791_v44 = vsel %vm702_vm2, %v680_v43, 0.0 }
 0x200   :  { %v792_v45 = vadd.f32 %v791_v44, %v790_v41  ;;  %v871_v41 = vunpack.c.l.b16 %v845_v9 }
 0x204   :  { %v585_v46 = vpop.f32.mrf.mxu0 }
 0x205   :  { %v681_v47 = vmax.f32 %v585_v46, 0.0  ;;  %v881_v46 = vpack.c.b16 %v873_v42, %v873_v42 }
 0x207   :  { %v793_v48 = vsel %vm702_vm2, %v681_v47, 0.0 }
 0x208   :  { %v794_v49 = vadd.f32 %v793_v48, %v792_v45  ;;  %v879_v45 = vpack.c.b16 %v871_v41, %v871_v41  ;;  %v633_v48 = vpop.f32.mrf.mxu2 }
 0x20c   :  { %v588_v50 = vpop.f32.mrf.mxu0 }
 0x20d   :  { %v682_v51 = vmax.f32 %v588_v50, 0.0  ;;  %v892_v50 = vsel %vm890_vm3, %v879_v45, 0 }
 0x20e   :  { %922 = vmatpush.bf16.msrb.mxu1 %v892_v50 }
 0x20f   :  { %v795_v52 = vsel %vm702_vm2, %v682_v51, 0.0  ;;  %v898_v51 = vsel %vm890_vm3, %v881_v46, 0  ;;  %v5709_v46 = vld [vmem:[%s5935_s4] sm:$0xff] }
 0x210   :  { %v796_v53 = vadd.f32 %v795_v52, %v794_v49  ;;  %948 = vmatpush.bf16.msra.mxu3 %v898_v51 }
 0x214   :  { %v590_v54 = vpop.f32.mrf.mxu0 }
 0x215   :  { %v683_v55 = vmax.f32 %v590_v54, 0.0 }
 0x217   :  { %v797_v56 = vsel %vm702_vm2, %v683_v55, 0.0  ;;  %v696_v55 = vmax.f32 %v623_v30, 0.0 }
 0x218   :  { %v798_v57 = vadd.f32 %v797_v56, %v796_v53  ;;  %v625_v53 = vpop.f32.mrf.mxu1 }
 0x21c   :  { %v593_v59 = vpop.f32.mrf.mxu0 }
 0x21d   :  { %v684_v60 = vmax.f32 %v593_v59, 0.0 }
 0x21f   :  { %v799_v61 = vsel %vm702_vm2, %v684_v60, 0.0  ;;  %v697_v60 = vmax.f32 %v625_v53, 0.0 }
 0x220   :  { %v800_v62 = vadd.f32 %v799_v61, %v798_v57  ;;  %v874_v57 = vunpack.c.h.b16 %v846_v38 }
 0x221   :  { %v825_v9 = vsel %vm702_vm2, %v697_v60, 0.0 }
 0x224   :  { %v595_v63 = vpop.f32.mrf.mxu0 }
 0x225   :  { %v685_v7 = vmax.f32 %v595_v63, 0.0  ;;  %v698_v63 = vmax.f32 %v5656_v8, 0.0  ;;  %v766_v8 = vrot.slane %v5607_v58, 4 }
 0x227   :  { %v801_v12 = vsel %vm702_vm2, %v685_v7, 0.0  ;;  %v699_v7 = vmax.f32 %v630_v26, 0.0  ;;  %v827_v14 = vsel %vm702_vm2, %v698_v63, 0.0 }
 0x228   :  { %v802_v18 = vadd.f32 %v801_v12, %v800_v62  ;;  %v882_v62 = vpack.c.b16 %v874_v57, %v874_v57  ;;  %v853_v57 = vperm.slane %v5709_v46, 2 }
 0x22c   :  { %v598_v0 = vpop.f32.mrf.mxu0 }
 0x22d   :  { %v686_v10 = vmax.f32 %v598_v0, 0.0 }
 0x22f   :  { %v803_v15 = vsel %vm702_vm2, %v686_v10, 0.0 }
 0x230   :  { %v804_v22 = vadd.f32 %v803_v15, %v802_v18  ;;  %v700_v15 = vmax.f32 %v633_v48, 0.0  ;;  %v5715_v48 = vld [vmem:[%s5935_s4 + $0x8] sm:$0xff] }
 0x231   :  { %v1046_v53 = vperm.slane %v5715_v48, 0 }
 0x234   :  { %v600_v1 = vpop.f32.mrf.mxu0 }
 0x235   :  { %v687_v13 = vmax.f32 %v600_v1, 0.0  ;;  %v847_v1 = vld [vmem:[%s5934_s3 + $0x10] sm:$0xff] }
 0x237   :  { %v805_v20 = vsel %vm702_vm2, %v687_v13, 0.0  ;;  %v635_v13 = vpop.f32.mrf.mxu2 }
 0x238   :  { %v806_v25 = vadd.f32 %v805_v20, %v804_v22  ;;  %v701_v20 = vmax.f32 %v635_v13, 0.0  ;;  %v854_v13 = vperm.slane %v5709_v46, 3 }
 0x23c   :  { %v603_v2 = vpop.f32.mrf.mxu0 }
 0x23d   :  { %v688_v16 = vmax.f32 %v603_v2, 0.0  ;;  %v823_v2 = vsel %vm702_vm2, %v696_v55, 0.0  ;;  %v852_v55 = vperm.slane %v5709_v46, 1 }
 0x23f   :  { %v807_v23 = vsel %vm702_vm2, %v688_v16, 0.0 }
 0x240   :  { %v808_v29 = vadd.f32 %v807_v23, %v806_v25  ;;  %v831_v23 = vsel %vm702_vm2, %v700_v15, 0.0  ;;  %v833_v25 = vsel %vm702_vm2, %v701_v20, 0.0  ;;  %v1049_v20 = vperm.slane %v5715_v48, 3 }
 0x244   :  { %v605_v3 = vpop.f32.mrf.mxu0 }
 0x245   :  { %v689_v21 = vmax.f32 %v605_v3, 0.0  ;;  %v875_v3 = vunpack.c.l.b16 %v847_v1 }
 0x247   :  { %v809_v27 = vsel %vm702_vm2, %v689_v21, 0.0  ;;  %v883_v10 = vpack.c.b16 %v875_v3, %v875_v3  ;;  %v767_v21 = vadd.f32 %v766_v8, %v5607_v58 }
 0x248   :  { %v810_v33 = vadd.f32 %v809_v27, %v808_v29 }
 0x249   :  { %v904_v16 = vsel %vm890_vm3, %v883_v10, 0  ;;  %v768_v26 = vrot.slane %v767_v21, 2 }
 0x24a   :  { %974 = vmatpush.bf16.msra.mxu2 %v904_v16 }
 0x24b   :  { %v769_v29 = vadd.f32 %v768_v26, %v767_v21 }
 0x24c   :  { %v608_v4 = vpop.f32.mrf.mxu0 }
 0x24d   :  { %v690_v24 = vmax.f32 %v608_v4, 0.0  ;;  %v901_v4 = vsel %vm890_vm3, %v882_v62, 0 }
 0x24e   :  { %961 = vmatpush.bf16.msra.mxu1 %v901_v4 }
 0x24f   :  { %v811_v31 = vsel %vm702_vm2, %v690_v24, 0.0 }
 0x250   :  { %v812_v37 = vadd.f32 %v811_v31, %v810_v33  ;;  %v770_v33 = vrot.slane %v769_v29, 1 }
 0x254   :  { %v610_v5 = vpop.f32.mrf.mxu0 }
 0x255   :  { %v691_v28 = vmax.f32 %v610_v5, 0.0  ;;  %v876_v5 = vunpack.c.h.b16 %v847_v1  ;;  %v1047_v1 = vperm.slane %v5715_v48, 1 }
 0x257   :  { %v813_v35 = vsel %vm702_vm2, %v691_v28, 0.0  ;;  %v884_v11 = vpack.c.b16 %v876_v5, %v876_v5  ;;  %v1048_v5 = vperm.slane %v5715_v48, 2 }
 0x258   :  { %v814_v43 = vadd.f32 %v813_v35, %v812_v37  ;;  %v771_v37 = vadd.f32 %v770_v33, %v769_v29 }
 0x259   :  { %v907_v17 = vsel %vm890_vm3, %v884_v11, 0 }
 0x25a   :  { %987 = vmatpush.bf16.msrb.mxu3 %v907_v17 }
 0x25c   :  { %v613_v6 = vpop.f32.mrf.mxu0 }
 0x25d   :  { %v692_v32 = vmax.f32 %v613_v6, 0.0 }
 0x25f   :  { %v815_v39 = vsel %vm702_vm2, %v692_v32, 0.0  ;;  %v848_v32 = vld [vmem:[%s5934_s3 + $0x18] sm:$0xff]  ;;  %s134_s3 = sld [smem:[#allocation5]] }
 0x260   :  { %v816_v47 = vadd.f32 %v815_v39, %v814_v43  ;;  %v878_v35 = vunpack.c.h.b16 %v848_v32 }
 0x262   :  { %v886_v39 = vpack.c.b16 %v878_v35, %v878_v35  ;;  %v1051_v35 = vperm.slane %v5715_v48, 5 }
 0x264   :  { %v615_v19 = vpop.f32.mrf.mxu0 }
 0x265   :  { %v693_v36 = vmax.f32 %v615_v19, 0.0  ;;  %v829_v19 = vsel %vm702_vm2, %v699_v7, 0.0  ;;  %v5717_v50 = vstv %s134_s3 }
 0x267   :  { %v817_v44 = vsel %vm702_vm2, %v693_v36, 0.0  ;;  %v877_v36 = vunpack.c.l.b16 %v848_v32 }
 0x268   :  { %v818_v52 = vadd.f32 %v817_v44, %v816_v47  ;;  %v913_v44 = vsel %vm890_vm3, %v886_v39, 0  ;;  %v851_v47 = vperm.slane %v5709_v46, 0 }
 0x269   :  { %v885_v41 = vpack.c.b16 %v877_v36, %v877_v36 }
 0x26b   :  { %v910_v45 = vsel %vm890_vm3, %v885_v41, 0 }
 0x26c   :  { %v618_v34 = vpop.f32.mrf.mxu0 }
 0x26d   :  { %v694_v40 = vmax.f32 %v618_v34, 0.0 }
 0x26f   :  { %v819_v49 = vsel %vm702_vm2, %v694_v40, 0.0 }
 0x270   :  { %v820_v59 = vadd.f32 %v819_v49, %v818_v52  ;;  %v5722_v52 = vld [vmem:[%s5935_s4 + $0x10] sm:$0xff] }
 0x271   :  { %v1074_v10 = vperm.slane %v5722_v52, 2 }
 0x274   :  { %v620_v54 = vpop.f32.mrf.mxu0 }
 0x275   :  { %v695_v56 = vmax.f32 %v620_v54, 0.0 }
 0x277   :  { %v821_v61 = vsel %vm702_vm2, %v695_v56, 0.0  ;;  %v1072_v56 = vperm.slane %v5722_v52, 0 }
 0x278   :  { %v822_v0 = vadd.f32 %v821_v61, %v820_v59 }
 0x27a   :  { %v824_v6 = vadd.f32 %v823_v2, %v822_v0 }
 0x27c   :  { %v826_v12 = vadd.f32 %v825_v9, %v824_v6  ;;  %v1073_v6 = vperm.slane %v5722_v52, 1 }
 0x27e   :  { %v828_v18 = vadd.f32 %v827_v14, %v826_v12 }
 0x280   :  { %v830_v22 = vadd.f32 %v829_v19, %v828_v18 }
 0x282   :  { %v832_v24 = vadd.f32 %v831_v23, %v830_v22  ;;  %v855_v22 = vperm.slane %v5709_v46, 4  ;;  %v1075_v23 = vperm.slane %v5722_v52, 3 }
 0x284   :  { %v834_v27 = vadd.f32 %v833_v25, %v832_v24  ;;  %v856_v24 = vperm.slane %v5709_v46, 5 }
 0x286   :  { %v835_v28 = vrot.slane %v834_v27, 4 }
 0x288   :  { %v836_v30 = vadd.f32 %v835_v28, %v834_v27 }
 0x28a   :  { %v837_v31 = vrot.slane %v836_v30, 2 }
 0x28c   :  { %v838_v34 = vadd.f32 %v837_v31, %v836_v30  ;;  %v1050_v31 = vperm.slane %v5715_v48, 4 }
 0x28e   :  { %v839_v58 = vrot.slane %v838_v34, 1 }
 0x290   :  { %v840_v38 = vadd.f32 %v839_v58, %v838_v34  ;;  %v1076_v58 = vperm.slane %v5722_v52, 4 }
 0x292   :  { %v842_v40 = vsel %vm841_vm4, %v771_v37, %v840_v38  ;;  %v1077_v38 = vperm.slane %v5722_v52, 5 }
 0x293   :  { %v843_v42 = vmul.f32 0.00390625, %v842_v40 }
 0x295   :  { %v844_v43 = vpack.c.bf16 %v843_v42, %v843_v42  ;;  %v857_v42 = vperm.slane %v5709_v46, 6 }
 0x297   :  { %3719 = vmatmul.msk.bf16.vlgmr.msrb.gmra.mxu1 %vm702_vm2, %v844_v43  ;;  %3720 = vmatmul.msk.bf16.vlgmr.msrb.gmra.mxu2 %vm702_vm2, %v844_v43 }
 0x298   :  { %3721 = vmatmul.msk.bf16.vlgmr.msra.gmra.mxu3 %vm702_vm2, %v844_v43  ;;  %1013 = vmatpush.bf16.msrb.mxu2 %v913_v44 }
 0x299   :  { %1000 = vmatpush.bf16.msrb.mxu1 %v910_v45 }
 0x2a7   :  { %3722 = vmatmul.msk.bf16.vlgmr.msra.gmra.mxu1 %vm702_vm2, %v844_v43  ;;  %3723 = vmatmul.msk.bf16.vlgmr.msra.gmra.mxu2 %vm702_vm2, %v844_v43 }
 0x2a8   :  { %3724 = vmatmul.msk.bf16.vlgmr.msrb.gmra.mxu3 %vm702_vm2, %v844_v43 }
 0x2b7   :  { %3725 = vmatmul.msk.bf16.vlgmr.msrb.gmra.mxu1 %vm702_vm2, %v844_v43  ;;  %3726 = vmatmul.msk.bf16.vlgmr.msrb.gmra.mxu2 %vm702_vm2, %v844_v43 }
 0x314   :  { %v924_v49 = vpop.f32.mrf.mxu1 }
 0x315   :  { %v925_v51 = vadd.f32 %v924_v49, %v851_v47 }
 0x317   :  { %vm1019_vm5 = vcmp.ge.f32.partialorder %v925_v51, 0.0  ;;  %v1028_v54 = vmul.f32 %v5717_v50, %v925_v51 }
 0x319   :  { %v1036_v59 = vsel %vm1019_vm5, %v925_v51, %v1028_v54 }
 0x31a   :  { %v1062_v60 = vmul.f32 %v1046_v53, %v1036_v59  ;;  %v937_v61 = vpop.f32.mrf.mxu2  ;;  %v1052_v53 = vperm.slane %v5715_v48, 6 }
 0x31b   :  { %v938_v62 = vadd.f32 %v937_v61, %v852_v55  ;;  %v950_v63 = vpop.f32.mrf.mxu3  ;;  %v858_v55 = vperm.slane %v5709_v46, 7 }
 0x31c   :  { %v5729_v0 = vadd.f32 %v1072_v56, %v1062_v60  ;;  %v951_v2 = vadd.f32 %v950_v63, %v853_v57  ;;  %v926_v3 = vpop.f32.mrf.mxu1  ;;  %v1078_v56 = vperm.slane %v5722_v52, 6  ;;  %v1053_v63 = vperm.slane %v5715_v48, 7 }
 0x31d   :  { %vm1020_vm6 = vcmp.ge.f32.partialorder %v938_v62, 0.0  ;;  %v1029_v4 = vmul.f32 %v5717_v50, %v938_v62  ;;  %v1079_v3 = vperm.slane %v5722_v52, 7 }
 0x31e   :  { %vm1021_vm7 = vcmp.ge.f32.partialorder %v951_v2, 0.0  ;;  %v1030_v7 = vmul.f32 %v5717_v50, %v951_v2 }
 0x31f   :  { %v1037_v9 = vsel %vm1020_vm6, %v938_v62, %v1029_v4 }
 0x320   :  { %v1063_v11 = vmul.f32 %v1047_v1, %v1037_v9  ;;  %v1038_v8 = vsel %vm1021_vm7, %v951_v2, %v1030_v7 }
 0x321   :  { %v1064_v12 = vmul.f32 %v1048_v5, %v1038_v8 }
 0x322   :  { %v5738_v14 = vadd.f32 %v1073_v6, %v1063_v11  ;;  %v939_v15 = vpop.f32.mrf.mxu2 }
 0x323   :  { %v5740_v16 = vadd.f32 %v1074_v10, %v1064_v12  ;;  %v952_v17 = vpop.f32.mrf.mxu3 }
 0x324   :  { %v963_v18 = vpop.f32.mrf.mxu1 }
 0x325   :  { %v964_v19 = vadd.f32 %v963_v18, %v854_v13 }
 0x327   :  { %vm1022_vm8 = vcmp.ge.f32.partialorder %v964_v19, 0.0  ;;  %v1031_v21 = vmul.f32 %v5717_v50, %v964_v19 }
 0x329   :  { %v1039_v25 = vsel %vm1022_vm8, %v964_v19, %v1031_v21 }
 0x32a   :  { %v1065_v26 = vmul.f32 %v1049_v20, %v1039_v25  ;;  %v976_v27 = vpop.f32.mrf.mxu2 }
 0x32b   :  { %v977_v28 = vadd.f32 %v976_v27, %v855_v22  ;;  %v989_v29 = vpop.f32.mrf.mxu3 }
 0x32c   :  { %v5747_v30 = vadd.f32 %v1075_v23, %v1065_v26  ;;  %v990_v32 = vadd.f32 %v989_v29, %v856_v24  ;;  %v965_v33 = vpop.f32.mrf.mxu1 }
 0x32d   :  { %vm1023_vm9 = vcmp.ge.f32.partialorder %v977_v28, 0.0  ;;  %v1032_v34 = vmul.f32 %v5717_v50, %v977_v28 }
 0x32e   :  { %vm1024_vm10 = vcmp.ge.f32.partialorder %v990_v32, 0.0  ;;  %v1033_v36 = vmul.f32 %v5717_v50, %v990_v32 }
 0x32f   :  { %v1040_v37 = vsel %vm1023_vm9, %v977_v28, %v1032_v34 }
 0x330   :  { %v1066_v39 = vmul.f32 %v1050_v31, %v1040_v37  ;;  %v1041_v40 = vsel %vm1024_vm10, %v990_v32, %v1033_v36 }
 0x331   :  { %v1067_v41 = vmul.f32 %v1051_v35, %v1041_v40 }
 0x332   :  { %v5756_v43 = vadd.f32 %v1076_v58, %v1066_v39  ;;  %v978_v44 = vpop.f32.mrf.mxu2 }
 0x333   :  { %v5758_v45 = vadd.f32 %v1077_v38, %v1067_v41  ;;  %v991_v47 = vpop.f32.mrf.mxu3 }
 0x334   :  { %v1002_v49 = vpop.f32.mrf.mxu1 }
 0x335   :  { %v1003_v51 = vadd.f32 %v1002_v49, %v857_v42 }
 0x337   :  { %vm1025_vm11 = vcmp.ge.f32.partialorder %v1003_v51, 0.0  ;;  %v1034_v54 = vmul.f32 %v5717_v50, %v1003_v51 }
 0x339   :  { %v1042_v57 = vsel %vm1025_vm11, %v1003_v51, %v1034_v54 }
 0x33a   :  { %v1068_v59 = vmul.f32 %v1052_v53, %v1042_v57  ;;  %v1015_v60 = vpop.f32.mrf.mxu2 }
 0x33b   :  { %v1016_v61 = vadd.f32 %v1015_v60, %v858_v55 }
 0x33c   :  { %v5764_v62 = vadd.f32 %v1078_v56, %v1068_v59  ;;  %v1004_v1 = vpop.f32.mrf.mxu1 }
 0x33d   :  { %vm1026_vm12 = vcmp.ge.f32.partialorder %v1016_v61, 0.0  ;;  %v1035_v2 = vmul.f32 %v5717_v50, %v1016_v61 }
 0x33f   :  { %v1043_v4 = vsel %vm1026_vm12, %v1016_v61, %v1035_v2 }
 0x340   :  { %v1069_v5 = vmul.f32 %v1053_v63, %v1043_v4 }
 0x342   :  { %v5769_v6 = vadd.f32 %v1079_v3, %v1069_v5  ;;  %v1017_v46 = vpop.f32.mrf.mxu2 }
 0x343   :  { %5313 = dma.done.wait [#allocation4], 32768 }
 0x344   :  { %5314 = vsyncadd [#allocation4], 4294934528  ;;  %v3841_v7 = vld [vmem:[#allocation2 + $0xe0] sm:$0xf]  ;;  %v4976_v9 = vld [vmem:[#allocation2 + $0xec] sm:$0xf0] }
 0x345   :  { %v3969_v10 = vld [vmem:[#allocation2 + $0x1e0] sm:$0xf]  ;;  %v3842_v11 = vor.u32 %v4976_v9, %v3841_v7  ;;  %v5008_v8 = vld [vmem:[#allocation2 + $0x1ec] sm:$0xf0] }
 0x346   :  { %v3825_v12 = vld [vmem:[#allocation2 + $0xc0] sm:$0xf]  ;;  %v4972_v48 = vld [vmem:[#allocation2 + $0xcc] sm:$0xf0]  ;;  %v3970_v13 = vor.u32 %v5008_v8, %v3969_v10 }
 0x347   :  { %v3953_v15 = vld [vmem:[#allocation2 + $0x1c0] sm:$0xf]  ;;  %v5004_v17 = vld [vmem:[#allocation2 + $0x1cc] sm:$0xf0]  ;;  %2644 = vmatpush.bf16.msra.mxu3 %v3842_v11  ;;  %v3826_v52 = vor.u32 %v4972_v48, %v3825_v12 }
 0x348   :  { %v4097_v50 = vld [vmem:[#allocation2 + $0x2e0] sm:$0xf]  ;;  %v5040_v18 = vld [vmem:[#allocation2 + $0x2ec] sm:$0xf0]  ;;  %2657 = vmatpush.bf16.msra.mxu1 %v3970_v13  ;;  %v3954_v19 = vor.u32 %v5004_v17, %v3953_v15 }
 0x349   :  { %v4098_v20 = vor.u32 %v5040_v18, %v4097_v50  ;;  %v3809_v21 = vld [vmem:[#allocation2 + $0xa0] sm:$0xf]  ;;  %v4968_v22 = vld [vmem:[#allocation2 + $0xac] sm:$0xf0] }
 0x34a   :  { %v4081_v23 = vld [vmem:[#allocation2 + $0x2c0] sm:$0xf]  ;;  %v5000_v25 = vld [vmem:[#allocation2 + $0x1ac] sm:$0xf0]  ;;  %v3810_v28 = vor.u32 %v4968_v22, %v3809_v21 }
 0x34b   :  { %v3937_v24 = vld [vmem:[#allocation2 + $0x1a0] sm:$0xf]  ;;  %v5036_v26 = vld [vmem:[#allocation2 + $0x2cc] sm:$0xf0]  ;;  %2670 = vmatpush.bf16.msra.mxu2 %v4098_v20  ;;  %2645 = vmatpush.bf16.msra.mxu3 %v3826_v52 }
 0x34c   :  { %v4082_v27 = vor.u32 %v5036_v26, %v4081_v23  ;;  %v4065_v29 = vld [vmem:[#allocation2 + $0x2a0] sm:$0xf]  ;;  %v5032_v31 = vld [vmem:[#allocation2 + $0x2ac] sm:$0xf0]  ;;  %2658 = vmatpush.bf16.msra.mxu1 %v3954_v19  ;;  %v3938_v32 = vor.u32 %v5000_v25, %v3937_v24 }
 0x34d   :  { %v3793_v33 = vld [vmem:[#allocation2 + $0x80] sm:$0xf]  ;;  %v4964_v34 = vld [vmem:[#allocation2 + $0x8c] sm:$0xf0]  ;;  %v4066_v36 = vor.u32 %v5032_v31, %v4065_v29 }
 0x34e   :  { %v3921_v35 = vld [vmem:[#allocation2 + $0x180] sm:$0xf]  ;;  %v4996_v58 = vld [vmem:[#allocation2 + $0x18c] sm:$0xf0]  ;;  %v3794_v37 = vor.u32 %v4964_v34, %v3793_v33 }
 0x34f   :  { %2671 = vmatpush.bf16.msra.mxu2 %v4082_v27  ;;  %2646 = vmatpush.bf16.msra.mxu3 %v3810_v28  ;;  %v4049_v38 = vld [vmem:[#allocation2 + $0x280] sm:$0xf]  ;;  %v5028_v39 = vld [vmem:[#allocation2 + $0x28c] sm:$0xf0]  ;;  %v3922_v40 = vor.u32 %v4996_v58, %v3921_v35  ;;  %v5773_v35 = vpack.c.bf16 %v5729_v0, %v5729_v0 }
 0x350   :  { %2659 = vmatpush.bf16.msra.mxu1 %v3938_v32  ;;  %v3777_v41 = vld [vmem:[#allocation2 + $0x60] sm:$0xf]  ;;  %v4960_v42 = vld [vmem:[#allocation2 + $0x6c] sm:$0xf0]  ;;  %v4050_v49 = vor.u32 %v5028_v39, %v4049_v38 }
 0x351   :  { %v3905_v44 = vld [vmem:[#allocation2 + $0x160] sm:$0xf]  ;;  %v4992_v47 = vld [vmem:[#allocation2 + $0x16c] sm:$0xf0]  ;;  %v3778_v51 = vor.u32 %v4960_v42, %v3777_v41 }
 0x352   :  { %v4033_v53 = vld [vmem:[#allocation2 + $0x260] sm:$0xf]  ;;  %v5024_v54 = vld [vmem:[#allocation2 + $0x26c] sm:$0xf0]  ;;  %v3906_v55 = vor.u32 %v4992_v47, %v3905_v44  ;;  %v5781_v44 = vpack.c.bf16 %v5740_v16, %v5740_v16 }
 0x353   :  { %2672 = vmatpush.bf16.msra.mxu2 %v4066_v36  ;;  %2647 = vmatpush.bf16.msra.mxu3 %v3794_v37  ;;  %v3761_v56 = vld [vmem:[#allocation2 + $0x40] sm:$0xf]  ;;  %v4956_v57 = vld [vmem:[#allocation2 + $0x4c] sm:$0xf0]  ;;  %v4034_v61 = vor.u32 %v5024_v54, %v4033_v53  ;;  %v5777_v36 = vpack.c.bf16 %v5738_v14, %v5738_v14 }
 0x354   :  { %2660 = vmatpush.bf16.msra.mxu1 %v3922_v40  ;;  %v3889_v59 = vld [vmem:[#allocation2 + $0x140] sm:$0xf]  ;;  %v4988_v60 = vld [vmem:[#allocation2 + $0x14c] sm:$0xf0]  ;;  %v3762_v63 = vor.u32 %v4956_v57, %v3761_v56 }
 0x355   :  { %v4017_v1 = vld [vmem:[#allocation2 + $0x240] sm:$0xf]  ;;  %v5020_v2 = vld [vmem:[#allocation2 + $0x24c] sm:$0xf0]  ;;  %v3890_v3 = vor.u32 %v4988_v60, %v3889_v59 }
 0x356   :  { %v3745_v4 = vld [vmem:[#allocation2 + $0x20] sm:$0xf]  ;;  %v4952_v5 = vld [vmem:[#allocation2 + $0x2c] sm:$0xf0]  ;;  %v4018_v9 = vor.u32 %v5020_v2, %v4017_v1 }
 0x357   :  { %2673 = vmatpush.bf16.msra.mxu2 %v4050_v49  ;;  %2648 = vmatpush.bf16.msra.mxu3 %v3778_v51  ;;  %v3873_v46 = vld [vmem:[#allocation2 + $0x120] sm:$0xf]  ;;  %v4984_v7 = vld [vmem:[#allocation2 + $0x12c] sm:$0xf0]  ;;  %v3746_v10 = vor.u32 %v4952_v5, %v3745_v4 }
 0x358   :  { %2661 = vmatpush.bf16.msra.mxu1 %v3906_v55  ;;  %v4001_v11 = vld [vmem:[#allocation2 + $0x220] sm:$0xf]  ;;  %v5016_v8 = vld [vmem:[#allocation2 + $0x22c] sm:$0xf0]  ;;  %v3874_v12 = vor.u32 %v4984_v7, %v3873_v46 }
 0x359   :  { %v3729_v48 = vld [vmem:[#allocation2] sm:$0xf]  ;;  %v4948_v13 = vld [vmem:[#allocation2 + $0xc] sm:$0xf0]  ;;  %v4002_v18 = vor.u32 %v5016_v8, %v4001_v11 }
 0x35a   :  { %v3857_v15 = vld [vmem:[#allocation2 + $0x100] sm:$0xf]  ;;  %v4980_v17 = vld [vmem:[#allocation2 + $0x10c] sm:$0xf0]  ;;  %v3730_v21 = vor.u32 %v4948_v13, %v3729_v48 }
 0x35b   :  { %2674 = vmatpush.bf16.msra.mxu2 %v4034_v61  ;;  %2649 = vmatpush.bf16.msra.mxu3 %v3762_v63  ;;  %v4225_v50 = vld [vmem:[#allocation2 + $0x3e0] sm:$0xf]  ;;  %v5072_v52 = vld [vmem:[#allocation2 + $0x3ec] sm:$0xf0]  ;;  %v3858_v24 = vor.u32 %v4980_v17, %v3857_v15 }
 0x35c   :  { %2662 = vmatpush.bf16.msra.mxu1 %v3890_v3  ;;  %v4353_v19 = vld [vmem:[#allocation2 + $0x4e0] sm:$0xf]  ;;  %v5104_v20 = vld [vmem:[#allocation2 + $0x4ec] sm:$0xf0]  ;;  %v4226_v25 = vor.u32 %v5072_v52, %v4225_v50 }
 0x35d   :  { %v3985_v22 = vld [vmem:[#allocation2 + $0x200] sm:$0xf]  ;;  %v5012_v23 = vld [vmem:[#allocation2 + $0x20c] sm:$0xf0]  ;;  %v4354_v28 = vor.u32 %v5104_v20, %v4353_v19 }
 0x35e   :  { %v4481_v26 = vld [vmem:[#allocation2 + $0x5e0] sm:$0xf]  ;;  %v5136_v27 = vld [vmem:[#allocation2 + $0x5ec] sm:$0xf0]  ;;  %v3986_v32 = vor.u32 %v5012_v23, %v3985_v22 }
 0x35f   :  { %2675 = vmatpush.bf16.msra.mxu2 %v4018_v9  ;;  %2650 = vmatpush.bf16.msra.mxu3 %v3746_v10  ;;  %v4209_v29 = vld [vmem:[#allocation2 + $0x3c0] sm:$0xf]  ;;  %v5068_v31 = vld [vmem:[#allocation2 + $0x3cc] sm:$0xf0]  ;;  %v4482_v58 = vor.u32 %v5136_v27, %v4481_v26 }
 0x360   :  { %2663 = vmatpush.bf16.msra.mxu1 %v3874_v12  ;;  %v4337_v33 = vld [vmem:[#allocation2 + $0x4c0] sm:$0xf]  ;;  %v5100_v34 = vld [vmem:[#allocation2 + $0x4cc] sm:$0xf0]  ;;  %v4210_v37 = vor.u32 %v5068_v31, %v4209_v29 }
 0x361   :  { %v4465_v38 = vld [vmem:[#allocation2 + $0x5c0] sm:$0xf]  ;;  %v5132_v39 = vld [vmem:[#allocation2 + $0x5cc] sm:$0xf0]  ;;  %v4338_v40 = vor.u32 %v5100_v34, %v4337_v33 }
 0x362   :  { %v4193_v41 = vld [vmem:[#allocation2 + $0x3a0] sm:$0xf]  ;;  %v5064_v42 = vld [vmem:[#allocation2 + $0x3ac] sm:$0xf0]  ;;  %v4466_v14 = vor.u32 %v5132_v39, %v4465_v38 }
 0x363   :  { %2676 = vmatpush.bf16.msra.mxu2 %v4002_v18  ;;  %2651 = vmatpush.bf16.msra.mxu3 %v3730_v21  ;;  %v4321_v0 = vld [vmem:[#allocation2 + $0x4a0] sm:$0xf]  ;;  %v5096_v47 = vld [vmem:[#allocation2 + $0x4ac] sm:$0xf0]  ;;  %v4194_v49 = vor.u32 %v5064_v42, %v4193_v41 }
 0x364   :  { %2664 = vmatpush.bf16.msra.mxu1 %v3858_v24  ;;  %v4449_v51 = vld [vmem:[#allocation2 + $0x5a0] sm:$0xf]  ;;  %v5128_v53 = vld [vmem:[#allocation2 + $0x5ac] sm:$0xf0]  ;;  %v4322_v54 = vor.u32 %v5096_v47, %v4321_v0  ;;  %v4974_v47 = vld [vmem:[#allocation2 + $0xe4] sm:$0xf] }
 0x365   :  { %v4177_v55 = vld [vmem:[#allocation2 + $0x380] sm:$0xf]  ;;  %v5060_v56 = vld [vmem:[#allocation2 + $0x38c] sm:$0xf0]  ;;  %v4450_v59 = vor.u32 %v5128_v53, %v4449_v51 }
 0x366   :  { %2652 = vmatmul.bf16.vlgmr.msra.gmra.mxu3 %v5773_v35  ;;  %v4305_v16 = vld [vmem:[#allocation2 + $0x480] sm:$0xf]  ;;  %v5092_v57 = vld [vmem:[#allocation2 + $0x48c] sm:$0xf0]  ;;  %v4178_v60 = vor.u32 %v5060_v56, %v4177_v55  ;;  %v5788_v55 = vpack.c.bf16 %v5747_v30, %v5747_v30 }
 0x367   :  { %2683 = vmatpush.bf16.msrb.mxu3 %v4226_v25  ;;  %2677 = vmatpush.bf16.msra.mxu2 %v3986_v32  ;;  %v4433_v61 = vld [vmem:[#allocation2 + $0x580] sm:$0xf]  ;;  %v5124_v63 = vld [vmem:[#allocation2 + $0x58c] sm:$0xf0]  ;;  %v4306_v1 = vor.u32 %v5092_v57, %v4305_v16 }
 0x368   :  { %2696 = vmatpush.bf16.msrb.mxu1 %v4354_v28  ;;  %v4161_v2 = vld [vmem:[#allocation2 + $0x360] sm:$0xf]  ;;  %v5056_v3 = vld [vmem:[#allocation2 + $0x36c] sm:$0xf0]  ;;  %v4434_v46 = vor.u32 %v5124_v63, %v4433_v61  ;;  %v4970_v61 = vld [vmem:[#allocation2 + $0xc4] sm:$0xf] }
 0x369   :  { %2665 = vmatmul.bf16.vlgmr.msra.gmra.mxu1 %v5777_v36  ;;  %v4289_v4 = vld [vmem:[#allocation2 + $0x460] sm:$0xf]  ;;  %v5088_v5 = vld [vmem:[#allocation2 + $0x46c] sm:$0xf0]  ;;  %v4162_v7 = vor.u32 %v5056_v3, %v4161_v2  ;;  %v3827_v63 = vld [vmem:[#allocation2 + $0xd0] sm:$0xf0]  ;;  %v5796_v2 = vpack.c.bf16 %v5758_v45, %v5758_v45 }
 0x36a   :  { %2678 = vmatmul.bf16.vlgmr.msra.gmra.mxu2 %v5781_v44  ;;  %v4417_v9 = vld [vmem:[#allocation2 + $0x560] sm:$0xf]  ;;  %v5120_v10 = vld [vmem:[#allocation2 + $0x56c] sm:$0xf0]  ;;  %v4290_v11 = vor.u32 %v5088_v5, %v4289_v4 }
 0x36b   :  { %2709 = vmatpush.bf16.msrb.mxu2 %v4482_v58  ;;  %2684 = vmatpush.bf16.msrb.mxu3 %v4210_v37  ;;  %v4145_v8 = vld [vmem:[#allocation2 + $0x340] sm:$0xf]  ;;  %v5052_v12 = vld [vmem:[#allocation2 + $0x34c] sm:$0xf0]  ;;  %v4418_v15 = vor.u32 %v5120_v10, %v4417_v9  ;;  %v3811_v9 = vld [vmem:[#allocation2 + $0xb0] sm:$0xf0] }
 0x36c   :  { %2697 = vmatpush.bf16.msrb.mxu1 %v4338_v40  ;;  %v4273_v48 = vld [vmem:[#allocation2 + $0x440] sm:$0xf]  ;;  %v5084_v13 = vld [vmem:[#allocation2 + $0x44c] sm:$0xf0]  ;;  %v4146_v17 = vor.u32 %v5052_v12, %v4145_v8 }
 0x36d   :  { %v4401_v50 = vld [vmem:[#allocation2 + $0x540] sm:$0xf]  ;;  %v5116_v52 = vld [vmem:[#allocation2 + $0x54c] sm:$0xf0]  ;;  %v4274_v18 = vor.u32 %v5084_v13, %v4273_v48 }
 0x36e   :  { %v4129_v19 = vld [vmem:[#allocation2 + $0x320] sm:$0xf]  ;;  %v5048_v20 = vld [vmem:[#allocation2 + $0x32c] sm:$0xf0]  ;;  %v4402_v23 = vor.u32 %v5116_v52, %v4401_v50 }
 0x36f   :  { %2710 = vmatpush.bf16.msrb.mxu2 %v4466_v14  ;;  %2685 = vmatpush.bf16.msrb.mxu3 %v4194_v49  ;;  %v4257_v21 = vld [vmem:[#allocation2 + $0x420] sm:$0xf]  ;;  %v5080_v22 = vld [vmem:[#allocation2 + $0x42c] sm:$0xf0]  ;;  %v4130_v24 = vor.u32 %v5048_v20, %v4129_v19  ;;  %v3843_v14 = vld [vmem:[#allocation2 + $0xf0] sm:$0xf0] }
 0x370   :  { %2698 = vmatpush.bf16.msrb.mxu1 %v4322_v54  ;;  %v4385_v25 = vld [vmem:[#allocation2 + $0x520] sm:$0xf]  ;;  %v5112_v26 = vld [vmem:[#allocation2 + $0x52c] sm:$0xf0]  ;;  %v4258_v27 = vor.u32 %v5080_v22, %v4257_v21  ;;  %v3846_v57 = vor.u32 %v4974_v47, %v3843_v14  ;;  %v3747_v47 = vld [vmem:[#allocation2 + $0x30] sm:$0xf0] }
 0x371   :  { %v4113_v28 = vld [vmem:[#allocation2 + $0x300] sm:$0xf]  ;;  %v5044_v29 = vld [vmem:[#allocation2 + $0x30c] sm:$0xf0]  ;;  %v4386_v58 = vor.u32 %v5112_v26, %v4385_v25 }
 0x372   :  { %v4241_v31 = vld [vmem:[#allocation2 + $0x400] sm:$0xf]  ;;  %v5076_v32 = vld [vmem:[#allocation2 + $0x40c] sm:$0xf0]  ;;  %v4114_v39 = vor.u32 %v5044_v29, %v4113_v28 }
 0x373   :  { %2711 = vmatpush.bf16.msrb.mxu2 %v4450_v59  ;;  %2686 = vmatpush.bf16.msrb.mxu3 %v4178_v60  ;;  %v4609_v33 = vld [vmem:[#allocation2 + $0x6e0] sm:$0xf]  ;;  %v5168_v34 = vld [vmem:[#allocation2 + $0x6ec] sm:$0xf0]  ;;  %v4242_v42 = vor.u32 %v5076_v32, %v4241_v31  ;;  %v5792_v59 = vpack.c.bf16 %v5756_v43, %v5756_v43  ;;  %v3830_v43 = vor.u32 %v4970_v61, %v3827_v63  ;;  %v4099_v61 = vld [vmem:[#allocation2 + $0x2f0] sm:$0xf0] }
 0x374   :  { %2699 = vmatpush.bf16.msrb.mxu1 %v4306_v1  ;;  %v4737_v37 = vld [vmem:[#allocation2 + $0x7e0] sm:$0xf]  ;;  %v5200_v38 = vld [vmem:[#allocation2 + $0x7ec] sm:$0xf0]  ;;  %v4610_v0 = vor.u32 %v5168_v34, %v4609_v33  ;;  %v4954_v33 = vld [vmem:[#allocation2 + $0x44] sm:$0xf] }
 0x375   :  { %v4369_v40 = vld [vmem:[#allocation2 + $0x500] sm:$0xf]  ;;  %v5108_v41 = vld [vmem:[#allocation2 + $0x50c] sm:$0xf0]  ;;  %v4738_v49 = vor.u32 %v5200_v38, %v4737_v37  ;;  %v3763_v34 = vld [vmem:[#allocation2 + $0x50] sm:$0xf0] }
 0x376   :  { %v4593_v51 = vld [vmem:[#allocation2 + $0x6c0] sm:$0xf]  ;;  %v5164_v53 = vld [vmem:[#allocation2 + $0x6cc] sm:$0xf0]  ;;  %v4370_v54 = vor.u32 %v5108_v41, %v4369_v40  ;;  %v3766_v41 = vor.u32 %v4954_v33, %v3763_v34  ;;  %v4990_v34 = vld [vmem:[#allocation2 + $0x164] sm:$0xf] }
 0x377   :  { %2712 = vmatpush.bf16.msrb.mxu2 %v4434_v46  ;;  %2687 = vmatpush.bf16.msrb.mxu3 %v4162_v7  ;;  %v4721_v56 = vld [vmem:[#allocation2 + $0x7c0] sm:$0xf]  ;;  %v5196_v16 = vld [vmem:[#allocation2 + $0x7cc] sm:$0xf0]  ;;  %v4594_v60 = vor.u32 %v5164_v53, %v4593_v51  ;;  %v4966_v7 = vld [vmem:[#allocation2 + $0xa4] sm:$0xf] }
 0x378   :  { %2700 = vmatpush.bf16.msrb.mxu1 %v4290_v11  ;;  %v4722_v1 = vor.u32 %v5196_v16, %v4721_v56  ;;  %v4577_v30 = vld [vmem:[#allocation2 + $0x6a0] sm:$0xf]  ;;  %v5160_v3 = vld [vmem:[#allocation2 + $0x6ac] sm:$0xf0]  ;;  %v3814_v48 = vor.u32 %v4966_v7, %v3811_v9  ;;  %v5006_v56 = vld [vmem:[#allocation2 + $0x1e4] sm:$0xf] }
 0x379   :  { %v4705_v4 = vld [vmem:[#allocation2 + $0x7a0] sm:$0xf]  ;;  %v5192_v5 = vld [vmem:[#allocation2 + $0x7ac] sm:$0xf0]  ;;  %v4578_v46 = vor.u32 %v5160_v3, %v4577_v30  ;;  %v3971_v16 = vld [vmem:[#allocation2 + $0x1f0] sm:$0xf0] }
 0x37a   :  { %v4706_v45 = vor.u32 %v5192_v5, %v4705_v4  ;;  %v4561_v10 = vld [vmem:[#allocation2 + $0x680] sm:$0xf]  ;;  %v5156_v11 = vld [vmem:[#allocation2 + $0x68c] sm:$0xf0]  ;;  %v3731_v30 = vld [vmem:[#allocation2 + $0x10] sm:$0xf0]  ;;  %v3974_v4 = vor.u32 %v5006_v56, %v3971_v16 }
 0x37b   :  { %2713 = vmatpush.bf16.msrb.mxu2 %v4418_v15  ;;  %2688 = vmatpush.bf16.msrb.mxu3 %v4146_v17  ;;  %v4689_v8 = vld [vmem:[#allocation2 + $0x780] sm:$0xf]  ;;  %v5188_v12 = vld [vmem:[#allocation2 + $0x78c] sm:$0xf0]  ;;  %v4562_v13 = vor.u32 %v5156_v11, %v4561_v10  ;;  %v4962_v15 = vld [vmem:[#allocation2 + $0x84] sm:$0xf] }
 0x37c   :  { %2701 = vmatpush.bf16.msrb.mxu1 %v4274_v18  ;;  %v3795_v17 = vld [vmem:[#allocation2 + $0x90] sm:$0xf0]  ;;  %v4690_v50 = vor.u32 %v5188_v12, %v4689_v8  ;;  %v4545_v52 = vld [vmem:[#allocation2 + $0x660] sm:$0xf]  ;;  %v5152_v18 = vld [vmem:[#allocation2 + $0x66c] sm:$0xf0] }
 0x37d   :  { %v4673_v19 = vld [vmem:[#allocation2 + $0x760] sm:$0xf]  ;;  %v5184_v20 = vld [vmem:[#allocation2 + $0x76c] sm:$0xf0]  ;;  %v3798_v21 = vor.u32 %v4962_v15, %v3795_v17  ;;  %v4546_v22 = vor.u32 %v5152_v18, %v4545_v52  ;;  %v5070_v5 = vld [vmem:[#allocation2 + $0x3e4] sm:$0xf] }
 0x37e   :  { %v4674_v25 = vor.u32 %v5184_v20, %v4673_v19  ;;  %v4529_v26 = vld [vmem:[#allocation2 + $0x640] sm:$0xf]  ;;  %v5180_v29 = vld [vmem:[#allocation2 + $0x74c] sm:$0xf0]  ;;  %v5002_v7 = vld [vmem:[#allocation2 + $0x1c4] sm:$0xf] }
 0x37f   :  { %2714 = vmatpush.bf16.msrb.mxu2 %v4402_v23  ;;  %2689 = vmatpush.bf16.msrb.mxu3 %v4130_v24  ;;  %v4958_v23 = vld [vmem:[#allocation2 + $0x64] sm:$0xf]  ;;  %v3779_v24 = vld [vmem:[#allocation2 + $0x70] sm:$0xf0]  ;;  %v4657_v28 = vld [vmem:[#allocation2 + $0x740] sm:$0xf] }
 0x380   :  { %2702 = vmatpush.bf16.msrb.mxu1 %v4258_v27  ;;  %v5148_v27 = vld [vmem:[#allocation2 + $0x64c] sm:$0xf0]  ;;  %v3782_v31 = vor.u32 %v4958_v23, %v3779_v24  ;;  %v4513_v37 = vld [vmem:[#allocation2 + $0x620] sm:$0xf]  ;;  %v3955_v9 = vld [vmem:[#allocation2 + $0x1d0] sm:$0xf0] }
 0x381   :  { %v4530_v32 = vor.u32 %v5148_v27, %v4529_v26  ;;  %v5144_v38 = vld [vmem:[#allocation2 + $0x62c] sm:$0xf0]  ;;  %v4625_v53 = vld [vmem:[#allocation2 + $0x700] sm:$0xf]  ;;  %v5034_v11 = vld [vmem:[#allocation2 + $0x2c4] sm:$0xf] }
 0x382   :  { %v5176_v40 = vld [vmem:[#allocation2 + $0x72c] sm:$0xf0]  ;;  %v4083_v8 = vld [vmem:[#allocation2 + $0x2d0] sm:$0xf0]  ;;  %v5066_v15 = vld [vmem:[#allocation2 + $0x3c4] sm:$0xf] }
 0x383   :  { %2715 = vmatpush.bf16.msrb.mxu2 %v4386_v58  ;;  %2690 = vmatpush.bf16.msrb.mxu3 %v4114_v39  ;;  %v4658_v58 = vor.u32 %v5180_v29, %v4657_v28  ;;  %v4641_v39 = vld [vmem:[#allocation2 + $0x720] sm:$0xf]  ;;  %v5140_v51 = vld [vmem:[#allocation2 + $0x60c] sm:$0xf0]  ;;  %v4211_v17 = vld [vmem:[#allocation2 + $0x3d0] sm:$0xf0] }
 0x384   :  { %2703 = vmatpush.bf16.msrb.mxu1 %v4242_v42  ;;  %v4514_v42 = vor.u32 %v5144_v38, %v4513_v37  ;;  %v4642_v14 = vor.u32 %v5176_v40, %v4641_v39  ;;  %v4998_v52 = vld [vmem:[#allocation2 + $0x1a4] sm:$0xf]  ;;  %v3939_v18 = vld [vmem:[#allocation2 + $0x1b0] sm:$0xf0]  ;;  %v4214_v20 = vor.u32 %v5066_v15, %v4211_v17 }
 0x385   :  { %v4067_v19 = vld [vmem:[#allocation2 + $0x2b0] sm:$0xf0]  ;;  %v4994_v24 = vld [vmem:[#allocation2 + $0x184] sm:$0xf] }
 0x386   :  { %2691 = vmatmul.bf16.vlgmr.msrb.gmra.mxu3 %v5788_v55  ;;  %v5026_v26 = vld [vmem:[#allocation2 + $0x284] sm:$0xf]  ;;  %v4051_v27 = vld [vmem:[#allocation2 + $0x290] sm:$0xf0] }
 0x387   :  { %2722 = vmatpush.bf16.msra.mxu3 %v4610_v0  ;;  %2716 = vmatpush.bf16.msrb.mxu2 %v4370_v54  ;;  %v4950_v0 = vld [vmem:[#allocation2 + $0x24] sm:$0xf]  ;;  %v5172_v54 = vld [vmem:[#allocation2 + $0x70c] sm:$0xf0]  ;;  %v4054_v33 = vor.u32 %v5026_v26, %v4051_v27  ;;  %v4035_v38 = vld [vmem:[#allocation2 + $0x270] sm:$0xf0] }
 0x388   :  { %2735 = vmatpush.bf16.msra.mxu1 %v4738_v49  ;;  %v4497_v49 = vld [vmem:[#allocation2 + $0x600] sm:$0xf]  ;;  %v4626_v3 = vor.u32 %v5172_v54, %v4625_v53  ;;  %v5022_v37 = vld [vmem:[#allocation2 + $0x264] sm:$0xf]  ;;  %v4147_v16 = vld [vmem:[#allocation2 + $0x350] sm:$0xf0] }
 0x389   :  { %2704 = vmatmul.bf16.vlgmr.msrb.gmra.mxu1 %v5792_v59  ;;  %v4498_v63 = vor.u32 %v5140_v51, %v4497_v49  ;;  %v5018_v49 = vld [vmem:[#allocation2 + $0x244] sm:$0xf]  ;;  %v4019_v51 = vld [vmem:[#allocation2 + $0x250] sm:$0xf0] }
 0x38a   :  { %2717 = vmatmul.bf16.vlgmr.msrb.gmra.mxu2 %v5796_v2  ;;  %v5050_v56 = vld [vmem:[#allocation2 + $0x344] sm:$0xf]  ;;  %v4483_v15 = vld [vmem:[#allocation2 + $0x5f0] sm:$0xf0] }
 0x38b   :  { %2748 = vmatpush.bf16.msra.mxu2 %v3846_v57  ;;  %2723 = vmatpush.bf16.msra.mxu3 %v4594_v60  ;;  %v3750_v57 = vor.u32 %v4950_v0, %v3747_v47  ;;  %v5038_v60 = vld [vmem:[#allocation2 + $0x2e4] sm:$0xf]  ;;  %v4038_v0 = vor.u32 %v5022_v37, %v4035_v38 }
 0x38c   :  { %2736 = vmatpush.bf16.msra.mxu1 %v4722_v1  ;;  %v4946_v1 = vld [vmem:[#allocation2 + $0x4] sm:$0xf] }
 0x38d   :  { %v3734_v10 = vor.u32 %v4946_v1, %v3731_v30  ;;  %v4986_v47 = vld [vmem:[#allocation2 + $0x144] sm:$0xf]  ;;  %v4003_v1 = vld [vmem:[#allocation2 + $0x230] sm:$0xf0]  ;;  %v4150_v30 = vor.u32 %v5050_v56, %v4147_v16 }
 0x38e   :  { %v5086_v16 = vld [vmem:[#allocation2 + $0x464] sm:$0xf] }
 0x38f   :  { %2749 = vmatpush.bf16.msra.mxu2 %v3830_v43  ;;  %2724 = vmatpush.bf16.msra.mxu3 %v4578_v46  ;;  %v4227_v43 = vld [vmem:[#allocation2 + $0x3f0] sm:$0xf0]  ;;  %v4102_v46 = vor.u32 %v5038_v60, %v4099_v61  ;;  %v4982_v60 = vld [vmem:[#allocation2 + $0x124] sm:$0xf] }
 0x390   :  { %2737 = vmatpush.bf16.msra.mxu1 %v4706_v45  ;;  %v5803_v45 = vpack.c.bf16 %v5764_v62, %v5764_v62  ;;  %v4230_v12 = vor.u32 %v5070_v5, %v4227_v43  ;;  %v5030_v62 = vld [vmem:[#allocation2 + $0x2a4] sm:$0xf]  ;;  %v3875_v61 = vld [vmem:[#allocation2 + $0x130] sm:$0xf0] }
 0x391   :  { %v4070_v23 = vor.u32 %v5030_v62, %v4067_v19  ;;  %v4131_v5 = vld [vmem:[#allocation2 + $0x330] sm:$0xf0]  ;;  %v5166_v19 = vld [vmem:[#allocation2 + $0x6e4] sm:$0xf] }
 0x393   :  { %2750 = vmatpush.bf16.msra.mxu2 %v3814_v48  ;;  %2725 = vmatpush.bf16.msra.mxu3 %v4562_v13  ;;  %v5807_v48 = vpack.c.bf16 %v5769_v6, %v5769_v6  ;;  %v3958_v13 = vor.u32 %v5002_v7, %v3955_v9  ;;  %v3942_v6 = vor.u32 %v4998_v52, %v3939_v18  ;;  %v3859_v7 = vld [vmem:[#allocation2 + $0x110] sm:$0xf0]  ;;  %v5010_v9 = vld [vmem:[#allocation2 + $0x204] sm:$0xf] }
 0x394   :  { %2738 = vmatpush.bf16.msra.mxu1 %v4690_v50  ;;  %v4086_v50 = vor.u32 %v5034_v11, %v4083_v8  ;;  %v5102_v11 = vld [vmem:[#allocation2 + $0x4e4] sm:$0xf]  ;;  %v4355_v8 = vld [vmem:[#allocation2 + $0x4f0] sm:$0xf0] }
 0x395   :  { %v4115_v52 = vld [vmem:[#allocation2 + $0x310] sm:$0xf0]  ;;  %v4358_v62 = vor.u32 %v5102_v11, %v4355_v8  ;;  %v5146_v11 = vld [vmem:[#allocation2 + $0x644] sm:$0xf] }
 0x396   :  { %v4531_v8 = vld [vmem:[#allocation2 + $0x650] sm:$0xf0] }
 0x397   :  { %2751 = vmatpush.bf16.msra.mxu2 %v3798_v21  ;;  %2726 = vmatpush.bf16.msra.mxu3 %v4546_v22  ;;  %v5062_v21 = vld [vmem:[#allocation2 + $0x3a4] sm:$0xf]  ;;  %v4195_v22 = vld [vmem:[#allocation2 + $0x3b0] sm:$0xf0] }
 0x398   :  { %2739 = vmatpush.bf16.msra.mxu1 %v4674_v25  ;;  %v3923_v25 = vld [vmem:[#allocation2 + $0x190] sm:$0xf0]  ;;  %v4198_v28 = vor.u32 %v5062_v21, %v4195_v22  ;;  %v5098_v21 = vld [vmem:[#allocation2 + $0x4c4] sm:$0xf] }
 0x399   :  { %v3926_v29 = vor.u32 %v4994_v24, %v3923_v25  ;;  %v4339_v22 = vld [vmem:[#allocation2 + $0x4d0] sm:$0xf0]  ;;  %v5130_v24 = vld [vmem:[#allocation2 + $0x5c4] sm:$0xf] }
 0x39a   :  { %v4467_v25 = vld [vmem:[#allocation2 + $0x5d0] sm:$0xf0]  ;;  %v4342_v27 = vor.u32 %v5098_v21, %v4339_v22  ;;  %v5106_v22 = vld [vmem:[#allocation2 + $0x504] sm:$0xf] }
 0x39b   :  { %2752 = vmatpush.bf16.msra.mxu2 %v3782_v31  ;;  %2727 = vmatpush.bf16.msra.mxu3 %v4530_v32  ;;  %v5058_v31 = vld [vmem:[#allocation2 + $0x384] sm:$0xf]  ;;  %v4179_v32 = vld [vmem:[#allocation2 + $0x390] sm:$0xf0] }
 0x39c   :  { %2740 = vmatpush.bf16.msra.mxu1 %v4658_v58  ;;  %v3907_v58 = vld [vmem:[#allocation2 + $0x170] sm:$0xf0]  ;;  %v4182_v39 = vor.u32 %v5058_v31, %v4179_v32  ;;  %v4470_v31 = vor.u32 %v5130_v24, %v4467_v25  ;;  %v5094_v32 = vld [vmem:[#allocation2 + $0x4a4] sm:$0xf] }
 0x39d   :  { %v3910_v40 = vor.u32 %v4990_v34, %v3907_v58  ;;  %v5126_v34 = vld [vmem:[#allocation2 + $0x5a4] sm:$0xf]  ;;  %v4451_v58 = vld [vmem:[#allocation2 + $0x5b0] sm:$0xf0] }
 0x39e   :  { %v4243_v21 = vld [vmem:[#allocation2 + $0x410] sm:$0xf0]  ;;  %v5198_v24 = vld [vmem:[#allocation2 + $0x7e4] sm:$0xf] }
 0x39f   :  { %2753 = vmatpush.bf16.msra.mxu2 %v3766_v41  ;;  %2728 = vmatpush.bf16.msra.mxu3 %v4514_v42  ;;  %v5054_v41 = vld [vmem:[#allocation2 + $0x364] sm:$0xf]  ;;  %v4163_v42 = vld [vmem:[#allocation2 + $0x370] sm:$0xf0] }
 0x3a0   :  { %2741 = vmatpush.bf16.msra.mxu1 %v4642_v14  ;;  %v3891_v14 = vld [vmem:[#allocation2 + $0x150] sm:$0xf0]  ;;  %v4166_v53 = vor.u32 %v5054_v41, %v4163_v42  ;;  %v4454_v41 = vor.u32 %v5126_v34, %v4451_v58  ;;  %v5090_v42 = vld [vmem:[#allocation2 + $0x484] sm:$0xf]  ;;  %v3977_v58 = vld [vmem:[#allocation2 + $0x1e8] sm:$0xf] }
 0x3a1   :  { %v3894_v54 = vor.u32 %v4986_v47, %v3891_v14  ;;  %v5122_v47 = vld [vmem:[#allocation2 + $0x584] sm:$0xf]  ;;  %v4435_v14 = vld [vmem:[#allocation2 + $0x590] sm:$0xf0] }
 0x3a2   :  { %v4438_v56 = vor.u32 %v5122_v47, %v4435_v14  ;;  %v4739_v25 = vld [vmem:[#allocation2 + $0x7f0] sm:$0xf0] }
 0x3a3   :  { %2754 = vmatpush.bf16.msra.mxu2 %v3750_v57  ;;  %2729 = vmatpush.bf16.msra.mxu3 %v4498_v63  ;;  %v4022_v57 = vor.u32 %v5018_v49, %v4019_v51  ;;  %v5014_v63 = vld [vmem:[#allocation2 + $0x224] sm:$0xf]  ;;  %v4742_v34 = vor.u32 %v5198_v24, %v4739_v25  ;;  %v3897_v25 = vld [vmem:[#allocation2 + $0x148] sm:$0xf] }
 0x3a4   :  { %2742 = vmatpush.bf16.msra.mxu1 %v4626_v3  ;;  %v3878_v3 = vor.u32 %v4982_v60, %v3875_v61  ;;  %v4006_v43 = vor.u32 %v5014_v63, %v4003_v1  ;;  %v5118_v60 = vld [vmem:[#allocation2 + $0x564] sm:$0xf]  ;;  %v4419_v61 = vld [vmem:[#allocation2 + $0x570] sm:$0xf0] }
 0x3a6   :  { %2730 = vmatmul.bf16.vlgmr.msra.gmra.mxu3 %v5803_v45 }
 0x3a7   :  { %2761 = vmatpush.bf16.msrb.mxu3 %v3974_v4  ;;  %2755 = vmatpush.bf16.msra.mxu2 %v3734_v10  ;;  %v5046_v4 = vld [vmem:[#allocation2 + $0x324] sm:$0xf]  ;;  %v3987_v10 = vld [vmem:[#allocation2 + $0x210] sm:$0xf0] }
 0x3a8   :  { %2774 = vmatpush.bf16.msrb.mxu1 %v4102_v46  ;;  %v4978_v46 = vld [vmem:[#allocation2 + $0x104] sm:$0xf]  ;;  %v3990_v18 = vor.u32 %v5010_v9, %v3987_v10 }
 0x3a9   :  { %2743 = vmatmul.bf16.vlgmr.msra.gmra.mxu1 %v5807_v48  ;;  %v3862_v17 = vor.u32 %v4978_v46, %v3859_v7  ;;  %v5114_v46 = vld [vmem:[#allocation2 + $0x544] sm:$0xf]  ;;  %v4403_v7 = vld [vmem:[#allocation2 + $0x550] sm:$0xf0] }
 0x3aa   :  { %2756 = vmatmul.bf16.vlgmr.msra.gmra.mxu2 %v5773_v35 }
 0x3ab   :  { %2787 = vmatpush.bf16.msrb.mxu2 %v4230_v12  ;;  %2762 = vmatpush.bf16.msrb.mxu3 %v3958_v13  ;;  %v4134_v12 = vor.u32 %v5046_v4, %v4131_v5  ;;  %v5134_v13 = vld [vmem:[#allocation2 + $0x5e4] sm:$0xf]  ;;  %v4422_v4 = vor.u32 %v5118_v60, %v4419_v61 }
 0x3ac   :  { %2775 = vmatpush.bf16.msrb.mxu1 %v4086_v50  ;;  %v5042_v50 = vld [vmem:[#allocation2 + $0x304] sm:$0xf] }
 0x3ad   :  { %v5082_v5 = vld [vmem:[#allocation2 + $0x444] sm:$0xf] }
 0x3af   :  { %2788 = vmatpush.bf16.msrb.mxu2 %v4214_v20  ;;  %2763 = vmatpush.bf16.msrb.mxu3 %v3942_v6  ;;  %v4611_v20 = vld [vmem:[#allocation2 + $0x6f0] sm:$0xf0]  ;;  %v4486_v6 = vor.u32 %v5134_v13, %v4483_v15  ;;  %v5078_v13 = vld [vmem:[#allocation2 + $0x424] sm:$0xf] }
 0x3b0   :  { %2776 = vmatpush.bf16.msrb.mxu1 %v4070_v23  ;;  %v4118_v23 = vor.u32 %v5042_v50, %v4115_v52  ;;  %v4614_v26 = vor.u32 %v5166_v19, %v4611_v20  ;;  %v4259_v15 = vld [vmem:[#allocation2 + $0x430] sm:$0xf0]  ;;  %v4534_v52 = vor.u32 %v5146_v11, %v4531_v8  ;;  %v5182_v8 = vld [vmem:[#allocation2 + $0x764] sm:$0xf] }
 0x3b1   :  { %v4387_v50 = vld [vmem:[#allocation2 + $0x530] sm:$0xf0] }
 0x3b2   :  { %v4515_v19 = vld [vmem:[#allocation2 + $0x630] sm:$0xf0] }
 0x3b3   :  { %2789 = vmatpush.bf16.msrb.mxu2 %v4198_v28  ;;  %2764 = vmatpush.bf16.msrb.mxu3 %v3926_v29  ;;  %v5162_v28 = vld [vmem:[#allocation2 + $0x6c4] sm:$0xf]  ;;  %v4595_v29 = vld [vmem:[#allocation2 + $0x6d0] sm:$0xf0] }
 0x3b4   :  { %2777 = vmatpush.bf16.msrb.mxu1 %v4054_v33  ;;  %v4323_v33 = vld [vmem:[#allocation2 + $0x4b0] sm:$0xf0]  ;;  %v4598_v37 = vor.u32 %v5162_v28, %v4595_v29  ;;  %v4977_v28 = vld [vmem:[#allocation2 + $0xf4] sm:$0xf0] }
 0x3b5   :  { %v4326_v38 = vor.u32 %v5094_v32, %v4323_v33  ;;  %v4499_v32 = vld [vmem:[#allocation2 + $0x610] sm:$0xf0] }
 0x3b7   :  { %2790 = vmatpush.bf16.msrb.mxu2 %v4182_v39  ;;  %2765 = vmatpush.bf16.msrb.mxu3 %v3910_v40  ;;  %v5158_v39 = vld [vmem:[#allocation2 + $0x6a4] sm:$0xf]  ;;  %v4579_v40 = vld [vmem:[#allocation2 + $0x6b0] sm:$0xf0] }
 0x3b8   :  { %2778 = vmatpush.bf16.msrb.mxu1 %v4038_v0  ;;  %v4307_v0 = vld [vmem:[#allocation2 + $0x490] sm:$0xf0]  ;;  %v4582_v49 = vor.u32 %v5158_v39, %v4579_v40  ;;  %v5194_v39 = vld [vmem:[#allocation2 + $0x7c4] sm:$0xf] }
 0x3b9   :  { %v4310_v51 = vor.u32 %v5090_v42, %v4307_v0  ;;  %v4723_v40 = vld [vmem:[#allocation2 + $0x7d0] sm:$0xf0]  ;;  %v3833_v42 = vld [vmem:[#allocation2 + $0xc8] sm:$0xf]  ;;  %v4973_v0 = vld [vmem:[#allocation2 + $0xd4] sm:$0xf0] }
 0x3ba   :  { %v4726_v14 = vor.u32 %v5194_v39, %v4723_v40  ;;  %v4985_v39 = vld [vmem:[#allocation2 + $0x134] sm:$0xf0] }
 0x3bb   :  { %2791 = vmatpush.bf16.msrb.mxu2 %v4166_v53  ;;  %2766 = vmatpush.bf16.msrb.mxu3 %v3894_v54  ;;  %v5154_v53 = vld [vmem:[#allocation2 + $0x684] sm:$0xf]  ;;  %v4563_v54 = vld [vmem:[#allocation2 + $0x690] sm:$0xf0] }
 0x3bc   :  { %2779 = vmatpush.bf16.msrb.mxu1 %v4022_v57  ;;  %v4291_v57 = vld [vmem:[#allocation2 + $0x470] sm:$0xf0]  ;;  %v4566_v63 = vor.u32 %v5154_v53, %v4563_v54  ;;  %v3834_v53 = vor.u32 %v4973_v0, %v3833_v42  ;;  %v5190_v54 = vld [vmem:[#allocation2 + $0x7a4] sm:$0xf] }
 0x3bd   :  { %v4294_v1 = vor.u32 %v5086_v16, %v4291_v57  ;;  %v3817_v16 = vld [vmem:[#allocation2 + $0xa8] sm:$0xf]  ;;  %v4969_v57 = vld [vmem:[#allocation2 + $0xb4] sm:$0xf0]  ;;  %v5170_v0 = vld [vmem:[#allocation2 + $0x704] sm:$0xf] }
 0x3bf   :  { %2792 = vmatpush.bf16.msrb.mxu2 %v4150_v30  ;;  %2767 = vmatpush.bf16.msrb.mxu3 %v3878_v3  ;;  %v5150_v30 = vld [vmem:[#allocation2 + $0x664] sm:$0xf]  ;;  %v4547_v3 = vld [vmem:[#allocation2 + $0x670] sm:$0xf0] }
 0x3c0   :  { %2780 = vmatpush.bf16.msrb.mxu1 %v4006_v43  ;;  %v4275_v43 = vld [vmem:[#allocation2 + $0x450] sm:$0xf0]  ;;  %v4550_v9 = vor.u32 %v5150_v30, %v4547_v3  ;;  %v3818_v30 = vor.u32 %v4969_v57, %v3817_v16  ;;  %v5186_v3 = vld [vmem:[#allocation2 + $0x784] sm:$0xf]  ;;  %v4233_v16 = vld [vmem:[#allocation2 + $0x3e8] sm:$0xf] }
 0x3c1   :  { %v4278_v10 = vor.u32 %v5082_v5, %v4275_v43  ;;  %v3801_v5 = vld [vmem:[#allocation2 + $0x88] sm:$0xf]  ;;  %v4965_v43 = vld [vmem:[#allocation2 + $0x94] sm:$0xf0] }
 0x3c2   :  { %v3802_v11 = vor.u32 %v4965_v43, %v3801_v5  ;;  %v5073_v57 = vld [vmem:[#allocation2 + $0x3f4] sm:$0xf0] }
 0x3c3   :  { %2793 = vmatpush.bf16.msrb.mxu2 %v4134_v12  ;;  %2768 = vmatpush.bf16.msrb.mxu3 %v3862_v17  ;;  %v4406_v12 = vor.u32 %v5114_v46, %v4403_v7  ;;  %v5110_v17 = vld [vmem:[#allocation2 + $0x524] sm:$0xf]  ;;  %v4234_v43 = vor.u32 %v5073_v57, %v4233_v16  ;;  %v4281_v57 = vld [vmem:[#allocation2 + $0x448] sm:$0xf] }
 0x3c4   :  { %2781 = vmatpush.bf16.msrb.mxu1 %v3990_v18  ;;  %v4262_v18 = vor.u32 %v5078_v13, %v4259_v15  ;;  %v4390_v20 = vor.u32 %v5110_v17, %v4387_v50  ;;  %v3785_v13 = vld [vmem:[#allocation2 + $0x68] sm:$0xf]  ;;  %v4961_v15 = vld [vmem:[#allocation2 + $0x74] sm:$0xf0] }
 0x3c6   :  { %2769 = vmatmul.bf16.vlgmr.msrb.gmra.mxu3 %v5777_v36 }
 0x3c7   :  { %2800 = vmatpush.bf16.msra.mxu3 %v4358_v62  ;;  %2794 = vmatpush.bf16.msrb.mxu2 %v4118_v23  ;;  %v5142_v62 = vld [vmem:[#allocation2 + $0x624] sm:$0xf]  ;;  %v4371_v23 = vld [vmem:[#allocation2 + $0x510] sm:$0xf0] }
 0x3c8   :  { %2813 = vmatpush.bf16.msra.mxu1 %v4486_v6  ;;  %v5074_v6 = vld [vmem:[#allocation2 + $0x404] sm:$0xf]  ;;  %v4374_v33 = vor.u32 %v5106_v22, %v4371_v23  ;;  %v4957_v22 = vld [vmem:[#allocation2 + $0x54] sm:$0xf0] }
 0x3c9   :  { %2782 = vmatmul.bf16.vlgmr.msrb.gmra.mxu1 %v5781_v44  ;;  %v4246_v29 = vor.u32 %v5074_v6, %v4243_v21  ;;  %v4659_v6 = vld [vmem:[#allocation2 + $0x750] sm:$0xf0]  ;;  %v3769_v21 = vld [vmem:[#allocation2 + $0x48] sm:$0xf] }
 0x3ca   :  { %2795 = vmatmul.bf16.vlgmr.msrb.gmra.mxu2 %v5788_v55 }
 0x3cb   :  { %2826 = vmatpush.bf16.msra.mxu2 %v4614_v26  ;;  %2801 = vmatpush.bf16.msra.mxu3 %v4342_v27  ;;  %v4518_v26 = vor.u32 %v5142_v62, %v4515_v19  ;;  %v3849_v27 = vld [vmem:[#allocation2 + $0xe8] sm:$0xf]  ;;  %v3786_v19 = vor.u32 %v4961_v15, %v3785_v13 }
 0x3cc   :  { %2814 = vmatpush.bf16.msra.mxu1 %v4470_v31  ;;  %v5138_v31 = vld [vmem:[#allocation2 + $0x604] sm:$0xf]  ;;  %v4345_v15 = vld [vmem:[#allocation2 + $0x4c8] sm:$0xf] }
 0x3cf   :  { %2827 = vmatpush.bf16.msra.mxu2 %v4598_v37  ;;  %2802 = vmatpush.bf16.msra.mxu3 %v4326_v38  ;;  %v5009_v37 = vld [vmem:[#allocation2 + $0x1f4] sm:$0xf0]  ;;  %v3850_v38 = vor.u32 %v4977_v28, %v3849_v27  ;;  %v3770_v27 = vor.u32 %v4957_v22, %v3769_v21  ;;  %v5174_v28 = vld [vmem:[#allocation2 + $0x724] sm:$0xf]  ;;  %v4329_v21 = vld [vmem:[#allocation2 + $0x4a8] sm:$0xf] }
 0x3d0   :  { %2815 = vmatpush.bf16.msra.mxu1 %v4454_v41  ;;  %v4502_v41 = vor.u32 %v5138_v31, %v4499_v32  ;;  %v3978_v47 = vor.u32 %v5009_v37, %v3977_v58  ;;  %v3753_v32 = vld [vmem:[#allocation2 + $0x28] sm:$0xf]  ;;  %v5097_v22 = vld [vmem:[#allocation2 + $0x4b4] sm:$0xf0] }
 0x3d3   :  { %2828 = vmatpush.bf16.msra.mxu2 %v4582_v49  ;;  %2803 = vmatpush.bf16.msra.mxu3 %v4310_v51  ;;  %v3961_v49 = vld [vmem:[#allocation2 + $0x1c8] sm:$0xf]  ;;  %v5005_v51 = vld [vmem:[#allocation2 + $0x1d4] sm:$0xf0] }
 0x3d4   :  { %2816 = vmatpush.bf16.msra.mxu1 %v4438_v56  ;;  %v4707_v56 = vld [vmem:[#allocation2 + $0x7b0] sm:$0xf0]  ;;  %v3962_v60 = vor.u32 %v5005_v51, %v3961_v49  ;;  %v4949_v51 = vld [vmem:[#allocation2 + $0x14] sm:$0xf0] }
 0x3d5   :  { %v4710_v61 = vor.u32 %v5190_v54, %v4707_v56  ;;  %v5041_v54 = vld [vmem:[#allocation2 + $0x2f4] sm:$0xf0] }
 0x3d7   :  { %2829 = vmatpush.bf16.msra.mxu2 %v4566_v63  ;;  %2804 = vmatpush.bf16.msra.mxu3 %v4294_v1  ;;  %v3945_v63 = vld [vmem:[#allocation2 + $0x1a8] sm:$0xf]  ;;  %v5001_v1 = vld [vmem:[#allocation2 + $0x1b4] sm:$0xf0] }
 0x3d8   :  { %2817 = vmatpush.bf16.msra.mxu1 %v4422_v4  ;;  %v4691_v4 = vld [vmem:[#allocation2 + $0x790] sm:$0xf0]  ;;  %v3946_v46 = vor.u32 %v5001_v1, %v3945_v63  ;;  %v4981_v63 = vld [vmem:[#allocation2 + $0x114] sm:$0xf0] }
 0x3d9   :  { %v4694_v7 = vor.u32 %v5186_v3, %v4691_v4  ;;  %v4361_v3 = vld [vmem:[#allocation2 + $0x4e8] sm:$0xf]  ;;  %v5105_v4 = vld [vmem:[#allocation2 + $0x4f4] sm:$0xf0] }
 0x3db   :  { %2830 = vmatpush.bf16.msra.mxu2 %v4550_v9  ;;  %2805 = vmatpush.bf16.msra.mxu3 %v4278_v10  ;;  %v3929_v9 = vld [vmem:[#allocation2 + $0x188] sm:$0xf]  ;;  %v4997_v10 = vld [vmem:[#allocation2 + $0x194] sm:$0xf0] }
 0x3dc   :  { %2818 = vmatpush.bf16.msra.mxu1 %v4406_v12  ;;  %v4675_v12 = vld [vmem:[#allocation2 + $0x770] sm:$0xf0]  ;;  %v3930_v17 = vor.u32 %v4997_v10, %v3929_v9  ;;  %v4217_v10 = vld [vmem:[#allocation2 + $0x3c8] sm:$0xf] }
 0x3dd   :  { %v4678_v50 = vor.u32 %v5182_v8, %v4675_v12  ;;  %v4362_v8 = vor.u32 %v5105_v4, %v4361_v3  ;;  %v4137_v4 = vld [vmem:[#allocation2 + $0x328] sm:$0xf] }
 0x3df   :  { %2831 = vmatpush.bf16.msra.mxu2 %v4534_v52  ;;  %2806 = vmatpush.bf16.msra.mxu3 %v4262_v18  ;;  %v3913_v52 = vld [vmem:[#allocation2 + $0x168] sm:$0xf]  ;;  %v4993_v18 = vld [vmem:[#allocation2 + $0x174] sm:$0xf0] }
 0x3e0   :  { %2819 = vmatpush.bf16.msra.mxu1 %v4390_v20  ;;  %v5178_v20 = vld [vmem:[#allocation2 + $0x744] sm:$0xf]  ;;  %v3914_v23 = vor.u32 %v4993_v18, %v3913_v52  ;;  %v4073_v52 = vld [vmem:[#allocation2 + $0x2a8] sm:$0xf]  ;;  %v5033_v18 = vld [vmem:[#allocation2 + $0x2b4] sm:$0xf0] }
 0x3e1   :  { %v4662_v24 = vor.u32 %v5178_v20, %v4659_v6  ;;  %v4074_v6 = vor.u32 %v5033_v18, %v4073_v52  ;;  %v5045_v52 = vld [vmem:[#allocation2 + $0x314] sm:$0xf0] }
 0x3e2   :  { %v5137_v18 = vld [vmem:[#allocation2 + $0x5f4] sm:$0xf0] }
 0x3e3   :  { %2832 = vmatpush.bf16.msra.mxu2 %v4518_v26  ;;  %2807 = vmatpush.bf16.msra.mxu3 %v4246_v29  ;;  %v4989_v26 = vld [vmem:[#allocation2 + $0x154] sm:$0xf0]  ;;  %v4643_v29 = vld [vmem:[#allocation2 + $0x730] sm:$0xf0] }
 0x3e4   :  { %2820 = vmatpush.bf16.msra.mxu1 %v4374_v33  ;;  %v4953_v33 = vld [vmem:[#allocation2 + $0x34] sm:$0xf0]  ;;  %v3898_v58 = vor.u32 %v4989_v26, %v3897_v25  ;;  %v4646_v37 = vor.u32 %v5174_v28, %v4643_v29  ;;  %v4185_v26 = vld [vmem:[#allocation2 + $0x388] sm:$0xf]  ;;  %v4330_v28 = vor.u32 %v5097_v22, %v4329_v21 }
 0x3e5   :  { %v3754_v42 = vor.u32 %v4953_v33, %v3753_v32  ;;  %v5029_v25 = vld [vmem:[#allocation2 + $0x294] sm:$0xf0]  ;;  %v4249_v21 = vld [vmem:[#allocation2 + $0x408] sm:$0xf] }
 0x3e6   :  { %2808 = vmatmul.bf16.vlgmr.msra.gmra.mxu3 %v5792_v59  ;;  %v2666_v62 = vpop.f32.mrf.mxu1  ;;  %v5093_v32 = vld [vmem:[#allocation2 + $0x494] sm:$0xf0] }
 0x3e7   :  { %2839 = vmatpush.bf16.msrb.mxu3 %v4742_v34  ;;  %2833 = vmatpush.bf16.msra.mxu2 %v4502_v41  ;;  %v5077_v22 = vld [vmem:[#allocation2 + $0x414] sm:$0xf0] }
 0x3e8   :  { %2852 = vmatpush.bf16.msrb.mxu1 %v3850_v38  ;;  %v3881_v38 = vld [vmem:[#allocation2 + $0x128] sm:$0xf] }
 0x3e9   :  { %2821 = vmatmul.bf16.vlgmr.msra.gmra.mxu1 %v5796_v2  ;;  %v2653_v31 = vpop.f32.mrf.mxu3  ;;  %v3882_v56 = vor.u32 %v4985_v39, %v3881_v38  ;;  %v5057_v38 = vld [vmem:[#allocation2 + $0x374] sm:$0xf0] }
 0x3ea   :  { %2834 = vmatmul.bf16.vlgmr.msra.gmra.mxu2 %v5803_v45  ;;  %v2667_v34 = vadd.f32 %v2666_v62, %v2653_v31  ;;  %v4201_v62 = vld [vmem:[#allocation2 + $0x3a8] sm:$0xf] }
 0x3eb   :  { %2865 = vmatpush.bf16.msrb.mxu2 %v3978_v47  ;;  %2840 = vmatpush.bf16.msrb.mxu3 %v4726_v14  ;;  %v4627_v47 = vld [vmem:[#allocation2 + $0x710] sm:$0xf0]  ;;  %v3737_v14 = vld [vmem:[#allocation2 + $0x8] sm:$0xf] }
 0x3ec   :  { %2853 = vmatpush.bf16.msrb.mxu1 %v3834_v53  ;;  %v4105_v53 = vld [vmem:[#allocation2 + $0x2e8] sm:$0xf]  ;;  %v3738_v1 = vor.u32 %v4949_v51, %v3737_v14  ;;  %v5021_v51 = vld [vmem:[#allocation2 + $0x254] sm:$0xf0] }
 0x3ed   :  { %v2679_v40 = vpop.f32.mrf.mxu2  ;;  %v4313_v31 = vld [vmem:[#allocation2 + $0x488] sm:$0xf] }
 0x3ee   :  { %v2668_v41 = vpop.f32.mrf.mxu1  ;;  %v5818_v49 = vadd.f32 %v2679_v40, %v2667_v34  ;;  %v4041_v34 = vld [vmem:[#allocation2 + $0x268] sm:$0xf]  ;;  %v4314_v39 = vor.u32 %v5093_v32, %v4313_v31  ;;  %v5133_v31 = vld [vmem:[#allocation2 + $0x5d4] sm:$0xf0]  ;;  %v4250_v32 = vor.u32 %v5077_v22, %v4249_v21 }
 0x3ef   :  { %2866 = vmatpush.bf16.msrb.mxu2 %v3962_v60  ;;  %2841 = vmatpush.bf16.msrb.mxu3 %v4710_v61  ;;  %v4630_v60 = vor.u32 %v5170_v0, %v4627_v47  ;;  %v3865_v61 = vld [vmem:[#allocation2 + $0x108] sm:$0xf]  ;;  %v5181_v21 = vld [vmem:[#allocation2 + $0x754] sm:$0xf0] }
 0x3f0   :  { %2854 = vmatpush.bf16.msrb.mxu1 %v3818_v30  ;;  %v4106_v30 = vor.u32 %v5041_v54, %v4105_v53  ;;  %v3866_v9 = vor.u32 %v4981_v63, %v3865_v61  ;;  %v4297_v41 = vld [vmem:[#allocation2 + $0x468] sm:$0xf]  ;;  %v5053_v54 = vld [vmem:[#allocation2 + $0x354] sm:$0xf0] }
 0x3f1   :  { %v2655_v5 = vpop.f32.mrf.mxu3  ;;  %v4025_v14 = vld [vmem:[#allocation2 + $0x248] sm:$0xf] }
 0x3f2   :  { %v4153_v53 = vld [vmem:[#allocation2 + $0x348] sm:$0xf]  ;;  %v4026_v16 = vor.u32 %v5021_v51, %v4025_v14  ;;  %v5049_v5 = vld [vmem:[#allocation2 + $0x334] sm:$0xf0] }
 0x3f3   :  { %2867 = vmatpush.bf16.msrb.mxu2 %v3946_v46  ;;  %2842 = vmatpush.bf16.msrb.mxu3 %v4694_v7  ;;  %v4089_v46 = vld [vmem:[#allocation2 + $0x2c8] sm:$0xf]  ;;  %v5037_v7 = vld [vmem:[#allocation2 + $0x2d4] sm:$0xf0]  ;;  %v4154_v63 = vor.u32 %v5053_v54, %v4153_v53 }
 0x3f4   :  { %2855 = vmatpush.bf16.msrb.mxu1 %v3802_v11  ;;  %v5069_v11 = vld [vmem:[#allocation2 + $0x3d4] sm:$0xf0]  ;;  %v4090_v13 = vor.u32 %v5037_v7, %v4089_v46  ;;  %v4713_v54 = vld [vmem:[#allocation2 + $0x7a8] sm:$0xf] }
 0x3f5   :  { %v2681_v12 = vpop.f32.mrf.mxu2  ;;  %v5161_v14 = vld [vmem:[#allocation2 + $0x6b4] sm:$0xf0] }
 0x3f6   :  { %v4138_v12 = vor.u32 %v5049_v5, %v4137_v4  ;;  %v5189_v4 = vld [vmem:[#allocation2 + $0x794] sm:$0xf0] }
 0x3f7   :  { %2868 = vmatpush.bf16.msrb.mxu2 %v3930_v17  ;;  %2843 = vmatpush.bf16.msrb.mxu3 %v4678_v50  ;;  %v5101_v17 = vld [vmem:[#allocation2 + $0x4d4] sm:$0xf0]  ;;  %v4218_v50 = vor.u32 %v5069_v11, %v4217_v10  ;;  %v4265_v10 = vld [vmem:[#allocation2 + $0x428] sm:$0xf] }
 0x3f8   :  { %2856 = vmatpush.bf16.msrb.mxu1 %v3786_v19  ;;  %v5065_v19 = vld [vmem:[#allocation2 + $0x3b4] sm:$0xf0]  ;;  %v4346_v20 = vor.u32 %v5101_v17, %v4345_v15  ;;  %v4121_v17 = vld [vmem:[#allocation2 + $0x308] sm:$0xf] }
 0x3f9   :  { %v5081_v11 = vld [vmem:[#allocation2 + $0x434] sm:$0xf0] }
 0x3fa   :  { %v5013_v15 = vld [vmem:[#allocation2 + $0x214] sm:$0xf0] }
 0x3fb   :  { %2869 = vmatpush.bf16.msrb.mxu2 %v3914_v23  ;;  %2844 = vmatpush.bf16.msrb.mxu3 %v4662_v24  ;;  %v4202_v23 = vor.u32 %v5065_v19, %v4201_v62  ;;  %v4057_v24 = vld [vmem:[#allocation2 + $0x288] sm:$0xf]  ;;  %v4266_v62 = vor.u32 %v5081_v11, %v4265_v10 }
 0x3fc   :  { %2857 = vmatpush.bf16.msrb.mxu1 %v3770_v27  ;;  %v5061_v27 = vld [vmem:[#allocation2 + $0x394] sm:$0xf0]  ;;  %v4058_v29 = vor.u32 %v5029_v25, %v4057_v24  ;;  %v4617_v19 = vld [vmem:[#allocation2 + $0x6e8] sm:$0xf] }
 0x3fd   :  { %v4186_v33 = vor.u32 %v5061_v27, %v4185_v26  ;;  %v4745_v25 = vld [vmem:[#allocation2 + $0x7e8] sm:$0xf]  ;;  %v5201_v26 = vld [vmem:[#allocation2 + $0x7f4] sm:$0xf0] }
 0x3ff   :  { %2870 = vmatpush.bf16.msrb.mxu2 %v3898_v58  ;;  %2845 = vmatpush.bf16.msrb.mxu3 %v4646_v37  ;;  %v5025_v58 = vld [vmem:[#allocation2 + $0x274] sm:$0xf0]  ;;  %v4169_v37 = vld [vmem:[#allocation2 + $0x368] sm:$0xf] }
 0x400   :  { %2858 = vmatpush.bf16.msrb.mxu1 %v3754_v42  ;;  %v4042_v40 = vor.u32 %v5025_v58, %v4041_v34  ;;  %v5089_v42 = vld [vmem:[#allocation2 + $0x474] sm:$0xf0]  ;;  %v4170_v47 = vor.u32 %v5057_v38, %v4169_v37  ;;  %v4746_v58 = vor.u32 %v5201_v26, %v4745_v25  ;;  %v4393_v25 = vld [vmem:[#allocation2 + $0x528] sm:$0xf] }
 0x401   :  { %v5165_v34 = vld [vmem:[#allocation2 + $0x6d4] sm:$0xf0] }
 0x402   :  { %v5113_v26 = vld [vmem:[#allocation2 + $0x534] sm:$0xf0] }
 0x403   :  { %2871 = vmatpush.bf16.msrb.mxu2 %v3882_v56  ;;  %2846 = vmatpush.bf16.msrb.mxu3 %v4630_v60  ;;  %v4298_v56 = vor.u32 %v5089_v42, %v4297_v41  ;;  %v5085_v60 = vld [vmem:[#allocation2 + $0x454] sm:$0xf0]  ;;  %v4457_v42 = vld [vmem:[#allocation2 + $0x5a8] sm:$0xf] }
 0x404   :  { %2859 = vmatpush.bf16.msrb.mxu1 %v3738_v1  ;;  %v4009_v1 = vld [vmem:[#allocation2 + $0x228] sm:$0xf] }
 0x406   :  { %2847 = vmatmul.bf16.vlgmr.msrb.gmra.mxu3 %v5807_v48  ;;  %v2705_v0 = vpop.f32.mrf.mxu1 }
 0x407   :  { %2878 = vmatpush.bf16.msra.mxu3 %v4106_v30  ;;  %2872 = vmatpush.bf16.msrb.mxu2 %v3866_v9  ;;  %v5017_v30 = vld [vmem:[#allocation2 + $0x234] sm:$0xf0] }
 0x408   :  { %2891 = vmatpush.bf16.msra.mxu1 %v4234_v43  ;;  %v4282_v43 = vor.u32 %v5085_v60, %v4281_v57  ;;  %v4010_v9 = vor.u32 %v5017_v30, %v4009_v1  ;;  %v4441_v57 = vld [vmem:[#allocation2 + $0x588] sm:$0xf]  ;;  %v5125_v60 = vld [vmem:[#allocation2 + $0x594] sm:$0xf0] }
 0x409   :  { %2860 = vmatmul.bf16.vlgmr.msrb.gmra.mxu1 %v5773_v35  ;;  %v2692_v61 = vpop.f32.mrf.mxu3  ;;  %v4442_v30 = vor.u32 %v5125_v60, %v4441_v57  ;;  %v3979_v57 = vld [vmem:[#allocation2 + $0x1f8] sm:$0xf0] }
 0x40a   :  { %2873 = vmatmul.bf16.vlgmr.msrb.gmra.mxu2 %v5777_v36  ;;  %v2693_v3 = vadd.f32 %v2692_v61, %v5818_v49  ;;  %v4489_v49 = vld [vmem:[#allocation2 + $0x5e8] sm:$0xf] }
 0x40b   :  { %2904 = vmatpush.bf16.msra.mxu2 %v4362_v8  ;;  %2879 = vmatpush.bf16.msra.mxu3 %v4090_v13  ;;  %v3993_v13 = vld [vmem:[#allocation2 + $0x208] sm:$0xf]  ;;  %v4490_v24 = vor.u32 %v5137_v18, %v4489_v49  ;;  %v5149_v18 = vld [vmem:[#allocation2 + $0x654] sm:$0xf0] }
 0x40c   :  { %2892 = vmatpush.bf16.msra.mxu1 %v4218_v50  ;;  %v2706_v46 = vadd.f32 %v2705_v0, %v2693_v3  ;;  %v5129_v0 = vld [vmem:[#allocation2 + $0x5b4] sm:$0xf0]  ;;  %v4569_v61 = vld [vmem:[#allocation2 + $0x688] sm:$0xf] }
 0x40d   :  { %v2718_v7 = vpop.f32.mrf.mxu2  ;;  %v4458_v53 = vor.u32 %v5129_v0, %v4457_v42  ;;  %v4697_v3 = vld [vmem:[#allocation2 + $0x788] sm:$0xf]  ;;  %v5109_v42 = vld [vmem:[#allocation2 + $0x514] sm:$0xf0] }
 0x40e   :  { %v2707_v8 = vpop.f32.mrf.mxu1  ;;  %v5824_v50 = vadd.f32 %v2718_v7, %v2706_v46  ;;  %v5121_v46 = vld [vmem:[#allocation2 + $0x574] sm:$0xf0]  ;;  %v4553_v7 = vld [vmem:[#allocation2 + $0x668] sm:$0xf]  ;;  %v4698_v10 = vor.u32 %v5189_v4, %v4697_v3  ;;  %v5039_v4 = vld [vmem:[#allocation2 + $0x2ec] sm:$0xf] }
 0x40f   :  { %2905 = vmatpush.bf16.msra.mxu2 %v4346_v20  ;;  %2880 = vmatpush.bf16.msra.mxu3 %v4074_v6  ;;  %v5169_v20 = vld [vmem:[#allocation2 + $0x6f4] sm:$0xf0]  ;;  %v3994_v6 = vor.u32 %v5013_v15, %v3993_v13  ;;  %v4537_v49 = vld [vmem:[#allocation2 + $0x648] sm:$0xf] }
 0x410   :  { %2893 = vmatpush.bf16.msra.mxu1 %v4202_v23  ;;  %v4122_v23 = vor.u32 %v5045_v52, %v4121_v17  ;;  %v5185_v13 = vld [vmem:[#allocation2 + $0x774] sm:$0xf0]  ;;  %v4409_v17 = vld [vmem:[#allocation2 + $0x548] sm:$0xf] }
 0x411   :  { %v2694_v27 = vpop.f32.mrf.mxu3  ;;  %v5117_v52 = vld [vmem:[#allocation2 + $0x554] sm:$0xf0]  ;;  %v4505_v0 = vld [vmem:[#allocation2 + $0x608] sm:$0xf] }
 0x413   :  { %2906 = vmatpush.bf16.msra.mxu2 %v4330_v28  ;;  %2881 = vmatpush.bf16.msra.mxu3 %v4058_v29  ;;  %v4618_v28 = vor.u32 %v5169_v20, %v4617_v19  ;;  %v4473_v29 = vld [vmem:[#allocation2 + $0x5c8] sm:$0xf]  ;;  %v4410_v20 = vor.u32 %v5117_v52, %v4409_v17 }
 0x414   :  { %2894 = vmatpush.bf16.msra.mxu1 %v4186_v33  ;;  %v4601_v33 = vld [vmem:[#allocation2 + $0x6c8] sm:$0xf]  ;;  %v4474_v38 = vor.u32 %v5133_v31, %v4473_v29  ;;  %v5145_v31 = vld [vmem:[#allocation2 + $0x634] sm:$0xf0] }
 0x415   :  { %v2720_v37 = vpop.f32.mrf.mxu2  ;;  %v4602_v41 = vor.u32 %v5165_v34, %v4601_v33  ;;  %v4521_v29 = vld [vmem:[#allocation2 + $0x628] sm:$0xf] }
 0x416   :  { %v4649_v37 = vld [vmem:[#allocation2 + $0x728] sm:$0xf] }
 0x417   :  { %2907 = vmatpush.bf16.msra.mxu2 %v4314_v39  ;;  %2882 = vmatpush.bf16.msra.mxu3 %v4042_v40  ;;  %v4729_v39 = vld [vmem:[#allocation2 + $0x7c8] sm:$0xf]  ;;  %v5197_v40 = vld [vmem:[#allocation2 + $0x7d4] sm:$0xf0] }
 0x418   :  { %2895 = vmatpush.bf16.msra.mxu1 %v4170_v47  ;;  %v4585_v47 = vld [vmem:[#allocation2 + $0x6a8] sm:$0xf]  ;;  %v4730_v51 = vor.u32 %v5197_v40, %v4729_v39 }
 0x41b   :  { %2908 = vmatpush.bf16.msra.mxu2 %v4298_v56  ;;  %2883 = vmatpush.bf16.msra.mxu3 %v4026_v16  ;;  %v5193_v56 = vld [vmem:[#allocation2 + $0x7b4] sm:$0xf0]  ;;  %v4586_v16 = vor.u32 %v5161_v14, %v4585_v47 }
 0x41c   :  { %2896 = vmatpush.bf16.msra.mxu1 %v4154_v63  ;;  %v5157_v63 = vld [vmem:[#allocation2 + $0x694] sm:$0xf0]  ;;  %v4714_v1 = vor.u32 %v5193_v56, %v4713_v54  ;;  %v5845_v54 = vstv %s5469_s28 }
 0x41d   :  { %v4570_v5 = vor.u32 %v5157_v63, %v4569_v61  ;;  %v5141_v14 = vld [vmem:[#allocation2 + $0x614] sm:$0xf0]  ;;  %v4633_v63 = vld [vmem:[#allocation2 + $0x708] sm:$0xf] }
 0x41f   :  { %2909 = vmatpush.bf16.msra.mxu2 %v4282_v43  ;;  %2884 = vmatpush.bf16.msra.mxu3 %v4010_v9  ;;  %v4425_v43 = vld [vmem:[#allocation2 + $0x568] sm:$0xf]  ;;  %v5153_v9 = vld [vmem:[#allocation2 + $0x674] sm:$0xf0] }
 0x420   :  { %2897 = vmatpush.bf16.msra.mxu1 %v4138_v12  ;;  %v4426_v11 = vor.u32 %v5121_v46, %v4425_v43  ;;  %v4681_v12 = vld [vmem:[#allocation2 + $0x768] sm:$0xf]  ;;  %v4554_v15 = vor.u32 %v5153_v9, %v4553_v7  ;;  %v4971_v9 = vld [vmem:[#allocation2 + $0xcc] sm:$0xf] }
 0x421   :  { %v4682_v19 = vor.u32 %v5185_v13, %v4681_v12  ;;  %v3963_v12 = vld [vmem:[#allocation2 + $0x1d8] sm:$0xf0] }
 0x423   :  { %2910 = vmatpush.bf16.msra.mxu2 %v4266_v62  ;;  %2885 = vmatpush.bf16.msra.mxu3 %v3994_v6  ;;  %v5832_v62 = vld [vmem:[%s5935_s4 + $0x18] sm:$0xf]  ;;  %v4665_v6 = vld [vmem:[#allocation2 + $0x748] sm:$0xf] }
 0x424   :  { %2898 = vmatpush.bf16.msra.mxu1 %v4122_v23  ;;  %v5837_v23 = vld [vmem:[%s5935_s4 + $0x1c] sm:$0xf] }
 0x425   :  { %v3076_v34 = vperm.slane %v5837_v23, 0 }
 0x426   :  { %2886 = vmatmul.bf16.vlgmr.msra.gmra.mxu3 %v5781_v44  ;;  %v2744_v8 = vpop.f32.mrf.mxu1 }
 0x427   :  { %2917 = vmatpush.bf16.msrb.mxu3 %v4490_v24  ;;  %2911 = vmatpush.bf16.msra.mxu2 %v4250_v32  ;;  %v4538_v24 = vor.u32 %v5149_v18, %v4537_v49  ;;  %v4666_v32 = vor.u32 %v5181_v21, %v4665_v6  ;;  %v5035_v49 = vld [vmem:[#allocation2 + $0x2cc] sm:$0xf]  ;;  %v4091_v18 = vld [vmem:[#allocation2 + $0x2d8] sm:$0xf0] }
 0x428   :  { %2930 = vmatpush.bf16.msrb.mxu1 %v4618_v28  ;;  %v3062_v28 = vperm.slane %v5832_v62, 0  ;;  %v3819_v6 = vld [vmem:[#allocation2 + $0xb8] sm:$0xf0]  ;;  %v4999_v21 = vld [vmem:[#allocation2 + $0x1ac] sm:$0xf] }
 0x429   :  { %2899 = vmatmul.bf16.vlgmr.msra.gmra.mxu1 %v5788_v55  ;;  %v2731_v22 = vpop.f32.mrf.mxu3 }
 0x42a   :  { %2912 = vmatmul.bf16.vlgmr.msra.gmra.mxu2 %v5792_v59  ;;  %v2732_v27 = vadd.f32 %v2731_v22, %v5824_v50  ;;  %v4377_v50 = vld [vmem:[#allocation2 + $0x508] sm:$0xf]  ;;  %v3947_v22 = vld [vmem:[#allocation2 + $0x1b8] sm:$0xf0] }
 0x42b   :  { %2943 = vmatpush.bf16.msrb.mxu2 %v4746_v58  ;;  %2918 = vmatpush.bf16.msrb.mxu3 %v4474_v38  ;;  %v4394_v58 = vor.u32 %v5113_v26, %v4393_v25  ;;  %v5177_v38 = vld [vmem:[#allocation2 + $0x734] sm:$0xf0]  ;;  %v4378_v61 = vor.u32 %v5109_v42, %v4377_v50  ;;  %v5031_v26 = vld [vmem:[#allocation2 + $0x2ac] sm:$0xf]  ;;  %v3787_v50 = vld [vmem:[#allocation2 + $0x78] sm:$0xf0] }
 0x42c   :  { %2931 = vmatpush.bf16.msrb.mxu1 %v4602_v41  ;;  %v2745_v33 = vadd.f32 %v2744_v8, %v2732_v27  ;;  %v4522_v41 = vor.u32 %v5145_v31, %v4521_v29  ;;  %v4650_v56 = vor.u32 %v5177_v38, %v4649_v37  ;;  %v5003_v8 = vld [vmem:[#allocation2 + $0x1cc] sm:$0xf]  ;;  %v4075_v27 = vld [vmem:[#allocation2 + $0x2b8] sm:$0xf0] }
 0x42d   :  { %v5842_v40 = vpop.f32.mrf.mxu2  ;;  %v4963_v29 = vld [vmem:[#allocation2 + $0x8c] sm:$0xf]  ;;  %v3803_v31 = vld [vmem:[#allocation2 + $0x98] sm:$0xf0] }
 0x42e   :  { %v2746_v39 = vpop.f32.mrf.mxu1  ;;  %v3070_v47 = vmul.f32 %v3062_v28, %v2745_v33  ;;  %v3950_v28 = vor.u32 %v4999_v21, %v3947_v22  ;;  %v3931_v33 = vld [vmem:[#allocation2 + $0x198] sm:$0xf0]  ;;  %v5027_v37 = vld [vmem:[#allocation2 + $0x28c] sm:$0xf] }
 0x42f   :  { %2944 = vmatpush.bf16.msrb.mxu2 %v4730_v51  ;;  %2919 = vmatpush.bf16.msrb.mxu3 %v4458_v53  ;;  %v4975_v51 = vld [vmem:[#allocation2 + $0xec] sm:$0xf]  ;;  %v3851_v53 = vld [vmem:[#allocation2 + $0xf8] sm:$0xf0] }
 0x430   :  { %2932 = vmatpush.bf16.msrb.mxu1 %v4586_v16  ;;  %v5007_v16 = vld [vmem:[#allocation2 + $0x1ec] sm:$0xf]  ;;  %v3084_v60 = vadd.f32 %v3076_v34, %v3070_v47  ;;  %v3854_v3 = vor.u32 %v4975_v51, %v3851_v53  ;;  %v4078_v34 = vor.u32 %v5031_v26, %v4075_v27  ;;  %v4059_v38 = vld [vmem:[#allocation2 + $0x298] sm:$0xf0] }
 0x431   :  { %v2733_v43 = vpop.f32.mrf.mxu3  ;;  %v3982_v7 = vor.u32 %v5007_v16, %v3979_v57  ;;  %v4991_v42 = vld [vmem:[#allocation2 + $0x16c] sm:$0xf]  ;;  %v4062_v47 = vor.u32 %v5027_v37, %v4059_v38  ;;  %v4043_v53 = vld [vmem:[#allocation2 + $0x278] sm:$0xf0] }
 0x432   :  { %vm3088_vm13 = vcmp.ge.f32.partialorder %v3084_v60, 0.0  ;;  %v3093_v46 = vmul.f32 %v5845_v54, %v3084_v60  ;;  %v5023_v51 = vld [vmem:[#allocation2 + $0x26c] sm:$0xf]  ;;  %v3867_v22 = vld [vmem:[#allocation2 + $0x118] sm:$0xf0] }
 0x433   :  { %2945 = vmatpush.bf16.msrb.mxu2 %v4714_v1  ;;  %2920 = vmatpush.bf16.msrb.mxu3 %v4442_v30  ;;  %v5173_v1 = vld [vmem:[#allocation2 + $0x714] sm:$0xf0]  ;;  %v4506_v30 = vor.u32 %v5141_v14, %v4505_v0  ;;  %v3915_v0 = vld [vmem:[#allocation2 + $0x178] sm:$0xf0]  ;;  %v4955_v57 = vld [vmem:[#allocation2 + $0x4c] sm:$0xf] }
 0x434   :  { %2933 = vmatpush.bf16.msrb.mxu1 %v4570_v5  ;;  %v4107_v5 = vld [vmem:[#allocation2 + $0x2f8] sm:$0xf0]  ;;  %v5848_v13 = vsel %vm3088_vm13, %v3084_v60, %v3093_v46  ;;  %v3918_v16 = vor.u32 %v4991_v42, %v3915_v0  ;;  %v4951_v43 = vld [vmem:[#allocation2 + $0x2c] sm:$0xf] }
 0x435   :  { %v2759_v17 = vpop.f32.mrf.mxu2  ;;  %v3771_v60 = vld [vmem:[#allocation2 + $0x58] sm:$0xf0]  ;;  %v4979_v21 = vld [vmem:[#allocation2 + $0x10c] sm:$0xf] }
 0x436   :  { %v3755_v46 = vld [vmem:[#allocation2 + $0x38] sm:$0xf0]  ;;  %v5103_v27 = vld [vmem:[#allocation2 + $0x4ec] sm:$0xf] }
 0x437   :  { %2946 = vmatpush.bf16.msrb.mxu2 %v4698_v10  ;;  %2921 = vmatpush.bf16.msrb.mxu3 %v4426_v11  ;;  %v3835_v10 = vld [vmem:[#allocation2 + $0xd8] sm:$0xf0]  ;;  %v4634_v11 = vor.u32 %v5173_v1, %v4633_v63  ;;  %v4046_v1 = vor.u32 %v5023_v51, %v4043_v53  ;;  %v5099_v0 = vld [vmem:[#allocation2 + $0x4cc] sm:$0xf] }
 0x438   :  { %2934 = vmatpush.bf16.msrb.mxu1 %v4554_v15  ;;  %v4110_v15 = vor.u32 %v5039_v4, %v4107_v5  ;;  %v3838_v52 = vor.u32 %v4971_v9, %v3835_v10  ;;  %v3899_v63 = vld [vmem:[#allocation2 + $0x158] sm:$0xf0]  ;;  %v4983_v9 = vld [vmem:[#allocation2 + $0x12c] sm:$0xf] }
 0x439   :  { %v4027_v4 = vld [vmem:[#allocation2 + $0x258] sm:$0xf0] }
 0x43a   :  { %v3883_v10 = vld [vmem:[#allocation2 + $0x138] sm:$0xf0] }
 0x43b   :  { %2947 = vmatpush.bf16.msrb.mxu2 %v4682_v19  ;;  %2922 = vmatpush.bf16.msrb.mxu3 %v4410_v20  ;;  %v3966_v19 = vor.u32 %v5003_v8, %v3963_v12  ;;  %v4967_v20 = vld [vmem:[#allocation2 + $0xac] sm:$0xf]  ;;  %v3758_v12 = vor.u32 %v4951_v43, %v3755_v46  ;;  %v4011_v17 = vld [vmem:[#allocation2 + $0x238] sm:$0xf0] }
 0x43c   :  { %2935 = vmatpush.bf16.msrb.mxu1 %v4538_v24  ;;  %v4094_v24 = vor.u32 %v5035_v49, %v4091_v18  ;;  %v3822_v25 = vor.u32 %v4967_v20, %v3819_v6  ;;  %v4947_v20 = vld [vmem:[#allocation2 + $0xc] sm:$0xf]  ;;  %v3739_v6 = vld [vmem:[#allocation2 + $0x18] sm:$0xf0] }
 0x43d   :  { %v4491_v37 = vld [vmem:[#allocation2 + $0x5f8] sm:$0xf0]  ;;  %v5059_v46 = vld [vmem:[#allocation2 + $0x38c] sm:$0xf] }
 0x43f   :  { %2948 = vmatpush.bf16.msrb.mxu2 %v4666_v32  ;;  %2923 = vmatpush.bf16.msrb.mxu3 %v4394_v58  ;;  %v4995_v32 = vld [vmem:[#allocation2 + $0x18c] sm:$0xf]  ;;  %v3806_v58 = vor.u32 %v4963_v29, %v3803_v31  ;;  %v3742_v29 = vor.u32 %v4947_v20, %v3739_v6  ;;  %v4427_v6 = vld [vmem:[#allocation2 + $0x578] sm:$0xf0] }
 0x440   :  { %2936 = vmatpush.bf16.msrb.mxu1 %v4522_v41  ;;  %v3934_v39 = vor.u32 %v4995_v32, %v3931_v33  ;;  %v4959_v41 = vld [vmem:[#allocation2 + $0x6c] sm:$0xf]  ;;  %v3995_v32 = vld [vmem:[#allocation2 + $0x218] sm:$0xf0]  ;;  %v3870_v33 = vor.u32 %v4979_v21, %v3867_v22 }
 0x441   :  { %v3790_v14 = vor.u32 %v4959_v41, %v3787_v50  ;;  %v5011_v31 = vld [vmem:[#allocation2 + $0x20c] sm:$0xf]  ;;  %v4219_v50 = vld [vmem:[#allocation2 + $0x3d8] sm:$0xf0] }
 0x442   :  { %v5067_v41 = vld [vmem:[#allocation2 + $0x3cc] sm:$0xf]  ;;  %v3998_v42 = vor.u32 %v5011_v31, %v3995_v32  ;;  %v4411_v31 = vld [vmem:[#allocation2 + $0x558] sm:$0xf0] }
 0x443   :  { %2949 = vmatpush.bf16.msrb.mxu2 %v4650_v56  ;;  %2924 = vmatpush.bf16.msrb.mxu3 %v4378_v61  ;;  %v4987_v61 = vld [vmem:[#allocation2 + $0x14c] sm:$0xf]  ;;  %v4222_v53 = vor.u32 %v5067_v41, %v4219_v50 }
 0x444   :  { %2937 = vmatpush.bf16.msrb.mxu1 %v4506_v30  ;;  %v3774_v30 = vor.u32 %v4955_v57, %v3771_v60  ;;  %v3902_v5 = vor.u32 %v4987_v61, %v3899_v63  ;;  %v5063_v60 = vld [vmem:[#allocation2 + $0x3ac] sm:$0xf]  ;;  %v4203_v61 = vld [vmem:[#allocation2 + $0x3b8] sm:$0xf0] }
 0x445   :  { %v5095_v63 = vld [vmem:[#allocation2 + $0x4ac] sm:$0xf] }
 0x446   :  { %2925 = vmatmul.bf16.vlgmr.msrb.gmra.mxu3 %v5796_v2  ;;  %v2783_v56 = vpop.f32.mrf.mxu1  ;;  %v5051_v22 = vld [vmem:[#allocation2 + $0x34c] sm:$0xf] }
 0x447   :  { %2956 = vmatpush.bf16.msra.mxu3 %v3854_v3  ;;  %2950 = vmatpush.bf16.msrb.mxu2 %v4634_v11  ;;  %v5019_v3 = vld [vmem:[#allocation2 + $0x24c] sm:$0xf] }
 0x448   :  { %2969 = vmatpush.bf16.msra.mxu1 %v3982_v7  ;;  %v4030_v8 = vor.u32 %v5019_v3, %v4027_v4  ;;  %v4206_v3 = vor.u32 %v5063_v60, %v4203_v61  ;;  %v5127_v4 = vld [vmem:[#allocation2 + $0x5ac] sm:$0xf]  ;;  %v4251_v61 = vld [vmem:[#allocation2 + $0x418] sm:$0xf0] }
 0x449   :  { %2938 = vmatmul.bf16.vlgmr.msrb.gmra.mxu1 %v5803_v45  ;;  %v2770_v7 = vpop.f32.mrf.mxu3 }
 0x44a   :  { %2951 = vmatmul.bf16.vlgmr.msrb.gmra.mxu2 %v5807_v48  ;;  %v2771_v11 = vadd.f32 %v2770_v7, %v5842_v40  ;;  %v4187_v7 = vld [vmem:[#allocation2 + $0x398] sm:$0xf0] }
 0x44b   :  { %2982 = vmatpush.bf16.msra.mxu2 %v4110_v15  ;;  %2957 = vmatpush.bf16.msra.mxu3 %v3838_v52  ;;  %v5015_v15 = vld [vmem:[#allocation2 + $0x22c] sm:$0xf] }
 0x44c   :  { %2970 = vmatpush.bf16.msra.mxu1 %v3966_v19  ;;  %v2784_v52 = vadd.f32 %v2783_v56, %v2771_v11  ;;  %v3886_v19 = vor.u32 %v4983_v9, %v3883_v10  ;;  %v4014_v40 = vor.u32 %v5015_v15, %v4011_v17  ;;  %v5131_v56 = vld [vmem:[#allocation2 + $0x5cc] sm:$0xf]  ;;  %v4315_v10 = vld [vmem:[#allocation2 + $0x498] sm:$0xf0] }
 0x44d   :  { %v2796_v49 = vpop.f32.mrf.mxu2  ;;  %v5091_v9 = vld [vmem:[#allocation2 + $0x48c] sm:$0xf]  ;;  %v4171_v17 = vld [vmem:[#allocation2 + $0x378] sm:$0xf0] }
 0x44e   :  { %v2785_v18 = vpop.f32.mrf.mxu1  ;;  %v5854_v26 = vadd.f32 %v2796_v49, %v2784_v52  ;;  %v5055_v15 = vld [vmem:[#allocation2 + $0x36c] sm:$0xf]  ;;  %v4299_v49 = vld [vmem:[#allocation2 + $0x478] sm:$0xf0] }
 0x44f   :  { %2983 = vmatpush.bf16.msra.mxu2 %v4094_v24  ;;  %2958 = vmatpush.bf16.msra.mxu3 %v3822_v25  ;;  %v5071_v24 = vld [vmem:[#allocation2 + $0x3ec] sm:$0xf]  ;;  %v4235_v25 = vld [vmem:[#allocation2 + $0x3f8] sm:$0xf0] }
 0x450   :  { %2971 = vmatpush.bf16.msra.mxu1 %v3950_v28  ;;  %v4363_v28 = vld [vmem:[#allocation2 + $0x4f8] sm:$0xf0]  ;;  %v5087_v52 = vld [vmem:[#allocation2 + $0x46c] sm:$0xf] }
 0x451   :  { %v2772_v38 = vpop.f32.mrf.mxu3  ;;  %v4302_v21 = vor.u32 %v5087_v52, %v4299_v49  ;;  %v5159_v49 = vld [vmem:[#allocation2 + $0x6ac] sm:$0xf] }
 0x452   :  { %v5079_v38 = vld [vmem:[#allocation2 + $0x42c] sm:$0xf] }
 0x453   :  { %2984 = vmatpush.bf16.msra.mxu2 %v4078_v34  ;;  %2959 = vmatpush.bf16.msra.mxu3 %v3806_v58  ;;  %v4238_v34 = vor.u32 %v5071_v24, %v4235_v25  ;;  %v5135_v58 = vld [vmem:[#allocation2 + $0x5ec] sm:$0xf]  ;;  %v4155_v24 = vld [vmem:[#allocation2 + $0x358] sm:$0xf0] }
 0x454   :  { %2972 = vmatpush.bf16.msra.mxu1 %v3934_v39  ;;  %v4366_v39 = vor.u32 %v5103_v27, %v4363_v28  ;;  %v5083_v25 = vld [vmem:[#allocation2 + $0x44c] sm:$0xf]  ;;  %v4158_v28 = vor.u32 %v5051_v22, %v4155_v24  ;;  %v4571_v22 = vld [vmem:[#allocation2 + $0x698] sm:$0xf0] }
 0x455   :  { %v2798_v51 = vpop.f32.mrf.mxu2  ;;  %v5187_v24 = vld [vmem:[#allocation2 + $0x78c] sm:$0xf] }
 0x457   :  { %2985 = vmatpush.bf16.msra.mxu2 %v4062_v47  ;;  %2960 = vmatpush.bf16.msra.mxu3 %v3790_v14  ;;  %v4347_v47 = vld [vmem:[#allocation2 + $0x4d8] sm:$0xf0]  ;;  %v4494_v14 = vor.u32 %v5135_v58, %v4491_v37 }
 0x458   :  { %2973 = vmatpush.bf16.msra.mxu1 %v3918_v16  ;;  %v4475_v16 = vld [vmem:[#allocation2 + $0x5d8] sm:$0xf0]  ;;  %v4350_v57 = vor.u32 %v5099_v0, %v4347_v47  ;;  %v5111_v47 = vld [vmem:[#allocation2 + $0x52c] sm:$0xf] }
 0x459   :  { %v4139_v58 = vld [vmem:[#allocation2 + $0x338] sm:$0xf0] }
 0x45b   :  { %2986 = vmatpush.bf16.msra.mxu2 %v4046_v1  ;;  %2961 = vmatpush.bf16.msra.mxu3 %v3774_v30  ;;  %v4331_v1 = vld [vmem:[#allocation2 + $0x4b8] sm:$0xf0]  ;;  %v4478_v30 = vor.u32 %v5131_v56, %v4475_v16  ;;  %v5043_v56 = vld [vmem:[#allocation2 + $0x30c] sm:$0xf] }
 0x45c   :  { %2974 = vmatpush.bf16.msra.mxu1 %v3902_v5  ;;  %v4459_v5 = vld [vmem:[#allocation2 + $0x5b8] sm:$0xf0]  ;;  %v4334_v43 = vor.u32 %v5095_v63, %v4331_v1 }
 0x45d   :  { %v4462_v11 = vor.u32 %v5127_v4, %v4459_v5  ;;  %v4123_v16 = vld [vmem:[#allocation2 + $0x318] sm:$0xf0]  ;;  %v5107_v5 = vld [vmem:[#allocation2 + $0x50c] sm:$0xf] }
 0x45e   :  { %v4619_v63 = vld [vmem:[#allocation2 + $0x6f8] sm:$0xf0]  ;;  %v4126_v4 = vor.u32 %v5043_v56, %v4123_v16 }
 0x45f   :  { %2987 = vmatpush.bf16.msra.mxu2 %v4030_v8  ;;  %2962 = vmatpush.bf16.msra.mxu3 %v3758_v12  ;;  %v5123_v8 = vld [vmem:[#allocation2 + $0x58c] sm:$0xf]  ;;  %v4443_v12 = vld [vmem:[#allocation2 + $0x598] sm:$0xf0] }
 0x460   :  { %2975 = vmatpush.bf16.msra.mxu1 %v3886_v19  ;;  %v4446_v18 = vor.u32 %v5123_v8, %v4443_v12  ;;  %v4174_v19 = vor.u32 %v5055_v15, %v4171_v17  ;;  %v5195_v12 = vld [vmem:[#allocation2 + $0x7cc] sm:$0xf] }
 0x463   :  { %2988 = vmatpush.bf16.msra.mxu2 %v4014_v40  ;;  %2963 = vmatpush.bf16.msra.mxu3 %v3742_v29  ;;  %v4283_v40 = vld [vmem:[#allocation2 + $0x458] sm:$0xf0]  ;;  %v5115_v29 = vld [vmem:[#allocation2 + $0x54c] sm:$0xf] }
 0x464   :  { %2976 = vmatpush.bf16.msra.mxu1 %v3870_v33  ;;  %v4286_v33 = vor.u32 %v5083_v25, %v4283_v40  ;;  %v4414_v41 = vor.u32 %v5115_v29, %v4411_v31  ;;  %v4699_v25 = vld [vmem:[#allocation2 + $0x798] sm:$0xf0]  ;;  %v5183_v29 = vld [vmem:[#allocation2 + $0x76c] sm:$0xf] }
 0x465   :  { %v4683_v31 = vld [vmem:[#allocation2 + $0x778] sm:$0xf0] }
 0x466   :  { %2964 = vmatmul.bf16.vlgmr.msra.gmra.mxu3 %v5773_v35  ;;  %v4190_v35 = vor.u32 %v5059_v46, %v4187_v7  ;;  %v2822_v20 = vpop.f32.mrf.mxu1 }
 0x467   :  { %2995 = vmatpush.bf16.msrb.mxu3 %v4238_v34  ;;  %2989 = vmatpush.bf16.msra.mxu2 %v3998_v42  ;;  %v5047_v34 = vld [vmem:[#allocation2 + $0x32c] sm:$0xf] }
 0x468   :  { %3008 = vmatpush.bf16.msrb.mxu1 %v4366_v39  ;;  %v4267_v39 = vld [vmem:[#allocation2 + $0x438] sm:$0xf0]  ;;  %v4142_v0 = vor.u32 %v5047_v34, %v4139_v58  ;;  %v5147_v34 = vld [vmem:[#allocation2 + $0x64c] sm:$0xf] }
 0x469   :  { %2977 = vmatmul.bf16.vlgmr.msra.gmra.mxu1 %v5777_v36  ;;  %v4318_v36 = vor.u32 %v5091_v9, %v4315_v10  ;;  %v2809_v32 = vpop.f32.mrf.mxu3  ;;  %v5179_v58 = vld [vmem:[#allocation2 + $0x74c] sm:$0xf] }
 0x46a   :  { %2990 = vmatmul.bf16.vlgmr.msra.gmra.mxu2 %v5781_v44  ;;  %v5119_v44 = vld [vmem:[#allocation2 + $0x56c] sm:$0xf]  ;;  %v2810_v37 = vadd.f32 %v2809_v32, %v5854_v26 }
 0x46b   :  { %3021 = vmatpush.bf16.msrb.mxu2 %v4494_v14  ;;  %2996 = vmatpush.bf16.msrb.mxu3 %v4222_v53  ;;  %v4430_v27 = vor.u32 %v5119_v44, %v4427_v6  ;;  %v4395_v14 = vld [vmem:[#allocation2 + $0x538] sm:$0xf0]  ;;  %v4270_v53 = vor.u32 %v5079_v38, %v4267_v39  ;;  %v5167_v26 = vld [vmem:[#allocation2 + $0x6ec] sm:$0xf]  ;;  %v3063_v38 = vperm.slane %v5832_v62, 1 }
 0x46c   :  { %3009 = vmatpush.bf16.msrb.mxu1 %v4350_v57  ;;  %v2823_v50 = vadd.f32 %v2822_v20, %v2810_v37  ;;  %v5075_v57 = vld [vmem:[#allocation2 + $0x40c] sm:$0xf]  ;;  %v4398_v1 = vor.u32 %v5111_v47, %v4395_v14  ;;  %v4622_v7 = vor.u32 %v5167_v26, %v4619_v63  ;;  %v4715_v20 = vld [vmem:[#allocation2 + $0x7b8] sm:$0xf0]  ;;  %v3077_v14 = vperm.slane %v5837_v23, 1 }
 0x46d   :  { %v2835_v42 = vpop.f32.mrf.mxu2  ;;  %v4254_v46 = vor.u32 %v5075_v57, %v4251_v61  ;;  %v4667_v37 = vld [vmem:[#allocation2 + $0x758] sm:$0xf0]  ;;  %v5139_v63 = vld [vmem:[#allocation2 + $0x60c] sm:$0xf] }
 0x46e   :  { %v2824_v51 = vpop.f32.mrf.mxu1  ;;  %v5860_v60 = vadd.f32 %v2835_v42, %v2823_v50  ;;  %v4670_v50 = vor.u32 %v5179_v58, %v4667_v37  ;;  %v5143_v42 = vld [vmem:[#allocation2 + $0x62c] sm:$0xf] }
 0x46f   :  { %3022 = vmatpush.bf16.msrb.mxu2 %v4478_v30  ;;  %2997 = vmatpush.bf16.msrb.mxu3 %v4206_v3  ;;  %v5199_v30 = vld [vmem:[#allocation2 + $0x7ec] sm:$0xf]  ;;  %v4747_v3 = vld [vmem:[#allocation2 + $0x7f8] sm:$0xf0] }
 0x470   :  { %3010 = vmatpush.bf16.msrb.mxu1 %v4334_v43  ;;  %v4379_v43 = vld [vmem:[#allocation2 + $0x518] sm:$0xf0]  ;;  %v4750_v10 = vor.u32 %v5199_v30, %v4747_v3  ;;  %v5175_v51 = vld [vmem:[#allocation2 + $0x72c] sm:$0xf] }
 0x471   :  { %v2811_v9 = vpop.f32.mrf.mxu3  ;;  %v4382_v8 = vor.u32 %v5107_v5, %v4379_v43  ;;  %v4635_v5 = vld [vmem:[#allocation2 + $0x718] sm:$0xf0] }
 0x473   :  { %3023 = vmatpush.bf16.msrb.mxu2 %v4462_v11  ;;  %2998 = vmatpush.bf16.msrb.mxu3 %v4190_v35  ;;  %v5163_v11 = vld [vmem:[#allocation2 + $0x6cc] sm:$0xf]  ;;  %v4603_v35 = vld [vmem:[#allocation2 + $0x6d8] sm:$0xf0] }
 0x474   :  { %3011 = vmatpush.bf16.msrb.mxu1 %v4318_v36  ;;  %v4731_v36 = vld [vmem:[#allocation2 + $0x7d8] sm:$0xf0]  ;;  %v4606_v17 = vor.u32 %v5163_v11, %v4603_v35 }
 0x475   :  { %v2837_v15 = vpop.f32.mrf.mxu2  ;;  %v4734_v52 = vor.u32 %v5195_v12, %v4731_v36 }
 0x477   :  { %3024 = vmatpush.bf16.msrb.mxu2 %v4446_v18  ;;  %2999 = vmatpush.bf16.msrb.mxu3 %v4174_v19  ;;  %v4587_v18 = vld [vmem:[#allocation2 + $0x6b8] sm:$0xf0]  ;;  %v5191_v19 = vld [vmem:[#allocation2 + $0x7ac] sm:$0xf] }
 0x478   :  { %3012 = vmatpush.bf16.msrb.mxu1 %v4302_v21  ;;  %v4590_v44 = vor.u32 %v5159_v49, %v4587_v18  ;;  %v4718_v6 = vor.u32 %v5191_v19, %v4715_v20  ;;  %v5155_v21 = vld [vmem:[#allocation2 + $0x68c] sm:$0xf] }
 0x479   :  { %v4574_v40 = vor.u32 %v5155_v21, %v4571_v22  ;;  %v3064_v21 = vperm.slane %v5832_v62, 2 }
 0x47b   :  { %3025 = vmatpush.bf16.msrb.mxu2 %v4430_v27  ;;  %3000 = vmatpush.bf16.msrb.mxu3 %v4158_v28  ;;  %v4702_v27 = vor.u32 %v5187_v24, %v4699_v25  ;;  %v4555_v28 = vld [vmem:[#allocation2 + $0x678] sm:$0xf0] }
 0x47c   :  { %3013 = vmatpush.bf16.msrb.mxu1 %v4286_v33  ;;  %v4686_v33 = vor.u32 %v5183_v29, %v4683_v31 }
 0x47f   :  { %3026 = vmatpush.bf16.msrb.mxu2 %v4414_v41  ;;  %3001 = vmatpush.bf16.msrb.mxu3 %v4142_v0  ;;  %v4523_v0 = vld [vmem:[#allocation2 + $0x638] sm:$0xf0] }
 0x480   :  { %3014 = vmatpush.bf16.msrb.mxu1 %v4270_v53  ;;  %v4651_v53 = vld [vmem:[#allocation2 + $0x738] sm:$0xf0]  ;;  %v4526_v16 = vor.u32 %v5143_v42, %v4523_v0 }
 0x481   :  { %v4654_v26 = vor.u32 %v5175_v51, %v4651_v53 }
 0x483   :  { %3027 = vmatpush.bf16.msrb.mxu2 %v4398_v1  ;;  %3002 = vmatpush.bf16.msrb.mxu3 %v4126_v4  ;;  %v4507_v1 = vld [vmem:[#allocation2 + $0x618] sm:$0xf0]  ;;  %v5171_v4 = vld [vmem:[#allocation2 + $0x70c] sm:$0xf] }
 0x484   :  { %3015 = vmatpush.bf16.msrb.mxu1 %v4254_v46  ;;  %v4510_v43 = vor.u32 %v5139_v63, %v4507_v1  ;;  %v4638_v46 = vor.u32 %v5171_v4, %v4635_v5 }
 0x486   :  { %3003 = vmatmul.bf16.vlgmr.msrb.gmra.mxu3 %v5788_v55  ;;  %v5151_v55 = vld [vmem:[#allocation2 + $0x66c] sm:$0xf]  ;;  %v2861_v32 = vpop.f32.mrf.mxu1 }
 0x487   :  { %3034 = vmatpush.bf16.msra.mxu3 %v4622_v7  ;;  %3028 = vmatpush.bf16.msrb.mxu2 %v4382_v8 }
 0x488   :  { %3047 = vmatpush.bf16.msra.mxu1 %v4750_v10 }
 0x489   :  { %3016 = vmatmul.bf16.vlgmr.msrb.gmra.mxu1 %v5792_v59  ;;  %v4558_v59 = vor.u32 %v5151_v55, %v4555_v28  ;;  %v2848_v41 = vpop.f32.mrf.mxu3 }
 0x48a   :  { %3029 = vmatmul.bf16.vlgmr.msrb.gmra.mxu2 %v5796_v2  ;;  %v4539_v2 = vld [vmem:[#allocation2 + $0x658] sm:$0xf0]  ;;  %v2849_v47 = vadd.f32 %v2848_v41, %v5860_v60 }
 0x48b   :  { %3035 = vmatpush.bf16.msra.mxu3 %v4606_v17  ;;  %v4542_v39 = vor.u32 %v5147_v34, %v4539_v2 }
 0x48c   :  { %3048 = vmatpush.bf16.msra.mxu1 %v4734_v52  ;;  %v3071_v56 = vmul.f32 %v3063_v38, %v2849_v47 }
 0x48d   :  { %v2874_v57 = vpop.f32.mrf.mxu2 }
 0x48e   :  { %v2863_v61 = vpop.f32.mrf.mxu1  ;;  %v2875_v30 = vadd.f32 %v2874_v57, %v2861_v32  ;;  %v3085_v3 = vadd.f32 %v3077_v14, %v3071_v56 }
 0x48f   :  { %3036 = vmatpush.bf16.msra.mxu3 %v4590_v44  ;;  %v3079_v61 = vperm.slane %v5837_v23, 3 }
 0x490   :  { %3049 = vmatpush.bf16.msra.mxu1 %v4718_v6  ;;  %vm3089_vm14 = vcmp.ge.f32.partialorder %v3085_v3, 0.0  ;;  %v3094_v60 = vmul.f32 %v5845_v54, %v3085_v3 }
 0x491   :  { %v2850_v7 = vpop.f32.mrf.mxu3 }
 0x492   :  { %v5869_v9 = vsel %vm3089_vm14, %v3085_v3, %v3094_v60 }
 0x493   :  { %3037 = vmatpush.bf16.msra.mxu3 %v4574_v40 }
 0x494   :  { %3050 = vmatpush.bf16.msra.mxu1 %v4702_v27 }
 0x495   :  { %v2876_v10 = vpop.f32.mrf.mxu2 }
 0x497   :  { %3038 = vmatpush.bf16.msra.mxu3 %v4558_v59 }
 0x498   :  { %3051 = vmatpush.bf16.msra.mxu1 %v4686_v33 }
 0x49b   :  { %3039 = vmatpush.bf16.msra.mxu3 %v4542_v39 }
 0x49c   :  { %3052 = vmatpush.bf16.msra.mxu1 %v4670_v50 }
 0x49f   :  { %3040 = vmatpush.bf16.msra.mxu3 %v4526_v16  ;;  %v3065_v16 = vperm.slane %v5832_v62, 3 }
 0x4a0   :  { %3053 = vmatpush.bf16.msra.mxu1 %v4654_v26 }
 0x4a3   :  { %3041 = vmatpush.bf16.msra.mxu3 %v4510_v43 }
 0x4a4   :  { %3054 = vmatpush.bf16.msra.mxu1 %v4638_v46 }
 0x4a6   :  { %3042 = vmatmul.bf16.vlgmr.msra.gmra.mxu3 %v5803_v45  ;;  %v2900_v11 = vpop.f32.mrf.mxu1 }
 0x4a7   :  { %3055 = vmatmul.bf16.vlgmr.msra.gmra.mxu1 %v5807_v48  ;;  %v3078_v48 = vperm.slane %v5837_v23, 2 }
 0x4a9   :  { %v2887_v35 = vpop.f32.mrf.mxu3 }
 0x4aa   :  { %v2888_v8 = vadd.f32 %v2887_v35, %v2875_v30 }
 0x4ac   :  { %v2901_v12 = vadd.f32 %v2900_v11, %v2888_v8 }
 0x4ad   :  { %v2913_v36 = vpop.f32.mrf.mxu2 }
 0x4ae   :  { %v2902_v15 = vpop.f32.mrf.mxu1  ;;  %v2914_v17 = vadd.f32 %v2913_v36, %v2901_v12 }
 0x4b1   :  { %v2889_v52 = vpop.f32.mrf.mxu3 }
 0x4b5   :  { %v2915_v49 = vpop.f32.mrf.mxu2 }
 0x4c6   :  { %v2939_v18 = vpop.f32.mrf.mxu1 }
 0x4c9   :  { %v2926_v19 = vpop.f32.mrf.mxu3 }
 0x4ca   :  { %v2927_v20 = vadd.f32 %v2926_v19, %v2914_v17 }
 0x4cc   :  { %v2940_v44 = vadd.f32 %v2939_v18, %v2927_v20 }
 0x4cd   :  { %v2952_v6 = vpop.f32.mrf.mxu2 }
 0x4ce   :  { %v2941_v22 = vpop.f32.mrf.mxu1  ;;  %v2953_v45 = vadd.f32 %v2952_v6, %v2940_v44 }
 0x4d0   :  { %v3072_v24 = vmul.f32 %v3064_v21, %v2953_v45 }
 0x4d1   :  { %v2928_v25 = vpop.f32.mrf.mxu3 }
 0x4d2   :  { %v3086_v40 = vadd.f32 %v3078_v48, %v3072_v24 }
 0x4d4   :  { %vm3090_vm15 = vcmp.ge.f32.partialorder %v3086_v40, 0.0  ;;  %v3095_v27 = vmul.f32 %v5845_v54, %v3086_v40 }
 0x4d5   :  { %v2954_v55 = vpop.f32.mrf.mxu2 }
 0x4d6   :  { %v5876_v28 = vsel %vm3090_vm15, %v3086_v40, %v3095_v27 }
 0x4e6   :  { %v2978_v29 = vpop.f32.mrf.mxu1 }
 0x4e9   :  { %v2965_v31 = vpop.f32.mrf.mxu3 }
 0x4ea   :  { %v2979_v50 = vadd.f32 %v2978_v29, %v2965_v31 }
 0x4ed   :  { %v2991_v59 = vpop.f32.mrf.mxu2 }
 0x4ee   :  { %v2980_v32 = vpop.f32.mrf.mxu1  ;;  %v2992_v42 = vadd.f32 %v2991_v59, %v2979_v50 }
 0x4f1   :  { %v2967_v33 = vpop.f32.mrf.mxu3 }
 0x4f5   :  { %v2993_v34 = vpop.f32.mrf.mxu2 }
 0x506   :  { %v3017_v2 = vpop.f32.mrf.mxu1 }
 0x509   :  { %v3004_v58 = vpop.f32.mrf.mxu3 }
 0x50a   :  { %v3005_v0 = vadd.f32 %v3004_v58, %v2992_v42 }
 0x50c   :  { %v3018_v47 = vadd.f32 %v3017_v2, %v3005_v0 }
 0x50d   :  { %v3030_v37 = vpop.f32.mrf.mxu2 }
 0x50e   :  { %v3019_v38 = vpop.f32.mrf.mxu1  ;;  %v3031_v51 = vadd.f32 %v3030_v37, %v3018_v47 }
 0x511   :  { %v3006_v39 = vpop.f32.mrf.mxu3 }
 0x515   :  { %v3032_v41 = vpop.f32.mrf.mxu2 }
 0x524   :  { %v3056_v14 = vpop.f32.mrf.mxu1 }
 0x529   :  { %v3043_v53 = vpop.f32.mrf.mxu3 }
 0x52a   :  { %v3044_v56 = vadd.f32 %v3043_v53, %v3031_v51 }
 0x52c   :  { %v3057_v57 = vadd.f32 %v3056_v14, %v3044_v56  ;;  %v3058_v26 = vpop.f32.mrf.mxu1 }
 0x52e   :  { %v3073_v63 = vmul.f32 %v3065_v16, %v3057_v57 }
 0x530   :  { %v3087_v1 = vadd.f32 %v3079_v61, %v3073_v63 }
 0x531   :  { %v3045_v30 = vpop.f32.mrf.mxu3 }
 0x532   :  { %vm3091_vm0 = vcmp.ge.f32.partialorder %v3087_v1, 0.0  ;;  %v3096_v3 = vmul.f32 %v5845_v54, %v3087_v1 }
 0x534   :  { %v5881_v4 = vsel %vm3091_vm0, %v3087_v1, %v3096_v3 }
 0x535   :  { %5315 = dma.done.wait [#allocation4 + $0x1], 4096 }
 0x536   :  { %5316 = vsyncadd [#allocation4 + $0x1], 4294963200  ;;  %v5209_v5 = vld [vmem:[#allocation3 + $0x48] sm:$0xff]  ;;  %v5217_v60 = vld [vmem:[#allocation3 + $0x78] sm:$0xff]  ;;  %v3105_v22 = vpack.c.bf16 %v5848_v13, %v5848_v13  ;;  %v3106_v48 = vpack.c.bf16 %v5869_v9, %v5869_v9  ;;  %v3107_v25 = vpack.c.bf16 %v5876_v28, %v5876_v28  ;;  %v3108_v31 = vpack.c.bf16 %v5881_v4, %v5881_v4  ;;  %s3526_s17 = sshll.u32 %s5939_s8, 4  ;;  %s3527_s17 = int_to_ptr.hbm [resolvable:$true] %s3526_s17 }
 0x537   :  { %3369 = vmatpush.bf16.msra.mxu2 %v5209_v5  ;;  %v5208_v43 = vld [vmem:[#allocation3 + $0x30] sm:$0xff]  ;;  %3382 = vmatpush.bf16.msrb.mxu3 %v5217_v60  ;;  %v5216_v62 = vld [vmem:[#allocation3 + $0x8] sm:$0xff]  ;;  %v5225_v46 = vld [vmem:[#allocation3 + $0xc0] sm:$0xff]  ;;  %v3422_v16 = vstv %s5474_s9  ;;  %s5321_s9 = smov [#allocation8]   ;;  %vm3517_vm2 = vcmask 17408  }
 0x538   :  { %3395 = vmatpush.bf16.msrb.mxu1 %v5225_v46  ;;  %v5224_v23 = vld [vmem:[#allocation3 + $0x70] sm:$0xff]  ;;  %v5207_v7 = vld [vmem:[#allocation3 + $0x68] sm:$0xff]  ;;  %v5214_v35 = vld [vmem:[#allocation3 + $0x60] sm:$0xff]  ;;  %s3524_s15 = sshll.u32 %s5321_s9, 4  ;;  %s3525_s15 = int_to_ptr.vmem [resolvable:$true] %s3524_s15 }
 0x539   :  { %v5215_v10 = vld [vmem:[#allocation3 + $0xf0] sm:$0xff]  ;;  %v5222_v8 = vld [vmem:[#allocation3 + $0xe0] sm:$0xff]  ;;  %v5205_v12 = vld [vmem:[#allocation3 + $0x18] sm:$0xff] }
 0x53a   :  { %v5223_v11 = vld [vmem:[#allocation3 + $0x90] sm:$0xff]  ;;  %v5213_v36 = vld [vmem:[#allocation3 + $0xb8] sm:$0xff]  ;;  %v5221_v15 = vld [vmem:[#allocation3 + $0xc8] sm:$0xff] }
 0x53b   :  { %3370 = vmatpush.bf16.msra.mxu2 %v5208_v43  ;;  %3383 = vmatpush.bf16.msrb.mxu3 %v5216_v62  ;;  %v5206_v54 = vld [vmem:[#allocation3 + $0x50] sm:$0xff]  ;;  %v5204_v17 = vld [vmem:[#allocation3 + $0xd8] sm:$0xff]  ;;  %v5212_v52 = vld [vmem:[#allocation3 + $0xe8] sm:$0xff] }
 0x53c   :  { %3396 = vmatpush.bf16.msrb.mxu1 %v5224_v23  ;;  %v5220_v49 = vld [vmem:[#allocation3 + $0x40] sm:$0xff]  ;;  %v5211_v19 = vld [vmem:[#allocation3 + $0x88] sm:$0xff]  ;;  %v5219_v20 = vld [vmem:[#allocation3 + $0x58] sm:$0xff] }
 0x53d   :  { %v5203_v18 = vld [vmem:[#allocation3] sm:$0xff]  ;;  %v5202_v44 = vld [vmem:[#allocation3 + $0xb0] sm:$0xff]  ;;  %v5233_v6 = vld [vmem:[#allocation3 + $0x98] sm:$0xff] }
 0x53e   :  { %v5210_v21 = vld [vmem:[#allocation3 + $0x80] sm:$0xff]  ;;  %v5218_v45 = vld [vmem:[#allocation3 + $0x38] sm:$0xff]  ;;  %v5229_v27 = vld [vmem:[#allocation3 + $0x28] sm:$0xff] }
 0x53f   :  { %3371 = vmatpush.bf16.msra.mxu2 %v5207_v7  ;;  %3384 = vmatpush.bf16.msrb.mxu3 %v5215_v10  ;;  %v5232_v24 = vld [vmem:[#allocation3 + $0x20] sm:$0xff]  ;;  %v5231_v40 = vld [vmem:[#allocation3 + $0xf8] sm:$0xff]  ;;  %v5228_v55 = vld [vmem:[#allocation3 + $0x10] sm:$0xff] }
 0x540   :  { %3397 = vmatpush.bf16.msrb.mxu1 %v5223_v11  ;;  %v5230_v13 = vld [vmem:[#allocation3 + $0xa0] sm:$0xff]  ;;  %v5227_v9 = vld [vmem:[#allocation3 + $0xd0] sm:$0xff]  ;;  %v5226_v29 = vld [vmem:[#allocation3 + $0xa8] sm:$0xff] }
 0x541   :  { %v5241_v28 = vld [vmem:[%s5936_s5 + $0x38] sm:$0xff]  ;;  %v5240_v59 = vld [vmem:[%s5936_s5 + $0x30] sm:$0xff]  ;;  %v5239_v32 = vld [vmem:[%s5936_s5 + $0x28] sm:$0xff] }
 0x542   :  { %v5238_v33 = vld [vmem:[%s5936_s5 + $0x20] sm:$0xff]  ;;  %v5237_v34 = vld [vmem:[%s5936_s5 + $0x18] sm:$0xff]  ;;  %v5236_v2 = vld [vmem:[%s5936_s5 + $0x10] sm:$0xff] }
 0x543   :  { %3372 = vmatpush.bf16.msra.mxu2 %v5206_v54  ;;  %3385 = vmatpush.bf16.msrb.mxu3 %v5214_v35  ;;  %v5235_v38 = vld [vmem:[%s5936_s5 + $0x8] sm:$0xff]  ;;  %v5234_v41 = vld [vmem:[%s5936_s5] sm:$0xff] }
 0x544   :  { %3398 = vmatpush.bf16.msrb.mxu1 %v5222_v8  ;;  %v5247_v47 = vld [vmem:[%s5935_s4 + $0x20] ss:$0 sm:$0xff]  ;;  %v5248_v61 = vld [vmem:[%s5935_s4 + $0x21] ss:$0 sm:$0xff]  ;;  %v5249_v63 = vld [vmem:[%s5935_s4 + $0x22] ss:$0 sm:$0xff] }
 0x545   :  { %v5250_v60 = vld [vmem:[%s5935_s4 + $0x23] ss:$0 sm:$0xff] }
 0x547   :  { %3373 = vmatpush.bf16.msra.mxu2 %v5205_v12  ;;  %3386 = vmatpush.bf16.msrb.mxu3 %v5213_v36 }
 0x548   :  { %3399 = vmatpush.bf16.msrb.mxu1 %v5221_v15 }
 0x54b   :  { %3374 = vmatpush.bf16.msra.mxu2 %v5204_v17  ;;  %3387 = vmatpush.bf16.msrb.mxu3 %v5212_v52 }
 0x54c   :  { %3400 = vmatpush.bf16.msrb.mxu1 %v5220_v49 }
 0x54f   :  { %3375 = vmatpush.bf16.msra.mxu2 %v5203_v18  ;;  %3388 = vmatpush.bf16.msrb.mxu3 %v5211_v19 }
 0x550   :  { %3401 = vmatpush.bf16.msrb.mxu1 %v5219_v20 }
 0x553   :  { %3376 = vmatpush.bf16.msra.mxu2 %v5202_v44  ;;  %3389 = vmatpush.bf16.msrb.mxu3 %v5210_v21 }
 0x554   :  { %3402 = vmatpush.bf16.msrb.mxu1 %v5218_v45 }
 0x556   :  { %3377 = vmatmul.bf16.vlgmr.msra.gmra.mxu2 %v3105_v22  ;;  %3390 = vmatmul.bf16.vlgmr.msrb.gmra.mxu3 %v3106_v48 }
 0x557   :  { %3408 = vmatpush.bf16.msrb.mxu2 %v5233_v6  ;;  %3403 = vmatmul.bf16.vlgmr.msrb.gmra.mxu1 %v3107_v25 }
 0x558   :  { %3504 = vmatpush.bf16.msra.mxu3 %v5241_v28 }
 0x55b   :  { %3409 = vmatpush.bf16.msrb.mxu2 %v5232_v24 }
 0x55c   :  { %3505 = vmatpush.bf16.msra.mxu3 %v5240_v59 }
 0x55f   :  { %3410 = vmatpush.bf16.msrb.mxu2 %v5231_v40 }
 0x560   :  { %3506 = vmatpush.bf16.msra.mxu3 %v5239_v32 }
 0x563   :  { %3411 = vmatpush.bf16.msrb.mxu2 %v5230_v13 }
 0x564   :  { %3507 = vmatpush.bf16.msra.mxu3 %v5238_v33 }
 0x567   :  { %3412 = vmatpush.bf16.msrb.mxu2 %v5229_v27 }
 0x568   :  { %3508 = vmatpush.bf16.msra.mxu3 %v5237_v34 }
 0x56b   :  { %3413 = vmatpush.bf16.msrb.mxu2 %v5228_v55 }
 0x56c   :  { %3509 = vmatpush.bf16.msra.mxu3 %v5236_v2 }
 0x56f   :  { %3414 = vmatpush.bf16.msrb.mxu2 %v5227_v9 }
 0x570   :  { %3510 = vmatpush.bf16.msra.mxu3 %v5235_v38 }
 0x573   :  { %3415 = vmatpush.bf16.msrb.mxu2 %v5226_v29 }
 0x574   :  { %3511 = vmatpush.bf16.msra.mxu3 %v5234_v41 }
 0x576   :  { %3416 = vmatmul.bf16.vlgmr.msrb.gmra.mxu2 %v3108_v31 }
 0x5d4   :  { %v3404_v58 = vpop.f32.mrf.mxu1 }
 0x5d9   :  { %v3378_v37 = vpop.f32.mrf.mxu2  ;;  %v3391_v39 = vpop.f32.mrf.mxu3 }
 0x5da   :  { %v3379_v14 = vadd.f32 %v5247_v47, %v3378_v37 }
 0x5dc   :  { %v3406_v50 = vpop.f32.mrf.mxu1  ;;  %v3392_v51 = vadd.f32 %v3391_v39, %v3379_v14 }
 0x5de   :  { %v3405_v53 = vadd.f32 %v3404_v58, %v3392_v51 }
 0x5e1   :  { %v3380_v42 = vpop.f32.mrf.mxu2  ;;  %v3393_v0 = vpop.f32.mrf.mxu3 }
 0x5f9   :  { %v3417_v56 = vpop.f32.mrf.mxu2 }
 0x5fa   :  { %v3418_v57 = vadd.f32 %v3417_v56, %v3405_v53 }
 0x5fc   :  { %vm3421_vm1 = vcmp.ge.f32.partialorder %v3418_v57, 0.0  ;;  %v3423_v26 = vmul.f32 %v3422_v16, %v3418_v57 }
 0x5fe   :  { %v3424_v1 = vsel %vm3421_vm1, %v3418_v57, %v3423_v26 }
 0x5ff   :  { %v3429_v30 = vmul.f32 %v5248_v61, %v3424_v1 }
 0x601   :  { %v3419_v3 = vpop.f32.mrf.mxu2  ;;  %v3434_v4 = vadd.f32 %v5249_v63, %v3429_v30 }
 0x603   :  { %v3435_v5 = vpack.c.bf16 %v3434_v4, %v3434_v4 }
 0x605   :  { %3512 = vmatmul.bf16.vlgmr.msra.gmra.mxu3 %v3435_v5 }
 0x688   :  { %v3513_v43 = vpop.f32.mrf.mxu3 }
 0x689   :  { %v3514_v62 = vadd.f32 %v5250_v60, %v3513_v43 }
 0x68b   :  { %3518 = vst.msk [vmem:[#allocation8] sm:$0x3] %vm3517_vm2, %v3514_v62 }
 0x68c   :  { %3529 = dma.vmem_to_hbm [thread:$0]  %s3525_s15, 32, %s3527_s17, [#allocation6]  }
 0x690   :  { %v3515_v46 = vpop.f32.mrf.mxu3 }
 0x691   :  { %5317 = dma.done.wait [#allocation6], 32  }
 0x692   :  { %5318 = vsyncadd [#allocation6], 4294967264 }
 0x693   :  { %3534 = vsyncpa [#allocation6], 1 }
 0x694   :  { %3535 = vsyncpa [#allocation7], 1 }
 0x695   :  { %3536 = vsyncmov [#allocation4] }
 0x698   :  { %s3537_s4 = vpop.sfrf %3536 }
 0x699   :  { %p4911_p0 = scmp.ne.s32.totalorder %s3537_s4, 0 }
 0x69b   :  { %3541 = shalt.err (%p4911_p0)  }
 0x69c   :  { %3543 = vsyncmov [#allocation4 + $0x1] }
 0x69f   :  { %s3544_s28 = vpop.sfrf %3543 }
 0x6a0   :  { %p4912_p1 = scmp.ne.s32.totalorder %s3544_s28, 0 }
 0x6a2   :  { %3548 = shalt.err (%p4912_p1)  }

</bundles_post_ra>
